<compile_context>
chip_gen: v7x
topology: tpu7x:2x2x1
jax: 0.10.0
libtpu: 0.0.40
codegen_flags: <defaults>
</compile_context>

<pallas_src>
import jax
import jax.numpy as jnp
from jax import lax
from jax.experimental import pallas as pl
from jax.experimental.pallas import tpu as pltpu


def _conv_bn_relu_kernel(x_ref, w_ref, gamma_ref, beta_ref, o_ref):
    """Whole-problem kernel (small shapes: everything resident in VMEM).

    x_ref:     (N, H, W, Cin)          NHWC activations
    w_ref:     (KH*KW*Cin, Cout)       im2col-flattened weights, (kh, kw, ci) order
    gamma_ref: (1, 1, 1, Cout)
    beta_ref:  (1, 1, 1, Cout)
    o_ref:     (N, Ho, Wo, Cout)       Ho = H-KH+1, Wo = W-KW+1
    """
    N, H, W, Cin = x_ref.shape
    _, Ho, Wo, Cout = o_ref.shape
    KH = H - Ho + 1
    KW = W - Wo + 1

    x = x_ref[...].astype(jnp.float32)
    w = w_ref[...].astype(jnp.float32)

    # --- Conv2d (valid, stride 1) as ONE im2col matmul (depth KH*KW*Cin) ------
    parts = []
    for kh in range(KH):                      # static unroll, compile-time taps
        for kw in range(KW):
            parts.append(x[:, kh:kh + Ho, kw:kw + Wo, :])     # (N, Ho, Wo, Cin)
    patches = jnp.concatenate(parts, axis=-1)                 # (N, Ho, Wo, KH*KW*Cin)

    acc = lax.dot_general(
        patches, w,
        dimension_numbers=(((3,), (0,)), ((), ())),
        preferred_element_type=jnp.float32)                   # (N, Ho, Wo, Cout)

    # NOTE: conv bias is intentionally omitted — training-mode BN subtracts the
    # per-channel batch mean, which cancels any per-channel bias exactly.

    # --- BatchNorm2d (training batch stats) + ReLU, fused epilogue ------------
    eps = 1e-5
    inv_cnt = 1.0 / float(N * Ho * Wo)
    mean = jnp.sum(acc, axis=(0, 1, 2), keepdims=True) * inv_cnt
    c = acc - mean                                             # centered, computed once
    var = jnp.sum(c * c, axis=(0, 1, 2), keepdims=True) * inv_cnt
    s = gamma_ref[...] * lax.rsqrt(var + eps)                  # per-channel scale
    y = c * s + beta_ref[...]                                  # single FMA epilogue
    o_ref[...] = jnp.maximum(y, 0.0).astype(o_ref.dtype)


def _convolution_block_impl(x_nchw, w_oihw, bias, gamma, beta):
    """Wrapper matching the PyTorch module: NCHW in -> NCHW out."""
    del bias  # exactly cancelled by training-mode BN mean subtraction (no-op)
    N, Cin, H, W = x_nchw.shape
    Cout, _, KH, KW = w_oihw.shape
    Ho, Wo = H - KH + 1, W - KW + 1

    x_nhwc = jnp.transpose(x_nchw, (0, 2, 3, 1))               # NCHW -> NHWC
    # OIHW -> (kh, kw, ci) x Cout, matching the in-kernel im2col concat order.
    w2 = jnp.transpose(w_oihw, (2, 3, 1, 0)).reshape(KH * KW * Cin, Cout)
    g4 = gamma.reshape(1, 1, 1, Cout).astype(jnp.float32)
    b4 = beta.reshape(1, 1, 1, Cout).astype(jnp.float32)

    vmem = pl.BlockSpec(memory_space=pltpu.MemorySpace.VMEM)
    out_nhwc = pl.pallas_call(
        _conv_bn_relu_kernel,
        out_shape=jax.ShapeDtypeStruct((N, Ho, Wo, Cout), jnp.float32),
        in_specs=[vmem] * 4,
        out_specs=vmem,
    )(x_nhwc, w2, g4, b4)

    # TODO(synk): emit an NCHW / lane-dense output slab directly from the kernel;
    # this needs a minor-dim transpose/reshape on unaligned (14, 8) tiles that is
    # not reliably lowered by Mosaic, so the relayout stays in the XLA wrapper.
    return jnp.transpose(out_nhwc, (0, 3, 1, 2))               # NHWC -> NCHW


convolution_block = jax.jit(_convolution_block_impl)


def _reference(x_nchw, w_oihw, bias, gamma, beta):
    """Plain-JAX reference (conv + bias + training-mode BN + ReLU)."""
    y = lax.conv_general_dilated(
        x_nchw.astype(jnp.float32), w_oihw.astype(jnp.float32),
        window_strides=(1, 1), padding="VALID",
        dimension_numbers=("NCHW", "OIHW", "NCHW"))
    y = y + bias.reshape(1, -1, 1, 1)
    mean = jnp.mean(y, axis=(0, 2, 3), keepdims=True)
    var = jnp.mean((y - mean) ** 2, axis=(0, 2, 3), keepdims=True)
    y = (y - mean) * lax.rsqrt(var + 1e-5)
    y = y * gamma.reshape(1, -1, 1, 1) + beta.reshape(1, -1, 1, 1)
    return jnp.maximum(y, 0.0)


if __name__ == "__main__":
    key = jax.random.PRNGKey(0)
    kx, kw, kb = jax.random.split(key, 3)

    N, Cin, Cout, H, W, K = 2, 4, 8, 16, 16, 3

    x = jax.random.normal(kx, (N, Cin, H, W), dtype=jnp.float32)
    fan_in = Cin * K * K
    w = jax.random.uniform(kw, (Cout, Cin, K, K), jnp.float32,
                           minval=-1.0, maxval=1.0) / jnp.sqrt(fan_in)
    b = jax.random.uniform(kb, (Cout,), jnp.float32,
                           minval=-1.0, maxval=1.0) / jnp.sqrt(fan_in)
    gamma = jnp.ones((Cout,), jnp.float32)
    beta = jnp.zeros((Cout,), jnp.float32)

    out = convolution_block(x, w, b, gamma, beta)
    out = jax.block_until_ready(out)

    ref = _reference(x, w, b, gamma, beta)
    assert out.shape == (N, Cout, H - K + 1, W - K + 1), out.shape
    assert jnp.allclose(out, ref, atol=1e-4, rtol=1e-4), \
        float(jnp.max(jnp.abs(out - ref)))

    print("KERNEL_OK")
</pallas_src>

<mosaic_0001>
module attributes {stable_mosaic.version = 11 : i64} {
  func.func @_conv_bn_relu_kernel(%arg0: memref<2x16x16x4xf32, #tpu.memory_space<vmem>>, %arg1: memref<36x8xf32, #tpu.memory_space<vmem>>, %arg2: memref<1x1x1x8xf32, #tpu.memory_space<vmem>>, %arg3: memref<1x1x1x8xf32, #tpu.memory_space<vmem>>, %arg4: memref<2x14x14x8xf32, #tpu.memory_space<vmem>>) attributes {dimension_semantics = [], scalar_prefetch = 0 : i64, scratch_operands = 0 : i64, tpu.core_type = #tpu.core_type<tc>} {
    %c0 = arith.constant 0 : index
    %c0_0 = arith.constant 0 : index
    %c0_1 = arith.constant 0 : index
    %c0_2 = arith.constant 0 : index
    %0 = vector.load %arg0[%c0, %c0_0, %c0_1, %c0_2] : memref<2x16x16x4xf32, #tpu.memory_space<vmem>>, vector<2x16x16x4xf32>
    %c0_3 = arith.constant 0 : index
    %c0_4 = arith.constant 0 : index
    %1 = vector.load %arg1[%c0_3, %c0_4] : memref<36x8xf32, #tpu.memory_space<vmem>>, vector<36x8xf32>
    %2 = vector.extract_strided_slice %0 {offsets = [0, 0, 0, 0], sizes = [2, 14, 14, 4], strides = [1, 1, 1, 1]} : vector<2x16x16x4xf32> to vector<2x14x14x4xf32>
    %3 = vector.extract_strided_slice %0 {offsets = [0, 0, 1, 0], sizes = [2, 14, 14, 4], strides = [1, 1, 1, 1]} : vector<2x16x16x4xf32> to vector<2x14x14x4xf32>
    %4 = vector.extract_strided_slice %0 {offsets = [0, 0, 2, 0], sizes = [2, 14, 14, 4], strides = [1, 1, 1, 1]} : vector<2x16x16x4xf32> to vector<2x14x14x4xf32>
    %5 = vector.extract_strided_slice %0 {offsets = [0, 1, 0, 0], sizes = [2, 14, 14, 4], strides = [1, 1, 1, 1]} : vector<2x16x16x4xf32> to vector<2x14x14x4xf32>
    %6 = vector.extract_strided_slice %0 {offsets = [0, 1, 1, 0], sizes = [2, 14, 14, 4], strides = [1, 1, 1, 1]} : vector<2x16x16x4xf32> to vector<2x14x14x4xf32>
    %7 = vector.extract_strided_slice %0 {offsets = [0, 1, 2, 0], sizes = [2, 14, 14, 4], strides = [1, 1, 1, 1]} : vector<2x16x16x4xf32> to vector<2x14x14x4xf32>
    %8 = vector.extract_strided_slice %0 {offsets = [0, 2, 0, 0], sizes = [2, 14, 14, 4], strides = [1, 1, 1, 1]} : vector<2x16x16x4xf32> to vector<2x14x14x4xf32>
    %9 = vector.extract_strided_slice %0 {offsets = [0, 2, 1, 0], sizes = [2, 14, 14, 4], strides = [1, 1, 1, 1]} : vector<2x16x16x4xf32> to vector<2x14x14x4xf32>
    %10 = vector.extract_strided_slice %0 {offsets = [0, 2, 2, 0], sizes = [2, 14, 14, 4], strides = [1, 1, 1, 1]} : vector<2x16x16x4xf32> to vector<2x14x14x4xf32>
    %11 = tpu.concatenate %2, %3, %4, %5, %6, %7, %8, %9, %10 in 3 : vector<2x14x14x4xf32>, vector<2x14x14x4xf32>, vector<2x14x14x4xf32>, vector<2x14x14x4xf32>, vector<2x14x14x4xf32>, vector<2x14x14x4xf32>, vector<2x14x14x4xf32>, vector<2x14x14x4xf32>, vector<2x14x14x4xf32> -> vector<2x14x14x36xf32>
    %cst = arith.constant dense<0.000000e+00> : vector<2x14x14x8xf32>
    %12 = tpu.matmul %11, %1, %cst {dimension_numbers = #tpu.dot_dimension_numbers<[3], [0], [0, 1, 2], [1], [0, 0, 0, 1, 0, 2, 1, 1], [], []>} : vector<2x14x14x36xf32>, vector<36x8xf32>, vector<2x14x14x8xf32> -> vector<2x14x14x8xf32>
    %cst_5 = arith.constant dense<0.000000e+00> : vector<8xf32>
    %13 = vector.multi_reduction <add>, %12, %cst_5 [0, 1, 2] : vector<2x14x14x8xf32> to vector<8xf32>
    %14 = vector.shape_cast %13 : vector<8xf32> to vector<1x1x1x8xf32>
    %cst_6 = arith.constant 0.00255102036 : f32
    %15 = vector.broadcast %cst_6 : f32 to vector<1x1x1x8xf32>
    %16 = arith.mulf %14, %15 : vector<1x1x1x8xf32>
    %17 = vector.broadcast %16 : vector<1x1x1x8xf32> to vector<2x14x14x8xf32>
    %18 = arith.subf %12, %17 : vector<2x14x14x8xf32>
    %19 = arith.mulf %18, %18 : vector<2x14x14x8xf32>
    %cst_7 = arith.constant dense<0.000000e+00> : vector<8xf32>
    %20 = vector.multi_reduction <add>, %19, %cst_7 [0, 1, 2] : vector<2x14x14x8xf32> to vector<8xf32>
    %21 = vector.shape_cast %20 : vector<8xf32> to vector<1x1x1x8xf32>
    %cst_8 = arith.constant 0.00255102036 : f32
    %22 = vector.broadcast %cst_8 : f32 to vector<1x1x1x8xf32>
    %23 = arith.mulf %21, %22 : vector<1x1x1x8xf32>
    %c0_9 = arith.constant 0 : index
    %c0_10 = arith.constant 0 : index
    %c0_11 = arith.constant 0 : index
    %c0_12 = arith.constant 0 : index
    %24 = vector.load %arg2[%c0_9, %c0_10, %c0_11, %c0_12] : memref<1x1x1x8xf32, #tpu.memory_space<vmem>>, vector<1x1x1x8xf32>
    %cst_13 = arith.constant 9.99999974E-6 : f32
    %25 = vector.broadcast %cst_13 : f32 to vector<1x1x1x8xf32>
    %26 = arith.addf %23, %25 : vector<1x1x1x8xf32>
    %27 = math.rsqrt %26 : vector<1x1x1x8xf32>
    %28 = arith.mulf %24, %27 : vector<1x1x1x8xf32>
    %29 = vector.broadcast %28 : vector<1x1x1x8xf32> to vector<2x14x14x8xf32>
    %30 = arith.mulf %18, %29 : vector<2x14x14x8xf32>
    %c0_14 = arith.constant 0 : index
    %c0_15 = arith.constant 0 : index
    %c0_16 = arith.constant 0 : index
    %c0_17 = arith.constant 0 : index
    %31 = vector.load %arg3[%c0_14, %c0_15, %c0_16, %c0_17] : memref<1x1x1x8xf32, #tpu.memory_space<vmem>>, vector<1x1x1x8xf32>
    %32 = vector.broadcast %31 : vector<1x1x1x8xf32> to vector<2x14x14x8xf32>
    %33 = arith.addf %30, %32 : vector<2x14x14x8xf32>
    %cst_18 = arith.constant 0.000000e+00 : f32
    %34 = vector.broadcast %cst_18 : f32 to vector<2x14x14x8xf32>
    %35 = arith.maximumf %33, %34 : vector<2x14x14x8xf32>
    %c0_19 = arith.constant 0 : index
    %c0_20 = arith.constant 0 : index
    %c0_21 = arith.constant 0 : index
    %c0_22 = arith.constant 0 : index
    %36 = vector.load %arg4[%c0_19, %c0_20, %c0_21, %c0_22] : memref<2x14x14x8xf32, #tpu.memory_space<vmem>>, vector<2x14x14x8xf32>
    tpu.vector_store %arg4[%c0_19, %c0_20, %c0_21, %c0_22], %35 {strides = array<i32>} : memref<2x14x14x8xf32, #tpu.memory_space<vmem>>, vector<2x14x14x8xf32>,
    return
  }
}

</mosaic_0001>

<bundles_post_ra>
// kernel: _convolution_block_impl.1
= control target key start
LH: loop header
LB: loop body
LE: loop exit
PB: predicated region body
PF: predicated region fallthrough
CT: control target
= control target key end

     0   :  { %vm142_vm0 = vcmask 1046528   ;;  %s10500_s27 = smov 4   ;;  %vm395_vm1 = vcmask 1045504   ;;  %s10501_s28 = smov 8   ;;  %vm4056_vm2 = vcmask 1043456   ;;  %vm10510_vm3 = vmmov 0   ;;  %s19648_s0 = inlined_call_operand.vmem [shape: f32[2,16,16,4], index: 0, kind: input, shape index: {}]   ;;  %s19649_s1 = inlined_call_operand.vmem [shape: f32[36,8], index: 1, kind: input, shape index: {}]   ;;  %s19650_s3 = inlined_call_operand.vmem [shape: f32[1,1,1,8], index: 3, kind: input, shape index: {}]   ;;  %s19651_s2 = inlined_call_operand.vmem [shape: f32[1,1,1,8], index: 2, kind: input, shape index: {}]   ;;  %s19652_s4 = inlined_call_operand.vmem [shape: f32[2,14,14,8], index: 4, kind: output, shape index: {}]  }
   0x1   :  { %v10540_v0 = vld [vmem:[%s19648_s0 + $0x18] sm:$0xff]  ;;  %v10545_v1 = vld [vmem:[%s19648_s0 + $0x8] sm:$0xff]  ;;  %v10550_v2 = vld [vmem:[%s19648_s0 + $0x10] sm:$0xff]  ;;  %s10504_s7 = smov 16   ;;  %s10505_s12 = smov 24   ;;  %vm1745_vm4 = vcmask 64512  }
   0x2   :  { %v10553_v3 = vrot.slane %v10540_v0, 1  ;;  %v144_v4 = vrot.slane %v10545_v1, 1  ;;  %v146_v5 = vrot.slane %v10550_v2, 1  ;;  %v10560_v6 = vld [vmem:[%s19648_s0] sm:$0xff]  ;;  %v10565_v7 = vld [vmem:[%s19648_s0 + $0x28] sm:$0xff]  ;;  %v10588_v14 = vld [vmem:[%s19648_s0 + $0x38] sm:$0xff] }
   0x3   :  { %v10570_v8 = vld [vmem:[%s19648_s0 + $0x20] sm:$0xff]  ;;  %v143_v9 = vrot.slane %v10560_v6, 1  ;;  %v10582_v12 = vrot.slane %v10565_v7, 1  ;;  %v10593_v15 = vld [vmem:[%s19648_s0 + $0x30] sm:$0xff]  ;;  %v10603_v17 = vrot.slane %v10588_v14, 1  ;;  %v10609_v19 = vld [vmem:[%s19648_s0 + $0x48] sm:$0xff] }
   0x4   :  { %20352 = vst [vmem:[#allocation2_spill] sm:$0xff] %v10553_v3  ;;  %233 = vrot.lane.b32.xlu1 %v10553_v3, %s10500_s27  ;;  %229 = vrot.lane.b32.xlu0 %v144_v4, %s10500_s27  ;;  %v10578_v10 = vsel %vm142_vm0, %v146_v5, %v10553_v3  ;;  %v149_v13 = vrot.slane %v10570_v8, 1  ;;  %v152_v18 = vrot.slane %v10593_v15, 1  ;;  %v10614_v20 = vld [vmem:[%s19648_s0 + $0x40] sm:$0xff]  ;;  %v10625_v22 = vrot.slane %v10609_v19, 1  ;;  %v10631_v24 = vld [vmem:[%s19648_s0 + $0x58] sm:$0xff] }
   0x5   :  { %20353 = vst [vmem:[#allocation3_spill] sm:$0xff] %v10578_v10  ;;  %v145_v11 = vsel %vm142_vm0, %v143_v9, %v144_v4  ;;  %20354 = vst [vmem:[#allocation4_spill] sm:$0xff] %v10582_v12  ;;  %v155_v23 = vrot.slane %v10614_v20, 1  ;;  %v10636_v25 = vld [vmem:[%s19648_s0 + $0x50] sm:$0xff]  ;;  %v10647_v27 = vrot.slane %v10631_v24, 1  ;;  %v10653_v29 = vld [vmem:[%s19648_s0 + $0x68] sm:$0xff] }
   0x6   :  { %v10600_v16 = vsel %vm142_vm0, %v149_v13, %v10582_v12  ;;  %20356 = vst [vmem:[#allocation6_spill] sm:$0xff] %v10603_v17  ;;  %v10622_v21 = vsel %vm142_vm0, %v152_v18, %v10603_v17  ;;  %20358 = vst [vmem:[#allocation8_spill] sm:$0xff] %v10625_v22  ;;  %v158_v28 = vrot.slane %v10636_v25, 1  ;;  %v10658_v30 = vld [vmem:[%s19648_s0 + $0x60] sm:$0xff]  ;;  %v10669_v32 = vrot.slane %v10653_v29, 1  ;;  %v10675_v34 = vld [vmem:[%s19648_s0 + $0x78] sm:$0xff] }
   0x7   :  { %20355 = vst [vmem:[#allocation5_spill] sm:$0xff] %v10600_v16  ;;  %20357 = vst [vmem:[#allocation7_spill] sm:$0xff] %v10622_v21  ;;  %v10644_v26 = vsel %vm142_vm0, %v155_v23, %v10625_v22  ;;  %v161_v33 = vrot.slane %v10658_v30, 1  ;;  %v10680_v35 = vld [vmem:[%s19648_s0 + $0x70] sm:$0xff]  ;;  %v10691_v37 = vrot.slane %v10675_v34, 1  ;;  %v10697_v39 = vld [vmem:[%s19648_s0 + $0x88] sm:$0xff] }
   0x8   :  { %231 = vrot.lane.b32.xlu1 %v10578_v10, %s10500_s27  ;;  %227 = vrot.lane.b32.xlu0 %v145_v11, %s10500_s27  ;;  %20359 = vst [vmem:[#allocation9_spill] sm:$0xff] %v10644_v26  ;;  %20360 = vst [vmem:[#allocation10_spill] sm:$0xff] %v10647_v27  ;;  %v10666_v31 = vsel %vm142_vm0, %v158_v28, %v10647_v27  ;;  %v164_v38 = vrot.slane %v10680_v35, 1  ;;  %v10702_v40 = vld [vmem:[%s19648_s0 + $0x80] sm:$0xff]  ;;  %v10713_v42 = vrot.slane %v10697_v39, 1  ;;  %v10719_v44 = vld [vmem:[%s19648_s0 + $0x98] sm:$0xff] }
   0x9   :  { %20361 = vst [vmem:[#allocation11_spill] sm:$0xff] %v10666_v31  ;;  %20362 = vst [vmem:[#allocation12_spill] sm:$0xff] %v10669_v32  ;;  %v10688_v36 = vsel %vm142_vm0, %v161_v33, %v10669_v32  ;;  %v167_v43 = vrot.slane %v10702_v40, 1  ;;  %v10724_v45 = vld [vmem:[%s19648_s0 + $0x90] sm:$0xff]  ;;  %v10735_v47 = vrot.slane %v10719_v44, 1  ;;  %v10741_v49 = vld [vmem:[%s19648_s0 + $0xa8] sm:$0xff] }
   0xa   :  { %20363 = vst [vmem:[#allocation13_spill] sm:$0xff] %v10688_v36  ;;  %20364 = vst [vmem:[#allocation14_spill] sm:$0xff] %v10691_v37  ;;  %v10710_v41 = vsel %vm142_vm0, %v164_v38, %v10691_v37  ;;  %v170_v48 = vrot.slane %v10724_v45, 1  ;;  %v10746_v50 = vld [vmem:[%s19648_s0 + $0xa0] sm:$0xff]  ;;  %v10757_v52 = vrot.slane %v10741_v49, 1  ;;  %v10763_v54 = vld [vmem:[%s19648_s0 + $0xb8] sm:$0xff] }
   0xb   :  { %20365 = vst [vmem:[#allocation15_spill] sm:$0xff] %v10710_v41  ;;  %20366 = vst [vmem:[#allocation16_spill] sm:$0xff] %v10713_v42  ;;  %v10732_v46 = vsel %vm142_vm0, %v167_v43, %v10713_v42  ;;  %v173_v53 = vrot.slane %v10746_v50, 1  ;;  %v10768_v55 = vld [vmem:[%s19648_s0 + $0xb0] sm:$0xff]  ;;  %v10779_v57 = vrot.slane %v10763_v54, 1  ;;  %v10785_v59 = vld [vmem:[%s19648_s0 + $0xc8] sm:$0xff] }
   0xc   :  { %237 = vrot.lane.b32.xlu1 %v10582_v12, %s10500_s27  ;;  %235 = vrot.lane.b32.xlu0 %v10600_v16, %s10500_s27  ;;  %20367 = vst [vmem:[#allocation17_spill] sm:$0xff] %v10732_v46  ;;  %20368 = vst [vmem:[#allocation18_spill] sm:$0xff] %v10735_v47  ;;  %v10754_v51 = vsel %vm142_vm0, %v170_v48, %v10735_v47  ;;  %v176_v58 = vrot.slane %v10768_v55, 1  ;;  %v10790_v60 = vld [vmem:[%s19648_s0 + $0xc0] sm:$0xff]  ;;  %v10801_v62 = vrot.slane %v10785_v59, 1  ;;  %v10807_v4 = vld [vmem:[%s19648_s0 + $0xd8] sm:$0xff] }
   0xd   :  { %20369 = vst [vmem:[#allocation19_spill] sm:$0xff] %v10754_v51  ;;  %20370 = vst [vmem:[#allocation20_spill] sm:$0xff] %v10757_v52  ;;  %v10776_v56 = vsel %vm142_vm0, %v173_v53, %v10757_v52  ;;  %v179_v63 = vrot.slane %v10790_v60, 1  ;;  %v10812_v5 = vld [vmem:[%s19648_s0 + $0xd0] sm:$0xff]  ;;  %v10823_v11 = vrot.slane %v10807_v4, 1  ;;  %v10829_v18 = vld [vmem:[%s19648_s0 + $0x108] sm:$0xff] }
   0xe   :  { %20371 = vst [vmem:[#allocation21_spill] sm:$0xff] %v10776_v56  ;;  %20372 = vst [vmem:[#allocation22_spill] sm:$0xff] %v10779_v57  ;;  %v10798_v61 = vsel %vm142_vm0, %v176_v58, %v10779_v57  ;;  %v182_v13 = vrot.slane %v10812_v5, 1  ;;  %v10834_v23 = vld [vmem:[%s19648_s0 + $0x100] sm:$0xff]  ;;  %v186_v33 = vrot.slane %v10829_v18, 1  ;;  %v10849_v43 = vld [vmem:[%s19648_s0 + $0x118] sm:$0xff] }
   0xf   :  { %20373 = vst [vmem:[#allocation23_spill] sm:$0xff] %v10798_v61  ;;  %20374 = vst [vmem:[#allocation24_spill] sm:$0xff] %v10801_v62  ;;  %v10820_v9 = vsel %vm142_vm0, %v179_v63, %v10801_v62  ;;  %v185_v38 = vrot.slane %v10834_v23, 1  ;;  %v10854_v48 = vld [vmem:[%s19648_s0 + $0x110] sm:$0xff]  ;;  %v10862_v58 = vrot.slane %v10849_v43, 1  ;;  %v11108_v3 = vld [vmem:[%s19648_s0 + $0x1d8] sm:$0xff] }
  0x10   :  { %241 = vrot.lane.b32.xlu1 %v10603_v17, %s10500_s27  ;;  %239 = vrot.lane.b32.xlu0 %v10622_v21, %s10500_s27  ;;  %20375 = vst [vmem:[#allocation25_spill] sm:$0xff] %v10820_v9  ;;  %20376 = vst [vmem:[#allocation26_spill] sm:$0xff] %v10823_v11  ;;  %v10842_v28 = vsel %vm142_vm0, %v182_v13, %v10823_v11  ;;  %v188_v63 = vrot.slane %v10854_v48, 1  ;;  %v10868_v13 = vld [vmem:[%s19648_s0 + $0x128] sm:$0xff]  ;;  %v11143_v10 = vrot.slane %v10540_v0, 2  ;;  %s10506_s13 = smov 20  }
  0x11   :  { %20377 = vst [vmem:[#allocation27_spill] sm:$0xff] %v10842_v28  ;;  %v187_v53 = vsel %vm142_vm0, %v185_v38, %v186_v33  ;;  %20378 = vst [vmem:[#allocation28_spill] sm:$0xff] %v10862_v58  ;;  %v11086_v21 = vld [vmem:[%s19648_s0 + $0x1c8] sm:$0xff]  ;;  %s10508_s16 = smov 32   ;;  %s10509_s17 = smov 28   ;;  %vm1688_vm5 = vcmask 31744  }
  0x12   :  { %v10879_v38 = vsel %vm142_vm0, %v188_v63, %v10862_v58  ;;  %20404 = vst [vmem:[#allocation54_spill] sm:$0xff] %v11143_v10  ;;  %vm1802_vm6 = vcmask 97280   ;;  %vm1859_vm7 = vcmask 130048   ;;  %vm1916_vm8 = vcmask 162816  }
  0x13   :  { %20379 = vst [vmem:[#allocation29_spill] sm:$0xff] %v10879_v38  ;;  %vm1973_vm9 = vcmask 195584   ;;  %vm2030_vm10 = vcmask 228352   ;;  %vm2087_vm11 = vcmask 261120   ;;  %vm3957_vm12 = vcmask 293888  }
  0x14   :  { %245 = vrot.lane.b32.xlu1 %v10625_v22, %s10500_s27  ;;  %243 = vrot.lane.b32.xlu0 %v10644_v26, %s10500_s27  ;;  %v11064_v26 = vld [vmem:[%s19648_s0 + $0x1b8] sm:$0xff]  ;;  %vm6429_vm13 = vcmask 62464  }
  0x18   :  { %249 = vrot.lane.b32.xlu1 %v10647_v27, %s10500_s27  ;;  %247 = vrot.lane.b32.xlu0 %v10666_v31, %s10500_s27  ;;  %v11042_v31 = vld [vmem:[%s19648_s0 + $0x1a8] sm:$0xff] }
  0x1c   :  { %253 = vrot.lane.b32.xlu1 %v10669_v32, %s10500_s27  ;;  %251 = vrot.lane.b32.xlu0 %v10688_v36, %s10500_s27  ;;  %v11020_v36 = vld [vmem:[%s19648_s0 + $0x198] sm:$0xff] }
  0x20   :  { %257 = vrot.lane.b32.xlu1 %v10691_v37, %s10500_s27  ;;  %255 = vrot.lane.b32.xlu0 %v10710_v41, %s10500_s27  ;;  %v10998_v41 = vld [vmem:[%s19648_s0 + $0x188] sm:$0xff] }
  0x24   :  { %261 = vrot.lane.b32.xlu1 %v10713_v42, %s10500_s27  ;;  %259 = vrot.lane.b32.xlu0 %v10732_v46, %s10500_s27  ;;  %v10976_v46 = vld [vmem:[%s19648_s0 + $0x178] sm:$0xff] }
  0x28   :  { %265 = vrot.lane.b32.xlu1 %v10735_v47, %s10500_s27  ;;  %263 = vrot.lane.b32.xlu0 %v10754_v51, %s10500_s27  ;;  %v10954_v51 = vld [vmem:[%s19648_s0 + $0x168] sm:$0xff] }
  0x2c   :  { %269 = vrot.lane.b32.xlu1 %v10757_v52, %s10500_s27  ;;  %267 = vrot.lane.b32.xlu0 %v10776_v56, %s10500_s27  ;;  %v10915_v52 = vld [vmem:[%s19648_s0 + $0x140] sm:$0xff]  ;;  %v10932_v56 = vld [vmem:[%s19648_s0 + $0x158] sm:$0xff] }
  0x30   :  { %273 = vrot.lane.b32.xlu1 %v10779_v57, %s10500_s27  ;;  %271 = vrot.lane.b32.xlu0 %v10798_v61, %s10500_s27  ;;  %v10910_v61 = vld [vmem:[%s19648_s0 + $0x148] sm:$0xff] }
  0x34   :  { %277 = vrot.lane.b32.xlu1 %v10801_v62, %s10500_s27  ;;  %275 = vrot.lane.b32.xlu0 %v10820_v9, %s10500_s27  ;;  %v10873_v62 = vld [vmem:[%s19648_s0 + $0x120] sm:$0xff]  ;;  %v10888_v9 = vld [vmem:[%s19648_s0 + $0x138] sm:$0xff] }
  0x35   :  { %v10904_v63 = vrot.slane %v10888_v9, 1 }
  0x37   :  { %20382 = vst [vmem:[#allocation32_spill] sm:$0xff] %v10904_v63 }
  0x38   :  { %281 = vrot.lane.b32.xlu1 %v10823_v11, %s10500_s27  ;;  %279 = vrot.lane.b32.xlu0 %v10842_v28, %s10500_s27  ;;  %v10882_v11 = vrot.slane %v10868_v13, 1  ;;  %v191_v28 = vrot.slane %v10873_v62, 1 }
  0x3a   :  { %20380 = vst [vmem:[#allocation30_spill] sm:$0xff] %v10882_v11 }
  0x3c   :  { %285 = vrot.lane.b32.xlu1 %v186_v33, %s10500_s27  ;;  %283 = vrot.lane.b32.xlu0 %v187_v53, %s10500_s27  ;;  %v10893_v33 = vld [vmem:[%s19648_s0 + $0x130] sm:$0xff]  ;;  %v10901_v53 = vsel %vm142_vm0, %v191_v28, %v10882_v11 }
  0x3d   :  { %20381 = vst [vmem:[#allocation31_spill] sm:$0xff] %v10901_v53  ;;  %v194_v57 = vrot.slane %v10893_v33, 1 }
  0x3f   :  { %v10923_v28 = vsel %vm142_vm0, %v194_v57, %v10904_v63 }
  0x40   :  { %289 = vrot.lane.b32.xlu1 %v10862_v58, %s10500_s27  ;;  %287 = vrot.lane.b32.xlu0 %v10879_v38, %s10500_s27  ;;  %20383 = vst [vmem:[#allocation33_spill] sm:$0xff] %v10923_v28  ;;  %v10926_v58 = vrot.slane %v10910_v61, 1  ;;  %v197_v38 = vrot.slane %v10915_v52, 1 }
  0x42   :  { %20384 = vst [vmem:[#allocation34_spill] sm:$0xff] %v10926_v58  ;;  %v10945_v57 = vsel %vm142_vm0, %v197_v38, %v10926_v58 }
  0x43   :  { %20385 = vst [vmem:[#allocation35_spill] sm:$0xff] %v10945_v57 }
  0x44   :  { %293 = vrot.lane.b32.xlu1 %v10882_v11, %s10500_s27  ;;  %291 = vrot.lane.b32.xlu0 %v10901_v53, %s10500_s27  ;;  %v10937_v11 = vld [vmem:[%s19648_s0 + $0x150] sm:$0xff]  ;;  %v10948_v53 = vrot.slane %v10932_v56, 1 }
  0x45   :  { %v200_v47 = vrot.slane %v10937_v11, 1 }
  0x46   :  { %20386 = vst [vmem:[#allocation36_spill] sm:$0xff] %v10948_v53 }
  0x47   :  { %v10967_v38 = vsel %vm142_vm0, %v200_v47, %v10948_v53 }
  0x48   :  { %297 = vrot.lane.b32.xlu1 %v10904_v63, %s10500_s27  ;;  %295 = vrot.lane.b32.xlu0 %v10923_v28, %s10500_s27  ;;  %v10959_v63 = vld [vmem:[%s19648_s0 + $0x160] sm:$0xff]  ;;  %20387 = vst [vmem:[#allocation37_spill] sm:$0xff] %v10967_v38  ;;  %v10970_v28 = vrot.slane %v10954_v51, 1 }
  0x49   :  { %v203_v42 = vrot.slane %v10959_v63, 1 }
  0x4a   :  { %20388 = vst [vmem:[#allocation38_spill] sm:$0xff] %v10970_v28 }
  0x4b   :  { %v10989_v47 = vsel %vm142_vm0, %v203_v42, %v10970_v28 }
  0x4c   :  { %301 = vrot.lane.b32.xlu1 %v10926_v58, %s10500_s27  ;;  %299 = vrot.lane.b32.xlu0 %v10945_v57, %s10500_s27  ;;  %v10981_v58 = vld [vmem:[%s19648_s0 + $0x170] sm:$0xff]  ;;  %20389 = vst [vmem:[#allocation39_spill] sm:$0xff] %v10989_v47  ;;  %v10992_v57 = vrot.slane %v10976_v46, 1 }
  0x4d   :  { %v206_v37 = vrot.slane %v10981_v58, 1 }
  0x4e   :  { %20390 = vst [vmem:[#allocation40_spill] sm:$0xff] %v10992_v57 }
  0x4f   :  { %v11011_v42 = vsel %vm142_vm0, %v206_v37, %v10992_v57 }
  0x50   :  { %305 = vrot.lane.b32.xlu1 %v10948_v53, %s10500_s27  ;;  %303 = vrot.lane.b32.xlu0 %v10967_v38, %s10500_s27  ;;  %v11003_v53 = vld [vmem:[%s19648_s0 + $0x180] sm:$0xff]  ;;  %20391 = vst [vmem:[#allocation41_spill] sm:$0xff] %v11011_v42  ;;  %v11014_v38 = vrot.slane %v10998_v41, 1 }
  0x51   :  { %v209_v32 = vrot.slane %v11003_v53, 1 }
  0x52   :  { %20392 = vst [vmem:[#allocation42_spill] sm:$0xff] %v11014_v38 }
  0x53   :  { %v11033_v37 = vsel %vm142_vm0, %v209_v32, %v11014_v38 }
  0x54   :  { %309 = vrot.lane.b32.xlu1 %v10970_v28, %s10500_s27  ;;  %307 = vrot.lane.b32.xlu0 %v10989_v47, %s10500_s27  ;;  %v11025_v28 = vld [vmem:[%s19648_s0 + $0x190] sm:$0xff]  ;;  %20393 = vst [vmem:[#allocation43_spill] sm:$0xff] %v11033_v37  ;;  %v11036_v47 = vrot.slane %v11020_v36, 1 }
  0x55   :  { %v212_v27 = vrot.slane %v11025_v28, 1 }
  0x56   :  { %20394 = vst [vmem:[#allocation44_spill] sm:$0xff] %v11036_v47 }
  0x57   :  { %v11055_v32 = vsel %vm142_vm0, %v212_v27, %v11036_v47 }
  0x58   :  { %313 = vrot.lane.b32.xlu1 %v10992_v57, %s10500_s27  ;;  %311 = vrot.lane.b32.xlu0 %v11011_v42, %s10500_s27  ;;  %v11047_v57 = vld [vmem:[%s19648_s0 + $0x1a0] sm:$0xff]  ;;  %20395 = vst [vmem:[#allocation45_spill] sm:$0xff] %v11055_v32  ;;  %v11058_v42 = vrot.slane %v11042_v31, 1 }
  0x59   :  { %v215_v22 = vrot.slane %v11047_v57, 1 }
  0x5a   :  { %20396 = vst [vmem:[#allocation46_spill] sm:$0xff] %v11058_v42 }
  0x5b   :  { %v11077_v27 = vsel %vm142_vm0, %v215_v22, %v11058_v42 }
  0x5c   :  { %317 = vrot.lane.b32.xlu1 %v11014_v38, %s10500_s27  ;;  %315 = vrot.lane.b32.xlu0 %v11033_v37, %s10500_s27  ;;  %v11069_v38 = vld [vmem:[%s19648_s0 + $0x1b0] sm:$0xff]  ;;  %20397 = vst [vmem:[#allocation47_spill] sm:$0xff] %v11077_v27  ;;  %v11080_v37 = vrot.slane %v11064_v26, 1 }
  0x5d   :  { %v218_v17 = vrot.slane %v11069_v38, 1 }
  0x5e   :  { %20398 = vst [vmem:[#allocation48_spill] sm:$0xff] %v11080_v37 }
  0x5f   :  { %v11099_v22 = vsel %vm142_vm0, %v218_v17, %v11080_v37 }
  0x60   :  { %321 = vrot.lane.b32.xlu1 %v11036_v47, %s10500_s27  ;;  %319 = vrot.lane.b32.xlu0 %v11055_v32, %s10500_s27  ;;  %v11091_v47 = vld [vmem:[%s19648_s0 + $0x1c0] sm:$0xff]  ;;  %20399 = vst [vmem:[#allocation49_spill] sm:$0xff] %v11099_v22  ;;  %v11102_v32 = vrot.slane %v11086_v21, 1 }
  0x61   :  { %v221_v12 = vrot.slane %v11091_v47, 1 }
  0x62   :  { %20400 = vst [vmem:[#allocation50_spill] sm:$0xff] %v11102_v32 }
  0x63   :  { %v11121_v17 = vsel %vm142_vm0, %v221_v12, %v11102_v32  ;;  %v396_v12 = vrot.slane %v10560_v6, 2  ;;  %v11153_v6 = vrot.slane %v10565_v7, 2 }
  0x64   :  { %325 = vrot.lane.b32.xlu1 %v11058_v42, %s10500_s27  ;;  %323 = vrot.lane.b32.xlu0 %v11077_v27, %s10500_s27  ;;  %v11113_v42 = vld [vmem:[%s19648_s0 + $0x1d0] sm:$0xff]  ;;  %20401 = vst [vmem:[#allocation51_spill] sm:$0xff] %v11121_v17  ;;  %v11124_v27 = vrot.slane %v11108_v3, 1 }
  0x65   :  { %v224_v16 = vrot.slane %v11113_v42, 1  ;;  %20406 = vst [vmem:[#allocation56_spill] sm:$0xff] %v11153_v6 }
  0x66   :  { %20402 = vst [vmem:[#allocation52_spill] sm:$0xff] %v11124_v27 }
  0x68   :  { %329 = vrot.lane.b32.xlu1 %v11080_v37, %s10500_s27  ;;  %327 = vrot.lane.b32.xlu0 %v11099_v22, %s10500_s27  ;;  %v11133_v37 = vsel %vm142_vm0, %v224_v16, %v11124_v27  ;;  %v397_v22 = vrot.slane %v10545_v1, 2  ;;  %v402_v16 = vrot.slane %v10570_v8, 2 }
  0x69   :  { %20403 = vst [vmem:[#allocation53_spill] sm:$0xff] %v11133_v37 }
  0x6c   :  { %333 = vrot.lane.b32.xlu1 %v11102_v32, %s10500_s27  ;;  %331 = vrot.lane.b32.xlu0 %v11121_v17, %s10500_s27  ;;  %v398_v32 = vsel %vm395_vm1, %v396_v12, %v397_v22  ;;  %v399_v17 = vrot.slane %v10550_v2, 2 }
  0x6e   :  { %v11150_v1 = vsel %vm395_vm1, %v399_v17, %v11143_v10  ;;  %v405_v17 = vrot.slane %v10593_v15, 2 }
  0x6f   :  { %20405 = vst [vmem:[#allocation55_spill] sm:$0xff] %v11150_v1 }
  0x70   :  { %337 = vrot.lane.b32.xlu1 %v11124_v27, %s10500_s27  ;;  %335 = vrot.lane.b32.xlu0 %v11133_v37, %s10500_s27  ;;  %s10502_s27 = smov 12  }
  0x74   :  { %482 = vrot.lane.b32.xlu1 %v397_v22, %s10501_s28  ;;  %480 = vrot.lane.b32.xlu0 %v398_v32, %s10501_s28  ;;  %v11166_v32 = vsel %vm395_vm1, %v402_v16, %v11153_v6  ;;  %v11169_v22 = vrot.slane %v10588_v14, 2  ;;  %v11185_v16 = vrot.slane %v10609_v19, 2 }
  0x75   :  { %20409 = vst [vmem:[#allocation59_spill] sm:$0xff] %v11166_v32 }
  0x76   :  { %v11156_v12 = vpop.permute.xlu1 %233  ;;  %v11158_v27 = vpop.permute.xlu0 %229  ;;  %20410 = vst [vmem:[#allocation60_spill] sm:$0xff] %v11169_v22  ;;  %20414 = vst [vmem:[#allocation64_spill] sm:$0xff] %v11185_v16 }
  0x77   :  { %20407 = vst [vmem:[#allocation57_spill] sm:$0xff] %v11156_v12  ;;  %20408 = vst [vmem:[#allocation58_spill] sm:$0xff] %v11158_v27  ;;  %v11182_v27 = vsel %vm395_vm1, %v405_v17, %v11169_v22  ;;  %v11201_v17 = vrot.slane %v10631_v24, 2 }
  0x78   :  { %486 = vrot.lane.b32.xlu1 %v11143_v10, %s10501_s28  ;;  %484 = vrot.lane.b32.xlu0 %v11150_v1, %s10501_s28  ;;  %20413 = vst [vmem:[#allocation63_spill] sm:$0xff] %v11182_v27  ;;  %v408_v10 = vrot.slane %v10614_v20, 2 }
  0x79   :  { %20418 = vst [vmem:[#allocation68_spill] sm:$0xff] %v11201_v17 }
  0x7a   :  { %v11172_v37 = vpop.permute.xlu1 %231  ;;  %v11174_v12 = vpop.permute.xlu0 %227 }
  0x7b   :  { %20411 = vst [vmem:[#allocation61_spill] sm:$0xff] %v11172_v37  ;;  %20412 = vst [vmem:[#allocation62_spill] sm:$0xff] %v11174_v12  ;;  %v11198_v12 = vsel %vm395_vm1, %v408_v10, %v11185_v16  ;;  %v11217_v10 = vrot.slane %v10653_v29, 2 }
  0x7c   :  { %490 = vrot.lane.b32.xlu1 %v11153_v6, %s10501_s28  ;;  %488 = vrot.lane.b32.xlu0 %v11166_v32, %s10501_s28  ;;  %20417 = vst [vmem:[#allocation67_spill] sm:$0xff] %v11198_v12  ;;  %v411_v6 = vrot.slane %v10636_v25, 2 }
  0x7d   :  { %20422 = vst [vmem:[#allocation72_spill] sm:$0xff] %v11217_v10 }
  0x7e   :  { %v11188_v1 = vpop.permute.xlu1 %237  ;;  %v11190_v37 = vpop.permute.xlu0 %235 }
  0x7f   :  { %20415 = vst [vmem:[#allocation65_spill] sm:$0xff] %v11188_v1  ;;  %20416 = vst [vmem:[#allocation66_spill] sm:$0xff] %v11190_v37  ;;  %v11214_v37 = vsel %vm395_vm1, %v411_v6, %v11201_v17  ;;  %v11233_v6 = vrot.slane %v10675_v34, 2 }
  0x80   :  { %494 = vrot.lane.b32.xlu1 %v11169_v22, %s10501_s28  ;;  %492 = vrot.lane.b32.xlu0 %v11182_v27, %s10501_s28  ;;  %20421 = vst [vmem:[#allocation71_spill] sm:$0xff] %v11214_v37  ;;  %v414_v22 = vrot.slane %v10658_v30, 2 }
  0x82   :  { %v11204_v32 = vpop.permute.xlu1 %241  ;;  %v11206_v1 = vpop.permute.xlu0 %239 }
  0x83   :  { %20419 = vst [vmem:[#allocation69_spill] sm:$0xff] %v11204_v32  ;;  %20420 = vst [vmem:[#allocation70_spill] sm:$0xff] %v11206_v1  ;;  %v11230_v1 = vsel %vm395_vm1, %v414_v22, %v11217_v10  ;;  %v11249_v22 = vrot.slane %v10697_v39, 2  ;;  %v423_v39 = vrot.slane %v10724_v45, 2 }
  0x84   :  { %498 = vrot.lane.b32.xlu1 %v11185_v16, %s10501_s28  ;;  %496 = vrot.lane.b32.xlu0 %v11198_v12, %s10501_s28  ;;  %v417_v16 = vrot.slane %v10680_v35, 2 }
  0x86   :  { %v11220_v27 = vpop.permute.xlu1 %245  ;;  %v11222_v32 = vpop.permute.xlu0 %243 }
  0x87   :  { %20423 = vst [vmem:[#allocation73_spill] sm:$0xff] %v11220_v27  ;;  %20424 = vst [vmem:[#allocation74_spill] sm:$0xff] %v11222_v32  ;;  %v11246_v32 = vsel %vm395_vm1, %v417_v16, %v11233_v6  ;;  %v11265_v16 = vrot.slane %v10719_v44, 2  ;;  %v426_v44 = vrot.slane %v10746_v50, 2 }
  0x88   :  { %502 = vrot.lane.b32.xlu1 %v11201_v17, %s10501_s28  ;;  %500 = vrot.lane.b32.xlu0 %v11214_v37, %s10501_s28  ;;  %v420_v17 = vrot.slane %v10702_v40, 2 }
  0x8a   :  { %v11236_v12 = vpop.permute.xlu1 %249  ;;  %v11238_v27 = vpop.permute.xlu0 %247 }
  0x8b   :  { %20425 = vst [vmem:[#allocation75_spill] sm:$0xff] %v11236_v12  ;;  %20426 = vst [vmem:[#allocation76_spill] sm:$0xff] %v11238_v27  ;;  %v11262_v27 = vsel %vm395_vm1, %v420_v17, %v11249_v22  ;;  %v11281_v17 = vrot.slane %v10741_v49, 2  ;;  %v429_v49 = vrot.slane %v10768_v55, 2 }
  0x8c   :  { %506 = vrot.lane.b32.xlu1 %v11217_v10, %s10501_s28  ;;  %504 = vrot.lane.b32.xlu0 %v11230_v1, %s10501_s28 }
  0x8e   :  { %v11252_v37 = vpop.permute.xlu1 %253  ;;  %v11254_v12 = vpop.permute.xlu0 %251 }
  0x8f   :  { %20427 = vst [vmem:[#allocation77_spill] sm:$0xff] %v11252_v37  ;;  %20428 = vst [vmem:[#allocation78_spill] sm:$0xff] %v11254_v12  ;;  %v11278_v12 = vsel %vm395_vm1, %v423_v39, %v11265_v16  ;;  %v11297_v39 = vrot.slane %v10763_v54, 2  ;;  %v432_v54 = vrot.slane %v10790_v60, 2 }
  0x90   :  { %510 = vrot.lane.b32.xlu1 %v11233_v6, %s10501_s28  ;;  %508 = vrot.lane.b32.xlu0 %v11246_v32, %s10501_s28 }
  0x91   :  { %20433 = vst [vmem:[#allocation83_spill] sm:$0xff] %v11297_v39 }
  0x92   :  { %v11268_v10 = vpop.permute.xlu1 %257  ;;  %v11270_v37 = vpop.permute.xlu0 %255 }
  0x93   :  { %20429 = vst [vmem:[#allocation79_spill] sm:$0xff] %v11268_v10  ;;  %20430 = vst [vmem:[#allocation80_spill] sm:$0xff] %v11270_v37  ;;  %v11294_v37 = vsel %vm395_vm1, %v426_v44, %v11281_v17  ;;  %v11313_v44 = vrot.slane %v10785_v59, 2  ;;  %v435_v59 = vrot.slane %v10812_v5, 2 }
  0x94   :  { %514 = vrot.lane.b32.xlu1 %v11249_v22, %s10501_s28  ;;  %512 = vrot.lane.b32.xlu0 %v11262_v27, %s10501_s28 }
  0x95   :  { %20436 = vst [vmem:[#allocation86_spill] sm:$0xff] %v11313_v44 }
  0x96   :  { %v11284_v45 = vpop.permute.xlu1 %261  ;;  %v11286_v10 = vpop.permute.xlu0 %259 }
  0x97   :  { %20431 = vst [vmem:[#allocation81_spill] sm:$0xff] %v11284_v45  ;;  %20432 = vst [vmem:[#allocation82_spill] sm:$0xff] %v11286_v10  ;;  %v11310_v10 = vsel %vm395_vm1, %v429_v49, %v11297_v39  ;;  %v11329_v49 = vrot.slane %v10807_v4, 2  ;;  %v438_v4 = vrot.slane %v10834_v23, 2 }
  0x98   :  { %518 = vrot.lane.b32.xlu1 %v11265_v16, %s10501_s28  ;;  %516 = vrot.lane.b32.xlu0 %v11278_v12, %s10501_s28 }
  0x99   :  { %20440 = vst [vmem:[#allocation90_spill] sm:$0xff] %v11329_v49 }
  0x9a   :  { %v11300_v50 = vpop.permute.xlu1 %265  ;;  %v11302_v45 = vpop.permute.xlu0 %263 }
  0x9b   :  { %20434 = vst [vmem:[#allocation84_spill] sm:$0xff] %v11300_v50  ;;  %20435 = vst [vmem:[#allocation85_spill] sm:$0xff] %v11302_v45  ;;  %v11326_v45 = vsel %vm395_vm1, %v432_v54, %v11313_v44  ;;  %v439_v54 = vrot.slane %v10829_v18, 2 }
  0x9c   :  { %522 = vrot.lane.b32.xlu1 %v11281_v17, %s10501_s28  ;;  %520 = vrot.lane.b32.xlu0 %v11294_v37, %s10501_s28  ;;  %20439 = vst [vmem:[#allocation89_spill] sm:$0xff] %v11326_v45 }
  0x9e   :  { %v11316_v55 = vpop.permute.xlu1 %269  ;;  %v11318_v50 = vpop.permute.xlu0 %267 }
  0x9f   :  { %20437 = vst [vmem:[#allocation87_spill] sm:$0xff] %v11316_v55  ;;  %20438 = vst [vmem:[#allocation88_spill] sm:$0xff] %v11318_v50  ;;  %v11342_v50 = vsel %vm395_vm1, %v435_v59, %v11329_v49  ;;  %v441_v59 = vrot.slane %v10854_v48, 2 }
  0xa0   :  { %526 = vrot.lane.b32.xlu1 %v11297_v39, %s10501_s28  ;;  %524 = vrot.lane.b32.xlu0 %v11310_v10, %s10501_s28  ;;  %20443 = vst [vmem:[#allocation93_spill] sm:$0xff] %v11342_v50 }
  0xa2   :  { %v11332_v60 = vpop.permute.xlu1 %273  ;;  %v11334_v55 = vpop.permute.xlu0 %271 }
  0xa3   :  { %20441 = vst [vmem:[#allocation91_spill] sm:$0xff] %v11332_v60  ;;  %20442 = vst [vmem:[#allocation92_spill] sm:$0xff] %v11334_v55  ;;  %v440_v60 = vsel %vm395_vm1, %v438_v4, %v439_v54  ;;  %v11356_v55 = vrot.slane %v10849_v43, 2  ;;  %v444_v43 = vrot.slane %v10873_v62, 2 }
  0xa4   :  { %530 = vrot.lane.b32.xlu1 %v11313_v44, %s10501_s28  ;;  %528 = vrot.lane.b32.xlu0 %v11326_v45, %s10501_s28  ;;  %v20562_v44 = vld [vmem:[#allocation14_spill] sm:$0xff] }
  0xa6   :  { %v11346_v39 = vpop.permute.xlu1 %277  ;;  %v11348_v5 = vpop.permute.xlu0 %275 }
  0xa7   :  { %20444 = vst [vmem:[#allocation94_spill] sm:$0xff] %v11346_v39  ;;  %20445 = vst [vmem:[#allocation95_spill] sm:$0xff] %v11348_v5  ;;  %v11367_v39 = vsel %vm395_vm1, %v441_v59, %v11356_v55  ;;  %v11370_v5 = vrot.slane %v10868_v13, 2  ;;  %v447_v13 = vrot.slane %v10893_v33, 2 }
  0xa8   :  { %534 = vrot.lane.b32.xlu1 %v11329_v49, %s10501_s28  ;;  %532 = vrot.lane.b32.xlu0 %v11342_v50, %s10501_s28  ;;  %v20560_v50 = vld [vmem:[#allocation62_spill] sm:$0xff] }
  0xaa   :  { %v11359_v18 = vpop.permute.xlu1 %281  ;;  %v11361_v23 = vpop.permute.xlu0 %279 }
  0xab   :  { %20446 = vst [vmem:[#allocation96_spill] sm:$0xff] %v11359_v18  ;;  %20447 = vst [vmem:[#allocation97_spill] sm:$0xff] %v11361_v23 }
  0xac   :  { %538 = vrot.lane.b32.xlu1 %v439_v54, %s10501_s28  ;;  %536 = vrot.lane.b32.xlu0 %v440_v60, %s10501_s28  ;;  %v11383_v60 = vsel %vm395_vm1, %v444_v43, %v11370_v5  ;;  %v11386_v54 = vrot.slane %v10888_v9, 2  ;;  %v11402_v43 = vrot.slane %v10910_v61, 2  ;;  %v450_v9 = vrot.slane %v10915_v52, 2 }
  0xad   :  { %v453_v61 = vrot.slane %v10937_v11, 2 }
  0xae   :  { %v11373_v4 = vpop.permute.xlu1 %285  ;;  %v11375_v48 = vpop.permute.xlu0 %283  ;;  %v11399_v18 = vsel %vm395_vm1, %v447_v13, %v11386_v54  ;;  %20452 = vst [vmem:[#allocation102_spill] sm:$0xff] %v11402_v43  ;;  %v11418_v13 = vrot.slane %v10932_v56, 2  ;;  %v456_v56 = vrot.slane %v10959_v63, 2 }
  0xaf   :  { %20448 = vst [vmem:[#allocation98_spill] sm:$0xff] %v11373_v4  ;;  %20449 = vst [vmem:[#allocation99_spill] sm:$0xff] %v11375_v48 }
  0xb0   :  { %542 = vrot.lane.b32.xlu1 %v11356_v55, %s10501_s28  ;;  %540 = vrot.lane.b32.xlu0 %v11367_v39, %s10501_s28  ;;  %20456 = vst [vmem:[#allocation106_spill] sm:$0xff] %v11418_v13 }
  0xb2   :  { %v11389_v62 = vpop.permute.xlu1 %289  ;;  %v11391_v59 = vpop.permute.xlu0 %287 }
  0xb3   :  { %20450 = vst [vmem:[#allocation100_spill] sm:$0xff] %v11389_v62  ;;  %20451 = vst [vmem:[#allocation101_spill] sm:$0xff] %v11391_v59  ;;  %v11415_v62 = vsel %vm395_vm1, %v450_v9, %v11402_v43  ;;  %v11434_v9 = vrot.slane %v10954_v51, 2  ;;  %v459_v51 = vrot.slane %v10981_v58, 2  ;;  %v10511_v59 = vmov 1983009808  }
  0xb4   :  { %546 = vrot.lane.b32.xlu1 %v11370_v5, %s10501_s28  ;;  %544 = vrot.lane.b32.xlu0 %v11383_v60, %s10501_s28  ;;  %20455 = vst [vmem:[#allocation105_spill] sm:$0xff] %v11415_v62 }
  0xb5   :  { %20460 = vst [vmem:[#allocation110_spill] sm:$0xff] %v11434_v9 }
  0xb6   :  { %v11405_v33 = vpop.permute.xlu1 %293  ;;  %v11407_v23 = vpop.permute.xlu0 %291 }
  0xb7   :  { %20453 = vst [vmem:[#allocation103_spill] sm:$0xff] %v11405_v33  ;;  %20454 = vst [vmem:[#allocation104_spill] sm:$0xff] %v11407_v23  ;;  %v11431_v23 = vsel %vm395_vm1, %v453_v61, %v11418_v13  ;;  %v11450_v61 = vrot.slane %v10976_v46, 2  ;;  %v462_v46 = vrot.slane %v11003_v53, 2 }
  0xb8   :  { %550 = vrot.lane.b32.xlu1 %v11386_v54, %s10501_s28  ;;  %548 = vrot.lane.b32.xlu0 %v11399_v18, %s10501_s28  ;;  %20459 = vst [vmem:[#allocation109_spill] sm:$0xff] %v11431_v23 }
  0xb9   :  { %20464 = vst [vmem:[#allocation114_spill] sm:$0xff] %v11450_v61 }
  0xba   :  { %v11421_v52 = vpop.permute.xlu1 %297  ;;  %v11423_v33 = vpop.permute.xlu0 %295 }
  0xbb   :  { %20457 = vst [vmem:[#allocation107_spill] sm:$0xff] %v11421_v52  ;;  %20458 = vst [vmem:[#allocation108_spill] sm:$0xff] %v11423_v33  ;;  %v11447_v33 = vsel %vm395_vm1, %v456_v56, %v11434_v9  ;;  %v11466_v56 = vrot.slane %v10998_v41, 2  ;;  %v465_v41 = vrot.slane %v11025_v28, 2 }
  0xbc   :  { %554 = vrot.lane.b32.xlu1 %v11402_v43, %s10501_s28  ;;  %552 = vrot.lane.b32.xlu0 %v11415_v62, %s10501_s28  ;;  %20463 = vst [vmem:[#allocation113_spill] sm:$0xff] %v11447_v33 }
  0xbd   :  { %20468 = vst [vmem:[#allocation118_spill] sm:$0xff] %v11466_v56 }
  0xbe   :  { %v11437_v11 = vpop.permute.xlu1 %301  ;;  %v11439_v52 = vpop.permute.xlu0 %299 }
  0xbf   :  { %20461 = vst [vmem:[#allocation111_spill] sm:$0xff] %v11437_v11  ;;  %20462 = vst [vmem:[#allocation112_spill] sm:$0xff] %v11439_v52  ;;  %v11463_v52 = vsel %vm395_vm1, %v459_v51, %v11450_v61  ;;  %v11482_v51 = vrot.slane %v11020_v36, 2  ;;  %v468_v36 = vrot.slane %v11047_v57, 2 }
  0xc0   :  { %558 = vrot.lane.b32.xlu1 %v11418_v13, %s10501_s28  ;;  %556 = vrot.lane.b32.xlu0 %v11431_v23, %s10501_s28  ;;  %20467 = vst [vmem:[#allocation117_spill] sm:$0xff] %v11463_v52  ;;  %v2202_v23 = vunpack.c.l.s4 %v10511_v59  ;;  %v11898_v59 = vld [vmem:[%s19648_s0 + $0x78] sm:$0xff] }
  0xc1   :  { %20472 = vst [vmem:[#allocation122_spill] sm:$0xff] %v11482_v51 }
  0xc2   :  { %v11453_v63 = vpop.permute.xlu1 %305  ;;  %v11455_v11 = vpop.permute.xlu0 %303 }
  0xc3   :  { %20465 = vst [vmem:[#allocation115_spill] sm:$0xff] %v11453_v63  ;;  %20466 = vst [vmem:[#allocation116_spill] sm:$0xff] %v11455_v11  ;;  %v11479_v11 = vsel %vm395_vm1, %v462_v46, %v11466_v56  ;;  %v11498_v46 = vrot.slane %v11042_v31, 2  ;;  %v471_v31 = vrot.slane %v11069_v38, 2 }
  0xc4   :  { %562 = vrot.lane.b32.xlu1 %v11434_v9, %s10501_s28  ;;  %560 = vrot.lane.b32.xlu0 %v11447_v33, %s10501_s28  ;;  %20471 = vst [vmem:[#allocation121_spill] sm:$0xff] %v11479_v11 }
  0xc5   :  { %20476 = vst [vmem:[#allocation126_spill] sm:$0xff] %v11498_v46 }
  0xc6   :  { %v11469_v58 = vpop.permute.xlu1 %309  ;;  %v11471_v63 = vpop.permute.xlu0 %307 }
  0xc7   :  { %20469 = vst [vmem:[#allocation119_spill] sm:$0xff] %v11469_v58  ;;  %20470 = vst [vmem:[#allocation120_spill] sm:$0xff] %v11471_v63  ;;  %v11495_v63 = vsel %vm395_vm1, %v465_v41, %v11482_v51  ;;  %v11514_v41 = vrot.slane %v11064_v26, 2  ;;  %v474_v26 = vrot.slane %v11091_v47, 2 }
  0xc8   :  { %566 = vrot.lane.b32.xlu1 %v11450_v61, %s10501_s28  ;;  %564 = vrot.lane.b32.xlu0 %v11463_v52, %s10501_s28  ;;  %20475 = vst [vmem:[#allocation125_spill] sm:$0xff] %v11495_v63  ;;  %v20505_v61 = vld [vmem:[#allocation2_spill] sm:$0xff] }
  0xc9   :  { %20480 = vst [vmem:[#allocation130_spill] sm:$0xff] %v11514_v41 }
  0xca   :  { %v11485_v53 = vpop.permute.xlu1 %313  ;;  %v11487_v58 = vpop.permute.xlu0 %311 }
  0xcb   :  { %20473 = vst [vmem:[#allocation123_spill] sm:$0xff] %v11485_v53  ;;  %20474 = vst [vmem:[#allocation124_spill] sm:$0xff] %v11487_v58  ;;  %v11511_v58 = vsel %vm395_vm1, %v468_v36, %v11498_v46  ;;  %v11530_v36 = vrot.slane %v11086_v21, 2  ;;  %v477_v21 = vrot.slane %v11113_v42, 2 }
  0xcc   :  { %570 = vrot.lane.b32.xlu1 %v11466_v56, %s10501_s28  ;;  %568 = vrot.lane.b32.xlu0 %v11479_v11, %s10501_s28  ;;  %20479 = vst [vmem:[#allocation129_spill] sm:$0xff] %v11511_v58  ;;  %v19807_v11 = vmov 0.0  }
  0xcd   :  { %20484 = vst [vmem:[#allocation134_spill] sm:$0xff] %v11530_v36  ;;  %10251 = vmatprep.mubr.msk.f32.mxu0 %vm10510_vm3, %v19807_v11  ;;  %10326 = vmatprep.mubr.msk.f32.mxu1 %vm10510_vm3, %v19807_v11 }
  0xce   :  { %v11501_v28 = vpop.permute.xlu1 %317  ;;  %v11503_v53 = vpop.permute.xlu0 %315 }
  0xcf   :  { %20477 = vst [vmem:[#allocation127_spill] sm:$0xff] %v11501_v28  ;;  %20478 = vst [vmem:[#allocation128_spill] sm:$0xff] %v11503_v53  ;;  %v11527_v53 = vsel %vm395_vm1, %v471_v31, %v11514_v41  ;;  %v11546_v31 = vrot.slane %v11108_v3, 2 }
  0xd0   :  { %574 = vrot.lane.b32.xlu1 %v11482_v51, %s10501_s28  ;;  %572 = vrot.lane.b32.xlu0 %v11495_v63, %s10501_s28  ;;  %20483 = vst [vmem:[#allocation133_spill] sm:$0xff] %v11527_v53  ;;  %v10503_v51 = vmov 0.0|0.0   ;;  %v84_v63 = vld [vmem:[%s19649_s1 + $0x18] sm:$0xff] }
  0xd1   :  { %20488 = vst [vmem:[#allocation138_spill] sm:$0xff] %v11546_v31  ;;  %10398 = vmatprep.subr.bf16.mxu0 %v10503_v51  ;;  %10404 = vmatprep.subr.bf16.mxu1 %v10503_v51 }
  0xd2   :  { %v11517_v57 = vpop.permute.xlu1 %321  ;;  %v11519_v28 = vpop.permute.xlu0 %319 }
  0xd3   :  { %20481 = vst [vmem:[#allocation131_spill] sm:$0xff] %v11517_v57  ;;  %20482 = vst [vmem:[#allocation132_spill] sm:$0xff] %v11519_v28  ;;  %v11543_v28 = vsel %vm395_vm1, %v474_v26, %v11530_v36 }
  0xd4   :  { %578 = vrot.lane.b32.xlu1 %v11498_v46, %s10501_s28  ;;  %576 = vrot.lane.b32.xlu0 %v11511_v58, %s10501_s28  ;;  %20487 = vst [vmem:[#allocation137_spill] sm:$0xff] %v11543_v28 }
  0xd6   :  { %v11533_v38 = vpop.permute.xlu1 %325  ;;  %v11535_v57 = vpop.permute.xlu0 %323 }
  0xd7   :  { %20485 = vst [vmem:[#allocation135_spill] sm:$0xff] %v11533_v38  ;;  %20486 = vst [vmem:[#allocation136_spill] sm:$0xff] %v11535_v57  ;;  %v11559_v57 = vsel %vm395_vm1, %v477_v21, %v11546_v31 }
  0xd8   :  { %582 = vrot.lane.b32.xlu1 %v11514_v41, %s10501_s28  ;;  %580 = vrot.lane.b32.xlu0 %v11527_v53, %s10501_s28  ;;  %20491 = vst [vmem:[#allocation141_spill] sm:$0xff] %v11559_v57  ;;  %v81_v41 = vld [vmem:[%s19649_s1] sm:$0xff] }
  0xda   :  { %v11549_v47 = vpop.permute.xlu1 %329  ;;  %v11551_v38 = vpop.permute.xlu0 %327 }
  0xdb   :  { %20489 = vst [vmem:[#allocation139_spill] sm:$0xff] %v11549_v47  ;;  %20490 = vst [vmem:[#allocation140_spill] sm:$0xff] %v11551_v38 }
  0xdc   :  { %586 = vrot.lane.b32.xlu1 %v11530_v36, %s10501_s28  ;;  %584 = vrot.lane.b32.xlu0 %v11543_v28, %s10501_s28 }
  0xde   :  { %v11561_v26 = vpop.permute.xlu1 %333  ;;  %v11563_v3 = vpop.permute.xlu0 %331 }
  0xdf   :  { %20492 = vst [vmem:[#allocation142_spill] sm:$0xff] %v11561_v26  ;;  %20493 = vst [vmem:[#allocation143_spill] sm:$0xff] %v11563_v3 }
  0xe0   :  { %590 = vrot.lane.b32.xlu1 %v11546_v31, %s10501_s28  ;;  %588 = vrot.lane.b32.xlu0 %v11559_v57, %s10501_s28 }
  0xe2   :  { %v11569_v42 = vpop.permute.xlu1 %337  ;;  %v11571_v47 = vpop.permute.xlu0 %335 }
  0xe3   :  { %20494 = vst [vmem:[#allocation144_spill] sm:$0xff] %v11569_v42  ;;  %20495 = vst [vmem:[#allocation145_spill] sm:$0xff] %v11571_v47 }
  0xe4   :  { %654 = vrot.lane.b32.xlu1 %v10540_v0, %s10502_s27  ;;  %652 = vrot.lane.b32.xlu0 %v10550_v2, %s10502_s27 }
  0xe6   :  { %v11577_v21 = vpop.permute.xlu1 %482  ;;  %v11579_v26 = vpop.permute.xlu0 %480 }
  0xe8   :  { %658 = vrot.lane.b32.xlu1 %v10565_v7, %s10502_s27  ;;  %656 = vrot.lane.b32.xlu0 %v10570_v8, %s10502_s27 }
  0xea   :  { %v11585_v42 = vpop.permute.xlu1 %486  ;;  %v11587_v47 = vpop.permute.xlu0 %484 }
  0xec   :  { %662 = vrot.lane.b32.xlu1 %v10588_v14, %s10502_s27  ;;  %660 = vrot.lane.b32.xlu0 %v10593_v15, %s10502_s27 }
  0xee   :  { %v11593_v0 = vpop.permute.xlu1 %490  ;;  %v11595_v2 = vpop.permute.xlu0 %488 }
  0xf0   :  { %666 = vrot.lane.b32.xlu1 %v10609_v19, %s10502_s27  ;;  %664 = vrot.lane.b32.xlu0 %v10614_v20, %s10502_s27 }
  0xf2   :  { %v11601_v3 = vpop.permute.xlu1 %494  ;;  %v11603_v38 = vpop.permute.xlu0 %492 }
  0xf4   :  { %670 = vrot.lane.b32.xlu1 %v10631_v24, %s10502_s27  ;;  %668 = vrot.lane.b32.xlu0 %v10636_v25, %s10502_s27 }
  0xf6   :  { %v11609_v31 = vpop.permute.xlu1 %498  ;;  %v11611_v57 = vpop.permute.xlu0 %496 }
  0xf8   :  { %674 = vrot.lane.b32.xlu1 %v10653_v29, %s10502_s27  ;;  %672 = vrot.lane.b32.xlu0 %v10658_v30, %s10502_s27  ;;  %v82_v29 = vld [vmem:[%s19649_s1 + $0x8] sm:$0xff] }
  0xf9   :  { %v10399_v58 = vpack.c.bf16 %v82_v29, %v81_v41 }
  0xfa   :  { %v11617_v36 = vpop.permute.xlu1 %502  ;;  %v11619_v28 = vpop.permute.xlu0 %500 }
  0xfb   :  { %10400 = vmatpush3.bf16.msra.mxu0 %v10399_v58  ;;  %10407 = vmatpush3.bf16.msra.mxu1 %v10399_v58 }
  0xfc   :  { %678 = vrot.lane.b32.xlu1 %v10675_v34, %s10502_s27  ;;  %676 = vrot.lane.b32.xlu0 %v10680_v35, %s10502_s27  ;;  %v20496_v34 = vld [vmem:[#allocation3_spill] sm:$0xff]  ;;  %v83_v35 = vld [vmem:[%s19649_s1 + $0x10] sm:$0xff] }
  0xfd   :  { %10401 = vmatprep.subr.bf16.mxu0 %v10503_v51  ;;  %v10402_v56 = vpack.c.bf16 %v84_v63, %v83_v35  ;;  %10405 = vmatprep.subr.bf16.mxu1 %v10503_v51  ;;  %v85_v63 = vld [vmem:[%s19649_s1 + $0x20] sm:$0xf] }
  0xfe   :  { %v11631_v53 = vpop.permute.xlu1 %506  ;;  %v11633_v46 = vpop.permute.xlu0 %504 }
  0xff   :  { %10403 = vmatpush3.bf16.msra.mxu0 %v10402_v56  ;;  %10408 = vmatpush3.bf16.msra.mxu1 %v10402_v56  ;;  %v20501_v56 = vld [vmem:[#allocation5_spill] sm:$0xff] }
 0x100   :  { %826 = vrot.lane.b32.xlu1 %v20496_v34, %s10504_s7  ;;  %680 = vrot.lane.b32.xlu0 %v10702_v40, %s10502_s27  ;;  %v20497_v40 = vld [vmem:[#allocation55_spill] sm:$0xff] }
 0x101   :  { %10249 = vmatprep.subr.mxu0 %v19807_v11  ;;  %10406 = vmatprep.subr.mxu1 %v19807_v11  ;;  %v20510_v11 = vld [vmem:[#allocation4_spill] sm:$0xff] }
 0x102   :  { %v11645_v41 = vpop.permute.xlu1 %510  ;;  %v11647_v29 = vpop.permute.xlu0 %508 }
 0x103   :  { %10250 = vmatpush3.msk.msra.mxu0 %vm4056_vm2, %v85_v63  ;;  %10409 = vmatpush3.msk.msra.mxu1 %vm4056_vm2, %v85_v63 }
 0x104   :  { %1172 = vrot.lane.b32.xlu1 %v10570_v8, %s10505_s12  ;;  %1000 = vrot.lane.b32.xlu0 %v20497_v40, %s10506_s13  ;;  %v20500_v8 = vld [vmem:[#allocation59_spill] sm:$0xff]  ;;  %v20504_v40 = vld [vmem:[#allocation54_spill] sm:$0xff] }
 0x106   :  { %v11653_v34 = vpop.permute.xlu1 %514  ;;  %v11655_v58 = vpop.permute.xlu0 %512 }
 0x107   :  { %20498 = vst [vmem:[#allocation3_spill] sm:$0xff] %v11653_v34  ;;  %20499 = vst [vmem:[#allocation55_spill] sm:$0xff] %v11655_v58 }
 0x108   :  { %1520 = vrot.lane.b32.xlu1 %v20500_v8, %s10508_s16  ;;  %1346 = vrot.lane.b32.xlu0 %v20501_v56, %s10509_s17 }
 0x10a   :  { %v11668_v51 = vpop.permute.xlu1 %518  ;;  %v11670_v35 = vpop.permute.xlu0 %516 }
 0x10b   :  { %20502 = vst [vmem:[#allocation59_spill] sm:$0xff] %v11668_v51  ;;  %20503 = vst [vmem:[#allocation5_spill] sm:$0xff] %v11670_v35  ;;  %v2204_v35 = vlaneseq }
 0x10c   :  { %1002 = vrot.lane.b32.xlu1 %v20504_v40, %s10506_s13  ;;  %828 = vrot.lane.b32.xlu0 %v20505_v61, %s10504_s7 }
 0x10e   :  { %v11678_v52 = vpop.permute.xlu1 %522  ;;  %v11680_v9 = vpop.permute.xlu0 %520 }
 0x10f   :  { %20506 = vst [vmem:[#allocation54_spill] sm:$0xff] %v11678_v52  ;;  %20507 = vst [vmem:[#allocation2_spill] sm:$0xff] %v11680_v9  ;;  %v20513_v52 = vld [vmem:[#allocation56_spill] sm:$0xff] }
 0x110   :  { %1174 = vrot.lane.b32.xlu1 %v10565_v7, %s10505_s12  ;;  %830 = vrot.lane.b32.xlu0 %v20501_v56, %s10504_s7 }
 0x112   :  { %v11686_v63 = vpop.permute.xlu1 %526  ;;  %v11688_v33 = vpop.permute.xlu0 %524 }
 0x113   :  { %20508 = vst [vmem:[#allocation146_spill] sm:$0xff] %v11686_v63  ;;  %20509 = vst [vmem:[#allocation147_spill] sm:$0xff] %v11688_v33  ;;  %v20516_v63 = vld [vmem:[#allocation7_spill] sm:$0xff]  ;;  %v20524_v33 = vld [vmem:[#allocation6_spill] sm:$0xff] }
 0x114   :  { %1348 = vrot.lane.b32.xlu1 %v20510_v11, %s10509_s17  ;;  %1004 = vrot.lane.b32.xlu0 %v20500_v8, %s10506_s13 }
 0x116   :  { %v11694_v61 = vpop.permute.xlu1 %530  ;;  %v11696_v40 = vpop.permute.xlu0 %528 }
 0x117   :  { %20511 = vst [vmem:[#allocation4_spill] sm:$0xff] %v11694_v61  ;;  %20512 = vst [vmem:[#allocation148_spill] sm:$0xff] %v11696_v40  ;;  %v20519_v40 = vld [vmem:[#allocation63_spill] sm:$0xff] }
 0x118   :  { %1522 = vrot.lane.b32.xlu1 %v20513_v52, %s10508_s16  ;;  %1176 = vrot.lane.b32.xlu0 %v10593_v15, %s10505_s12 }
 0x11a   :  { %v11702_v7 = vpop.permute.xlu1 %534  ;;  %v11704_v56 = vpop.permute.xlu0 %532 }
 0x11b   :  { %20514 = vst [vmem:[#allocation56_spill] sm:$0xff] %v11702_v7  ;;  %20515 = vst [vmem:[#allocation149_spill] sm:$0xff] %v11704_v56 }
 0x11c   :  { %832 = vrot.lane.b32.xlu1 %v20510_v11, %s10504_s7  ;;  %1350 = vrot.lane.b32.xlu0 %v20516_v63, %s10509_s17 }
 0x11e   :  { %v11710_v8 = vpop.permute.xlu1 %538  ;;  %v11712_v61 = vpop.permute.xlu0 %536 }
 0x11f   :  { %20517 = vst [vmem:[#allocation7_spill] sm:$0xff] %v11710_v8  ;;  %20518 = vst [vmem:[#allocation150_spill] sm:$0xff] %v11712_v61  ;;  %v10426_v8 = vld [vmem:[%s19648_s0] sm:$0xff]  ;;  %v2203_v61 = vunpack.c.0.s8 %v2202_v23 }
 0x120   :  { %1006 = vrot.lane.b32.xlu1 %v20513_v52, %s10506_s13  ;;  %1524 = vrot.lane.b32.xlu0 %v20519_v40, %s10508_s16  ;;  %v1689_v43 = vsel %vm1688_vm5, %v10426_v8, %v20560_v50  ;;  %v11905_v50 = vshrl.u32 %v2204_v35, 7 }
 0x122   :  { %v11718_v15 = vpop.permute.xlu1 %542  ;;  %v11720_v7 = vpop.permute.xlu0 %540 }
 0x123   :  { %20520 = vst [vmem:[#allocation63_spill] sm:$0xff] %v11718_v15  ;;  %20521 = vst [vmem:[#allocation151_spill] sm:$0xff] %v11720_v7  ;;  %v20527_v15 = vld [vmem:[#allocation60_spill] sm:$0xff] }
 0x124   :  { %1178 = vrot.lane.b32.xlu1 %v10588_v14, %s10505_s12  ;;  %834 = vrot.lane.b32.xlu0 %v20516_v63, %s10504_s7 }
 0x126   :  { %v11726_v11 = vpop.permute.xlu1 %546  ;;  %v11728_v56 = vpop.permute.xlu0 %544 }
 0x127   :  { %20522 = vst [vmem:[#allocation152_spill] sm:$0xff] %v11726_v11  ;;  %20523 = vst [vmem:[#allocation153_spill] sm:$0xff] %v11728_v56  ;;  %v20530_v11 = vld [vmem:[#allocation9_spill] sm:$0xff]  ;;  %v20558_v56 = vld [vmem:[#allocation72_spill] sm:$0xff] }
 0x128   :  { %1352 = vrot.lane.b32.xlu1 %v20524_v33, %s10509_s17  ;;  %1008 = vrot.lane.b32.xlu0 %v20519_v40, %s10506_s13 }
 0x12a   :  { %v11734_v52 = vpop.permute.xlu1 %550  ;;  %v11736_v9 = vpop.permute.xlu0 %548 }
 0x12b   :  { %20525 = vst [vmem:[#allocation6_spill] sm:$0xff] %v11734_v52  ;;  %20526 = vst [vmem:[#allocation154_spill] sm:$0xff] %v11736_v9  ;;  %v20533_v9 = vld [vmem:[#allocation67_spill] sm:$0xff] }
 0x12c   :  { %1526 = vrot.lane.b32.xlu1 %v20527_v15, %s10508_s16  ;;  %1180 = vrot.lane.b32.xlu0 %v10614_v20, %s10505_s12 }
 0x12e   :  { %v11742_v14 = vpop.permute.xlu1 %554  ;;  %v11744_v63 = vpop.permute.xlu0 %552 }
 0x12f   :  { %20528 = vst [vmem:[#allocation60_spill] sm:$0xff] %v11742_v14  ;;  %20529 = vst [vmem:[#allocation155_spill] sm:$0xff] %v11744_v63  ;;  %v20536_v63 = vld [vmem:[#allocation8_spill] sm:$0xff] }
 0x130   :  { %836 = vrot.lane.b32.xlu1 %v20524_v33, %s10504_s7  ;;  %1354 = vrot.lane.b32.xlu0 %v20530_v11, %s10509_s17 }
 0x132   :  { %v11750_v40 = vpop.permute.xlu1 %558  ;;  %v11752_v52 = vpop.permute.xlu0 %556 }
 0x133   :  { %20531 = vst [vmem:[#allocation9_spill] sm:$0xff] %v11750_v40  ;;  %20532 = vst [vmem:[#allocation156_spill] sm:$0xff] %v11752_v52  ;;  %v20539_v52 = vld [vmem:[#allocation64_spill] sm:$0xff] }
 0x134   :  { %1010 = vrot.lane.b32.xlu1 %v20527_v15, %s10506_s13  ;;  %1528 = vrot.lane.b32.xlu0 %v20533_v9, %s10508_s16 }
 0x136   :  { %v11758_v20 = vpop.permute.xlu1 %562  ;;  %v11760_v14 = vpop.permute.xlu0 %560 }
 0x137   :  { %20534 = vst [vmem:[#allocation67_spill] sm:$0xff] %v11758_v20  ;;  %20535 = vst [vmem:[#allocation157_spill] sm:$0xff] %v11760_v14 }
 0x138   :  { %1356 = vrot.lane.b32.xlu1 %v20536_v63, %s10509_s17  ;;  %1182 = vrot.lane.b32.xlu0 %v10609_v19, %s10505_s12 }
 0x13a   :  { %v11766_v33 = vpop.permute.xlu1 %566  ;;  %v11768_v40 = vpop.permute.xlu0 %564 }
 0x13b   :  { %20537 = vst [vmem:[#allocation8_spill] sm:$0xff] %v11766_v33  ;;  %20538 = vst [vmem:[#allocation158_spill] sm:$0xff] %v11768_v40  ;;  %v20544_v40 = vld [vmem:[#allocation11_spill] sm:$0xff] }
 0x13c   :  { %1530 = vrot.lane.b32.xlu1 %v20539_v52, %s10508_s16  ;;  %838 = vrot.lane.b32.xlu0 %v20530_v11, %s10504_s7 }
 0x13e   :  { %v11774_v15 = vpop.permute.xlu1 %570  ;;  %v11776_v20 = vpop.permute.xlu0 %568 }
 0x13f   :  { %20540 = vst [vmem:[#allocation64_spill] sm:$0xff] %v11774_v15  ;;  %20541 = vst [vmem:[#allocation159_spill] sm:$0xff] %v11776_v20 }
 0x140   :  { %1184 = vrot.lane.b32.xlu1 %v10636_v25, %s10505_s12  ;;  %1012 = vrot.lane.b32.xlu0 %v20533_v9, %s10506_s13  ;;  %v20547_v25 = vld [vmem:[#allocation71_spill] sm:$0xff] }
 0x142   :  { %v11782_v19 = vpop.permute.xlu1 %574  ;;  %v11784_v33 = vpop.permute.xlu0 %572 }
 0x143   :  { %20542 = vst [vmem:[#allocation160_spill] sm:$0xff] %v11782_v19  ;;  %20543 = vst [vmem:[#allocation161_spill] sm:$0xff] %v11784_v33 }
 0x144   :  { %840 = vrot.lane.b32.xlu1 %v20536_v63, %s10504_s7  ;;  %1358 = vrot.lane.b32.xlu0 %v20544_v40, %s10509_s17 }
 0x146   :  { %v11790_v11 = vpop.permute.xlu1 %578  ;;  %v11792_v15 = vpop.permute.xlu0 %576 }
 0x147   :  { %20545 = vst [vmem:[#allocation11_spill] sm:$0xff] %v11790_v11  ;;  %20546 = vst [vmem:[#allocation162_spill] sm:$0xff] %v11792_v15  ;;  %v20552_v15 = vld [vmem:[#allocation10_spill] sm:$0xff] }
 0x148   :  { %1014 = vrot.lane.b32.xlu1 %v20539_v52, %s10506_s13  ;;  %1532 = vrot.lane.b32.xlu0 %v20547_v25, %s10508_s16 }
 0x14a   :  { %v11798_v9 = vpop.permute.xlu1 %582  ;;  %v11800_v19 = vpop.permute.xlu0 %580 }
 0x14b   :  { %20548 = vst [vmem:[#allocation71_spill] sm:$0xff] %v11798_v9  ;;  %20549 = vst [vmem:[#allocation163_spill] sm:$0xff] %v11800_v19  ;;  %v20555_v19 = vld [vmem:[#allocation68_spill] sm:$0xff] }
 0x14c   :  { %1186 = vrot.lane.b32.xlu1 %v10631_v24, %s10505_s12  ;;  %842 = vrot.lane.b32.xlu0 %v20544_v40, %s10504_s7  ;;  %20561 = vst [vmem:[#allocation68_spill] sm:$0xff] %v11905_v50 }
 0x14e   :  { %v11806_v63 = vpop.permute.xlu1 %586  ;;  %v11808_v11 = vpop.permute.xlu0 %584 }
 0x14f   :  { %20550 = vst [vmem:[#allocation164_spill] sm:$0xff] %v11806_v63  ;;  %20551 = vst [vmem:[#allocation165_spill] sm:$0xff] %v11808_v11  ;;  %v20556_v63 = vld [vmem:[#allocation13_spill] sm:$0xff]  ;;  %v11843_v11 = vld [vmem:[%s19648_s0 + $0x68] sm:$0xff] }
 0x150   :  { %1360 = vrot.lane.b32.xlu1 %v20552_v15, %s10509_s17  ;;  %1016 = vrot.lane.b32.xlu0 %v20547_v25, %s10506_s13 }
 0x152   :  { %v11814_v52 = vpop.permute.xlu1 %590  ;;  %v11816_v9 = vpop.permute.xlu0 %588 }
 0x153   :  { %20553 = vst [vmem:[#allocation10_spill] sm:$0xff] %v11814_v52  ;;  %20554 = vst [vmem:[#allocation166_spill] sm:$0xff] %v11816_v9 }
 0x154   :  { %1534 = vrot.lane.b32.xlu1 %v20555_v19, %s10508_s16  ;;  %1188 = vrot.lane.b32.xlu0 %v10658_v30, %s10505_s12 }
 0x156   :  { %v11822_v24 = vpop.permute.xlu1 %654  ;;  %v653_v40 = vpop.permute.xlu0 %652 }
 0x158   :  { %1536 = vrot.lane.b32.xlu1 %v11230_v1, %s10508_s16  ;;  %1362 = vrot.lane.b32.xlu0 %v20556_v63, %s10509_s17 }
 0x15a   :  { %v11828_v25 = vpop.permute.xlu1 %658  ;;  %v11830_v52 = vpop.permute.xlu0 %656 }
 0x15c   :  { %1018 = vrot.lane.b32.xlu1 %v20555_v19, %s10506_s13  ;;  %844 = vrot.lane.b32.xlu0 %v20552_v15, %s10504_s7  ;;  %v20557_v15 = vld [vmem:[#allocation12_spill] sm:$0xff] }
 0x15e   :  { %v11836_v30 = vpop.permute.xlu1 %662  ;;  %v11838_v9 = vpop.permute.xlu0 %660 }
 0x160   :  { %1190 = vrot.lane.b32.xlu1 %v11843_v11, %s10505_s12  ;;  %846 = vrot.lane.b32.xlu0 %v20556_v63, %s10504_s7  ;;  %v11866_v63 = vld [vmem:[%s19648_s0 + $0x70] sm:$0xff] }
 0x162   :  { %v11849_v33 = vpop.permute.xlu1 %666  ;;  %v11851_v19 = vpop.permute.xlu0 %664 }
 0x164   :  { %1364 = vrot.lane.b32.xlu1 %v20557_v15, %s10509_s17  ;;  %1020 = vrot.lane.b32.xlu0 %v11230_v1, %s10506_s13  ;;  %v20559_v1 = vld [vmem:[#allocation15_spill] sm:$0xff] }
 0x166   :  { %v11857_v20 = vpop.permute.xlu1 %670  ;;  %v11859_v14 = vpop.permute.xlu0 %668 }
 0x168   :  { %1538 = vrot.lane.b32.xlu1 %v20558_v56, %s10508_s16  ;;  %1192 = vrot.lane.b32.xlu0 %v11866_v63, %s10505_s12 }
 0x16a   :  { %v11870_v51 = vpop.permute.xlu1 %674  ;;  %v11872_v13 = vpop.permute.xlu0 %672 }
 0x16c   :  { %848 = vrot.lane.b32.xlu1 %v20557_v15, %s10504_s7  ;;  %1366 = vrot.lane.b32.xlu0 %v20559_v1, %s10509_s17 }
 0x16e   :  { %v11878_v49 = vpop.permute.xlu1 %678  ;;  %v11880_v7 = vpop.permute.xlu0 %676 }
 0x170   :  { %1022 = vrot.lane.b32.xlu1 %v20558_v56, %s10506_s13  ;;  %1540 = vrot.lane.b32.xlu0 %v11246_v32, %s10508_s16  ;;  %v1746_v56 = vsel %vm1745_vm4, %v1689_v43, %v11579_v26 }
 0x171   :  { %v1803_v4 = vsel %vm1802_vm6, %v1746_v56, %v653_v40  ;;  %v11914_v40 = vsub.s32 %v2203_v61, %v11905_v50  ;;  %v20566_v50 = vld [vmem:[#allocation58_spill] sm:$0xff] }
 0x172   :  { %v827_v15 = vpop.permute.xlu1 %826  ;;  %v11886_v34 = vpop.permute.xlu0 %680 }
 0x173   :  { %v1860_v8 = vsel %vm1859_vm7, %v1803_v4, %v827_v15  ;;  %20563 = vst [vmem:[#allocation13_spill] sm:$0xff] %v11914_v40 }
 0x174   :  { %1194 = vrot.lane.b32.xlu1 %v11898_v59, %s10505_s12  ;;  %850 = vrot.lane.b32.xlu0 %v20559_v1, %s10504_s7 }
 0x176   :  { %v1173_v43 = vpop.permute.xlu1 %1172  ;;  %v1001_v26 = vpop.permute.xlu0 %1000 }
 0x177   :  { %v1917_v48 = vsel %vm1916_vm8, %v1860_v8, %v1001_v26 }
 0x178   :  { %1368 = vrot.lane.b32.xlu1 %v20562_v44, %s10509_s17  ;;  %1024 = vrot.lane.b32.xlu0 %v11246_v32, %s10506_s13  ;;  %v1974_v35 = vsel %vm1973_vm9, %v1917_v48, %v1173_v43  ;;  %v11924_v32 = vld [vmem:[%s19648_s0 + $0x80] sm:$0xff] }
 0x179   :  { %20564 = vst [vmem:[#allocation12_spill] sm:$0xff] %v11924_v32 }
 0x17a   :  { %v1521_v23 = vpop.permute.xlu1 %1520  ;;  %v1347_v4 = vpop.permute.xlu0 %1346 }
 0x17b   :  { %v2031_v1 = vsel %vm2030_vm10, %v1974_v35, %v1347_v4 }
 0x17c   :  { %v2088_v15 = vsel %vm2087_vm11, %v2031_v1, %v1521_v23  ;;  %1542 = vrot.lane.b32.xlu1 %v11233_v6, %s10508_s16  ;;  %1196 = vrot.lane.b32.xlu0 %v11924_v32, %s10505_s12  ;;  %v20565_v23 = vld [vmem:[#allocation17_spill] sm:$0xff]  ;;  %v10429_v1 = vld [vmem:[%s19648_s0 + $0x8] sm:$0xff] }
 0x17d   :  { %v2200_v61 = vcombine.high %v2088_v15, %v2088_v15  ;;  %v2207_v56 = vrot.slane %v2088_v15, %v11914_v40  ;;  %v1690_v15 = vsel %vm1688_vm5, %v10429_v1, %v20566_v50 }
 0x17e   :  { %v1003_v48 = vpop.permute.xlu1 %1002  ;;  %v829_v8 = vpop.permute.xlu0 %828 }
 0x17f   :  { %v2214_v43 = vrot.slane %v2200_v61, %v11914_v40  ;;  %v2215_v26 = vcombine.high %v2207_v56, %v2207_v56  ;;  %v1747_v61 = vsel %vm1745_vm4, %v1690_v15, %v11577_v21 }
 0x180   :  { %852 = vrot.lane.b32.xlu1 %v20562_v44, %s10504_s7  ;;  %1370 = vrot.lane.b32.xlu0 %v20565_v23, %s10509_s17  ;;  %v1804_v44 = vsel %vm1802_vm6, %v1747_v61, %v11822_v24  ;;  %v20567_v24 = vld [vmem:[#allocation16_spill] sm:$0xff] }
 0x181   :  { %v2216_v35 = vcombine.high %v2214_v43, %v2214_v43  ;;  %v3124_v4 = vcombine.low %v2207_v56, %v2215_v26  ;;  %v1861_v26 = vsel %vm1859_vm7, %v1804_v44, %v829_v8  ;;  %v10431_v61 = vld [vmem:[%s19648_s0 + $0x10] sm:$0xff]  ;;  %v20569_v44 = vld [vmem:[#allocation61_spill] sm:$0xff] }
 0x182   :  { %v1175_v62 = vpop.permute.xlu1 %1174  ;;  %v831_v58 = vpop.permute.xlu0 %830 }
 0x183   :  { %v3125_v32 = vcombine.low %v2214_v43, %v2216_v35  ;;  %v3132_v56 = vrot.slane %v3124_v4, %v11914_v40  ;;  %v1918_v43 = vsel %vm1916_vm8, %v1861_v26, %v1003_v48  ;;  %v20568_v48 = vmov 0.0  }
 0x184   :  { %1026 = vrot.lane.b32.xlu1 %v11233_v6, %s10506_s13  ;;  %1544 = vrot.lane.b32.xlu0 %v11262_v27, %s10508_s16  ;;  %v11956_v6 = vld [vmem:[%s19648_s0 + $0x88] sm:$0xff]  ;;  %v1975_v8 = vsel %vm1973_vm9, %v1918_v43, %v1175_v62 }
 0x185   :  { %v3139_v50 = vrot.slane %v3125_v32, %v11914_v40 }
 0x186   :  { %v1349_v1 = vpop.permute.xlu1 %1348  ;;  %v1005_v45 = vpop.permute.xlu0 %1004 }
 0x187   :  { %v3140_v21 = vcombine.low %v3132_v56, %v3139_v50  ;;  %v2032_v32 = vsel %vm2030_vm10, %v1975_v8, %v1349_v1  ;;  %v1691_v56 = vsel %vm1688_vm5, %v10431_v61, %v20569_v44  ;;  %v11985_v61 = vld [vmem:[%s19648_s0 + $0x90] sm:$0xff] }
 0x188   :  { %1372 = vrot.lane.b32.xlu1 %v20567_v24, %s10509_s17  ;;  %1198 = vrot.lane.b32.xlu0 %v11956_v6, %s10505_s12  ;;  %v1748_v26 = vsel %vm1745_vm4, %v1691_v56, %v11587_v47 }
 0x189   :  { %10252 = vmatmul.mubr.msk.f32.vlgmr.msra.gmra.mrb[0].mxu0 %vm3957_vm12, %v3140_v21  ;;  %v1805_v50 = vsel %vm1802_vm6, %v1748_v26, %v11830_v52  ;;  %v20570_v26 = vld [vmem:[#allocation19_spill] sm:$0xff] }
 0x18a   :  { %v1523_v35 = vpop.permute.xlu1 %1522  ;;  %v1177_v4 = vpop.permute.xlu0 %1176  ;;  %10254 = vmatprep.mubr.msk.f32.mxu0 %vm10510_vm3, %v20568_v48  ;;  %v1862_v43 = vsel %vm1859_vm7, %v1805_v50, %v831_v58 }
 0x18b   :  { %v2089_v15 = vsel %vm2087_vm11, %v2032_v32, %v1523_v35  ;;  %v1919_v8 = vsel %vm1916_vm8, %v1862_v43, %v1005_v45  ;;  %v20571_v43 = vld [vmem:[#allocation57_spill] sm:$0xff] }
 0x18c   :  { %v2224_v62 = vrot.slane %v2089_v15, %v11914_v40  ;;  %1546 = vrot.lane.b32.xlu1 %v11249_v22, %s10508_s16  ;;  %854 = vrot.lane.b32.xlu0 %v20565_v23, %s10504_s7  ;;  %v2217_v32 = vcombine.high %v2089_v15, %v2089_v15  ;;  %v1976_v47 = vsel %vm1973_vm9, %v1919_v8, %v1177_v4 }
 0x18e   :  { %v833_v1 = vpop.permute.xlu1 %832  ;;  %v1351_v21 = vpop.permute.xlu0 %1350  ;;  %v2232_v35 = vcombine.high %v2224_v62, %v2224_v62  ;;  %v2231_v15 = vrot.slane %v2217_v32, %v11914_v40 }
 0x18f   :  { %v2033_v52 = vsel %vm2030_vm10, %v1976_v47, %v1351_v21  ;;  %v10433_v21 = vld [vmem:[%s19648_s0 + $0x18] sm:$0xff] }
 0x190   :  { %1200 = vrot.lane.b32.xlu1 %v11985_v61, %s10505_s12  ;;  %1028 = vrot.lane.b32.xlu0 %v11262_v27, %s10506_s13  ;;  %v3141_v44 = vcombine.low %v2224_v62, %v2232_v35  ;;  %v1692_v8 = vsel %vm1688_vm5, %v10433_v21, %v20571_v43 }
 0x191   :  { %v1749_v47 = vsel %vm1745_vm4, %v1692_v8, %v11585_v42 }
 0x192   :  { %v1007_v58 = vpop.permute.xlu1 %1006  ;;  %v1525_v23 = vpop.permute.xlu0 %1524  ;;  %v3149_v62 = vrot.slane %v3141_v44, %v11914_v40 }
 0x193   :  { %v2090_v45 = vsel %vm2087_vm11, %v2033_v52, %v1525_v23  ;;  %v1806_v52 = vsel %vm1802_vm6, %v1749_v47, %v11828_v25 }
 0x194   :  { %v2240_v56 = vrot.slane %v2090_v45, %v11914_v40  ;;  %1374 = vrot.lane.b32.xlu1 %v20570_v26, %s10509_s17  ;;  %682 = vrot.lane.b32.xlu0 %v11956_v6, %s10502_s27  ;;  %v2233_v32 = vcombine.high %v2090_v45, %v2090_v45  ;;  %v1863_v44 = vsel %vm1859_vm7, %v1806_v52, %v833_v1  ;;  %v10434_v1 = vld [vmem:[%s19648_s0 + $0x20] sm:$0xff] }
 0x195   :  { %v1920_v45 = vsel %vm1916_vm8, %v1863_v44, %v1007_v58  ;;  %v20572_v58 = vld [vmem:[#allocation66_spill] sm:$0xff] }
 0x196   :  { %v3142_v27 = vcombine.low %v2231_v15, %v2240_v56  ;;  %v1179_v50 = vpop.permute.xlu1 %1178  ;;  %v835_v4 = vpop.permute.xlu0 %834  ;;  %v2248_v43 = vcombine.high %v2240_v56, %v2240_v56 }
 0x197   :  { %v1977_v42 = vsel %vm1973_vm9, %v1920_v45, %v1179_v50 }
 0x198   :  { %v3156_v35 = vrot.slane %v3142_v27, %v11914_v40  ;;  %1548 = vrot.lane.b32.xlu1 %v11278_v12, %s10508_s16  ;;  %856 = vrot.lane.b32.xlu0 %v20567_v24, %s10504_s7  ;;  %v2247_v27 = vrot.slane %v2233_v32, %v11914_v40 }
 0x19a   :  { %v1353_v23 = vpop.permute.xlu1 %1352  ;;  %v1009_v15 = vpop.permute.xlu0 %1008  ;;  %v3157_v21 = vcombine.low %v3149_v62, %v3156_v35  ;;  %v3158_v62 = vcombine.low %v2248_v43, %v2247_v27  ;;  %v2249_v50 = vcombine.high %v2247_v27, %v2247_v27  ;;  %v12037_v35 = vld [vmem:[%s19648_s0 + $0x98] sm:$0xff] }
 0x19b   :  { %v2034_v25 = vsel %vm2030_vm10, %v1977_v42, %v1353_v23 }
 0x19c   :  { %1030 = vrot.lane.b32.xlu1 %v11249_v22, %s10506_s13  ;;  %684 = vrot.lane.b32.xlu0 %v11985_v61, %s10502_s27  ;;  %v1693_v22 = vsel %vm1688_vm5, %v10434_v1, %v20572_v58  ;;  %v3166_v43 = vrot.slane %v3158_v62, %v11914_v40 }
 0x19d   :  { %10255 = vmatmul.mubr.msk.f32.gmra.mrb[2].mxu0 %vm3957_vm12, %v3157_v21  ;;  %v1750_v47 = vsel %vm1745_vm4, %v1693_v22, %v11595_v2 }
 0x19e   :  { %v1527_v24 = vpop.permute.xlu1 %1526  ;;  %v1181_v8 = vpop.permute.xlu0 %1180  ;;  %10257 = vmatprep.mubr.msk.f32.mxu0 %vm10510_vm3, %v20568_v48  ;;  %v1807_v52 = vsel %vm1802_vm6, %v1750_v47, %v11838_v9  ;;  %v10436_v9 = vld [vmem:[%s19648_s0 + $0x28] sm:$0xff] }
 0x19f   :  { %v2091_v56 = vsel %vm2087_vm11, %v2034_v25, %v1527_v24  ;;  %v1864_v45 = vsel %vm1859_vm7, %v1807_v52, %v835_v4  ;;  %v20574_v4 = vld [vmem:[#allocation65_spill] sm:$0xff] }
 0x1a0   :  { %v2257_v32 = vrot.slane %v2091_v56, %v11914_v40  ;;  %1202 = vrot.lane.b32.xlu1 %v12037_v35, %s10505_s12  ;;  %858 = vrot.lane.b32.xlu0 %v20570_v26, %s10504_s7  ;;  %v2250_v27 = vcombine.high %v2091_v56, %v2091_v56  ;;  %v1921_v42 = vsel %vm1916_vm8, %v1864_v45, %v1009_v15  ;;  %v20573_v26 = vld [vmem:[#allocation18_spill] sm:$0xff] }
 0x1a1   :  { %v1978_v2 = vsel %vm1973_vm9, %v1921_v42, %v1181_v8  ;;  %v1694_v24 = vsel %vm1688_vm5, %v10436_v9, %v20574_v4 }
 0x1a2   :  { %v3159_v23 = vcombine.low %v2249_v50, %v2257_v32  ;;  %v837_v21 = vpop.permute.xlu1 %836  ;;  %v1355_v44 = vpop.permute.xlu0 %1354  ;;  %v1751_v56 = vsel %vm1745_vm4, %v1694_v24, %v11593_v0  ;;  %v2264_v62 = vrot.slane %v2250_v27, %v11914_v40 }
 0x1a3   :  { %v2035_v1 = vsel %vm2030_vm10, %v1978_v2, %v1355_v44  ;;  %v1808_v50 = vsel %vm1802_vm6, %v1751_v56, %v11836_v30  ;;  %v20575_v2 = vld [vmem:[#allocation21_spill] sm:$0xff] }
 0x1a4   :  { %v3173_v25 = vrot.slane %v3159_v23, %v11914_v40  ;;  %1376 = vrot.lane.b32.xlu1 %v20573_v26, %s10509_s17  ;;  %1032 = vrot.lane.b32.xlu0 %v11278_v12, %s10506_s13  ;;  %v2265_v12 = vcombine.high %v2257_v32, %v2257_v32  ;;  %v12074_v23 = vld [vmem:[%s19648_s0 + $0xa0] sm:$0xff]  ;;  %v1865_v0 = vsel %vm1859_vm7, %v1808_v50, %v837_v21  ;;  %v12090_v21 = vld [vmem:[%s19648_s0 + $0x110] sm:$0xff] }
 0x1a5   :  { %v20577_v50 = vld [vmem:[#allocation70_spill] sm:$0xff] }
 0x1a6   :  { %v1011_v15 = vpop.permute.xlu1 %1010  ;;  %v1529_v58 = vpop.permute.xlu0 %1528  ;;  %v3174_v22 = vcombine.low %v3166_v43, %v3173_v25  ;;  %v3175_v43 = vcombine.low %v2265_v12, %v2264_v62  ;;  %v20576_v62 = vld [vmem:[#allocation29_spill] sm:$0xff] }
 0x1a7   :  { %v2092_v8 = vsel %vm2087_vm11, %v2035_v1, %v1529_v58  ;;  %v1922_v30 = vsel %vm1916_vm8, %v1865_v0, %v1011_v15 }
 0x1a8   :  { %v2266_v47 = vcombine.high %v2092_v8, %v2092_v8  ;;  %v2273_v52 = vrot.slane %v2092_v8, %v11914_v40  ;;  %1550 = vrot.lane.b32.xlu1 %v11265_v16, %s10508_s16  ;;  %1204 = vrot.lane.b32.xlu0 %v12074_v23, %s10505_s12  ;;  %v3183_v58 = vrot.slane %v3175_v43, %v11914_v40  ;;  %v10439_v8 = vld [vmem:[%s19648_s0 + $0x30] sm:$0xff] }
 0x1a9   :  { %10258 = vmatmul.mubr.msk.f32.gmra.mrb[4].mxu0 %vm3957_vm12, %v3174_v22 }
 0x1aa   :  { %v2280_v32 = vrot.slane %v2266_v47, %v11914_v40  ;;  %v2281_v44 = vcombine.high %v2273_v52, %v2273_v52  ;;  %v1357_v45 = vpop.permute.xlu1 %1356  ;;  %v1183_v27 = vpop.permute.xlu0 %1182  ;;  %10260 = vmatprep.mubr.msk.f32.mxu0 %vm10510_vm3, %v20568_v48  ;;  %v1695_v47 = vsel %vm1688_vm5, %v10439_v8, %v20577_v50  ;;  %v20578_v8 = vld [vmem:[#allocation28_spill] sm:$0xff] }
 0x1ab   :  { %v1979_v42 = vsel %vm1973_vm9, %v1922_v30, %v1183_v27 }
 0x1ac   :  { %v3176_v25 = vcombine.low %v2273_v52, %v2281_v44  ;;  %1378 = vrot.lane.b32.xlu1 %v20575_v2, %s10509_s17  ;;  %708 = vrot.lane.b32.xlu0 %v12090_v21, %s10502_s27  ;;  %v2282_v9 = vcombine.high %v2280_v32, %v2280_v32  ;;  %v2036_v1 = vsel %vm2030_vm10, %v1979_v42, %v1357_v45  ;;  %v10440_v42 = vld [vmem:[%s19648_s0 + $0x118] sm:$0xff] }
 0x1ad   :  { %v1752_v45 = vsel %vm1745_vm4, %v1695_v47, %v11603_v38 }
 0x1ae   :  { %v3190_v4 = vrot.slane %v3176_v25, %v11914_v40  ;;  %v1531_v24 = vpop.permute.xlu1 %1530  ;;  %v839_v15 = vpop.permute.xlu0 %838  ;;  %v3192_v52 = vcombine.low %v2280_v32, %v2282_v9  ;;  %v1809_v27 = vsel %vm1802_vm6, %v1752_v45, %v11851_v19  ;;  %v20579_v45 = vld [vmem:[#allocation69_spill] sm:$0xff] }
 0x1af   :  { %v2093_v22 = vsel %vm2087_vm11, %v2036_v1, %v1531_v24  ;;  %v1866_v32 = vsel %vm1859_vm7, %v1809_v27, %v839_v15 }
 0x1b0   :  { %v2290_v56 = vrot.slane %v2093_v22, %v11914_v40  ;;  %1552 = vrot.lane.b32.xlu1 %v11294_v37, %s10508_s16  ;;  %882 = vrot.lane.b32.xlu0 %v20576_v62, %s10504_s7  ;;  %v3191_v12 = vcombine.low %v3183_v58, %v3190_v4  ;;  %v3200_v38 = vrot.slane %v3192_v52, %v11914_v40 }
 0x1b1   :  { %v2283_v24 = vcombine.high %v2093_v22, %v2093_v22 }
 0x1b2   :  { %v2298_v0 = vcombine.high %v2290_v56, %v2290_v56  ;;  %v1185_v30 = vpop.permute.xlu1 %1184  ;;  %v1013_v44 = vpop.permute.xlu0 %1012  ;;  %10261 = vmatmul.mubr.msk.f32.gmra.mrb[6].mxu0 %vm3957_vm12, %v3191_v12 }
 0x1b3   :  { %10263 = vmatprep.mubr.msk.f32.mxu0 %vm10510_vm3, %v20568_v48  ;;  %v1923_v19 = vsel %vm1916_vm8, %v1866_v32, %v1013_v44  ;;  %v2297_v22 = vrot.slane %v2283_v24, %v11914_v40  ;;  %v10442_v44 = vld [vmem:[%s19648_s0 + $0x38] sm:$0xff] }
 0x1b4   :  { %v3193_v43 = vcombine.low %v2290_v56, %v2298_v0  ;;  %710 = vrot.lane.b32.xlu1 %v10440_v42, %s10502_s27  ;;  %686 = vrot.lane.b32.xlu0 %v12037_v35, %s10502_s27  ;;  %v1980_v1 = vsel %vm1973_vm9, %v1923_v19, %v1185_v30  ;;  %v1696_v27 = vsel %vm1688_vm5, %v10442_v44, %v20579_v45 }
 0x1b5   :  { %v1753_v42 = vsel %vm1745_vm4, %v1696_v27, %v11601_v3 }
 0x1b6   :  { %v3207_v25 = vrot.slane %v3193_v43, %v11914_v40  ;;  %v841_v9 = vpop.permute.xlu1 %840  ;;  %v1359_v4 = vpop.permute.xlu0 %1358  ;;  %v1810_v32 = vsel %vm1802_vm6, %v1753_v42, %v11849_v33 }
 0x1b7   :  { %v2037_v15 = vsel %vm2030_vm10, %v1980_v1, %v1359_v4  ;;  %v1867_v24 = vsel %vm1859_vm7, %v1810_v32, %v841_v9  ;;  %v20581_v1 = vld [vmem:[#allocation31_spill] sm:$0xff] }
 0x1b8   :  { %860 = vrot.lane.b32.xlu1 %v20573_v26, %s10504_s7  ;;  %1056 = vrot.lane.b32.xlu0 %v11367_v39, %s10506_s13  ;;  %v3208_v35 = vcombine.low %v3200_v38, %v3207_v25  ;;  %v12140_v39 = vld [vmem:[%s19648_s0 + $0x120] sm:$0xff] }
 0x1ba   :  { %v1015_v58 = vpop.permute.xlu1 %1014  ;;  %10264 = vmatmul.mubr.msk.f32.gmra.mrb[8].mxu0 %vm3957_vm12, %v3208_v35  ;;  %v1533_v56 = vpop.permute.xlu0 %1532  ;;  %v20580_v35 = vld [vmem:[#allocation74_spill] sm:$0xff] }
 0x1bb   :  { %v2094_v62 = vsel %vm2087_vm11, %v2037_v15, %v1533_v56  ;;  %10266 = vmatprep.mubr.msk.f32.mxu0 %vm10510_vm3, %v20568_v48  ;;  %v1924_v3 = vsel %vm1916_vm8, %v1867_v24, %v1015_v58 }
 0x1bc   :  { %v2299_v26 = vcombine.high %v2094_v62, %v2094_v62  ;;  %v2306_v12 = vrot.slane %v2094_v62, %v11914_v40  ;;  %1228 = vrot.lane.b32.xlu1 %v12140_v39, %s10505_s12  ;;  %884 = vrot.lane.b32.xlu0 %v20578_v8, %s10504_s7 }
 0x1be   :  { %v2313_v50 = vrot.slane %v2299_v26, %v11914_v40  ;;  %v2314_v47 = vcombine.high %v2306_v12, %v2306_v12  ;;  %v3209_v52 = vcombine.low %v2297_v22, %v2306_v12  ;;  %v1187_v0 = vpop.permute.xlu1 %1186  ;;  %v843_v30 = vpop.permute.xlu0 %842 }
 0x1bf   :  { %v1981_v9 = vsel %vm1973_vm9, %v1924_v3, %v1187_v0 }
 0x1c0   :  { %v3210_v43 = vcombine.low %v2314_v47, %v2313_v50  ;;  %1034 = vrot.lane.b32.xlu1 %v11265_v16, %s10506_s13  ;;  %688 = vrot.lane.b32.xlu0 %v12074_v23, %s10502_s27  ;;  %v3217_v38 = vrot.slane %v3209_v52, %v11914_v40  ;;  %v10443_v16 = vld [vmem:[%s19648_s0 + $0x40] sm:$0xff] }
 0x1c1   :  { %v1697_v23 = vsel %vm1688_vm5, %v10443_v16, %v20580_v35 }
 0x1c2   :  { %v3224_v25 = vrot.slane %v3210_v43, %v11914_v40  ;;  %v1361_v19 = vpop.permute.xlu1 %1360  ;;  %v1017_v4 = vpop.permute.xlu0 %1016  ;;  %v1754_v15 = vsel %vm1745_vm4, %v1697_v23, %v11611_v57 }
 0x1c3   :  { %v1811_v56 = vsel %vm1802_vm6, %v1754_v15, %v11859_v14  ;;  %v2038_v62 = vsel %vm2030_vm10, %v1981_v9, %v1361_v19  ;;  %v12188_v14 = vld [vmem:[%s19648_s0 + $0xa8] sm:$0xff]  ;;  %v20582_v9 = vld [vmem:[#allocation73_spill] sm:$0xff] }
 0x1c4   :  { %1402 = vrot.lane.b32.xlu1 %v20581_v1, %s10509_s17  ;;  %1058 = vrot.lane.b32.xlu0 %v11356_v55, %s10506_s13  ;;  %v3225_v33 = vcombine.low %v3217_v38, %v3224_v25  ;;  %v1868_v26 = vsel %vm1859_vm7, %v1811_v56, %v843_v30  ;;  %v2315_v55 = vcombine.high %v2313_v50, %v2313_v50  ;;  %v10446_v15 = vld [vmem:[%s19648_s0 + $0x48] sm:$0xff] }
 0x1c5   :  { %v1925_v47 = vsel %vm1916_vm8, %v1868_v26, %v1017_v4  ;;  %v1698_v56 = vsel %vm1688_vm5, %v10446_v15, %v20582_v9  ;;  %v20583_v26 = vld [vmem:[#allocation30_spill] sm:$0xff] }
 0x1c6   :  { %v1535_v22 = vpop.permute.xlu1 %1534  ;;  %10267 = vmatmul.mubr.msk.f32.gmra.mrb[10].mxu0 %vm3957_vm12, %v3225_v33  ;;  %v1189_v58 = vpop.permute.xlu0 %1188 }
 0x1c7   :  { %v2095_v12 = vsel %vm2087_vm11, %v2038_v62, %v1535_v22  ;;  %10269 = vmatprep.mubr.msk.f32.mxu0 %vm10510_vm3, %v20568_v48  ;;  %v1982_v30 = vsel %vm1973_vm9, %v1925_v47, %v1189_v58 }
 0x1c8   :  { %v2316_v57 = vcombine.high %v2095_v12, %v2095_v12  ;;  %v2323_v8 = vrot.slane %v2095_v12, %v11914_v40  ;;  %1206 = vrot.lane.b32.xlu1 %v12188_v14, %s10505_s12  ;;  %862 = vrot.lane.b32.xlu0 %v20575_v2, %s10504_s7  ;;  %v12204_v2 = vld [vmem:[%s19648_s0 + $0x128] sm:$0xff]  ;;  %v20584_v12 = vld [vmem:[#allocation20_spill] sm:$0xff] }
 0x1ca   :  { %v2330_v52 = vrot.slane %v2316_v57, %v11914_v40  ;;  %v2331_v0 = vcombine.high %v2323_v8, %v2323_v8  ;;  %v3226_v50 = vcombine.low %v2315_v55, %v2323_v8  ;;  %v1537_v44 = vpop.permute.xlu1 %1536  ;;  %v1363_v45 = vpop.permute.xlu0 %1362 }
 0x1cb   :  { %v2039_v27 = vsel %vm2030_vm10, %v1982_v30, %v1363_v45 }
 0x1cc   :  { %v3227_v43 = vcombine.low %v2331_v0, %v2330_v52  ;;  %v2096_v42 = vsel %vm2087_vm11, %v2039_v27, %v1537_v44  ;;  %1576 = vrot.lane.b32.xlu1 %v11383_v60, %s10508_s16  ;;  %1230 = vrot.lane.b32.xlu0 %v12204_v2, %s10505_s12  ;;  %v3234_v25 = vrot.slane %v3226_v50, %v11914_v40 }
 0x1cd   :  { %v2332_v32 = vcombine.high %v2096_v42, %v2096_v42  ;;  %v2339_v38 = vrot.slane %v2096_v42, %v11914_v40  ;;  %v20585_v42 = vld [vmem:[#allocation76_spill] sm:$0xff] }
 0x1ce   :  { %v3241_v19 = vrot.slane %v3227_v43, %v11914_v40  ;;  %v1019_v4 = vpop.permute.xlu1 %1018  ;;  %v845_v24 = vpop.permute.xlu0 %844  ;;  %v10448_v43 = vld [vmem:[%s19648_s0 + $0x50] sm:$0xff] }
 0x1cf   :  { %v2346_v16 = vrot.slane %v2332_v32, %v11914_v40  ;;  %v2347_v35 = vcombine.high %v2339_v38, %v2339_v38 }
 0x1d0   :  { %1036 = vrot.lane.b32.xlu1 %v11294_v37, %s10506_s13  ;;  %712 = vrot.lane.b32.xlu0 %v12140_v39, %s10502_s27  ;;  %v3242_v23 = vcombine.low %v3234_v25, %v3241_v19  ;;  %v1755_v37 = vsel %vm1745_vm4, %v1698_v56, %v11609_v31 }
 0x1d1   :  { %v2348_v3 = vcombine.high %v2346_v16, %v2346_v16  ;;  %v3243_v33 = vcombine.low %v2339_v38, %v2347_v35  ;;  %v1812_v39 = vsel %vm1802_vm6, %v1755_v37, %v11857_v20  ;;  %v10447_v20 = vld [vmem:[%s19648_s0 + $0xb0] sm:$0xff] }
 0x1d2   :  { %v1191_v62 = vpop.permute.xlu1 %1190  ;;  %10270 = vmatmul.mubr.msk.f32.gmra.mrb[12].mxu0 %vm3957_vm12, %v3242_v23  ;;  %v847_v22 = vpop.permute.xlu0 %846  ;;  %v1869_v57 = vsel %vm1859_vm7, %v1812_v39, %v845_v24  ;;  %v20587_v39 = vld [vmem:[#allocation75_spill] sm:$0xff] }
 0x1d3   :  { %v3244_v58 = vcombine.low %v2346_v16, %v2348_v3  ;;  %10272 = vmatprep.mubr.msk.f32.mxu0 %vm10510_vm3, %v20568_v48  ;;  %v3251_v55 = vrot.slane %v3243_v33, %v11914_v40  ;;  %v1926_v0 = vsel %vm1916_vm8, %v1869_v57, %v1019_v4 }
 0x1d4   :  { %1404 = vrot.lane.b32.xlu1 %v20583_v26, %s10509_s17  ;;  %1380 = vrot.lane.b32.xlu0 %v20584_v12, %s10509_s17  ;;  %v1983_v50 = vsel %vm1973_vm9, %v1926_v0, %v1191_v62 }
 0x1d5   :  { %v3258_v8 = vrot.slane %v3244_v58, %v11914_v40  ;;  %v10449_v58 = vld [vmem:[%s19648_s0 + $0x58] sm:$0xff] }
 0x1d6   :  { %v1365_v31 = vpop.permute.xlu1 %1364  ;;  %v1021_v47 = vpop.permute.xlu0 %1020 }
 0x1d7   :  { %v3259_v52 = vcombine.low %v3251_v55, %v3258_v8  ;;  %v2040_v30 = vsel %vm2030_vm10, %v1983_v50, %v1365_v31  ;;  %v1700_v55 = vsel %vm1688_vm5, %v10449_v58, %v20587_v39 }
 0x1d8   :  { %1208 = vrot.lane.b32.xlu1 %v10447_v20, %s10505_s12  ;;  %886 = vrot.lane.b32.xlu0 %v20581_v1, %s10504_s7  ;;  %v1699_v1 = vsel %vm1688_vm5, %v10448_v43, %v20585_v42 }
 0x1d9   :  { %10273 = vmatmul.mubr.msk.f32.gmra.mrb[14].mxu0 %vm3957_vm12, %v3259_v52  ;;  %v1756_v38 = vsel %vm1745_vm4, %v1699_v1, %v11619_v28 }
 0x1da   :  { %v1539_v44 = vpop.permute.xlu1 %1538  ;;  %v1193_v45 = vpop.permute.xlu0 %1192  ;;  %10275 = vmatprep.mubr.msk.f32.mxu0 %vm10510_vm3, %v20568_v48  ;;  %v1813_v25 = vsel %vm1802_vm6, %v1756_v38, %v11872_v13  ;;  %v20588_v38 = vld [vmem:[#allocation78_spill] sm:$0xff] }
 0x1db   :  { %v2097_v27 = vsel %vm2087_vm11, %v2040_v30, %v1539_v44  ;;  %v1870_v24 = vsel %vm1859_vm7, %v1813_v25, %v847_v22 }
 0x1dc   :  { %v2356_v32 = vrot.slane %v2097_v27, %v11914_v40  ;;  %1578 = vrot.lane.b32.xlu1 %v11370_v5, %s10508_s16  ;;  %1554 = vrot.lane.b32.xlu0 %v11281_v17, %s10508_s16  ;;  %v1927_v16 = vsel %vm1916_vm8, %v1870_v24, %v1021_v47  ;;  %v2349_v35 = vcombine.high %v2097_v27, %v2097_v27  ;;  %v20589_v24 = vld [vmem:[#allocation33_spill] sm:$0xff] }
 0x1dd   :  { %v1984_v3 = vsel %vm1973_vm9, %v1927_v16, %v1193_v45  ;;  %v1757_v47 = vsel %vm1745_vm4, %v1700_v55, %v11617_v36 }
 0x1de   :  { %v849_v19 = vpop.permute.xlu1 %848  ;;  %v1367_v4 = vpop.permute.xlu0 %1366  ;;  %v2364_v23 = vcombine.high %v2356_v32, %v2356_v32  ;;  %v2363_v9 = vrot.slane %v2349_v35, %v11914_v40  ;;  %v1814_v52 = vsel %vm1802_vm6, %v1757_v47, %v11870_v51 }
 0x1df   :  { %v2041_v28 = vsel %vm2030_vm10, %v1984_v3, %v1367_v4  ;;  %v1871_v44 = vsel %vm1859_vm7, %v1814_v52, %v849_v19 }
 0x1e0   :  { %1060 = vrot.lane.b32.xlu1 %v11383_v60, %s10506_s13  ;;  %690 = vrot.lane.b32.xlu0 %v12188_v14, %s10502_s27  ;;  %v3260_v56 = vcombine.low %v2356_v32, %v2364_v23  ;;  %v20586_v60 = vld [vmem:[#allocation23_spill] sm:$0xff]  ;;  %v10451_v32 = vld [vmem:[%s19648_s0 + $0x60] sm:$0xff] }
 0x1e2   :  { %v1023_v33 = vpop.permute.xlu1 %1022  ;;  %v1541_v13 = vpop.permute.xlu0 %1540  ;;  %v3268_v57 = vrot.slane %v3260_v56, %v11914_v40 }
 0x1e3   :  { %v2098_v15 = vsel %vm2087_vm11, %v2041_v28, %v1541_v13  ;;  %v1928_v45 = vsel %vm1916_vm8, %v1871_v44, %v1023_v33 }
 0x1e4   :  { %v2372_v62 = vrot.slane %v2098_v15, %v11914_v40  ;;  %864 = vrot.lane.b32.xlu1 %v20584_v12, %s10504_s7  ;;  %1382 = vrot.lane.b32.xlu0 %v20586_v60, %s10509_s17  ;;  %v2365_v8 = vcombine.high %v2098_v15, %v2098_v15  ;;  %v12289_v12 = vld [vmem:[%s19648_s0 + $0x130] sm:$0xff] }
 0x1e6   :  { %v3261_v14 = vcombine.low %v2363_v9, %v2372_v62  ;;  %v1195_v22 = vpop.permute.xlu1 %1194  ;;  %v851_v37 = vpop.permute.xlu0 %850  ;;  %v2379_v27 = vrot.slane %v2365_v8, %v11914_v40  ;;  %v2380_v43 = vcombine.high %v2372_v62, %v2372_v62 }
 0x1e7   :  { %v1985_v36 = vsel %vm1973_vm9, %v1928_v45, %v1195_v22 }
 0x1e8   :  { %v3275_v31 = vrot.slane %v3261_v14, %v11914_v40  ;;  %1556 = vrot.lane.b32.xlu1 %v11310_v10, %s10508_s16  ;;  %1232 = vrot.lane.b32.xlu0 %v12289_v12, %s10505_s12  ;;  %v3277_v25 = vcombine.low %v2380_v43, %v2379_v27  ;;  %v2381_v19 = vcombine.high %v2379_v27, %v2379_v27 }
 0x1ea   :  { %v1369_v0 = vpop.permute.xlu1 %1368  ;;  %v1025_v50 = vpop.permute.xlu0 %1024  ;;  %v3276_v30 = vcombine.low %v3268_v57, %v3275_v31  ;;  %v3285_v15 = vrot.slane %v3277_v25, %v11914_v40 }
 0x1eb   :  { %v2042_v51 = vsel %vm2030_vm10, %v1985_v36, %v1369_v0 }
 0x1ec   :  { %714 = vrot.lane.b32.xlu1 %v12204_v2, %s10502_s27  ;;  %692 = vrot.lane.b32.xlu0 %v10447_v20, %s10502_s27  ;;  %v1701_v2 = vsel %vm1688_vm5, %v10451_v32, %v20588_v38  ;;  %v20591_v38 = vld [vmem:[#allocation22_spill] sm:$0xff] }
 0x1ed   :  { %10276 = vmatmul.mubr.msk.f32.gmra.mrb[16].mxu0 %vm3957_vm12, %v3276_v30  ;;  %v1758_v16 = vsel %vm1745_vm4, %v1701_v2, %v11633_v46  ;;  %v20590_v46 = vld [vmem:[#allocation77_spill] sm:$0xff] }
 0x1ee   :  { %v1543_v42 = vpop.permute.xlu1 %1542  ;;  %v1197_v1 = vpop.permute.xlu0 %1196  ;;  %10278 = vmatprep.mubr.msk.f32.mxu0 %vm10510_vm3, %v20568_v48  ;;  %v1815_v35 = vsel %vm1802_vm6, %v1758_v16, %v11880_v7  ;;  %v1702_v7 = vsel %vm1688_vm5, %v11843_v11, %v20590_v46  ;;  %v10452_v11 = vld [vmem:[%s19648_s0 + $0xb8] sm:$0xff] }
 0x1ef   :  { %v2099_v20 = vsel %vm2087_vm11, %v2042_v51, %v1543_v42  ;;  %v1872_v33 = vsel %vm1859_vm7, %v1815_v35, %v851_v37  ;;  %v1759_v58 = vsel %vm1745_vm4, %v1702_v7, %v11631_v53 }
 0x1f0   :  { %v2389_v4 = vrot.slane %v2099_v20, %v11914_v40  ;;  %1406 = vrot.lane.b32.xlu1 %v20589_v24, %s10509_s17  ;;  %1038 = vrot.lane.b32.xlu0 %v11281_v17, %s10506_s13  ;;  %v2382_v13 = vcombine.high %v2099_v20, %v2099_v20  ;;  %v1929_v9 = vsel %vm1916_vm8, %v1872_v33, %v1025_v50 }
 0x1f1   :  { %v1986_v17 = vsel %vm1973_vm9, %v1929_v9, %v1197_v1 }
 0x1f2   :  { %v3278_v23 = vcombine.low %v2381_v19, %v2389_v4  ;;  %v853_v3 = vpop.permute.xlu1 %852  ;;  %v1371_v28 = vpop.permute.xlu0 %1370  ;;  %v2396_v39 = vrot.slane %v2382_v13, %v11914_v40 }
 0x1f3   :  { %v2043_v62 = vsel %vm2030_vm10, %v1986_v17, %v1371_v28 }
 0x1f4   :  { %v3292_v56 = vrot.slane %v3278_v23, %v11914_v40  ;;  %888 = vrot.lane.b32.xlu1 %v20583_v26, %s10504_s7  ;;  %866 = vrot.lane.b32.xlu0 %v20586_v60, %s10504_s7  ;;  %v2397_v26 = vcombine.high %v2389_v4, %v2389_v4  ;;  %v1816_v60 = vsel %vm1802_vm6, %v1759_v58, %v11878_v49 }
 0x1f5   :  { %v1873_v53 = vsel %vm1859_vm7, %v1816_v60, %v853_v3 }
 0x1f6   :  { %v1027_v14 = vpop.permute.xlu1 %1026  ;;  %v1545_v22 = vpop.permute.xlu0 %1544  ;;  %v3293_v37 = vcombine.low %v3285_v15, %v3292_v56  ;;  %v3294_v50 = vcombine.low %v2397_v26, %v2396_v39  ;;  %v20593_v15 = vld [vmem:[#allocation83_spill] sm:$0xff] }
 0x1f7   :  { %v2100_v55 = vsel %vm2087_vm11, %v2043_v62, %v1545_v22  ;;  %v1930_v31 = vsel %vm1916_vm8, %v1873_v53, %v1027_v14  ;;  %v20595_v53 = vld [vmem:[#allocation25_spill] sm:$0xff] }
 0x1f8   :  { %v2398_v57 = vcombine.high %v2100_v55, %v2100_v55  ;;  %v2405_v8 = vrot.slane %v2100_v55, %v11914_v40  ;;  %1580 = vrot.lane.b32.xlu1 %v11399_v18, %s10508_s16  ;;  %1210 = vrot.lane.b32.xlu0 %v10452_v11, %s10505_s12  ;;  %v3302_v42 = vrot.slane %v3294_v50, %v11914_v40 }
 0x1f9   :  { %10279 = vmatmul.mubr.msk.f32.gmra.mrb[18].mxu0 %vm3957_vm12, %v3293_v37 }
 0x1fa   :  { %v2412_v49 = vrot.slane %v2398_v57, %v11914_v40  ;;  %v2413_v47 = vcombine.high %v2405_v8, %v2405_v8  ;;  %v1373_v52 = vpop.permute.xlu1 %1372  ;;  %v1199_v0 = vpop.permute.xlu0 %1198  ;;  %10281 = vmatprep.mubr.msk.f32.mxu0 %vm10510_vm3, %v20568_v48 }
 0x1fb   :  { %v1987_v30 = vsel %vm1973_vm9, %v1930_v31, %v1199_v0  ;;  %v12425_v0 = vld [vmem:[%s19648_s0 + $0x140] sm:$0xff] }
 0x1fc   :  { %v3295_v44 = vcombine.low %v2405_v8, %v2413_v47  ;;  %1040 = vrot.lane.b32.xlu1 %v11310_v10, %s10506_s13  ;;  %716 = vrot.lane.b32.xlu0 %v12289_v12, %s10502_s27  ;;  %v2414_v45 = vcombine.high %v2412_v49, %v2412_v49  ;;  %v2044_v36 = vsel %vm2030_vm10, %v1987_v30, %v1373_v52  ;;  %v20592_v12 = vld [vmem:[#allocation80_spill] sm:$0xff] }
 0x1fd   :  { %v1703_v2 = vsel %vm1688_vm5, %v11866_v63, %v20592_v12  ;;  %v20594_v8 = vld [vmem:[#allocation32_spill] sm:$0xff] }
 0x1fe   :  { %v3309_v27 = vrot.slane %v3295_v44, %v11914_v40  ;;  %v1547_v43 = vpop.permute.xlu1 %1546  ;;  %v855_v51 = vpop.permute.xlu0 %854  ;;  %v3311_v20 = vcombine.low %v2412_v49, %v2414_v45  ;;  %v1760_v16 = vsel %vm1745_vm4, %v1703_v2, %v11647_v29 }
 0x1ff   :  { %v2101_v1 = vsel %vm2087_vm11, %v2044_v36, %v1547_v43  ;;  %v1817_v35 = vsel %vm1802_vm6, %v1760_v16, %v11886_v34  ;;  %v20597_v36 = vld [vmem:[#allocation89_spill] sm:$0xff] }
 0x200   :  { %v2422_v32 = vrot.slane %v2101_v1, %v11914_v40  ;;  %1384 = vrot.lane.b32.xlu1 %v20591_v38, %s10509_s17  ;;  %1062 = vrot.lane.b32.xlu0 %v11370_v5, %s10506_s13  ;;  %v3310_v10 = vcombine.low %v3302_v42, %v3309_v27  ;;  %v12380_v5 = vld [vmem:[%s19648_s0 + $0xc0] sm:$0xff]  ;;  %v1874_v63 = vsel %vm1859_vm7, %v1817_v35, %v855_v51 }
 0x201   :  { %v3319_v29 = vrot.slane %v3311_v20, %v11914_v40  ;;  %v2415_v13 = vcombine.high %v2101_v1, %v2101_v1 }
 0x202   :  { %v2430_v25 = vcombine.high %v2422_v32, %v2422_v32  ;;  %v1201_v19 = vpop.permute.xlu1 %1200  ;;  %v1029_v4 = vpop.permute.xlu0 %1028  ;;  %10282 = vmatmul.mubr.msk.f32.gmra.mrb[20].mxu0 %vm3957_vm12, %v3310_v10 }
 0x203   :  { %10284 = vmatprep.mubr.msk.f32.mxu0 %vm10510_vm3, %v20568_v48  ;;  %v1931_v3 = vsel %vm1916_vm8, %v1874_v63, %v1029_v4  ;;  %v2429_v14 = vrot.slane %v2415_v13, %v11914_v40  ;;  %v20601_v4 = vld [vmem:[#allocation55_spill] sm:$0xff] }
 0x204   :  { %v3312_v23 = vcombine.low %v2422_v32, %v2430_v25  ;;  %1212 = vrot.lane.b32.xlu1 %v12380_v5, %s10505_s12  ;;  %890 = vrot.lane.b32.xlu0 %v20589_v24, %s10504_s7  ;;  %v12397_v24 = vld [vmem:[%s19648_s0 + $0x138] sm:$0xff]  ;;  %v1988_v56 = vsel %vm1973_vm9, %v1931_v3, %v1201_v19  ;;  %v20598_v32 = vld [vmem:[#allocation82_spill] sm:$0xff]  ;;  %v20600_v19 = vld [vmem:[#allocation35_spill] sm:$0xff] }
 0x206   :  { %v3326_v34 = vrot.slane %v3312_v23, %v11914_v40  ;;  %v1375_v28 = vpop.permute.xlu1 %1374  ;;  %v683_v33 = vpop.permute.xlu0 %682 }
 0x207   :  { %v2045_v17 = vsel %vm2030_vm10, %v1988_v56, %v1375_v28 }
 0x208   :  { %1558 = vrot.lane.b32.xlu1 %v20593_v15, %s10508_s16  ;;  %1234 = vrot.lane.b32.xlu0 %v12397_v24, %s10505_s12  ;;  %v3327_v9 = vcombine.low %v3319_v29, %v3326_v34 }
 0x20a   :  { %v1549_v46 = vpop.permute.xlu1 %1548  ;;  %10285 = vmatmul.mubr.msk.f32.gmra.mrb[22].mxu0 %vm3957_vm12, %v3327_v9  ;;  %v857_v7 = vpop.permute.xlu0 %856  ;;  %v20602_v9 = vld [vmem:[#allocation105_spill] sm:$0xff] }
 0x20b   :  { %v2102_v62 = vsel %vm2087_vm11, %v2045_v17, %v1549_v46  ;;  %10287 = vmatprep.mubr.msk.f32.mxu0 %vm10510_vm3, %v20568_v48 }
 0x20c   :  { %v2431_v22 = vcombine.high %v2102_v62, %v2102_v62  ;;  %v2438_v37 = vrot.slane %v2102_v62, %v11914_v40  ;;  %1064 = vrot.lane.b32.xlu1 %v11399_v18, %s10506_s13  ;;  %694 = vrot.lane.b32.xlu0 %v10452_v11, %s10502_s27  ;;  %v20596_v11 = vld [vmem:[#allocation79_spill] sm:$0xff] }
 0x20d   :  { %v1704_v52 = vsel %vm1688_vm5, %v11898_v59, %v20596_v11 }
 0x20e   :  { %v2445_v58 = vrot.slane %v2431_v22, %v11914_v40  ;;  %v2446_v39 = vcombine.high %v2438_v37, %v2438_v37  ;;  %v3328_v26 = vcombine.low %v2429_v14, %v2438_v37  ;;  %v1031_v55 = vpop.permute.xlu1 %1030  ;;  %v685_v60 = vpop.permute.xlu0 %684  ;;  %v1761_v30 = vsel %vm1745_vm4, %v1704_v52, %v11645_v41 }
 0x20f   :  { %v1818_v44 = vsel %vm1802_vm6, %v1761_v30, %v683_v33 }
 0x210   :  { %v3329_v57 = vcombine.low %v2446_v39, %v2445_v58  ;;  %1408 = vrot.lane.b32.xlu1 %v20594_v8, %s10509_s17  ;;  %1386 = vrot.lane.b32.xlu0 %v20595_v53, %s10509_s17  ;;  %v3336_v31 = vrot.slane %v3328_v26, %v11914_v40  ;;  %v1875_v27 = vsel %vm1859_vm7, %v1818_v44, %v857_v7 }
 0x211   :  { %v1932_v43 = vsel %vm1916_vm8, %v1875_v27, %v1031_v55  ;;  %v2447_v2 = vcombine.high %v2445_v58, %v2445_v58 }
 0x212   :  { %v3343_v49 = vrot.slane %v3329_v57, %v11914_v40  ;;  %v1203_v18 = vpop.permute.xlu1 %1202  ;;  %v859_v47 = vpop.permute.xlu0 %858 }
 0x213   :  { %v1989_v41 = vsel %vm1973_vm9, %v1932_v43, %v1203_v18  ;;  %v10458_v43 = vld [vmem:[%s19648_s0 + $0xd0] sm:$0xff] }
 0x214   :  { %1236 = vrot.lane.b32.xlu1 %v12425_v0, %s10505_s12  ;;  %868 = vrot.lane.b32.xlu0 %v20591_v38, %s10504_s7  ;;  %v3344_v50 = vcombine.low %v3336_v31, %v3343_v49  ;;  %v20599_v38 = vld [vmem:[#allocation12_spill] sm:$0xff] }
 0x215   :  { %v1705_v10 = vsel %vm1688_vm5, %v20599_v38, %v20598_v32 }
 0x216   :  { %v1377_v45 = vpop.permute.xlu1 %1376  ;;  %10288 = vmatmul.mubr.msk.f32.gmra.mrb[24].mxu0 %vm3957_vm12, %v3344_v50  ;;  %v1033_v59 = vpop.permute.xlu0 %1032  ;;  %v1762_v16 = vsel %vm1745_vm4, %v1705_v10, %v20601_v4  ;;  %v20604_v50 = vld [vmem:[#allocation86_spill] sm:$0xff] }
 0x217   :  { %10290 = vmatprep.mubr.msk.f32.mxu0 %vm10510_vm3, %v20568_v48  ;;  %v2046_v51 = vsel %vm2030_vm10, %v1989_v41, %v1377_v45  ;;  %v1819_v35 = vsel %vm1802_vm6, %v1762_v16, %v685_v60 }
 0x218   :  { %1582 = vrot.lane.b32.xlu1 %v11386_v54, %s10508_s16  ;;  %1560 = vrot.lane.b32.xlu0 %v20597_v36, %s10508_s16  ;;  %v1876_v28 = vsel %vm1859_vm7, %v1819_v35, %v859_v47 }
 0x219   :  { %v1933_v33 = vsel %vm1916_vm8, %v1876_v28, %v1033_v59 }
 0x21a   :  { %v1551_v42 = vpop.permute.xlu1 %1550  ;;  %v1205_v1 = vpop.permute.xlu0 %1204 }
 0x21b   :  { %v2103_v12 = vsel %vm2087_vm11, %v2046_v51, %v1551_v42  ;;  %v1990_v56 = vsel %vm1973_vm9, %v1933_v33, %v1205_v1  ;;  %v20605_v51 = vld [vmem:[#allocation99_spill] sm:$0xff]  ;;  %v20606_v1 = vld [vmem:[#allocation150_spill] sm:$0xff] }
 0x21c   :  { %v2448_v20 = vcombine.high %v2103_v12, %v2103_v12  ;;  %v2455_v25 = vrot.slane %v2103_v12, %v11914_v40  ;;  %1410 = vrot.lane.b32.xlu1 %v20600_v19, %s10509_s17  ;;  %1042 = vrot.lane.b32.xlu0 %v20593_v15, %s10506_s13  ;;  %v10456_v15 = vld [vmem:[%s19648_s0 + $0xc8] sm:$0xff] }
 0x21d   :  { %v10461_v33 = vld [vmem:[%s19648_s0 + $0x108] sm:$0xff] }
 0x21e   :  { %v2462_v23 = vrot.slane %v2448_v20, %v11914_v40  ;;  %v2463_v63 = vcombine.high %v2455_v25, %v2455_v25  ;;  %v3345_v29 = vcombine.low %v2447_v2, %v2455_v25  ;;  %v1379_v34 = vpop.permute.xlu1 %1378  ;;  %v709_v3 = vpop.permute.xlu0 %708  ;;  %v20607_v25 = vld [vmem:[#allocation34_spill] sm:$0xff] }
 0x21f   :  { %v2047_v7 = vsel %vm2030_vm10, %v1990_v56, %v1379_v34  ;;  %v20611_v56 = vld [vmem:[#allocation93_spill] sm:$0xff] }
 0x220   :  { %v3346_v13 = vcombine.low %v2463_v63, %v2462_v23  ;;  %1584 = vrot.lane.b32.xlu1 %v20602_v9, %s10508_s16  ;;  %1214 = vrot.lane.b32.xlu0 %v10456_v15, %s10505_s12  ;;  %v3353_v17 = vrot.slane %v3345_v29, %v11914_v40  ;;  %v12546_v29 = vld [vmem:[%s19648_s0 + $0x150] sm:$0xff] }
 0x222   :  { %v3360_v46 = vrot.slane %v3346_v13, %v11914_v40  ;;  %v1553_v62 = vpop.permute.xlu1 %1552  ;;  %v883_v14 = vpop.permute.xlu0 %882  ;;  %v20609_v13 = vld [vmem:[#allocation98_spill] sm:$0xff] }
 0x223   :  { %v2104_v22 = vsel %vm2087_vm11, %v2047_v7, %v1553_v62  ;;  %v20613_v7 = vld [vmem:[#allocation81_spill] sm:$0xff] }
 0x224   :  { %v2464_v37 = vcombine.high %v2104_v22, %v2104_v22  ;;  %v2471_v58 = vrot.slane %v2104_v22, %v11914_v40  ;;  %718 = vrot.lane.b32.xlu1 %v12397_v24, %s10502_s27  ;;  %696 = vrot.lane.b32.xlu0 %v12380_v5, %s10502_s27  ;;  %v3361_v39 = vcombine.low %v3353_v17, %v3360_v46  ;;  %v20603_v5 = vld [vmem:[#allocation24_spill] sm:$0xff]  ;;  %v20612_v17 = vld [vmem:[#allocation7_spill] sm:$0xff] }
 0x225   :  { %v1706_v62 = vsel %vm1688_vm5, %v11956_v6, %v20613_v7 }
 0x226   :  { %v2478_v26 = vrot.slane %v2464_v37, %v11914_v40  ;;  %v2479_v55 = vcombine.high %v2471_v58, %v2471_v58  ;;  %v12477_v60 = vpop.permute.xlu1 %710  ;;  %10291 = vmatmul.mubr.msk.f32.gmra.mrb[26].mxu0 %vm3957_vm12, %v3361_v39  ;;  %v12480_v57 = vpop.permute.xlu0 %686  ;;  %v20614_v39 = vld [vmem:[#allocation3_spill] sm:$0xff] }
 0x227   :  { %10293 = vmatprep.mubr.msk.f32.mxu0 %vm10510_vm3, %v20568_v48 }
 0x228   :  { %v2480_v31 = vcombine.high %v2478_v26, %v2478_v26  ;;  %v3362_v49 = vcombine.low %v2471_v58, %v2479_v55  ;;  %870 = vrot.lane.b32.xlu1 %v20595_v53, %s10504_s7  ;;  %1388 = vrot.lane.b32.xlu0 %v20603_v5, %s10509_s17 }
 0x22a   :  { %v3363_v24 = vcombine.low %v2478_v26, %v2480_v31  ;;  %v12488_v18 = vpop.permute.xlu1 %860  ;;  %v1057_v47 = vpop.permute.xlu0 %1056  ;;  %v3370_v11 = vrot.slane %v3362_v49, %v11914_v40  ;;  %v1763_v26 = vsel %vm1745_vm4, %v1706_v62, %v20614_v39  ;;  %v20619_v39 = vld [vmem:[#allocation26_spill] sm:$0xff] }
 0x22b   :  { %v1820_v31 = vsel %vm1802_vm6, %v1763_v26, %v12480_v57 }
 0x22c   :  { %v3377_v52 = vrot.slane %v3363_v24, %v11914_v40  ;;  %1562 = vrot.lane.b32.xlu1 %v20604_v50, %s10508_s16  ;;  %892 = vrot.lane.b32.xlu0 %v20594_v8, %s10504_s7  ;;  %v1877_v6 = vsel %vm1859_vm7, %v1820_v31, %v12488_v18  ;;  %v20615_v18 = vld [vmem:[#allocation37_spill] sm:$0xff]  ;;  %v12668_v31 = vld [vmem:[%s19648_s0 + $0xe8] sm:$0xff] }
 0x22e   :  { %v1229_v30 = vpop.permute.xlu1 %1228  ;;  %v885_v44 = vpop.permute.xlu0 %884  ;;  %v3378_v53 = vcombine.low %v3370_v11, %v3377_v52 }
 0x230   :  { %1044 = vrot.lane.b32.xlu1 %v20597_v36, %s10506_s13  ;;  %720 = vrot.lane.b32.xlu0 %v12425_v0, %s10502_s27  ;;  %v10457_v0 = vld [vmem:[%s19648_s0 + $0x148] sm:$0xff] }
 0x231   :  { %10294 = vmatmul.mubr.msk.f32.gmra.mrb[28].mxu0 %vm3957_vm12, %v3378_v53 }
 0x232   :  { %v1035_v45 = vpop.permute.xlu1 %1034  ;;  %v12501_v59 = vpop.permute.xlu0 %688  ;;  %10296 = vmatprep.mubr.msk.f32.mxu0 %vm10510_vm3, %v20568_v48 }
 0x234   :  { %894 = vrot.lane.b32.xlu1 %v20600_v19, %s10504_s7  ;;  %1066 = vrot.lane.b32.xlu0 %v11386_v54, %s10506_s13  ;;  %v10459_v54 = vld [vmem:[%s19648_s0 + $0x100] sm:$0xff]  ;;  %v20608_v19 = vld [vmem:[#allocation27_spill] sm:$0xff] }
 0x235   :  { %v1717_v42 = vsel %vm1688_vm5, %v10459_v54, %v20605_v51 }
 0x236   :  { %v1403_v8 = vpop.permute.xlu1 %1402  ;;  %v1059_v27 = vpop.permute.xlu0 %1058  ;;  %v1774_v32 = vsel %vm1745_vm4, %v1717_v42, %v20606_v1  ;;  %v20617_v1 = vld [vmem:[#allocation5_spill] sm:$0xff] }
 0x237   :  { %v1831_v38 = vsel %vm1802_vm6, %v1774_v32, %v709_v3 }
 0x238   :  { %1238 = vrot.lane.b32.xlu1 %v10457_v0, %s10505_s12  ;;  %1216 = vrot.lane.b32.xlu0 %v10458_v43, %s10505_s12  ;;  %v1888_v2 = vsel %vm1859_vm7, %v1831_v38, %v883_v14 }
 0x239   :  { %v1945_v20 = vsel %vm1916_vm8, %v1888_v2, %v1057_v47 }
 0x23a   :  { %v1207_v36 = vpop.permute.xlu1 %1206  ;;  %v12517_v41 = vpop.permute.xlu0 %862  ;;  %v2002_v4 = vsel %vm1973_vm9, %v1945_v20, %v1229_v30 }
 0x23b   :  { %v2059_v16 = vsel %vm2030_vm10, %v2002_v4, %v1403_v8 }
 0x23c   :  { %1068 = vrot.lane.b32.xlu1 %v20602_v9, %s10506_s13  ;;  %698 = vrot.lane.b32.xlu0 %v10456_v15, %s10502_s27  ;;  %v1718_v9 = vsel %vm1688_vm5, %v10461_v33, %v20609_v13  ;;  %v20610_v15 = vld [vmem:[#allocation102_spill] sm:$0xff] }
 0x23d   :  { %v1775_v46 = vsel %vm1745_vm4, %v1718_v9, %v20612_v17 }
 0x23e   :  { %v1577_v10 = vpop.permute.xlu1 %1576  ;;  %v1231_v12 = vpop.permute.xlu0 %1230  ;;  %v1832_v14 = vsel %vm1802_vm6, %v1775_v46, %v12477_v60 }
 0x23f   :  { %v12541_v63 = vsel %vm2087_vm11, %v2059_v16, %v1577_v10  ;;  %v1889_v55 = vsel %vm1859_vm7, %v1832_v14, %v885_v44  ;;  %v20618_v16 = vld [vmem:[#allocation109_spill] sm:$0xff] }
 0x240   :  { %1412 = vrot.lane.b32.xlu1 %v20607_v25, %s10509_s17  ;;  %1390 = vrot.lane.b32.xlu0 %v20608_v19, %s10509_s17  ;;  %v2662_v34 = vcombine.high %v12541_v63, %v12541_v63  ;;  %v1946_v49 = vsel %vm1916_vm8, %v1889_v55, %v1059_v27 }
 0x241   :  { %v2003_v60 = vsel %vm1973_vm9, %v1946_v49, %v1231_v12  ;;  %v20620_v49 = vld [vmem:[#allocation101_spill] sm:$0xff] }
 0x242   :  { %v1037_v35 = vpop.permute.xlu1 %1036  ;;  %v12538_v23 = vpop.permute.xlu0 %712  ;;  %v2676_v22 = vrot.slane %v2662_v34, %v11914_v40  ;;  %v12625_v34 = vld [vmem:[%s19648_s0 + $0xd8] sm:$0xff] }
 0x244   :  { %1240 = vrot.lane.b32.xlu1 %v12546_v29, %s10505_s12  ;;  %872 = vrot.lane.b32.xlu0 %v20603_v5, %s10504_s7  ;;  %v1934_v5 = vsel %vm1916_vm8, %v1877_v6, %v1035_v45  ;;  %v2678_v24 = vcombine.high %v2676_v22, %v2676_v22  ;;  %v1719_v6 = vsel %vm1688_vm5, %v12090_v21, %v20620_v49 }
 0x245   :  { %v1991_v57 = vsel %vm1973_vm9, %v1934_v5, %v1207_v36  ;;  %v20616_v36 = vld [vmem:[#allocation85_spill] sm:$0xff] }
 0x246   :  { %v1405_v3 = vpop.permute.xlu1 %1404  ;;  %v1381_v28 = vpop.permute.xlu0 %1380  ;;  %v3549_v8 = vcombine.low %v2676_v22, %v2678_v24  ;;  %v1707_v54 = vsel %vm1688_vm5, %v11985_v61, %v20616_v36  ;;  %v12682_v24 = vrot.slane %v12668_v31, 1 }
 0x247   :  { %v2060_v47 = vsel %vm2030_vm10, %v2003_v60, %v1405_v3  ;;  %v2048_v44 = vsel %vm2030_vm10, %v1991_v57, %v1381_v28  ;;  %v1764_v32 = vsel %vm1745_vm4, %v1707_v54, %v20617_v1 }
 0x248   :  { %1586 = vrot.lane.b32.xlu1 %v20610_v15, %s10508_s16  ;;  %1564 = vrot.lane.b32.xlu0 %v20611_v56, %s10508_s16  ;;  %v3557_v38 = vrot.slane %v3549_v8, %v11914_v40 }
 0x24a   :  { %v1209_v37 = vpop.permute.xlu1 %1208  ;;  %v12571_v58 = vpop.permute.xlu0 %886 }
 0x24c   :  { %722 = vrot.lane.b32.xlu1 %v10457_v0, %s10502_s27  ;;  %700 = vrot.lane.b32.xlu0 %v10458_v43, %s10502_s27 }
 0x24e   :  { %v1579_v11 = vpop.permute.xlu1 %1578  ;;  %v1555_v52 = vpop.permute.xlu0 %1554 }
 0x24f   :  { %v12588_v30 = vsel %vm2087_vm11, %v2060_v47, %v1579_v11  ;;  %v2105_v45 = vsel %vm2087_vm11, %v2048_v44, %v1555_v52 }
 0x250   :  { %v2686_v53 = vrot.slane %v12588_v30, %v11914_v40  ;;  %1414 = vrot.lane.b32.xlu1 %v20615_v18, %s10509_s17  ;;  %1046 = vrot.lane.b32.xlu0 %v20604_v50, %s10506_s13  ;;  %v2488_v42 = vrot.slane %v2105_v45, %v11914_v40  ;;  %v1821_v50 = vsel %vm1802_vm6, %v1764_v32, %v12501_v59 }
 0x251   :  { %v1878_v2 = vsel %vm1859_vm7, %v1821_v50, %v12517_v41  ;;  %v2679_v57 = vcombine.high %v12588_v30, %v12588_v30 }
 0x252   :  { %v2694_v27 = vcombine.high %v2686_v53, %v2686_v53  ;;  %v1061_v0 = vpop.permute.xlu1 %1060  ;;  %v12598_v43 = vpop.permute.xlu0 %690  ;;  %v1935_v20 = vsel %vm1916_vm8, %v1878_v2, %v1037_v35  ;;  %v2496_v4 = vcombine.high %v2488_v42, %v2488_v42 }
 0x253   :  { %v1992_v59 = vsel %vm1973_vm9, %v1935_v20, %v1209_v37  ;;  %v12733_v20 = vld [vmem:[%s19648_s0 + $0x160] sm:$0xff] }
 0x254   :  { %v3550_v51 = vcombine.low %v2686_v53, %v2694_v27  ;;  %896 = vrot.lane.b32.xlu1 %v20607_v25, %s10504_s7  ;;  %874 = vrot.lane.b32.xlu0 %v20608_v19, %s10504_s7  ;;  %v2481_v25 = vcombine.high %v2105_v45, %v2105_v45  ;;  %v3379_v13 = vcombine.low %v2488_v42, %v2496_v4  ;;  %v20622_v53 = vld [vmem:[#allocation90_spill] sm:$0xff]  ;;  %v20623_v4 = vld [vmem:[#allocation36_spill] sm:$0xff] }
 0x256   :  { %v3564_v10 = vrot.slane %v3550_v51, %v11914_v40  ;;  %v12614_v61 = vpop.permute.xlu1 %864  ;;  %v1383_v12 = vpop.permute.xlu0 %1382  ;;  %v2495_v33 = vrot.slane %v2481_v25, %v11914_v40  ;;  %v3387_v22 = vrot.slane %v3379_v13, %v11914_v40 }
 0x257   :  { %v2049_v41 = vsel %vm2030_vm10, %v1992_v59, %v1383_v12 }
 0x258   :  { %1588 = vrot.lane.b32.xlu1 %v20618_v16, %s10508_s16  ;;  %v3565_v19 = vcombine.low %v3557_v38, %v3564_v10  ;;  %1218 = vrot.lane.b32.xlu0 %v12625_v34, %s10505_s12  ;;  %v12725_v10 = vrot.slane %v12668_v31, 2 }
 0x25a   :  { %v1557_v3 = vpop.permute.xlu1 %1556  ;;  %10327 = vmatmul.mubr.msk.f32.vlgmr.msra.gmra.mrb[0].mxu1 %vm3957_vm12, %v3565_v19  ;;  %v1233_v35 = vpop.permute.xlu0 %1232 }
 0x25b   :  { %v12632_v28 = vsel %vm2087_vm11, %v2049_v41, %v1557_v3  ;;  %10329 = vmatprep.mubr.msk.f32.mxu1 %vm10510_vm3, %v20568_v48 }
 0x25c   :  { %v12639_v9 = vrot.slane %v12632_v28, %v11914_v40  ;;  %1048 = vrot.lane.b32.xlu1 %v20611_v56, %s10506_s13  ;;  %v12643_v17 = vpop.f32.mrb[0].mxu0  ;;  %724 = vrot.lane.b32.xlu0 %v12546_v29, %s10502_s27  ;;  %v12661_v29 = vld [vmem:[%s19648_s0 + $0xe0] sm:$0xff] }
 0x25d   :  { %v10253_v46 = vpop.f32.mrb[1].mxu0  ;;  %v820_v5 = vrot.slane %v12661_v29, 1  ;;  %v994_v51 = vrot.slane %v12661_v29, 2 }
 0x25e   :  { %v3380_v7 = vcombine.low %v2495_v33, %v12639_v9  ;;  %v12648_v62 = vpop.permute.xlu1 %714  ;;  %v12650_v14 = vpop.permute.xlu0 %692  ;;  %v20624_v33 = vld [vmem:[#allocation84_spill] sm:$0xff]  ;;  %v2497_v46 = vcombine.high %v12632_v28, %v12632_v28 }
 0x25f   :  { %v12706_v45 = vsel %vm142_vm0, %v820_v5, %v12682_v24  ;;  %v12743_v3 = vsel %vm395_vm1, %v994_v51, %v12725_v10 }
 0x260   :  { %v3394_v37 = vrot.slane %v3380_v7, %v11914_v40  ;;  %1392 = vrot.lane.b32.xlu1 %v20619_v39, %s10509_s17  ;;  %1070 = vrot.lane.b32.xlu0 %v20610_v15, %s10506_s13  ;;  %v20621_v15 = vld [vmem:[#allocation151_spill] sm:$0xff]  ;;  %v20625_v7 = vld [vmem:[#allocation106_spill] sm:$0xff] }
 0x261   :  { %v1776_v60 = vsel %vm1745_vm4, %v1719_v6, %v20621_v15  ;;  %v2511_v15 = vrot.slane %v2497_v46, %v11914_v40 }
 0x262   :  { %v1407_v56 = vpop.permute.xlu1 %1406  ;;  %v12663_v26 = vpop.permute.xlu0 %1038  ;;  %v3395_v55 = vcombine.low %v3387_v22, %v3394_v37  ;;  %v1833_v21 = vsel %vm1802_vm6, %v1776_v60, %v12538_v23  ;;  %v10463_v23 = vld [vmem:[%s19648_s0 + $0x158] sm:$0xff]  ;;  %v20626_v37 = vld [vmem:[#allocation59_spill] sm:$0xff]  ;;  %v2512_v60 = vcombine.high %v12639_v9, %v12639_v9 }
 0x263   :  { %v1890_v52 = vsel %vm1859_vm7, %v1833_v21, %v12571_v58 }
 0x264   :  { %1220 = vrot.lane.b32.xlu1 %v12661_v29, %s10505_s12  ;;  %10297 = vmatmul.mubr.msk.f32.gmra.mrb[30].mxu0 %vm3957_vm12, %v3395_v55  ;;  %v1947_v44 = vsel %vm1916_vm8, %v1890_v52, %v1061_v0  ;;  %v2693_v0 = vrot.slane %v2679_v57, %v11914_v40 }
 0x265   :  { %898 = vrot.lane.b32.xlu0 %v20615_v18, %s10504_s7  ;;  %10299 = vmatprep.mubr.msk.f32.mxu0 %vm10510_vm3, %v20568_v48  ;;  %v2004_v18 = vsel %vm1973_vm9, %v1947_v44, %v1233_v35  ;;  %v10465_v35 = vld [vmem:[%s19648_s0 + $0x98] sm:$0xff]  ;;  %v3396_v44 = vcombine.low %v2512_v60, %v2511_v15 }
 0x266   :  { %v12688_v47 = vpop.permute.xlu1 %888  ;;  %v12690_v11 = vpop.permute.xlu0 %866  ;;  %v2061_v58 = vsel %vm2030_vm10, %v2004_v18, %v1407_v56  ;;  %v1708_v13 = vsel %vm1688_vm5, %v10465_v35, %v20624_v33  ;;  %v2513_v18 = vcombine.high %v2511_v15, %v2511_v15  ;;  %v20632_v35 = vld [vmem:[#allocation2_spill] sm:$0xff] }
 0x267   :  { %v1765_v56 = vsel %vm1745_vm4, %v1708_v13, %v20626_v37 }
 0x268   :  { %1566 = vrot.lane.b32.xlu1 %v20622_v53, %s10508_s16  ;;  %v1822_v55 = vsel %vm1802_vm6, %v1765_v56, %v12598_v43 }
 0x269   :  { %1242 = vrot.lane.b32.xlu0 %v10463_v23, %s10505_s12  ;;  %v1879_v28 = vsel %vm1859_vm7, %v1822_v55, %v12614_v61 }
 0x26a   :  { %v1581_v30 = vpop.permute.xlu1 %1580  ;;  %v1211_v8 = vpop.permute.xlu0 %1210  ;;  %v1936_v5 = vsel %vm1916_vm8, %v1879_v28, %v12663_v26 }
 0x26b   :  { %v2118_v27 = vsel %vm2087_vm11, %v2061_v58, %v1581_v30  ;;  %v1993_v43 = vsel %vm1973_vm9, %v1936_v5, %v1211_v8 }
 0x26c   :  { %v2695_v36 = vcombine.high %v2118_v27, %v2118_v27  ;;  %v2702_v54 = vrot.slane %v2118_v27, %v11914_v40  ;;  %1394 = vrot.lane.b32.xlu1 %v12706_v45, %s10509_s17  ;;  %v3404_v27 = vrot.slane %v3396_v44, %v11914_v40  ;;  %v12856_v44 = vld [vmem:[%s19648_s0 + $0x168] sm:$0xff] }
 0x26d   :  { %1072 = vrot.lane.b32.xlu0 %v20618_v16, %s10506_s13 }
 0x26e   :  { %v12718_v42 = vrot.slane %v2695_v36, %v11914_v40  ;;  %v2710_v1 = vcombine.high %v2702_v54, %v2702_v54  ;;  %v3566_v32 = vcombine.low %v2693_v0, %v2702_v54  ;;  %v12720_v50 = vpop.permute.xlu1 %1040  ;;  %v12722_v38 = vpop.permute.xlu0 %716  ;;  %v20628_v36 = vld [vmem:[#allocation113_spill] sm:$0xff] }
 0x270   :  { %v3567_v12 = vcombine.low %v2710_v1, %v12718_v42  ;;  %v12728_v2 = vpop.f32.mrb[2].mxu0  ;;  %1244 = vrot.lane.b32.xlu1 %v12733_v20, %s10505_s12  ;;  %v3574_v16 = vrot.slane %v3566_v32, %v11914_v40  ;;  %v10466_v1 = vld [vmem:[%s19648_s0 + $0x118] sm:$0xff]  ;;  %v20629_v32 = vld [vmem:[#allocation100_spill] sm:$0xff] }
 0x271   :  { %v10256_v25 = vpop.f32.mrb[3].mxu0  ;;  %1416 = vrot.lane.b32.xlu0 %v20623_v4, %s10509_s17 }
 0x272   :  { %v3581_v19 = vrot.slane %v3567_v12, %v11914_v40  ;;  %v1385_v59 = vpop.permute.xlu1 %1384  ;;  %v1063_v41 = vpop.permute.xlu0 %1062  ;;  %v1720_v12 = vsel %vm1688_vm5, %v10466_v1, %v20629_v32  ;;  %v10467_v25 = vld [vmem:[%s19648_s0 + $0xa0] sm:$0xff] }
 0x273   :  { %v2050_v61 = vsel %vm2030_vm10, %v1993_v43, %v1385_v59 }
 0x274   :  { %1590 = vrot.lane.b32.xlu1 %v20625_v7, %s10508_s16  ;;  %v3582_v22 = vcombine.low %v3574_v16, %v3581_v19  ;;  %v20631_v19 = vld [vmem:[#allocation63_spill] sm:$0xff] }
 0x275   :  { %1568 = vrot.lane.b32.xlu0 %v12743_v3, %s10508_s16  ;;  %v1777_v59 = vsel %vm1745_vm4, %v1720_v12, %v20631_v19 }
 0x276   :  { %v1213_v49 = vpop.permute.xlu1 %1212  ;;  %10330 = vmatmul.mubr.msk.f32.gmra.mrb[2].mxu1 %vm3957_vm12, %v3582_v22  ;;  %v12761_v6 = vpop.permute.xlu0 %890  ;;  %v1834_v33 = vsel %vm1802_vm6, %v1777_v59, %v12648_v62 }
 0x277   :  { %10332 = vmatprep.mubr.msk.f32.mxu1 %vm10510_vm3, %v20568_v48  ;;  %v1891_v37 = vsel %vm1859_vm7, %v1834_v33, %v12688_v47 }
 0x278   :  { %726 = vrot.lane.b32.xlu1 %v10463_v23, %s10502_s27  ;;  %v20627_v23 = vld [vmem:[#allocation39_spill] sm:$0xff]  ;;  %v1948_v15 = vsel %vm1916_vm8, %v1891_v37, %v1063_v41 }
 0x279   :  { %702 = vrot.lane.b32.xlu0 %v12625_v34, %s10502_s27 }
 0x27a   :  { %v1559_v21 = vpop.permute.xlu1 %1558  ;;  %v1235_v52 = vpop.permute.xlu0 %1234 }
 0x27b   :  { %v2107_v57 = vsel %vm2087_vm11, %v2050_v61, %v1559_v21  ;;  %v10468_v61 = vld [vmem:[%s19648_s0 + $0x120] sm:$0xff] }
 0x27c   :  { %v12779_v9 = vrot.slane %v2107_v57, %v11914_v40  ;;  %v12781_v58 = vpop.f32.mrb[4].mxu0  ;;  %876 = vrot.lane.b32.xlu1 %v20619_v39, %s10504_s7  ;;  %v2514_v56 = vcombine.high %v2107_v57, %v2107_v57 }
 0x27d   :  { %v10259_v26 = vpop.f32.mrb[5].mxu0  ;;  %1418 = vrot.lane.b32.xlu0 %v20627_v23, %s10509_s17 }
 0x27e   :  { %v3397_v34 = vcombine.low %v2513_v18, %v12779_v9  ;;  %v12788_v30 = vpop.permute.xlu1 %1064  ;;  %v12790_v8 = vpop.permute.xlu0 %694  ;;  %v2529_v41 = vcombine.high %v12779_v9, %v12779_v9  ;;  %v20634_v18 = vld [vmem:[#allocation153_spill] sm:$0xff]  ;;  %v2711_v26 = vcombine.high %v12718_v42, %v12718_v42 }
 0x280   :  { %v3411_v0 = vrot.slane %v3397_v34, %v11914_v40  ;;  %1592 = vrot.lane.b32.xlu1 %v20628_v36, %s10508_s16 }
 0x281   :  { %900 = vrot.lane.b32.xlu0 %v20623_v4, %s10504_s7  ;;  %v20630_v4 = vld [vmem:[#allocation88_spill] sm:$0xff] }
 0x282   :  { %v1409_v39 = vpop.permute.xlu1 %1408  ;;  %v1387_v54 = vpop.permute.xlu0 %1386  ;;  %v3412_v51 = vcombine.low %v3404_v27, %v3411_v0  ;;  %v1709_v16 = vsel %vm1688_vm5, %v10467_v25, %v20630_v4 }
 0x284   :  { %1050 = vrot.lane.b32.xlu1 %v20622_v53, %s10506_s13  ;;  %10300 = vmatmul.mubr.msk.f32.gmra.mrb[32].mxu0 %vm3957_vm12, %v3412_v51  ;;  %v1766_v53 = vsel %vm1745_vm4, %v1709_v16, %v20632_v35 }
 0x285   :  { %704 = vrot.lane.b32.xlu0 %v12661_v29, %s10502_s27  ;;  %10302 = vmatprep.mubr.msk.f32.mxu0 %vm10510_vm3, %v20568_v48  ;;  %v12821_v13 = vpop.f32.mrb[6].mxu0  ;;  %v1823_v22 = vsel %vm1802_vm6, %v1766_v53, %v12650_v14  ;;  %v2005_v14 = vsel %vm1973_vm9, %v1948_v15, %v1235_v52  ;;  %v47_v15 = vld [vmem:[%s19648_s0 + $0xf0] sm:$0xff] }
 0x286   :  { %v1237_v46 = vpop.permute.xlu1 %1236  ;;  %v10262_v29 = vpop.f32.mrb[7].mxu0  ;;  %v1880_v28 = vsel %vm1859_vm7, %v1823_v22, %v12690_v11  ;;  %v2062_v60 = vsel %vm2030_vm10, %v2005_v14, %v1409_v39  ;;  %v2528_v11 = vrot.slane %v2514_v56, %v11914_v40 }
 0x287   :  { %v12827_v55 = vpop.permute.xlu0 %868  ;;  %v1937_v62 = vsel %vm1916_vm8, %v1880_v28, %v12720_v50  ;;  %v20635_v29 = vld [vmem:[#allocation38_spill] sm:$0xff] }
 0x288   :  { %878 = vrot.lane.b32.xlu1 %v12706_v45, %s10504_s7  ;;  %v1994_v47 = vsel %vm1973_vm9, %v1937_v62, %v1213_v49  ;;  %v3413_v12 = vcombine.low %v2529_v41, %v2528_v11  ;;  %v10470_v11 = vld [vmem:[%s19648_s0 + $0xa8] sm:$0xff] }
 0x289   :  { %1074 = vrot.lane.b32.xlu0 %v20625_v7, %s10506_s13  ;;  %v2051_v45 = vsel %vm2030_vm10, %v1994_v47, %v1387_v54  ;;  %v20633_v7 = vld [vmem:[#allocation104_spill] sm:$0xff]  ;;  %v20636_v41 = vld [vmem:[#allocation87_spill] sm:$0xff] }
 0x28a   :  { %v1583_v5 = vpop.permute.xlu1 %1582  ;;  %v1721_v49 = vsel %vm1688_vm5, %v10468_v61, %v20633_v7  ;;  %v3421_v33 = vrot.slane %v3413_v12, %v11914_v40  ;;  %v20637_v61 = vld [vmem:[#allocation54_spill] sm:$0xff] }
 0x28b   :  { %v2119_v43 = vsel %vm2087_vm11, %v2062_v60, %v1583_v5  ;;  %v1561_v50 = vpop.permute.xlu0 %1560  ;;  %v1778_v9 = vsel %vm1745_vm4, %v1721_v49, %v20634_v18 }
 0x28c   :  { %v2712_v21 = vcombine.high %v2119_v43, %v2119_v43  ;;  %v2719_v52 = vrot.slane %v2119_v43, %v11914_v40  ;;  %v2108_v57 = vsel %vm2087_vm11, %v2051_v45, %v1561_v50  ;;  %1246 = vrot.lane.b32.xlu1 %v12856_v44, %s10505_s12  ;;  %v1835_v0 = vsel %vm1802_vm6, %v1778_v9, %v12722_v38 }
 0x28d   :  { %v2537_v34 = vrot.slane %v2108_v57, %v11914_v40  ;;  %1222 = vrot.lane.b32.xlu0 %v12668_v31, %s10505_s12  ;;  %v12867_v27 = vpop.f32.mrb[8].mxu0  ;;  %v1892_v32 = vsel %vm1859_vm7, %v1835_v0, %v12761_v6  ;;  %v2530_v60 = vcombine.high %v2108_v57, %v2108_v57  ;;  %v1710_v45 = vsel %vm1688_vm5, %v10470_v11, %v20636_v41 }
 0x28e   :  { %v2726_v39 = vrot.slane %v2712_v21, %v11914_v40  ;;  %v2727_v54 = vcombine.high %v2719_v52, %v2719_v52  ;;  %v1411_v51 = vpop.permute.xlu1 %1410  ;;  %v10265_v1 = vpop.f32.mrb[9].mxu0  ;;  %v3583_v42 = vcombine.low %v2711_v26, %v2719_v52  ;;  %v1949_v16 = vsel %vm1916_vm8, %v1892_v32, %v12788_v30 }
 0x28f   :  { %v2545_v25 = vcombine.high %v2537_v34, %v2537_v34  ;;  %v1043_v4 = vpop.permute.xlu0 %1042  ;;  %v2006_v38 = vsel %vm1973_vm9, %v1949_v16, %v1237_v46  ;;  %v1767_v7 = vsel %vm1745_vm4, %v1710_v45, %v20637_v61  ;;  %v20639_v45 = vld [vmem:[#allocation41_spill] sm:$0xff]  ;;  %v20641_v61 = vld [vmem:[#allocation92_spill] sm:$0xff] }
 0x290   :  { %v3584_v19 = vcombine.low %v2727_v54, %v2726_v39  ;;  %1052 = vrot.lane.b32.xlu1 %v12743_v3, %s10506_s13  ;;  %v2063_v6 = vsel %vm2030_vm10, %v2006_v38, %v1411_v51  ;;  %v3591_v22 = vrot.slane %v3583_v42, %v11914_v40  ;;  %v1824_v21 = vsel %vm1802_vm6, %v1767_v7, %v12790_v8  ;;  %v20638_v54 = vld [vmem:[#allocation110_spill] sm:$0xff] }
 0x291   :  { %v3414_v59 = vcombine.low %v2537_v34, %v2545_v25  ;;  %728 = vrot.lane.b32.xlu0 %v12733_v20, %s10502_s27  ;;  %v1881_v9 = vsel %vm1859_vm7, %v1824_v21, %v12827_v55  ;;  %v12928_v34 = vld [vmem:[%s19648_s0 + $0xf8] sm:$0xff]  ;;  %v1340_v55 = vrot.slane %v47_v15, 1  ;;  %v1514_v38 = vrot.slane %v47_v15, 2  ;;  %v20642_v21 = vld [vmem:[#allocation147_spill] sm:$0xff] }
 0x292   :  { %v3598_v35 = vrot.slane %v3584_v19, %v11914_v40  ;;  %v1585_v53 = vpop.permute.xlu1 %1584  ;;  %v1938_v8 = vsel %vm1916_vm8, %v1881_v9, %v1043_v4  ;;  %v1341_v42 = vrot.slane %v12928_v34, 1 }
 0x293   :  { %v3428_v30 = vrot.slane %v3414_v59, %v11914_v40  ;;  %v2120_v37 = vsel %vm2087_vm11, %v2063_v6, %v1585_v53  ;;  %v1215_v3 = vpop.permute.xlu0 %1214  ;;  %v1515_v59 = vrot.slane %v12928_v34, 2 }
 0x294   :  { %v2728_v56 = vcombine.high %v2120_v37, %v2120_v37  ;;  %v2735_v46 = vrot.slane %v2120_v37, %v11914_v40  ;;  %1420 = vrot.lane.b32.xlu1 %v20635_v29, %s10509_s17  ;;  %v3599_v28 = vcombine.low %v3591_v22, %v3598_v35  ;;  %v1995_v51 = vsel %vm1973_vm9, %v1938_v8, %v1215_v3 }
 0x295   :  { %1396 = vrot.lane.b32.xlu0 %v12682_v24, %s10509_s17  ;;  %v3429_v20 = vcombine.low %v3421_v33, %v3428_v30  ;;  %v1342_v53 = vsel %vm142_vm0, %v1340_v55, %v1341_v42  ;;  %v1516_v30 = vsel %vm395_vm1, %v1514_v38, %v1515_v59  ;;  %v20644_v55 = vld [vmem:[#allocation152_spill] sm:$0xff] }
 0x296   :  { %v2742_v62 = vrot.slane %v2728_v56, %v11914_v40  ;;  %v2743_v14 = vcombine.high %v2735_v46, %v2735_v46  ;;  %v12896_v47 = vpop.permute.xlu1 %718  ;;  %10333 = vmatmul.mubr.msk.f32.gmra.mrb[4].mxu1 %vm3957_vm12, %v3599_v28 }
 0x297   :  { %10303 = vmatmul.mubr.msk.f32.gmra.mrb[34].mxu0 %vm3957_vm12, %v3429_v20  ;;  %v12900_v5 = vpop.permute.xlu0 %696  ;;  %10335 = vmatprep.mubr.msk.f32.mxu1 %vm10510_vm3, %v20568_v48 }
 0x298   :  { %v2744_v43 = vcombine.high %v2742_v62, %v2742_v62  ;;  %v3600_v50 = vcombine.low %v2735_v46, %v2743_v14  ;;  %1224 = vrot.lane.b32.xlu1 %v47_v15, %s10505_s12  ;;  %10305 = vmatprep.mubr.msk.f32.mxu0 %vm10510_vm3, %v20568_v48 }
 0x299   :  { %902 = vrot.lane.b32.xlu0 %v20627_v23, %s10504_s7  ;;  %v12912_v49 = vpop.f32.mrb[10].mxu0  ;;  %v2544_v23 = vrot.slane %v2530_v60, %v11914_v40 }
 0x29a   :  { %v3601_v52 = vcombine.low %v2742_v62, %v2744_v43  ;;  %v12918_v57 = vpop.permute.xlu1 %870  ;;  %v10268_v18 = vpop.f32.mrb[11].mxu0  ;;  %v3608_v0 = vrot.slane %v3600_v50, %v11914_v40  ;;  %v20640_v50 = vld [vmem:[#allocation117_spill] sm:$0xff] }
 0x29b   :  { %v1389_v26 = vpop.permute.xlu0 %1388  ;;  %v2546_v25 = vcombine.high %v2544_v23, %v2544_v23 }
 0x29c   :  { %v3615_v39 = vrot.slane %v3601_v52, %v11914_v40  ;;  %1594 = vrot.lane.b32.xlu1 %v20638_v54, %s10508_s16  ;;  %v2052_v1 = vsel %vm2030_vm10, %v1995_v51, %v1389_v26 }
 0x29d   :  { %1570 = vrot.lane.b32.xlu0 %v12725_v10, %s10508_s16  ;;  %v3430_v33 = vcombine.low %v2544_v23, %v2546_v25 }
 0x29e   :  { %v1563_v32 = vpop.permute.xlu1 %1562  ;;  %v3616_v12 = vcombine.low %v3608_v0, %v3615_v39  ;;  %v20643_v0 = vld [vmem:[#allocation103_spill] sm:$0xff] }
 0x29f   :  { %v12941_v4 = vsel %vm2087_vm11, %v2052_v1, %v1563_v32  ;;  %v12943_v16 = vpop.permute.xlu0 %892  ;;  %v3438_v46 = vrot.slane %v3430_v33, %v11914_v40 }
 0x2a0   :  { %v2554_v19 = vrot.slane %v12941_v4, %v11914_v40  ;;  %1076 = vrot.lane.b32.xlu1 %v20628_v36, %s10506_s13  ;;  %10336 = vmatmul.mubr.msk.f32.gmra.mrb[6].mxu1 %vm3957_vm12, %v3616_v12  ;;  %v2547_v26 = vcombine.high %v12941_v4, %v12941_v4 }
 0x2a1   :  { %706 = vrot.lane.b32.xlu0 %v12668_v31, %s10502_s27  ;;  %10338 = vmatprep.mubr.msk.f32.mxu1 %vm10510_vm3, %v20568_v48 }
 0x2a2   :  { %v2562_v35 = vcombine.high %v2554_v19, %v2554_v19  ;;  %v1045_v6 = vpop.permute.xlu1 %1044  ;;  %v2561_v4 = vrot.slane %v2547_v26, %v11914_v40 }
 0x2a3   :  { %v12958_v22 = vpop.permute.xlu0 %720 }
 0x2a4   :  { %v3431_v36 = vcombine.low %v2554_v19, %v2562_v35  ;;  %880 = vrot.lane.b32.xlu1 %v12682_v24, %s10504_s7  ;;  %v12976_v24 = vld [vmem:[%s19648_s0 + $0x170] sm:$0xff] }
 0x2a5   :  { %1398 = vrot.lane.b32.xlu0 %v1342_v53, %s10509_s17  ;;  %v12963_v31 = vpop.f32.mrb[12].mxu0 }
 0x2a6   :  { %v3445_v37 = vrot.slane %v3431_v36, %v11914_v40  ;;  %v12969_v3 = vpop.permute.xlu1 %894  ;;  %v10271_v56 = vpop.f32.mrb[13].mxu0 }
 0x2a7   :  { %v1067_v20 = vpop.permute.xlu0 %1066 }
 0x2a8   :  { %1572 = vrot.lane.b32.xlu1 %v1516_v30, %s10508_s16  ;;  %v3446_v28 = vcombine.low %v3438_v46, %v3445_v37 }
 0x2a9   :  { %1248 = vrot.lane.b32.xlu0 %v12976_v24, %s10505_s12 }
 0x2aa   :  { %v1239_v15 = vpop.permute.xlu1 %1238  ;;  %10306 = vmatmul.mubr.msk.f32.gmra.mrb[36].mxu0 %vm3957_vm12, %v3446_v28  ;;  %v13062_v28 = vld [vmem:[%s19648_s0 + $0x178] sm:$0xff] }
 0x2ab   :  { %v1217_v62 = vpop.permute.xlu0 %1216  ;;  %10308 = vmatprep.mubr.msk.f32.mxu0 %vm10510_vm3, %v20568_v48 }
 0x2ac   :  { %1054 = vrot.lane.b32.xlu1 %v12725_v10, %s10506_s13  ;;  %v12983_v14 = vpop.f32.mrb[14].mxu0 }
 0x2ad   :  { %730 = vrot.lane.b32.xlu0 %v12856_v44, %s10502_s27  ;;  %v10274_v60 = vpop.f32.mrb[15].mxu0  ;;  %v10472_v44 = vld [vmem:[%s19648_s0 + $0xb0] sm:$0xff] }
 0x2ae   :  { %v12989_v11 = vpop.permute.xlu1 %1068  ;;  %v1711_v7 = vsel %vm1688_vm5, %v10472_v44, %v20641_v61  ;;  %v20646_v44 = vld [vmem:[#allocation40_spill] sm:$0xff]  ;;  %v20647_v61 = vld [vmem:[#allocation154_spill] sm:$0xff] }
 0x2af   :  { %v12991_v41 = vpop.permute.xlu0 %698 }
 0x2b0   :  { %904 = vrot.lane.b32.xlu1 %v20635_v29, %s10504_s7  ;;  %v1768_v29 = vsel %vm1745_vm4, %v1711_v7, %v20642_v21 }
 0x2b1   :  { %1422 = vrot.lane.b32.xlu0 %v20639_v45, %s10509_s17  ;;  %v1825_v18 = vsel %vm1802_vm6, %v1768_v29, %v12900_v5  ;;  %v10473_v5 = vld [vmem:[%s19648_s0 + $0x128] sm:$0xff] }
 0x2b2   :  { %v1413_v10 = vpop.permute.xlu1 %1412  ;;  %v1882_v23 = vsel %vm1859_vm7, %v1825_v18, %v12918_v57  ;;  %v1722_v39 = vsel %vm1688_vm5, %v10473_v5, %v20643_v0 }
 0x2b3   :  { %v1391_v43 = vpop.permute.xlu0 %1390  ;;  %v1939_v8 = vsel %vm1916_vm8, %v1882_v23, %v1045_v6 }
 0x2b4   :  { %1596 = vrot.lane.b32.xlu1 %v20640_v50, %s10508_s16  ;;  %v1996_v57 = vsel %vm1973_vm9, %v1939_v8, %v1217_v62 }
 0x2b5   :  { %1226 = vrot.lane.b32.xlu0 %v12928_v34, %s10505_s12  ;;  %v2053_v1 = vsel %vm2030_vm10, %v1996_v57, %v1391_v43 }
 0x2b6   :  { %v1241_v52 = vpop.permute.xlu1 %1240 }
 0x2b7   :  { %v13010_v9 = vpop.permute.xlu0 %872 }
 0x2b8   :  { %1078 = vrot.lane.b32.xlu1 %v20638_v54, %s10506_s13  ;;  %v1779_v54 = vsel %vm1745_vm4, %v1722_v39, %v20644_v55 }
 0x2b9   :  { %732 = vrot.lane.b32.xlu0 %v12976_v24, %s10502_s27  ;;  %v1836_v12 = vsel %vm1802_vm6, %v1779_v54, %v12896_v47 }
 0x2ba   :  { %v1587_v51 = vpop.permute.xlu1 %1586  ;;  %v1893_v19 = vsel %vm1859_vm7, %v1836_v12, %v12943_v16 }
 0x2bb   :  { %v1565_v32 = vpop.permute.xlu0 %1564  ;;  %v1950_v6 = vsel %vm1916_vm8, %v1893_v19, %v1067_v20 }
 0x2bc   :  { %v2110_v25 = vsel %vm2087_vm11, %v2053_v1, %v1565_v32  ;;  %906 = vrot.lane.b32.xlu1 %v20639_v45, %s10504_s7  ;;  %v2007_v53 = vsel %vm1973_vm9, %v1950_v6, %v1239_v15  ;;  %v20645_v45 = vld [vmem:[#allocation108_spill] sm:$0xff]  ;;  %v20649_v32 = vld [vmem:[#allocation121_spill] sm:$0xff] }
 0x2bd   :  { %v2563_v38 = vcombine.high %v2110_v25, %v2110_v25  ;;  %v2570_v35 = vrot.slane %v2110_v25, %v11914_v40  ;;  %1400 = vrot.lane.b32.xlu0 %v1341_v42, %s10509_s17  ;;  %v2064_v16 = vsel %vm2030_vm10, %v2007_v53, %v1413_v10  ;;  %v20650_v25 = vld [vmem:[#allocation43_spill] sm:$0xff] }
 0x2be   :  { %v13043_v47 = vpop.permute.xlu1 %722  ;;  %v2121_v42 = vsel %vm2087_vm11, %v2064_v16, %v1587_v51  ;;  %v10477_v16 = vld [vmem:[%s19648_s0 + $0xb8] sm:$0xff] }
 0x2bf   :  { %v13047_v33 = vrot.slane %v2563_v38, %v11914_v40  ;;  %v2578_v36 = vcombine.high %v2570_v35, %v2570_v35  ;;  %v3447_v30 = vcombine.low %v2561_v4, %v2570_v35  ;;  %v13049_v37 = vpop.permute.xlu0 %700  ;;  %v2752_v43 = vrot.slane %v2121_v42, %v11914_v40 }
 0x2c0   :  { %v13052_v56 = vpop.f32.mrb[16].mxu0  ;;  %1574 = vrot.lane.b32.xlu1 %v1515_v59, %s10508_s16  ;;  %v10475_v59 = vld [vmem:[%s19648_s0 + $0x130] sm:$0xff]  ;;  %v2745_v5 = vcombine.high %v2121_v42, %v2121_v42  ;;  %v20651_v42 = vld [vmem:[#allocation91_spill] sm:$0xff] }
 0x2c1   :  { %v3448_v46 = vcombine.low %v2578_v36, %v13047_v33  ;;  %v10277_v20 = vpop.f32.mrb[17].mxu0  ;;  %1250 = vrot.lane.b32.xlu0 %v13062_v28, %s10505_s12  ;;  %v3455_v62 = vrot.slane %v3447_v30, %v11914_v40  ;;  %v1723_v10 = vsel %vm1688_vm5, %v10475_v59, %v20645_v45  ;;  %v2760_v0 = vcombine.high %v2752_v43, %v2752_v43 }
 0x2c2   :  { %v1415_v15 = vpop.permute.xlu1 %1414  ;;  %v1780_v7 = vsel %vm1745_vm4, %v1723_v10, %v20647_v61  ;;  %v2759_v55 = vrot.slane %v2745_v5, %v11914_v40  ;;  %v20652_v20 = vld [vmem:[#allocation146_spill] sm:$0xff]  ;;  %v13155_v61 = vld [vmem:[%s19648_s0 + $0x188] sm:$0xff] }
 0x2c3   :  { %v3462_v60 = vrot.slane %v3448_v46, %v11914_v40  ;;  %v1047_v34 = vpop.permute.xlu0 %1046  ;;  %v1837_v29 = vsel %vm1802_vm6, %v1780_v7, %v12958_v22  ;;  %v3617_v54 = vcombine.low %v2752_v43, %v2760_v0  ;;  %v1712_v46 = vsel %vm1688_vm5, %v10477_v16, %v20651_v42  ;;  %v20653_v5 = vld [vmem:[#allocation42_spill] sm:$0xff] }
 0x2c4   :  { %1424 = vrot.lane.b32.xlu1 %v20646_v44, %s10509_s17  ;;  %v1894_v23 = vsel %vm1859_vm7, %v1837_v29, %v12969_v3  ;;  %v13099_v3 = vld [vmem:[%s19648_s0 + $0x180] sm:$0xff] }
 0x2c5   :  { %1080 = vrot.lane.b32.xlu0 %v20640_v50, %s10506_s13  ;;  %v3463_v21 = vcombine.low %v3455_v62, %v3462_v60  ;;  %v1951_v8 = vsel %vm1916_vm8, %v1894_v23, %v12989_v11  ;;  %v20648_v50 = vld [vmem:[#allocation114_spill] sm:$0xff]  ;;  %v3625_v35 = vrot.slane %v3617_v54, %v11914_v40  ;;  %v20654_v54 = vld [vmem:[#allocation95_spill] sm:$0xff] }
 0x2c6   :  { %v13082_v18 = vpop.permute.xlu1 %896  ;;  %v2008_v22 = vsel %vm1973_vm9, %v1951_v8, %v1241_v52  ;;  %v20658_v42 = vld [vmem:[#allocation6_spill] sm:$0xff] }
 0x2c7   :  { %10309 = vmatmul.mubr.msk.f32.gmra.mrb[38].mxu0 %vm3957_vm12, %v3463_v21  ;;  %v13087_v26 = vpop.permute.xlu0 %874  ;;  %v2065_v11 = vsel %vm2030_vm10, %v2008_v22, %v1415_v15  ;;  %v1769_v15 = vsel %vm1745_vm4, %v1712_v46, %v20652_v20  ;;  %v13197_v20 = vld [vmem:[%s19648_s0 + $0x190] sm:$0xff] }
 0x2c8   :  { %1598 = vrot.lane.b32.xlu1 %v20648_v50, %s10508_s16  ;;  %10311 = vmatprep.mubr.msk.f32.mxu0 %vm10510_vm3, %v20568_v48  ;;  %v1826_v62 = vsel %vm1802_vm6, %v1769_v15, %v12991_v41 }
 0x2c9   :  { %1252 = vrot.lane.b32.xlu0 %v13099_v3, %s10505_s12  ;;  %v1883_v45 = vsel %vm1859_vm7, %v1826_v62, %v13010_v9 }
 0x2ca   :  { %v1589_v39 = vpop.permute.xlu1 %1588 }
 0x2cb   :  { %v13105_v57 = vsel %vm2087_vm11, %v2065_v11, %v1589_v39  ;;  %v1219_v51 = vpop.permute.xlu0 %1218 }
 0x2cc   :  { %v13110_v52 = vrot.slane %v13105_v57, %v11914_v40  ;;  %v13112_v1 = vpop.f32.mrb[18].mxu0  ;;  %1600 = vrot.lane.b32.xlu1 %v20649_v32, %s10508_s16 }
 0x2cd   :  { %v10280_v12 = vpop.f32.mrb[19].mxu0  ;;  %1426 = vrot.lane.b32.xlu0 %v20650_v25, %s10509_s17 }
 0x2ce   :  { %v3618_v4 = vcombine.low %v2759_v55, %v13110_v52  ;;  %v13119_v19 = vpop.permute.xlu1 %1048 }
 0x2cf   :  { %v13121_v38 = vpop.permute.xlu0 %724 }
 0x2d0   :  { %v3632_v6 = vrot.slane %v3618_v4, %v11914_v40  ;;  %908 = vrot.lane.b32.xlu1 %v20646_v44, %s10504_s7  ;;  %v1940_v44 = vsel %vm1916_vm8, %v1883_v45, %v1047_v34  ;;  %v2579_v34 = vcombine.high %v13047_v33, %v13047_v33  ;;  %v10479_v33 = vld [vmem:[%s19648_s0 + $0xc0] sm:$0xff] }
 0x2d1   :  { %734 = vrot.lane.b32.xlu0 %v13062_v28, %s10502_s27  ;;  %v1997_v41 = vsel %vm1973_vm9, %v1940_v44, %v1219_v51  ;;  %v1713_v12 = vsel %vm1688_vm5, %v10479_v33, %v20654_v54 }
 0x2d2   :  { %v1393_v53 = vpop.permute.xlu1 %1392  ;;  %v3633_v36 = vcombine.low %v3625_v35, %v3632_v6  ;;  %v2761_v35 = vcombine.high %v13105_v57, %v13105_v57 }
 0x2d3   :  { %v1071_v30 = vpop.permute.xlu0 %1070  ;;  %v2054_v9 = vsel %vm2030_vm10, %v1997_v41, %v1393_v53  ;;  %v20656_v53 = vld [vmem:[#allocation118_spill] sm:$0xff] }
 0x2d4   :  { %1082 = vrot.lane.b32.xlu1 %v20648_v50, %s10506_s13  ;;  %10339 = vmatmul.mubr.msk.f32.gmra.mrb[8].mxu1 %vm3957_vm12, %v3633_v36  ;;  %v20657_v36 = vld [vmem:[#allocation148_spill] sm:$0xff] }
 0x2d5   :  { %736 = vrot.lane.b32.xlu0 %v13099_v3, %s10502_s27  ;;  %10341 = vmatprep.mubr.msk.f32.mxu1 %vm10510_vm3, %v20568_v48  ;;  %v13145_v60 = vpop.f32.mrb[20].mxu0  ;;  %v1770_v16 = vsel %vm1745_vm4, %v1713_v12, %v20657_v36  ;;  %v10482_v36 = vld [vmem:[%s19648_s0 + $0x140] sm:$0xff] }
 0x2d6   :  { %v1221_v59 = vpop.permute.xlu1 %1220  ;;  %v10283_v10 = vpop.f32.mrb[21].mxu0  ;;  %v1827_v15 = vsel %vm1802_vm6, %v1770_v16, %v13049_v37  ;;  %v20659_v37 = vld [vmem:[#allocation45_spill] sm:$0xff]  ;;  %v20661_v16 = vld [vmem:[#allocation112_spill] sm:$0xff] }
 0x2d7   :  { %v13149_v43 = vpop.permute.xlu0 %898  ;;  %v1884_v41 = vsel %vm1859_vm7, %v1827_v15, %v13087_v26 }
 0x2d8   :  { %1254 = vrot.lane.b32.xlu1 %v13155_v61, %s10505_s12 }
 0x2d9   :  { %910 = vrot.lane.b32.xlu0 %v20650_v25, %s10504_s7  ;;  %v20655_v25 = vld [vmem:[#allocation107_spill] sm:$0xff] }
 0x2da   :  { %v1567_v7 = vpop.permute.xlu1 %1566 }
 0x2db   :  { %v2111_v21 = vsel %vm2087_vm11, %v2054_v9, %v1567_v7  ;;  %v1243_v29 = vpop.permute.xlu0 %1242  ;;  %v2775_v7 = vrot.slane %v2761_v35, %v11914_v40 }
 0x2dc   :  { %v2580_v23 = vcombine.high %v2111_v21, %v2111_v21  ;;  %v2587_v8 = vrot.slane %v2111_v21, %v11914_v40  ;;  %1428 = vrot.lane.b32.xlu1 %v20653_v5, %s10509_s17 }
 0x2dd   :  { %1084 = vrot.lane.b32.xlu0 %v20649_v32, %s10506_s13  ;;  %v13171_v0 = vpop.f32.mrb[22].mxu0  ;;  %v10480_v32 = vld [vmem:[%s19648_s0 + $0x138] sm:$0xff] }
 0x2de   :  { %v2594_v50 = vrot.slane %v2580_v23, %v11914_v40  ;;  %v2595_v22 = vcombine.high %v2587_v8, %v2587_v8  ;;  %v3464_v11 = vcombine.low %v2579_v34, %v2587_v8  ;;  %v1395_v39 = vpop.permute.xlu1 %1394  ;;  %v10286_v51 = vpop.f32.mrb[23].mxu0  ;;  %v1724_v4 = vsel %vm1688_vm5, %v10480_v32, %v20655_v25 }
 0x2df   :  { %v13174_v55 = vpop.permute.xlu0 %1072  ;;  %v1781_v46 = vsel %vm1745_vm4, %v1724_v4, %v20658_v42  ;;  %v1941_v23 = vsel %vm1916_vm8, %v1884_v41, %v13119_v19  ;;  %v1725_v42 = vsel %vm1688_vm5, %v10482_v36, %v20661_v16 }
 0x2e0   :  { %v3465_v6 = vcombine.low %v2595_v22, %v2594_v50  ;;  %1602 = vrot.lane.b32.xlu1 %v20656_v53, %s10508_s16  ;;  %v1838_v57 = vsel %vm1802_vm6, %v1781_v46, %v13043_v47  ;;  %v3472_v62 = vrot.slane %v3464_v11, %v11914_v40  ;;  %v2776_v47 = vcombine.high %v13110_v52, %v13110_v52 }
 0x2e1   :  { %1256 = vrot.lane.b32.xlu0 %v13197_v20, %s10505_s12  ;;  %v1895_v44 = vsel %vm1859_vm7, %v1838_v57, %v13082_v18  ;;  %v1998_v26 = vsel %vm1973_vm9, %v1941_v23, %v1221_v59  ;;  %v20660_v59 = vld [vmem:[#allocation125_spill] sm:$0xff]  ;;  %v20662_v57 = vld [vmem:[#allocation155_spill] sm:$0xff] }
 0x2e2   :  { %v3479_v45 = vrot.slane %v3465_v6, %v11914_v40  ;;  %v1245_v10 = vpop.permute.xlu1 %1244  ;;  %v1952_v21 = vsel %vm1916_vm8, %v1895_v44, %v1071_v30  ;;  %v2055_v52 = vsel %vm2030_vm10, %v1998_v26, %v1395_v39  ;;  %v3634_v19 = vcombine.low %v2776_v47, %v2775_v7  ;;  %v13267_v23 = vld [vmem:[%s19648_s0 + $0x198] sm:$0xff] }
 0x2e3   :  { %v1417_v9 = vpop.permute.xlu0 %1416  ;;  %v2009_v18 = vsel %vm1973_vm9, %v1952_v21, %v1243_v29  ;;  %v2777_v29 = vcombine.high %v2775_v7, %v2775_v7  ;;  %v1782_v15 = vsel %vm1745_vm4, %v1725_v42, %v20662_v57  ;;  %v20665_v42 = vld [vmem:[#allocation47_spill] sm:$0xff] }
 0x2e4   :  { %1430 = vrot.lane.b32.xlu1 %v20659_v37, %s10509_s17  ;;  %v3480_v34 = vcombine.low %v3472_v62, %v3479_v45  ;;  %v2066_v8 = vsel %vm2030_vm10, %v2009_v18, %v1417_v9  ;;  %v1839_v44 = vsel %vm1802_vm6, %v1782_v15, %v13121_v38  ;;  %v20666_v15 = vld [vmem:[#allocation129_spill] sm:$0xff] }
 0x2e5   :  { %738 = vrot.lane.b32.xlu0 %v13155_v61, %s10502_s27  ;;  %v1896_v7 = vsel %vm1859_vm7, %v1839_v44, %v13149_v43 }
 0x2e6   :  { %v1591_v50 = vpop.permute.xlu1 %1590  ;;  %10312 = vmatmul.mubr.msk.f32.gmra.mrb[40].mxu0 %vm3957_vm12, %v3480_v34  ;;  %v1953_v34 = vsel %vm1916_vm8, %v1896_v7, %v13174_v55 }
 0x2e7   :  { %v2123_v30 = vsel %vm2087_vm11, %v2066_v8, %v1591_v50  ;;  %v1569_v22 = vpop.permute.xlu0 %1568  ;;  %10314 = vmatprep.mubr.msk.f32.mxu0 %vm10510_vm3, %v20568_v48  ;;  %v2010_v38 = vsel %vm1973_vm9, %v1953_v34, %v1245_v10  ;;  %v10486_v34 = vld [vmem:[%s19648_s0 + $0x148] sm:$0xff] }
 0x2e8   :  { %v2785_v11 = vrot.slane %v2123_v30, %v11914_v40  ;;  %v2112_v51 = vsel %vm2087_vm11, %v2055_v52, %v1569_v22  ;;  %1604 = vrot.lane.b32.xlu1 %v20660_v59, %s10508_s16  ;;  %v2778_v47 = vcombine.high %v2123_v30, %v2123_v30 }
 0x2e9   :  { %v2596_v33 = vcombine.high %v2112_v51, %v2112_v51  ;;  %v2603_v54 = vrot.slane %v2112_v51, %v11914_v40  ;;  %912 = vrot.lane.b32.xlu0 %v20653_v5, %s10504_s7  ;;  %v13236_v39 = vpop.f32.mrb[24].mxu0  ;;  %v3642_v5 = vrot.slane %v3634_v19, %v11914_v40  ;;  %v20663_v19 = vld [vmem:[#allocation44_spill] sm:$0xff] }
 0x2ea   :  { %v3635_v12 = vcombine.low %v2777_v29, %v2785_v11  ;;  %v13238_v32 = vpop.permute.xlu1 %726  ;;  %v10289_v25 = vpop.f32.mrb[25].mxu0  ;;  %v2792_v8 = vrot.slane %v2778_v47, %v11914_v40  ;;  %v2793_v50 = vcombine.high %v2785_v11, %v2785_v11 }
 0x2eb   :  { %v2610_v4 = vrot.slane %v2596_v33, %v11914_v40  ;;  %v2611_v35 = vcombine.high %v2603_v54, %v2603_v54  ;;  %v13241_v6 = vpop.permute.xlu0 %702 }
 0x2ec   :  { %v3649_v46 = vrot.slane %v3635_v12, %v11914_v40  ;;  %1086 = vrot.lane.b32.xlu1 %v20656_v53, %s10506_s13  ;;  %v3651_v11 = vcombine.low %v2793_v50, %v2792_v8  ;;  %v13297_v12 = vld [vmem:[%s19648_s0 + $0x1a0] sm:$0xff]  ;;  %v10487_v8 = vld [vmem:[%s19648_s0 + $0xc8] sm:$0xff] }
 0x2ed   :  { %v2612_v62 = vcombine.high %v2610_v4, %v2610_v4  ;;  %v3481_v45 = vcombine.low %v2603_v54, %v2611_v35  ;;  %740 = vrot.lane.b32.xlu0 %v13197_v20, %s10502_s27  ;;  %v20664_v54 = vld [vmem:[#allocation122_spill] sm:$0xff] }
 0x2ee   :  { %v13258_v41 = vpop.permute.xlu1 %876  ;;  %v3650_v9 = vcombine.low %v3642_v5, %v3649_v46  ;;  %v3659_v36 = vrot.slane %v3651_v11, %v11914_v40  ;;  %v20670_v50 = vld [vmem:[#allocation94_spill] sm:$0xff] }
 0x2ef   :  { %v3482_v21 = vcombine.low %v2610_v4, %v2612_v62  ;;  %v1419_v53 = vpop.permute.xlu0 %1418  ;;  %v3489_v43 = vrot.slane %v3481_v45, %v11914_v40 }
 0x2f0   :  { %1258 = vrot.lane.b32.xlu1 %v13267_v23, %s10505_s12  ;;  %10342 = vmatmul.mubr.msk.f32.gmra.mrb[10].mxu1 %vm3957_vm12, %v3650_v9  ;;  %v2067_v55 = vsel %vm2030_vm10, %v2010_v38, %v1419_v53  ;;  %v13325_v9 = vld [vmem:[%s19648_s0 + $0x1a8] sm:$0xff] }
 0x2f1   :  { %v3496_v18 = vrot.slane %v3482_v21, %v11914_v40  ;;  %914 = vrot.lane.b32.xlu0 %v20659_v37, %s10504_s7  ;;  %10344 = vmatprep.mubr.msk.f32.mxu1 %vm10510_vm3, %v20568_v48  ;;  %v20667_v38 = vld [vmem:[#allocation111_spill] sm:$0xff] }
 0x2f2   :  { %v1593_v26 = vpop.permute.xlu1 %1592 }
 0x2f3   :  { %v2124_v52 = vsel %vm2087_vm11, %v2067_v55, %v1593_v26  ;;  %v901_v30 = vpop.permute.xlu0 %900  ;;  %v3497_v10 = vcombine.low %v3489_v43, %v3496_v18  ;;  %v1726_v43 = vsel %vm1688_vm5, %v10486_v34, %v20667_v38  ;;  %v20668_v18 = vld [vmem:[#allocation46_spill] sm:$0xff]  ;;  %v20669_v55 = vld [vmem:[#allocation60_spill] sm:$0xff] }
 0x2f4   :  { %v2801_v22 = vrot.slane %v2124_v52, %v11914_v40  ;;  %1432 = vrot.lane.b32.xlu1 %v20663_v19, %s10509_s17  ;;  %v2794_v47 = vcombine.high %v2124_v52, %v2124_v52  ;;  %v1783_v26 = vsel %vm1745_vm4, %v1726_v43, %v20669_v55  ;;  %v1714_v52 = vsel %vm1688_vm5, %v10487_v8, %v20670_v50  ;;  %v10489_v55 = vld [vmem:[%s19648_s0 + $0xd0] sm:$0xff] }
 0x2f5   :  { %1088 = vrot.lane.b32.xlu0 %v20660_v59, %s10506_s13  ;;  %10315 = vmatmul.mubr.msk.f32.gmra.mrb[42].mxu0 %vm3957_vm12, %v3497_v10  ;;  %v1840_v10 = vsel %vm1802_vm6, %v1783_v26, %v13238_v32  ;;  %v20673_v26 = vld [vmem:[#allocation97_spill] sm:$0xff] }
 0x2f6   :  { %v2809_v37 = vcombine.high %v2801_v22, %v2801_v22  ;;  %v1051_v29 = vpop.permute.xlu1 %1050  ;;  %10317 = vmatprep.mubr.msk.f32.mxu0 %vm10510_vm3, %v20568_v48  ;;  %v1715_v8 = vsel %vm1688_vm5, %v10489_v55, %v20673_v26  ;;  %v20677_v55 = vld [vmem:[#allocation116_spill] sm:$0xff] }
 0x2f7   :  { %v13290_v51 = vpop.permute.xlu0 %704 }
 0x2f8   :  { %v3652_v33 = vcombine.low %v2801_v22, %v2809_v37  ;;  %1606 = vrot.lane.b32.xlu1 %v20664_v54, %s10508_s16  ;;  %v2808_v22 = vrot.slane %v2794_v47, %v11914_v40  ;;  %v20671_v37 = vld [vmem:[#allocation4_spill] sm:$0xff] }
 0x2f9   :  { %1260 = vrot.lane.b32.xlu0 %v13297_v12, %s10505_s12  ;;  %v13301_v59 = vpop.f32.mrb[26].mxu0  ;;  %v1771_v11 = vsel %vm1745_vm4, %v1714_v52, %v20671_v37  ;;  %v20675_v37 = vld [vmem:[#allocation149_spill] sm:$0xff] }
 0x2fa   :  { %v3666_v25 = vrot.slane %v3652_v33, %v11914_v40  ;;  %v13304_v4 = vpop.permute.xlu1 %878  ;;  %v10292_v35 = vpop.f32.mrb[27].mxu0  ;;  %v1897_v33 = vsel %vm1859_vm7, %v1840_v10, %v901_v30  ;;  %v20674_v10 = vld [vmem:[#allocation49_spill] sm:$0xff] }
 0x2fb   :  { %v1075_v16 = vpop.permute.xlu0 %1074 }
 0x2fc   :  { %1434 = vrot.lane.b32.xlu1 %v20665_v42, %s10509_s17  ;;  %v3667_v5 = vcombine.low %v3659_v36, %v3666_v25  ;;  %v1828_v25 = vsel %vm1802_vm6, %v1771_v11, %v13241_v6  ;;  %v1954_v35 = vsel %vm1916_vm8, %v1897_v33, %v1075_v16  ;;  %v20672_v36 = vld [vmem:[#allocation126_spill] sm:$0xff] }
 0x2fd   :  { %742 = vrot.lane.b32.xlu0 %v13267_v23, %s10502_s27  ;;  %v1885_v32 = vsel %vm1859_vm7, %v1828_v25, %v13258_v41 }
 0x2fe   :  { %v1247_v46 = vpop.permute.xlu1 %1246  ;;  %10345 = vmatmul.mubr.msk.f32.gmra.mrb[12].mxu1 %vm3957_vm12, %v3667_v5  ;;  %v1942_v30 = vsel %vm1916_vm8, %v1885_v32, %v1051_v29 }
 0x2ff   :  { %v1223_v57 = vpop.permute.xlu0 %1222  ;;  %10347 = vmatprep.mubr.msk.f32.mxu1 %vm10510_vm3, %v20568_v48  ;;  %v2011_v5 = vsel %vm1973_vm9, %v1954_v35, %v1247_v46 }
 0x300   :  { %1608 = vrot.lane.b32.xlu1 %v20666_v15, %s10508_s16  ;;  %v1999_v6 = vsel %vm1973_vm9, %v1942_v30, %v1223_v57 }
 0x301   :  { %916 = vrot.lane.b32.xlu0 %v20663_v19, %s10504_s7 }
 0x302   :  { %v1053_v62 = vpop.permute.xlu1 %1052 }
 0x303   :  { %v13318_v45 = vpop.permute.xlu0 %728 }
 0x304   :  { %v13320_v44 = vpop.f32.mrb[28].mxu0  ;;  %1262 = vrot.lane.b32.xlu1 %v13325_v9, %s10505_s12 }
 0x305   :  { %v10295_v7 = vpop.f32.mrb[29].mxu0  ;;  %1090 = vrot.lane.b32.xlu0 %v20664_v54, %s10506_s13 }
 0x306   :  { %v1421_v21 = vpop.permute.xlu1 %1420  ;;  %v2810_v7 = vcombine.high %v2808_v22, %v2808_v22 }
 0x307   :  { %v1397_v53 = vpop.permute.xlu0 %1396  ;;  %v2068_v47 = vsel %vm2030_vm10, %v2011_v5, %v1421_v21 }
 0x308   :  { %1436 = vrot.lane.b32.xlu1 %v20668_v18, %s10509_s17  ;;  %v2056_v43 = vsel %vm2030_vm10, %v1999_v6, %v1397_v53  ;;  %v3668_v46 = vcombine.low %v2808_v22, %v2810_v7 }
 0x309   :  { %744 = vrot.lane.b32.xlu0 %v13297_v12, %s10502_s27 }
 0x30a   :  { %v1225_v19 = vpop.permute.xlu1 %1224  ;;  %v3676_v22 = vrot.slane %v3668_v46, %v11914_v40 }
 0x30b   :  { %v13353_v54 = vpop.permute.xlu0 %902 }
 0x30c   :  { %1610 = vrot.lane.b32.xlu1 %v20672_v36, %s10508_s16 }
 0x30d   :  { %918 = vrot.lane.b32.xlu0 %v20665_v42, %s10504_s7  ;;  %v13377_v42 = vld [vmem:[%s19648_s0 + $0x1b0] sm:$0xff] }
 0x30e   :  { %v1595_v34 = vpop.permute.xlu1 %1594 }
 0x30f   :  { %v13369_v16 = vsel %vm2087_vm11, %v2068_v47, %v1595_v34  ;;  %v1571_v38 = vpop.permute.xlu0 %1570  ;;  %v20676_v47 = vld [vmem:[#allocation133_spill] sm:$0xff] }
 0x310   :  { %v2818_v41 = vrot.slane %v13369_v16, %v11914_v40  ;;  %1264 = vrot.lane.b32.xlu1 %v13377_v42, %s10505_s12  ;;  %v2113_v29 = vsel %vm2087_vm11, %v2056_v43, %v1571_v38 }
 0x311   :  { %1092 = vrot.lane.b32.xlu0 %v20666_v15, %s10506_s13  ;;  %v2620_v52 = vrot.slane %v2113_v29, %v11914_v40  ;;  %v1772_v15 = vsel %vm1745_vm4, %v1715_v8, %v20675_v37  ;;  %v2613_v7 = vcombine.high %v2113_v29, %v2113_v29 }
 0x312   :  { %v2826_v57 = vcombine.high %v2818_v41, %v2818_v41  ;;  %v1077_v21 = vpop.permute.xlu1 %1076  ;;  %v1829_v11 = vsel %vm1802_vm6, %v1772_v15, %v13290_v51 }
 0x313   :  { %v13384_v53 = vpop.permute.xlu0 %706  ;;  %v1886_v35 = vsel %vm1859_vm7, %v1829_v11, %v13304_v4  ;;  %v2628_v30 = vcombine.high %v2620_v52, %v2620_v52 }
 0x314   :  { %v3669_v50 = vcombine.low %v2818_v41, %v2826_v57  ;;  %1438 = vrot.lane.b32.xlu1 %v20674_v10, %s10509_s17  ;;  %v1943_v5 = vsel %vm1916_vm8, %v1886_v35, %v1053_v62  ;;  %v2627_v62 = vrot.slane %v2613_v7, %v11914_v40  ;;  %v10490_v57 = vld [vmem:[%s19648_s0 + $0x150] sm:$0xff] }
 0x315   :  { %746 = vrot.lane.b32.xlu0 %v13325_v9, %s10502_s27  ;;  %v2000_v6 = vsel %vm1973_vm9, %v1943_v5, %v1225_v19  ;;  %v3498_v41 = vcombine.low %v2620_v52, %v2628_v30  ;;  %v1727_v26 = vsel %vm1688_vm5, %v10490_v57, %v20677_v55  ;;  %v20678_v52 = vld [vmem:[#allocation156_spill] sm:$0xff]  ;;  %v10493_v57 = vld [vmem:[%s19648_s0 + $0xd8] sm:$0xff] }
 0x316   :  { %v3683_v33 = vrot.slane %v3669_v50, %v11914_v40  ;;  %v13402_v25 = vpop.permute.xlu1 %880  ;;  %v1784_v37 = vsel %vm1745_vm4, %v1727_v26, %v20678_v52  ;;  %v20679_v7 = vld [vmem:[#allocation48_spill] sm:$0xff]  ;;  %v20682_v52 = vld [vmem:[#allocation137_spill] sm:$0xff] }
 0x317   :  { %v1399_v32 = vpop.permute.xlu0 %1398  ;;  %v3506_v8 = vrot.slane %v3498_v41, %v11914_v40  ;;  %v1841_v15 = vsel %vm1802_vm6, %v1784_v37, %v13318_v45  ;;  %v20681_v55 = vld [vmem:[#allocation96_spill] sm:$0xff] }
 0x318   :  { %1612 = vrot.lane.b32.xlu1 %v20676_v47, %s10508_s16  ;;  %v3684_v34 = vcombine.low %v3676_v22, %v3683_v33  ;;  %v2057_v51 = vsel %vm2030_vm10, %v2000_v6, %v1399_v32  ;;  %v1898_v33 = vsel %vm1859_vm7, %v1841_v15, %v13353_v54  ;;  %v2811_v32 = vcombine.high %v13369_v16, %v13369_v16  ;;  %v20683_v37 = vld [vmem:[#allocation56_spill] sm:$0xff] }
 0x319   :  { %920 = vrot.lane.b32.xlu0 %v20668_v18, %s10504_s7  ;;  %v1955_v5 = vsel %vm1916_vm8, %v1898_v33, %v1077_v21  ;;  %v1716_v26 = vsel %vm1688_vm5, %v10493_v57, %v20681_v55 }
 0x31a   :  { %v1573_v38 = vpop.permute.xlu1 %1572  ;;  %10348 = vmatmul.mubr.msk.f32.gmra.mrb[14].mxu1 %vm3957_vm12, %v3684_v34  ;;  %v2825_v21 = vrot.slane %v2811_v32, %v11914_v40  ;;  %v1773_v15 = vsel %vm1745_vm4, %v1716_v26, %v20683_v37 }
 0x31b   :  { %v2114_v4 = vsel %vm2087_vm11, %v2057_v51, %v1573_v38  ;;  %v1249_v43 = vpop.permute.xlu0 %1248  ;;  %10350 = vmatprep.mubr.msk.f32.mxu1 %vm10510_vm3, %v20568_v48  ;;  %v20680_v51 = vld [vmem:[#allocation130_spill] sm:$0xff] }
 0x31c   :  { %v13419_v29 = vrot.slane %v2114_v4, %v11914_v40  ;;  %1094 = vrot.lane.b32.xlu1 %v20672_v36, %s10506_s13  ;;  %v13438_v36 = vld [vmem:[%s19648_s0 + $0x1b8] sm:$0xff] }
 0x31d   :  { %748 = vrot.lane.b32.xlu0 %v13377_v42, %s10502_s27 }
 0x31e   :  { %v3499_v18 = vcombine.low %v2627_v62, %v13419_v29  ;;  %v1055_v19 = vpop.permute.xlu1 %1054 }
 0x31f   :  { %v13426_v46 = vpop.permute.xlu0 %730 }
 0x320   :  { %v3513_v50 = vrot.slane %v3499_v18, %v11914_v40  ;;  %1266 = vrot.lane.b32.xlu1 %v13438_v36, %s10505_s12 }
 0x321   :  { %922 = vrot.lane.b32.xlu0 %v20674_v10, %s10504_s7  ;;  %v2012_v10 = vsel %vm1973_vm9, %v1955_v5, %v1249_v43 }
 0x322   :  { %v13448_v22 = vpop.permute.xlu1 %904  ;;  %v3514_v11 = vcombine.low %v3506_v8, %v3513_v50  ;;  %v2629_v8 = vcombine.high %v2114_v4, %v2114_v4 }
 0x323   :  { %v1423_v35 = vpop.permute.xlu0 %1422 }
 0x324   :  { %1440 = vrot.lane.b32.xlu1 %v20679_v7, %s10509_s17  ;;  %10318 = vmatmul.mubr.msk.f32.gmra.mrb[44].mxu0 %vm3957_vm12, %v3514_v11  ;;  %v2069_v45 = vsel %vm2030_vm10, %v2012_v10, %v1423_v35  ;;  %v20684_v11 = vld [vmem:[#allocation51_spill] sm:$0xff]  ;;  %v1830_v35 = vsel %vm1802_vm6, %v1773_v15, %v13384_v53 }
 0x325   :  { %1096 = vrot.lane.b32.xlu0 %v20676_v47, %s10506_s13  ;;  %10320 = vmatprep.mubr.msk.f32.mxu0 %vm10510_vm3, %v20568_v48  ;;  %v13472_v47 = vld [vmem:[%s19648_s0 + $0x1c0] sm:$0xff] }
 0x326   :  { %v1597_v54 = vpop.permute.xlu1 %1596 }
 0x327   :  { %v2126_v16 = vsel %vm2087_vm11, %v2069_v45, %v1597_v54  ;;  %v1227_v30 = vpop.permute.xlu0 %1226  ;;  %v1887_v45 = vsel %vm1859_vm7, %v1830_v35, %v13402_v25 }
 0x328   :  { %v2827_v34 = vcombine.high %v2126_v16, %v2126_v16  ;;  %v2834_v6 = vrot.slane %v2126_v16, %v11914_v40  ;;  %1614 = vrot.lane.b32.xlu1 %v20680_v51, %s10508_s16  ;;  %v2643_v16 = vrot.slane %v2629_v8, %v11914_v40 }
 0x329   :  { %1268 = vrot.lane.b32.xlu0 %v13472_v47, %s10505_s12 }
 0x32a   :  { %v13477_v38 = vrot.slane %v2827_v34, %v11914_v40  ;;  %v2842_v43 = vcombine.high %v2834_v6, %v2834_v6  ;;  %v3685_v62 = vcombine.low %v2825_v21, %v2834_v6  ;;  %v1079_v41 = vpop.permute.xlu1 %1078  ;;  %v2644_v21 = vcombine.high %v13419_v29, %v13419_v29  ;;  %v10494_v29 = vld [vmem:[%s19648_s0 + $0x158] sm:$0xff] }
 0x32b   :  { %v13479_v18 = vpop.permute.xlu0 %732  ;;  %v1944_v34 = vsel %vm1916_vm8, %v1887_v45, %v1055_v19  ;;  %v2669_v6 = vrot.slane %v12541_v63, %v11914_v40  ;;  %v20685_v19 = vld [vmem:[#allocation115_spill] sm:$0xff]  ;;  %v2645_v55 = vcombine.high %v2643_v16, %v2643_v16 }
 0x32c   :  { %v3686_v50 = vcombine.low %v2842_v43, %v13477_v38  ;;  %1616 = vrot.lane.b32.xlu1 %v20682_v52, %s10508_s16  ;;  %v3693_v32 = vrot.slane %v3685_v62, %v11914_v40  ;;  %v2001_v43 = vsel %vm1973_vm9, %v1944_v34, %v1227_v30  ;;  %v3515_v30 = vcombine.low %v2644_v21, %v2643_v16 }
 0x32d   :  { %1442 = vrot.lane.b32.xlu0 %v20684_v11, %s10509_s17  ;;  %v13493_v33 = vpop.f32.mrb[0].mxu1  ;;  %v2677_v15 = vcombine.high %v2669_v6, %v2669_v6 }
 0x32e   :  { %v3700_v4 = vrot.slane %v3686_v50, %v11914_v40  ;;  %v907_v5 = vpop.permute.xlu1 %906  ;;  %v10328_v10 = vpop.f32.mrb[1].mxu1  ;;  %v20686_v50 = vld [vmem:[#allocation9_spill] sm:$0xff]  ;;  %v3523_v21 = vrot.slane %v3515_v30, %v11914_v40 }
 0x32f   :  { %v1401_v54 = vpop.permute.xlu0 %1400 }
 0x330   :  { %924 = vrot.lane.b32.xlu1 %v20679_v7, %s10504_s7  ;;  %v3701_v53 = vcombine.low %v3693_v32, %v3700_v4  ;;  %v2058_v25 = vsel %vm2030_vm10, %v2001_v43, %v1401_v54  ;;  %v1728_v7 = vsel %vm1688_vm5, %v10494_v29, %v20685_v19  ;;  %v20687_v29 = vld [vmem:[#allocation120_spill] sm:$0xff] }
 0x331   :  { %750 = vrot.lane.b32.xlu0 %v13438_v36, %s10502_s27  ;;  %v1785_v37 = vsel %vm1745_vm4, %v1728_v7, %v20686_v50 }
 0x332   :  { %v1575_v62 = vpop.permute.xlu1 %1574  ;;  %10351 = vmatmul.mubr.msk.f32.gmra.mrb[16].mxu1 %vm3957_vm12, %v3701_v53  ;;  %v1842_v35 = vsel %vm1802_vm6, %v1785_v37, %v13426_v46  ;;  %v13542_v46 = vld [vmem:[%s19648_s0 + $0x1c8] sm:$0xff] }
 0x333   :  { %v2115_v57 = vsel %vm2087_vm11, %v2058_v25, %v1575_v62  ;;  %v1251_v63 = vpop.permute.xlu0 %1250  ;;  %10353 = vmatprep.mubr.msk.f32.mxu1 %vm10510_vm3, %v20568_v48  ;;  %v1899_v54 = vsel %vm1859_vm7, %v1842_v35, %v13448_v22  ;;  %v3533_v22 = vcombine.low %v2669_v6, %v2677_v15  ;;  %v20689_v15 = vld [vmem:[#allocation50_spill] sm:$0xff] }
 0x334   :  { %v2646_v26 = vcombine.high %v2115_v57, %v2115_v57  ;;  %v2653_v8 = vrot.slane %v2115_v57, %v11914_v40  ;;  %1098 = vrot.lane.b32.xlu1 %v20680_v51, %s10506_s13  ;;  %v1956_v34 = vsel %vm1916_vm8, %v1899_v54, %v1079_v41  ;;  %v10496_v41 = vld [vmem:[%s19648_s0 + $0x160] sm:$0xff] }
 0x335   :  { %752 = vrot.lane.b32.xlu0 %v13472_v47, %s10502_s27  ;;  %v2013_v62 = vsel %vm1973_vm9, %v1956_v34, %v1251_v63  ;;  %v1729_v19 = vsel %vm1688_vm5, %v10496_v41, %v20687_v29  ;;  %v3547_v35 = vrot.slane %v3533_v22, %v11914_v40 }
 0x336   :  { %v2660_v32 = vrot.slane %v2646_v26, %v11914_v40  ;;  %v2661_v4 = vcombine.high %v2653_v8, %v2653_v8  ;;  %v3516_v10 = vcombine.low %v2645_v55, %v2653_v8  ;;  %v1425_v45 = vpop.permute.xlu1 %1424  ;;  %v20688_v55 = vld [vmem:[#allocation157_spill] sm:$0xff] }
 0x337   :  { %v1081_v16 = vpop.permute.xlu0 %1080  ;;  %v13534_v51 = vpop.f32.mrb[30].mxu0  ;;  %v2070_v7 = vsel %vm2030_vm10, %v2013_v62, %v1425_v45  ;;  %v1786_v26 = vsel %vm1745_vm4, %v1729_v19, %v20688_v55  ;;  %v20691_v55 = vld [vmem:[#allocation53_spill] sm:$0xff] }
 0x338   :  { %v3530_v53 = vrot.slane %v3516_v10, %v11914_v40  ;;  %v3532_v43 = vcombine.low %v2661_v4, %v2660_v32  ;;  %1270 = vrot.lane.b32.xlu1 %v13542_v46, %s10505_s12  ;;  %v10298_v25 = vpop.f32.mrb[31].mxu0  ;;  %v2843_v4 = vcombine.high %v13477_v38, %v13477_v38 }
 0x339   :  { %926 = vrot.lane.b32.xlu0 %v20684_v11, %s10504_s7  ;;  %v1843_v11 = vsel %vm1802_vm6, %v1786_v26, %v13479_v18  ;;  %v13583_v25 = vld [vmem:[%s19648_s0 + $0x1d0] sm:$0xff] }
 0x33a   :  { %v1599_v57 = vpop.permute.xlu1 %1598  ;;  %v3531_v30 = vcombine.low %v3523_v21, %v3530_v53  ;;  %v3540_v6 = vrot.slane %v3532_v43, %v11914_v40  ;;  %v1900_v32 = vsel %vm1859_vm7, %v1843_v11, %v907_v5 }
 0x33b   :  { %v2127_v63 = vsel %vm2087_vm11, %v2070_v7, %v1599_v57  ;;  %v1253_v8 = vpop.permute.xlu0 %1252  ;;  %v1957_v18 = vsel %vm1916_vm8, %v1900_v32, %v1081_v16  ;;  %v10498_v32 = vld [vmem:[%s19648_s0 + $0x168] sm:$0xff] }
 0x33c   :  { %v2844_v50 = vcombine.high %v2127_v63, %v2127_v63  ;;  %v2851_v37 = vrot.slane %v2127_v63, %v11914_v40  ;;  %1444 = vrot.lane.b32.xlu1 %v20689_v15, %s10509_s17  ;;  %10321 = vmatmul.mubr.msk.f32.gmra.mrb[46].mxu0 %vm3957_vm12, %v3531_v30  ;;  %v2014_v5 = vsel %vm1973_vm9, %v1957_v18, %v1253_v8 }
 0x33d   :  { %1100 = vrot.lane.b32.xlu0 %v20682_v52, %s10506_s13  ;;  %10323 = vmatprep.mubr.msk.f32.mxu0 %vm10510_vm3, %v20568_v48  ;;  %v3548_v53 = vcombine.low %v3540_v6, %v3547_v35  ;;  %v20690_v52 = vld [vmem:[#allocation134_spill] sm:$0xff] }
 0x33e   :  { %v2858_v10 = vrot.slane %v2844_v50, %v11914_v40  ;;  %v2859_v45 = vcombine.high %v2851_v37, %v2851_v37  ;;  %v1601_v54 = vpop.permute.xlu1 %1600  ;;  %v3702_v21 = vcombine.low %v2843_v4, %v2851_v37  ;;  %v20692_v37 = vld [vmem:[#allocation141_spill] sm:$0xff]  ;;  %v20693_v4 = vld [vmem:[#allocation119_spill] sm:$0xff] }
 0x33f   :  { %v1427_v34 = vpop.permute.xlu0 %1426  ;;  %v1730_v18 = vsel %vm1688_vm5, %v10498_v32, %v20693_v4 }
 0x340   :  { %v3703_v38 = vcombine.low %v2859_v45, %v2858_v10  ;;  %v2071_v43 = vsel %vm2030_vm10, %v2014_v5, %v1427_v34  ;;  %1618 = vrot.lane.b32.xlu1 %v20690_v52, %s10508_s16  ;;  %10324 = vmatmul.mubr.msk.f32.gmra.mrb[48].mxu0 %vm3957_vm12, %v3548_v53  ;;  %v3710_v19 = vrot.slane %v3702_v21, %v11914_v40  ;;  %v20694_v21 = vld [vmem:[#allocation67_spill] sm:$0xff] }
 0x341   :  { %v2128_v16 = vsel %vm2087_vm11, %v2071_v43, %v1601_v54  ;;  %1272 = vrot.lane.b32.xlu0 %v13583_v25, %s10505_s12  ;;  %v1787_v5 = vsel %vm1745_vm4, %v1730_v18, %v20694_v21 }
 0x342   :  { %v3717_v22 = vrot.slane %v3703_v38, %v11914_v40  ;;  %v2860_v62 = vcombine.high %v2128_v16, %v2128_v16  ;;  %v2867_v41 = vrot.slane %v2128_v16, %v11914_v40  ;;  %v909_v29 = vpop.permute.xlu1 %908 }
 0x343   :  { %v735_v7 = vpop.permute.xlu0 %734 }
 0x344   :  { %v2874_v57 = vrot.slane %v2860_v62, %v11914_v40  ;;  %v2875_v30 = vcombine.high %v2867_v41, %v2867_v41  ;;  %1446 = vrot.lane.b32.xlu1 %v20691_v55, %s10509_s17  ;;  %v3718_v26 = vcombine.low %v3710_v19, %v3717_v22 }
 0x345   :  { %754 = vrot.lane.b32.xlu0 %v13542_v46, %s10502_s27 }
 0x346   :  { %v2876_v6 = vcombine.high %v2874_v57, %v2874_v57  ;;  %v1083_v63 = vpop.permute.xlu1 %1082  ;;  %v3719_v8 = vcombine.low %v2867_v41, %v2875_v30  ;;  %10354 = vmatmul.mubr.msk.f32.gmra.mrb[18].mxu1 %vm3957_vm12, %v3718_v26  ;;  %v13625_v41 = vld [vmem:[%s19648_s0 + $0x1d8] sm:$0xff] }
 0x347   :  { %v737_v11 = vpop.permute.xlu0 %736  ;;  %10356 = vmatprep.mubr.msk.f32.mxu1 %vm10510_vm3, %v20568_v48 }
 0x348   :  { %v3720_v50 = vcombine.low %v2874_v57, %v2876_v6  ;;  %1620 = vrot.lane.b32.xlu1 %v20692_v37, %s10508_s16  ;;  %v3727_v34 = vrot.slane %v3719_v8, %v11914_v40  ;;  %v13641_v57 = vld [vmem:[%s19648_s0 + $0x1e8] sm:$0xff]  ;;  %v20695_v6 = vld [vmem:[#allocation124_spill] sm:$0xff] }
 0x349   :  { %928 = vrot.lane.b32.xlu0 %v20689_v15, %s10504_s7  ;;  %v13603_v35 = vpop.f32.mrb[2].mxu1  ;;  %v1844_v15 = vsel %vm1802_vm6, %v1787_v5, %v735_v7  ;;  %v77_v7 = vld [vmem:[%s19648_s0 + $0x1e0] sm:$0xff]  ;;  %v20696_v8 = vld [vmem:[#allocation52_spill] sm:$0xff]  ;;  %v13655_v18 = vrot.slane %v13641_v57, 1 }
 0x34a   :  { %v1255_v10 = vpop.permute.xlu1 %1254  ;;  %v10331_v45 = vpop.f32.mrb[3].mxu1  ;;  %v3734_v54 = vrot.slane %v3720_v50, %v11914_v40  ;;  %v1901_v16 = vsel %vm1859_vm7, %v1844_v15, %v909_v29  ;;  %v20697_v50 = vld [vmem:[#allocation158_spill] sm:$0xff]  ;;  %v823_v4 = vrot.slane %v77_v7, 1 }
 0x34b   :  { %v911_v53 = vpop.permute.xlu0 %910  ;;  %v1958_v62 = vsel %vm1916_vm8, %v1901_v16, %v1083_v63  ;;  %v1731_v63 = vsel %vm1688_vm5, %v12976_v24, %v20695_v6  ;;  %v997_v16 = vrot.slane %v77_v7, 2 }
 0x34c   :  { %1102 = vrot.lane.b32.xlu1 %v20690_v52, %s10506_s13  ;;  %v3735_v38 = vcombine.low %v3727_v34, %v3734_v54  ;;  %v2015_v52 = vsel %vm1973_vm9, %v1958_v62, %v1255_v10  ;;  %v1788_v32 = vsel %vm1745_vm4, %v1731_v63, %v20697_v50 }
 0x34d   :  { %756 = vrot.lane.b32.xlu0 %v13583_v25, %s10502_s27  ;;  %v1845_v10 = vsel %vm1802_vm6, %v1788_v32, %v737_v11  ;;  %v825_v11 = vsel %vm142_vm0, %v823_v4, %v13655_v18 }
 0x34e   :  { %v1429_v43 = vpop.permute.xlu1 %1428  ;;  %10357 = vmatmul.mubr.msk.f32.gmra.mrb[20].mxu1 %vm3957_vm12, %v3735_v38  ;;  %v1902_v24 = vsel %vm1859_vm7, %v1845_v10, %v911_v53  ;;  %v20698_v38 = vld [vmem:[#allocation138_spill] sm:$0xff]  ;;  %v13669_v53 = vrot.slane %v13641_v57, 2 }
 0x34f   :  { %v1085_v22 = vpop.permute.xlu0 %1084  ;;  %10359 = vmatprep.mubr.msk.f32.mxu1 %vm10510_vm3, %v20568_v48  ;;  %v2072_v29 = vsel %vm2030_vm10, %v2015_v52, %v1429_v43 }
 0x350   :  { %1274 = vrot.lane.b32.xlu1 %v13625_v41, %s10505_s12  ;;  %v1959_v5 = vsel %vm1916_vm8, %v1902_v24, %v1085_v22  ;;  %v999_v6 = vsel %vm395_vm1, %v997_v16, %v13669_v53 }
 0x351   :  { %930 = vrot.lane.b32.xlu0 %v20691_v55, %s10504_s7 }
 0x352   :  { %v1603_v19 = vpop.permute.xlu1 %1602 }
 0x353   :  { %v2129_v30 = vsel %vm2087_vm11, %v2072_v29, %v1603_v19  ;;  %v1257_v26 = vpop.permute.xlu0 %1256 }
 0x354   :  { %v2884_v55 = vrot.slane %v2129_v30, %v11914_v40  ;;  %1448 = vrot.lane.b32.xlu1 %v20696_v8, %s10509_s17  ;;  %v2877_v34 = vcombine.high %v2129_v30, %v2129_v30  ;;  %v2016_v43 = vsel %vm1973_vm9, %v1959_v5, %v1257_v26  ;;  %v20699_v5 = vld [vmem:[#allocation123_spill] sm:$0xff] }
 0x355   :  { %1104 = vrot.lane.b32.xlu0 %v20692_v37, %s10506_s13 }
 0x356   :  { %v1431_v45 = vpop.permute.xlu1 %1430  ;;  %v2892_v15 = vcombine.high %v2884_v55, %v2884_v55  ;;  %v2891_v19 = vrot.slane %v2877_v34, %v11914_v40  ;;  %v1732_v34 = vsel %vm1688_vm5, %v13062_v28, %v20699_v5 }
 0x357   :  { %v739_v54 = vpop.permute.xlu0 %738  ;;  %v13659_v21 = vpop.f32.mrb[32].mxu0  ;;  %v2073_v62 = vsel %vm2030_vm10, %v2016_v43, %v1431_v45 }
 0x358   :  { %1622 = vrot.lane.b32.xlu1 %v20698_v38, %s10508_s16  ;;  %v10301_v37 = vpop.f32.mrb[33].mxu0  ;;  %v3736_v30 = vcombine.low %v2884_v55, %v2892_v15  ;;  %v20700_v15 = vld [vmem:[#allocation8_spill] sm:$0xff] }
 0x359   :  { %1276 = vrot.lane.b32.xlu0 %v77_v7, %s10505_s12 }
 0x35a   :  { %v1605_v22 = vpop.permute.xlu1 %1604  ;;  %v3744_v4 = vrot.slane %v3736_v30, %v11914_v40 }
 0x35b   :  { %v2130_v52 = vsel %vm2087_vm11, %v2073_v62, %v1605_v22  ;;  %v913_v29 = vpop.permute.xlu0 %912 }
 0x35c   :  { %v2900_v26 = vrot.slane %v2130_v52, %v11914_v40  ;;  %1450 = vrot.lane.b32.xlu1 %v825_v11, %s10509_s17  ;;  %v2893_v16 = vcombine.high %v2130_v52, %v2130_v52 }
 0x35d   :  { %758 = vrot.lane.b32.xlu0 %v13625_v41, %s10502_s27 }
 0x35e   :  { %v3737_v63 = vcombine.low %v2891_v19, %v2900_v26  ;;  %v1087_v50 = vpop.permute.xlu1 %1086  ;;  %v13709_v19 = vld [vmem:[%s19648_s0 + $0x1f8] sm:$0xff]  ;;  %v2907_v30 = vrot.slane %v2893_v16, %v11914_v40 }
 0x35f   :  { %v741_v32 = vpop.permute.xlu0 %740 }
 0x360   :  { %v3751_v10 = vrot.slane %v3737_v63, %v11914_v40  ;;  %1624 = vrot.lane.b32.xlu1 %v999_v6, %s10508_s16 }
 0x361   :  { %932 = vrot.lane.b32.xlu0 %v20696_v8, %s10504_s7  ;;  %v1789_v8 = vsel %vm1745_vm4, %v1732_v34, %v20700_v15  ;;  %v2908_v34 = vcombine.high %v2900_v26, %v2900_v26  ;;  %v20701_v15 = vld [vmem:[#allocation128_spill] sm:$0xff] }
 0x362   :  { %v1259_v55 = vpop.permute.xlu1 %1258  ;;  %v3752_v45 = vcombine.low %v3744_v4, %v3751_v10  ;;  %v1846_v43 = vsel %vm1802_vm6, %v1789_v8, %v739_v54  ;;  %v1733_v8 = vsel %vm1688_vm5, %v13099_v3, %v20701_v15  ;;  %v1518_v15 = vrot.slane %v13709_v19, 2 }
 0x363   :  { %v915_v24 = vpop.permute.xlu0 %914  ;;  %v1903_v22 = vsel %vm1859_vm7, %v1846_v43, %v913_v29  ;;  %v20702_v43 = vld [vmem:[#allocation159_spill] sm:$0xff]  ;;  %v3753_v26 = vcombine.low %v2908_v34, %v2907_v30 }
 0x364   :  { %1278 = vrot.lane.b32.xlu1 %v13641_v57, %s10505_s12  ;;  %10360 = vmatmul.mubr.msk.f32.gmra.mrb[22].mxu1 %vm3957_vm12, %v3752_v45  ;;  %v1960_v28 = vsel %vm1916_vm8, %v1903_v22, %v1087_v50  ;;  %v1790_v16 = vsel %vm1745_vm4, %v1733_v8, %v20702_v43  ;;  %v2909_v22 = vcombine.high %v2907_v30, %v2907_v30 }
 0x365   :  { %1106 = vrot.lane.b32.xlu0 %v20698_v38, %s10506_s13  ;;  %10362 = vmatprep.mubr.msk.f32.mxu1 %vm10510_vm3, %v20568_v48  ;;  %v79_v38 = vld [vmem:[%s19648_s0 + $0x1f0] sm:$0xff]  ;;  %v2017_v54 = vsel %vm1973_vm9, %v1960_v28, %v1259_v55  ;;  %v1344_v55 = vrot.slane %v13709_v19, 1  ;;  %v3761_v34 = vrot.slane %v3753_v26, %v11914_v40 }
 0x366   :  { %v1433_v37 = vpop.permute.xlu1 %1432  ;;  %v1343_v5 = vrot.slane %v79_v38, 1 }
 0x367   :  { %v1089_v62 = vpop.permute.xlu0 %1088  ;;  %v2074_v63 = vsel %vm2030_vm10, %v2017_v54, %v1433_v37  ;;  %v1847_v54 = vsel %vm1802_vm6, %v1790_v16, %v741_v32 }
 0x368   :  { %1452 = vrot.lane.b32.xlu1 %v13655_v18, %s10509_s17  ;;  %v1904_v3 = vsel %vm1859_vm7, %v1847_v54, %v915_v24  ;;  %v20703_v54 = vld [vmem:[#allocation127_spill] sm:$0xff] }
 0x369   :  { %760 = vrot.lane.b32.xlu0 %v77_v7, %s10502_s27  ;;  %v13714_v29 = vpop.f32.mrb[4].mxu1  ;;  %v1961_v8 = vsel %vm1916_vm8, %v1904_v3, %v1089_v62  ;;  %v20704_v3 = vld [vmem:[#allocation64_spill] sm:$0xff] }
 0x36a   :  { %v13712_v52 = vpop.f32.mrb[34].mxu0  ;;  %v1607_v7 = vpop.permute.xlu1 %1606 }
 0x36b   :  { %v10304_v50 = vpop.f32.mrb[35].mxu0  ;;  %v2131_v4 = vsel %vm2087_vm11, %v2074_v63, %v1607_v7  ;;  %v10334_v10 = vpop.f32.mrb[5].mxu1 }
 0x36c   :  { %v1261_v45 = vpop.permute.xlu0 %1260  ;;  %1626 = vrot.lane.b32.xlu1 %v13669_v53, %s10508_s16  ;;  %v2917_v37 = vrot.slane %v2131_v4, %v11914_v40  ;;  %v2910_v63 = vcombine.high %v2131_v4, %v2131_v4  ;;  %v1517_v50 = vrot.slane %v79_v38, 2 }
 0x36d   :  { %934 = vrot.lane.b32.xlu0 %v825_v11, %s10504_s7  ;;  %v1345_v11 = vsel %vm142_vm0, %v1343_v5, %v1344_v55  ;;  %v2018_v4 = vsel %vm1973_vm9, %v1961_v8, %v1261_v45 }
 0x36e   :  { %v1435_v28 = vpop.permute.xlu1 %1434  ;;  %v3754_v10 = vcombine.low %v2909_v22, %v2917_v37  ;;  %v2924_v16 = vrot.slane %v2910_v63, %v11914_v40  ;;  %v2925_v5 = vcombine.high %v2917_v37, %v2917_v37  ;;  %v1519_v45 = vsel %vm395_vm1, %v1517_v50, %v1518_v15 }
 0x36f   :  { %v2075_v30 = vsel %vm2030_vm10, %v2018_v4, %v1435_v28  ;;  %v1734_v37 = vsel %vm1688_vm5, %v13155_v61, %v20703_v54 }
 0x370   :  { %v743_v7 = vpop.permute.xlu0 %742  ;;  %1280 = vrot.lane.b32.xlu1 %v79_v38, %s10505_s12  ;;  %v3768_v32 = vrot.slane %v3754_v10, %v11914_v40  ;;  %v3770_v10 = vcombine.low %v2925_v5, %v2924_v16 }
 0x371   :  { %1108 = vrot.lane.b32.xlu0 %v999_v6, %s10506_s13 }
 0x372   :  { %v1609_v43 = vpop.permute.xlu1 %1608  ;;  %v3769_v28 = vcombine.low %v3761_v34, %v3768_v32  ;;  %v3778_v16 = vrot.slane %v3770_v10, %v11914_v40 }
 0x373   :  { %v13740_v38 = vpop.f32.mrb[6].mxu1  ;;  %v2132_v62 = vsel %vm2087_vm11, %v2075_v30, %v1609_v43 }
 0x374   :  { %v917_v24 = vpop.permute.xlu0 %916  ;;  %1454 = vrot.lane.b32.xlu1 %v1345_v11, %s10509_s17  ;;  %v10337_v6 = vpop.f32.mrb[7].mxu1  ;;  %v2933_v22 = vrot.slane %v2132_v62, %v11914_v40  ;;  %v1791_v11 = vsel %vm1745_vm4, %v1734_v37, %v20704_v3  ;;  %v2926_v26 = vcombine.high %v2132_v62, %v2132_v62  ;;  %10363 = vmatmul.mubr.msk.f32.gmra.mrb[24].mxu1 %vm3957_vm12, %v3769_v28  ;;  %v20705_v28 = vld [vmem:[#allocation132_spill] sm:$0xff] }
 0x375   :  { %762 = vrot.lane.b32.xlu0 %v13641_v57, %s10502_s27  ;;  %v1848_v57 = vsel %vm1802_vm6, %v1791_v11, %v743_v7  ;;  %10365 = vmatprep.mubr.msk.f32.mxu1 %vm10510_vm3, %v20568_v48  ;;  %v20706_v11 = vld [vmem:[#allocation161_spill] sm:$0xff] }
 0x376   :  { %v1263_v63 = vpop.permute.xlu1 %1262  ;;  %v2941_v8 = vcombine.high %v2933_v22, %v2933_v22  ;;  %v1905_v61 = vsel %vm1859_vm7, %v1848_v57, %v917_v24  ;;  %v2940_v5 = vrot.slane %v2926_v26, %v11914_v40 }
 0x378   :  { %v1091_v4 = vpop.permute.xlu0 %1090  ;;  %1628 = vrot.lane.b32.xlu1 %v1519_v45, %s10508_s16  ;;  %v3771_v50 = vcombine.low %v2933_v22, %v2941_v8  ;;  %v2942_v22 = vcombine.high %v2940_v5, %v2940_v5 }
 0x379   :  { %936 = vrot.lane.b32.xlu0 %v13655_v18, %s10504_s7  ;;  %v1962_v32 = vsel %vm1916_vm8, %v1905_v61, %v1091_v4 }
 0x37a   :  { %v1437_v43 = vpop.permute.xlu1 %1436  ;;  %v3785_v7 = vrot.slane %v3771_v50, %v11914_v40  ;;  %v2019_v18 = vsel %vm1973_vm9, %v1962_v32, %v1263_v63  ;;  %v1735_v63 = vsel %vm1688_vm5, %v13197_v20, %v20705_v28  ;;  %v3787_v26 = vcombine.low %v2940_v5, %v2942_v22 }
 0x37b   :  { %v2076_v34 = vsel %vm2030_vm10, %v2019_v18, %v1437_v43  ;;  %v1792_v10 = vsel %vm1745_vm4, %v1735_v63, %v20706_v11 }
 0x37c   :  { %v745_v30 = vpop.permute.xlu0 %744  ;;  %1282 = vrot.lane.b32.xlu1 %v13709_v19, %s10505_s12  ;;  %v3786_v6 = vcombine.low %v3778_v16, %v3785_v7  ;;  %v3795_v61 = vrot.slane %v3787_v26, %v11914_v40 }
 0x37d   :  { %1110 = vrot.lane.b32.xlu0 %v13669_v53, %s10506_s13  ;;  %v13773_v24 = vpop.f32.mrb[36].mxu0  ;;  %v1849_v4 = vsel %vm1802_vm6, %v1792_v10, %v745_v30 }
 0x37e   :  { %v1611_v62 = vpop.permute.xlu1 %1610  ;;  %v10307_v45 = vpop.f32.mrb[37].mxu0  ;;  %10366 = vmatmul.mubr.msk.f32.gmra.mrb[26].mxu1 %vm3957_vm12, %v3786_v6 }
 0x37f   :  { %v2133_v54 = vsel %vm2087_vm11, %v2076_v34, %v1611_v62  ;;  %10368 = vmatprep.mubr.msk.f32.mxu1 %vm10510_vm3, %v20568_v48 }
 0x380   :  { %v919_v37 = vpop.permute.xlu0 %918  ;;  %1630 = vrot.lane.b32.xlu1 %v1518_v15, %s10508_s16  ;;  %v2950_v53 = vrot.slane %v2133_v54, %v11914_v40  ;;  %v2943_v43 = vcombine.high %v2133_v54, %v2133_v54 }
 0x381   :  { %1456 = vrot.lane.b32.xlu0 %v1344_v55, %s10509_s17  ;;  %v1906_v55 = vsel %vm1859_vm7, %v1849_v4, %v919_v37 }
 0x382   :  { %v1265_v3 = vpop.permute.xlu1 %1264  ;;  %v2958_v8 = vcombine.high %v2950_v53, %v2950_v53  ;;  %v2957_v34 = vrot.slane %v2943_v43, %v11914_v40 }
 0x384   :  { %v1093_v15 = vpop.permute.xlu0 %1092  ;;  %v3788_v19 = vcombine.low %v2950_v53, %v2958_v8  ;;  %v20707_v8 = vld [vmem:[#allocation131_spill] sm:$0xff] }
 0x385   :  { %v1963_v57 = vsel %vm1916_vm8, %v1906_v55, %v1093_v15  ;;  %v1736_v15 = vsel %vm1688_vm5, %v13267_v23, %v20707_v8 }
 0x386   :  { %v1439_v50 = vpop.permute.xlu1 %1438  ;;  %v3802_v32 = vrot.slane %v3788_v19, %v11914_v40  ;;  %v2020_v16 = vsel %vm1973_vm9, %v1963_v57, %v1265_v3  ;;  %v20708_v19 = vld [vmem:[#allocation160_spill] sm:$0xff] }
 0x387   :  { %v2077_v5 = vsel %vm2030_vm10, %v2020_v16, %v1439_v50  ;;  %v1793_v55 = vsel %vm1745_vm4, %v1736_v15, %v20708_v19 }
 0x388   :  { %v747_v20 = vpop.permute.xlu0 %746  ;;  %v3803_v7 = vcombine.low %v3795_v61, %v3802_v32 }
 0x389   :  { %v1850_v57 = vsel %vm1802_vm6, %v1793_v55, %v747_v20 }
 0x38a   :  { %v1613_v18 = vpop.permute.xlu1 %1612  ;;  %10369 = vmatmul.mubr.msk.f32.gmra.mrb[28].mxu1 %vm3957_vm12, %v3803_v7  ;;  %v20709_v7 = vld [vmem:[#allocation136_spill] sm:$0xff] }
 0x38b   :  { %v2134_v30 = vsel %vm2087_vm11, %v2077_v5, %v1613_v18  ;;  %10371 = vmatprep.mubr.msk.f32.mxu1 %vm10510_vm3, %v20568_v48  ;;  %v1737_v5 = vsel %vm1688_vm5, %v13297_v12, %v20709_v7 }
 0x38c   :  { %v921_v6 = vpop.permute.xlu0 %920  ;;  %v2959_v62 = vcombine.high %v2134_v30, %v2134_v30  ;;  %v2966_v45 = vrot.slane %v2134_v30, %v11914_v40 }
 0x38d   :  { %v1907_v61 = vsel %vm1859_vm7, %v1850_v57, %v921_v6 }
 0x38e   :  { %v2973_v22 = vrot.slane %v2959_v62, %v11914_v40  ;;  %v2974_v54 = vcombine.high %v2966_v45, %v2966_v45  ;;  %v3804_v37 = vcombine.low %v2957_v34, %v2966_v45  ;;  %v1095_v53 = vpop.permute.xlu1 %1094  ;;  %v20710_v34 = vld [vmem:[#allocation162_spill] sm:$0xff] }
 0x38f   :  { %v1964_v43 = vsel %vm1916_vm8, %v1907_v61, %v1095_v53  ;;  %v1794_v6 = vsel %vm1745_vm4, %v1737_v5, %v20710_v34 }
 0x390   :  { %v749_v28 = vpop.permute.xlu0 %748  ;;  %v3805_v63 = vcombine.low %v2974_v54, %v2973_v22  ;;  %v3812_v3 = vrot.slane %v3804_v37, %v11914_v40 }
 0x391   :  { %v1851_v54 = vsel %vm1802_vm6, %v1794_v6, %v749_v28 }
 0x392   :  { %v3819_v11 = vrot.slane %v3805_v63, %v11914_v40  ;;  %v1267_v10 = vpop.permute.xlu1 %1266  ;;  %v2975_v63 = vcombine.high %v2973_v22, %v2973_v22 }
 0x393   :  { %v2021_v16 = vsel %vm1973_vm9, %v1964_v43, %v1267_v10 }
 0x394   :  { %v923_v26 = vpop.permute.xlu0 %922  ;;  %v3820_v4 = vcombine.low %v3812_v3, %v3819_v11 }
 0x395   :  { %v1908_v53 = vsel %vm1859_vm7, %v1851_v54, %v923_v26  ;;  %v20711_v54 = vld [vmem:[#allocation135_spill] sm:$0xff] }
 0x396   :  { %v1441_v50 = vpop.permute.xlu1 %1440  ;;  %10372 = vmatmul.mubr.msk.f32.gmra.mrb[30].mxu1 %vm3957_vm12, %v3820_v4 }
 0x397   :  { %10374 = vmatprep.mubr.msk.f32.mxu1 %vm10510_vm3, %v20568_v48  ;;  %v2078_v20 = vsel %vm2030_vm10, %v2021_v16, %v1441_v50 }
 0x398   :  { %v1097_v32 = vpop.permute.xlu0 %1096 }
 0x399   :  { %v1965_v12 = vsel %vm1916_vm8, %v1908_v53, %v1097_v32 }
 0x39a   :  { %v13818_v23 = vpop.f32.mrb[38].mxu0  ;;  %v1615_v18 = vpop.permute.xlu1 %1614 }
 0x39b   :  { %v10310_v30 = vpop.f32.mrb[39].mxu0  ;;  %v2135_v62 = vsel %vm2087_vm11, %v2078_v20, %v1615_v18 }
 0x39c   :  { %v1269_v45 = vpop.permute.xlu0 %1268  ;;  %v2976_v37 = vcombine.high %v2135_v62, %v2135_v62  ;;  %v2983_v3 = vrot.slane %v2135_v62, %v11914_v40 }
 0x39d   :  { %v2022_v4 = vsel %vm1973_vm9, %v1965_v12, %v1269_v45  ;;  %v20712_v12 = vld [vmem:[#allocation11_spill] sm:$0xff] }
 0x39e   :  { %v2990_v11 = vrot.slane %v2976_v37, %v11914_v40  ;;  %v1617_v10 = vpop.permute.xlu1 %1616  ;;  %v2991_v8 = vcombine.high %v2983_v3, %v2983_v3  ;;  %v3821_v15 = vcombine.low %v2975_v63, %v2983_v3  ;;  %v1738_v37 = vsel %vm1688_vm5, %v13325_v9, %v20711_v54 }
 0x3a0   :  { %v1443_v19 = vpop.permute.xlu0 %1442  ;;  %v3822_v57 = vcombine.low %v2991_v8, %v2990_v11  ;;  %v3829_v61 = vrot.slane %v3821_v15, %v11914_v40  ;;  %v1795_v11 = vsel %vm1745_vm4, %v1738_v37, %v20712_v12 }
 0x3a1   :  { %v2079_v55 = vsel %vm2030_vm10, %v2022_v4, %v1443_v19 }
 0x3a2   :  { %v2136_v28 = vsel %vm2087_vm11, %v2079_v55, %v1617_v10  ;;  %v925_v26 = vpop.permute.xlu1 %924  ;;  %v3836_v32 = vrot.slane %v3822_v57, %v11914_v40 }
 0x3a3   :  { %v2992_v50 = vcombine.high %v2136_v28, %v2136_v28  ;;  %v2999_v22 = vrot.slane %v2136_v28, %v11914_v40 }
 0x3a4   :  { %v751_v43 = vpop.permute.xlu0 %750  ;;  %v3837_v5 = vcombine.low %v3829_v61, %v3836_v32  ;;  %v20713_v32 = vld [vmem:[#allocation140_spill] sm:$0xff] }
 0x3a5   :  { %v3006_v16 = vrot.slane %v2992_v50, %v11914_v40  ;;  %v3007_v7 = vcombine.high %v2999_v22, %v2999_v22  ;;  %v1852_v8 = vsel %vm1802_vm6, %v1795_v11, %v751_v43  ;;  %v1739_v43 = vsel %vm1688_vm5, %v13377_v42, %v20713_v32  ;;  %v20715_v32 = vld [vmem:[#allocation139_spill] sm:$0xff] }
 0x3a6   :  { %v1099_v30 = vpop.permute.xlu1 %1098  ;;  %10375 = vmatmul.mubr.msk.f32.gmra.mrb[32].mxu1 %vm3957_vm12, %v3837_v5  ;;  %v1909_v19 = vsel %vm1859_vm7, %v1852_v8, %v925_v26 }
 0x3a7   :  { %v3008_v20 = vcombine.high %v3006_v16, %v3006_v16  ;;  %v3838_v18 = vcombine.low %v2999_v22, %v3007_v7  ;;  %v13839_v34 = vpop.f32.mrb[8].mxu1  ;;  %10377 = vmatprep.mubr.msk.f32.mxu1 %vm10510_vm3, %v20568_v48  ;;  %v1966_v9 = vsel %vm1916_vm8, %v1909_v19, %v1099_v30 }
 0x3a8   :  { %v753_v6 = vpop.permute.xlu0 %752  ;;  %v10340_v62 = vpop.f32.mrb[9].mxu1 }
 0x3a9   :  { %v3839_v45 = vcombine.low %v3006_v16, %v3008_v20  ;;  %v3846_v53 = vrot.slane %v3838_v18, %v11914_v40  ;;  %v20714_v16 = vld [vmem:[#allocation163_spill] sm:$0xff] }
 0x3aa   :  { %v1271_v63 = vpop.permute.xlu1 %1270  ;;  %v1796_v7 = vsel %vm1745_vm4, %v1739_v43, %v20714_v16  ;;  %v1740_v43 = vsel %vm1688_vm5, %v13438_v36, %v20715_v32 }
 0x3ab   :  { %v3853_v3 = vrot.slane %v3839_v45, %v11914_v40  ;;  %v2023_v57 = vsel %vm1973_vm9, %v1966_v9, %v1271_v63  ;;  %v1853_v5 = vsel %vm1802_vm6, %v1796_v7, %v753_v6 }
 0x3ac   :  { %v927_v10 = vpop.permute.xlu0 %926 }
 0x3ad   :  { %v3854_v15 = vcombine.low %v3846_v53, %v3853_v3  ;;  %v1910_v18 = vsel %vm1859_vm7, %v1853_v5, %v927_v10 }
 0x3ae   :  { %v1445_v4 = vpop.permute.xlu1 %1444 }
 0x3af   :  { %10378 = vmatmul.mubr.msk.f32.gmra.mrb[34].mxu1 %vm3957_vm12, %v3854_v15  ;;  %v2080_v28 = vsel %vm2030_vm10, %v2023_v57, %v1445_v4 }
 0x3b0   :  { %v1101_v55 = vpop.permute.xlu0 %1100  ;;  %10380 = vmatprep.mubr.msk.f32.mxu1 %vm10510_vm3, %v20568_v48 }
 0x3b1   :  { %v1967_v62 = vsel %vm1916_vm8, %v1910_v18, %v1101_v55 }
 0x3b2   :  { %v1619_v50 = vpop.permute.xlu1 %1618 }
 0x3b3   :  { %v2137_v22 = vsel %vm2087_vm11, %v2080_v28, %v1619_v50 }
 0x3b4   :  { %v1273_v61 = vpop.permute.xlu0 %1272  ;;  %v3016_v26 = vrot.slane %v2137_v22, %v11914_v40  ;;  %v3009_v45 = vcombine.high %v2137_v22, %v2137_v22 }
 0x3b5   :  { %v2024_v53 = vsel %vm1973_vm9, %v1967_v62, %v1273_v61 }
 0x3b6   :  { %v1447_v20 = vpop.permute.xlu1 %1446  ;;  %v3024_v54 = vcombine.high %v3016_v26, %v3016_v26  ;;  %v3023_v6 = vrot.slane %v3009_v45, %v11914_v40 }
 0x3b7   :  { %v2081_v63 = vsel %vm2030_vm10, %v2024_v53, %v1447_v20 }
 0x3b8   :  { %v755_v30 = vpop.permute.xlu0 %754  ;;  %v3855_v8 = vcombine.low %v3016_v26, %v3024_v54  ;;  %v20716_v26 = vld [vmem:[#allocation71_spill] sm:$0xff] }
 0x3b9   :  { %v13869_v37 = vpop.f32.mrb[40].mxu0  ;;  %v1797_v16 = vsel %vm1745_vm4, %v1740_v43, %v20716_v26 }
 0x3ba   :  { %v10313_v42 = vpop.f32.mrb[41].mxu0  ;;  %v1621_v3 = vpop.permute.xlu1 %1620  ;;  %v3863_v55 = vrot.slane %v3855_v8, %v11914_v40  ;;  %v1854_v5 = vsel %vm1802_vm6, %v1797_v16, %v755_v30  ;;  %v20717_v8 = vld [vmem:[#allocation143_spill] sm:$0xff] }
 0x3bb   :  { %v2138_v12 = vsel %vm2087_vm11, %v2081_v63, %v1621_v3 }
 0x3bc   :  { %v929_v11 = vpop.permute.xlu0 %928  ;;  %v3032_v10 = vrot.slane %v2138_v12, %v11914_v40  ;;  %v3025_v7 = vcombine.high %v2138_v12, %v2138_v12 }
 0x3bd   :  { %v1911_v18 = vsel %vm1859_vm7, %v1854_v5, %v929_v11  ;;  %v1741_v11 = vsel %vm1688_vm5, %v13472_v47, %v20717_v8  ;;  %v20720_v8 = vld [vmem:[#allocation164_spill] sm:$0xff] }
 0x3be   :  { %v3856_v15 = vcombine.low %v3023_v6, %v3032_v10  ;;  %v1103_v4 = vpop.permute.xlu1 %1102  ;;  %v3039_v53 = vrot.slane %v3025_v7, %v11914_v40  ;;  %v3040_v42 = vcombine.high %v3032_v10, %v3032_v10 }
 0x3bf   :  { %v1968_v54 = vsel %vm1916_vm8, %v1911_v18, %v1103_v4 }
 0x3c0   :  { %v757_v19 = vpop.permute.xlu0 %756  ;;  %v3870_v9 = vrot.slane %v3856_v15, %v11914_v40 }
 0x3c2   :  { %v1275_v57 = vpop.permute.xlu1 %1274  ;;  %v3871_v50 = vcombine.low %v3863_v55, %v3870_v9  ;;  %v20718_v55 = vld [vmem:[#allocation165_spill] sm:$0xff]  ;;  %v3872_v9 = vcombine.low %v3040_v42, %v3039_v53 }
 0x3c3   :  { %v13878_v28 = vpop.f32.mrb[10].mxu1  ;;  %v2025_v63 = vsel %vm1973_vm9, %v1968_v54, %v1275_v57  ;;  %v1798_v4 = vsel %vm1745_vm4, %v1741_v11, %v20718_v55 }
 0x3c4   :  { %v931_v22 = vpop.permute.xlu0 %930  ;;  %v10343_v61 = vpop.f32.mrb[11].mxu1  ;;  %10381 = vmatmul.mubr.msk.f32.gmra.mrb[36].mxu1 %vm3957_vm12, %v3871_v50  ;;  %v3041_v50 = vcombine.high %v3039_v53, %v3039_v53  ;;  %v1855_v10 = vsel %vm1802_vm6, %v1798_v4, %v757_v19  ;;  %v3880_v7 = vrot.slane %v3872_v9, %v11914_v40 }
 0x3c5   :  { %10383 = vmatprep.mubr.msk.f32.mxu1 %vm10510_vm3, %v20568_v48  ;;  %v1912_v61 = vsel %vm1859_vm7, %v1855_v10, %v931_v22 }
 0x3c6   :  { %v1449_v20 = vpop.permute.xlu1 %1448 }
 0x3c7   :  { %v2082_v3 = vsel %vm2030_vm10, %v2025_v63, %v1449_v20 }
 0x3c8   :  { %v1105_v62 = vpop.permute.xlu0 %1104  ;;  %v13890_v45 = vpop.f32.mrb[42].mxu0 }
 0x3c9   :  { %v10316_v36 = vpop.f32.mrb[43].mxu0  ;;  %v1969_v16 = vsel %vm1916_vm8, %v1912_v61, %v1105_v62 }
 0x3ca   :  { %v1623_v12 = vpop.permute.xlu1 %1622 }
 0x3cb   :  { %v2139_v6 = vsel %vm2087_vm11, %v2082_v3, %v1623_v12  ;;  %v20719_v3 = vld [vmem:[#allocation142_spill] sm:$0xff] }
 0x3cc   :  { %v1277_v30 = vpop.permute.xlu0 %1276  ;;  %v3049_v15 = vrot.slane %v2139_v6, %v11914_v40  ;;  %v3042_v32 = vcombine.high %v2139_v6, %v2139_v6  ;;  %v1742_v12 = vsel %vm1688_vm5, %v13542_v46, %v20719_v3  ;;  %v20722_v3 = vld [vmem:[#allocation166_spill] sm:$0xff] }
 0x3cd   :  { %v2026_v5 = vsel %vm1973_vm9, %v1969_v16, %v1277_v30  ;;  %v1799_v11 = vsel %vm1745_vm4, %v1742_v12, %v20720_v8 }
 0x3ce   :  { %v1451_v57 = vpop.permute.xlu1 %1450  ;;  %v3873_v43 = vcombine.low %v3041_v50, %v3049_v15  ;;  %v3056_v36 = vrot.slane %v3042_v32, %v11914_v40  ;;  %v3057_v22 = vcombine.high %v3049_v15, %v3049_v15 }
 0x3cf   :  { %v2083_v18 = vsel %vm2030_vm10, %v2026_v5, %v1451_v57 }
 0x3d0   :  { %v759_v26 = vpop.permute.xlu0 %758  ;;  %v3887_v47 = vrot.slane %v3873_v43, %v11914_v40  ;;  %v3889_v15 = vcombine.low %v3057_v22, %v3056_v36  ;;  %v20721_v22 = vld [vmem:[#allocation145_spill] sm:$0xff] }
 0x3d1   :  { %v13909_v20 = vpop.f32.mrb[12].mxu1  ;;  %v1856_v9 = vsel %vm1802_vm6, %v1799_v11, %v759_v26 }
 0x3d2   :  { %v1625_v54 = vpop.permute.xlu1 %1624  ;;  %v10346_v19 = vpop.f32.mrb[13].mxu1  ;;  %v3888_v63 = vcombine.low %v3880_v7, %v3887_v47  ;;  %v3897_v32 = vrot.slane %v3889_v15, %v11914_v40 }
 0x3d3   :  { %v2140_v53 = vsel %vm2087_vm11, %v2083_v18, %v1625_v54 }
 0x3d4   :  { %v933_v42 = vpop.permute.xlu0 %932  ;;  %v3065_v62 = vrot.slane %v2140_v53, %v11914_v40  ;;  %10384 = vmatmul.mubr.msk.f32.gmra.mrb[38].mxu1 %vm3957_vm12, %v3888_v63  ;;  %v3058_v6 = vcombine.high %v2140_v53, %v2140_v53  ;;  %v1743_v53 = vsel %vm1688_vm5, %v13583_v25, %v20721_v22 }
 0x3d5   :  { %10386 = vmatprep.mubr.msk.f32.mxu1 %vm10510_vm3, %v20568_v48  ;;  %v1913_v10 = vsel %vm1859_vm7, %v1856_v9, %v933_v42  ;;  %v1800_v12 = vsel %vm1745_vm4, %v1743_v53, %v20722_v3 }
 0x3d6   :  { %v1279_v30 = vpop.permute.xlu1 %1278  ;;  %v3073_v55 = vcombine.high %v3065_v62, %v3065_v62  ;;  %v3072_v57 = vrot.slane %v3058_v6, %v11914_v40 }
 0x3d8   :  { %v1107_v4 = vpop.permute.xlu0 %1106  ;;  %v3890_v50 = vcombine.low %v3065_v62, %v3073_v55  ;;  %v3074_v5 = vcombine.high %v3072_v57, %v3072_v57 }
 0x3d9   :  { %v1970_v46 = vsel %vm1916_vm8, %v1913_v10, %v1107_v4 }
 0x3da   :  { %v1453_v61 = vpop.permute.xlu1 %1452  ;;  %v3904_v43 = vrot.slane %v3890_v50, %v11914_v40  ;;  %v2027_v7 = vsel %vm1973_vm9, %v1970_v46, %v1279_v30  ;;  %v3906_v42 = vcombine.low %v3072_v57, %v3074_v5 }
 0x3db   :  { %v2084_v18 = vsel %vm2030_vm10, %v2027_v7, %v1453_v61 }
 0x3dc   :  { %v761_v16 = vpop.permute.xlu0 %760  ;;  %v3905_v47 = vcombine.low %v3897_v32, %v3904_v43  ;;  %v3914_v15 = vrot.slane %v3906_v42, %v11914_v40 }
 0x3dd   :  { %v1857_v30 = vsel %vm1802_vm6, %v1800_v12, %v761_v16  ;;  %v20723_v16 = vld [vmem:[#allocation144_spill] sm:$0xff] }
 0x3de   :  { %v1627_v26 = vpop.permute.xlu1 %1626  ;;  %10387 = vmatmul.mubr.msk.f32.gmra.mrb[40].mxu1 %vm3957_vm12, %v3905_v47  ;;  %v1744_v7 = vsel %vm1688_vm5, %v13625_v41, %v20723_v16 }
 0x3df   :  { %v2141_v54 = vsel %vm2087_vm11, %v2084_v18, %v1627_v26  ;;  %10389 = vmatprep.mubr.msk.f32.mxu1 %vm10510_vm3, %v20568_v48 }
 0x3e0   :  { %v935_v19 = vpop.permute.xlu0 %934  ;;  %v3082_v36 = vrot.slane %v2141_v54, %v11914_v40  ;;  %v3075_v50 = vcombine.high %v2141_v54, %v2141_v54  ;;  %v20724_v54 = vld [vmem:[#allocation10_spill] sm:$0xff] }
 0x3e1   :  { %v1914_v11 = vsel %vm1859_vm7, %v1857_v30, %v935_v19  ;;  %v1801_v19 = vsel %vm1745_vm4, %v1744_v7, %v20724_v54 }
 0x3e2   :  { %v3090_v63 = vcombine.high %v3082_v36, %v3082_v36  ;;  %v1281_v62 = vpop.permute.xlu1 %1280  ;;  %v3089_v47 = vrot.slane %v3075_v50, %v11914_v40 }
 0x3e4   :  { %v1109_v6 = vpop.permute.xlu0 %1108  ;;  %v3907_v8 = vcombine.low %v3082_v36, %v3090_v63 }
 0x3e5   :  { %v1971_v4 = vsel %vm1916_vm8, %v1914_v11, %v1109_v6 }
 0x3e6   :  { %v3921_v55 = vrot.slane %v3907_v8, %v11914_v40  ;;  %v1455_v9 = vpop.permute.xlu1 %1454  ;;  %v2028_v57 = vsel %vm1973_vm9, %v1971_v4, %v1281_v62 }
 0x3e7   :  { %v2085_v46 = vsel %vm2030_vm10, %v2028_v57, %v1455_v9 }
 0x3e8   :  { %v763_v25 = vpop.permute.xlu0 %762  ;;  %v3922_v10 = vcombine.low %v3914_v15, %v3921_v55 }
 0x3e9   :  { %v1858_v22 = vsel %vm1802_vm6, %v1801_v19, %v763_v25 }
 0x3ea   :  { %v1629_v61 = vpop.permute.xlu1 %1628  ;;  %10390 = vmatmul.mubr.msk.f32.gmra.mrb[42].mxu1 %vm3957_vm12, %v3922_v10 }
 0x3eb   :  { %v2142_v32 = vsel %vm2087_vm11, %v2085_v46, %v1629_v61  ;;  %10392 = vmatprep.mubr.msk.f32.mxu1 %vm10510_vm3, %v20568_v48 }
 0x3ec   :  { %v937_v43 = vpop.permute.xlu0 %936  ;;  %v3091_v5 = vcombine.high %v2142_v32, %v2142_v32  ;;  %v3098_v18 = vrot.slane %v2142_v32, %v11914_v40 }
 0x3ed   :  { %v13957_v26 = vpop.f32.mrb[14].mxu1  ;;  %v1915_v41 = vsel %vm1859_vm7, %v1858_v22, %v937_v43 }
 0x3ee   :  { %v10349_v36 = vpop.f32.mrb[15].mxu1  ;;  %v3105_v53 = vrot.slane %v3091_v5, %v11914_v40  ;;  %v3106_v42 = vcombine.high %v3098_v18, %v3098_v18  ;;  %v3923_v63 = vcombine.low %v3089_v47, %v3098_v18  ;;  %v1283_v62 = vpop.permute.xlu1 %1282 }
 0x3f0   :  { %v1111_v3 = vpop.permute.xlu0 %1110  ;;  %v3924_v12 = vcombine.low %v3106_v42, %v3105_v53  ;;  %v3931_v30 = vrot.slane %v3923_v63, %v11914_v40  ;;  %v3107_v50 = vcombine.high %v3105_v53, %v3105_v53 }
 0x3f1   :  { %v1972_v6 = vsel %vm1916_vm8, %v1915_v41, %v1111_v3 }
 0x3f2   :  { %v3938_v8 = vrot.slane %v3924_v12, %v11914_v40  ;;  %v1631_v11 = vpop.permute.xlu1 %1630  ;;  %v2029_v15 = vsel %vm1973_vm9, %v1972_v6, %v1283_v62 }
 0x3f4   :  { %v1457_v55 = vpop.permute.xlu0 %1456  ;;  %v3939_v9 = vcombine.low %v3931_v30, %v3938_v8  ;;  %v4419_v8 = vcombine.high %v12643_v17, %v12643_v17 }
 0x3f5   :  { %v2086_v4 = vsel %vm2030_vm10, %v2029_v15, %v1457_v55  ;;  %v4436_v15 = vcombine.high %v12728_v2, %v12728_v2  ;;  %v14003_v55 = vrot.slane %v12728_v2, %v11914_v40  ;;  %v4470_v2 = vcombine.high %v12821_v13, %v12821_v13 }
 0x3f6   :  { %v2143_v25 = vsel %vm2087_vm11, %v2086_v4, %v1631_v11  ;;  %10393 = vmatmul.mubr.msk.f32.gmra.mrb[44].mxu1 %vm3957_vm12, %v3939_v9  ;;  %v13997_v11 = vrot.slane %v4419_v8, %v11914_v40  ;;  %v4453_v4 = vcombine.high %v12781_v58, %v12781_v58  ;;  %v14009_v9 = vrot.slane %v12781_v58, %v11914_v40 }
 0x3f7   :  { %v3108_v10 = vcombine.high %v2143_v25, %v2143_v25  ;;  %v3115_v57 = vrot.slane %v2143_v25, %v11914_v40  ;;  %v13972_v46 = vpop.f32.mrb[44].mxu0  ;;  %10395 = vmatprep.mubr.msk.f32.mxu1 %vm10510_vm3, %v20568_v48  ;;  %v14028_v58 = vcombine.high %v14003_v55, %v14003_v55 }
 0x3f8   :  { %v10319_v61 = vpop.f32.mrb[45].mxu0  ;;  %20725 = vst [vmem:[#allocation72_spill] sm:$0xff] %v13997_v11  ;;  %20726 = vst [vmem:[#allocation15_spill] sm:$0xff] %v14009_v9 }
 0x3f9   :  { %v3122_v32 = vrot.slane %v3108_v10, %v11914_v40  ;;  %v3123_v43 = vcombine.high %v3115_v57, %v3115_v57  ;;  %v3940_v16 = vcombine.low %v3107_v50, %v3115_v57  ;;  %v14015_v10 = vrot.slane %v12643_v17, %v11914_v40  ;;  %20729 = vst [vmem:[#allocation17_spill] sm:$0xff] %v14028_v58 }
 0x3fa   :  { %v14019_v57 = vcombine.high %v13997_v11, %v13997_v11  ;;  %v14024_v61 = vrot.slane %v4436_v15, %v11914_v40  ;;  %v14035_v17 = vcombine.high %v14009_v9, %v14009_v9 }
 0x3fb   :  { %v3941_v7 = vcombine.low %v3123_v43, %v3122_v32  ;;  %v3948_v47 = vrot.slane %v3940_v16, %v11914_v40  ;;  %v14031_v32 = vrot.slane %v4453_v4, %v11914_v40  ;;  %v14039_v43 = vrot.slane %v12867_v27, %v11914_v40 }
 0x3fc   :  { %20727 = vst [vmem:[#allocation62_spill] sm:$0xff] %v14019_v57  ;;  %20728 = vst [vmem:[#allocation14_spill] sm:$0xff] %v14024_v61  ;;  %v14043_v16 = vcombine.high %v14015_v10, %v14015_v10 }
 0x3fd   :  { %v3955_v5 = vrot.slane %v3941_v7, %v11914_v40  ;;  %20730 = vst [vmem:[#allocation58_spill] sm:$0xff] %v14031_v32  ;;  %20731 = vst [vmem:[#allocation16_spill] sm:$0xff] %v14035_v17  ;;  %v5449_v7 = vcombine.low %v13997_v11, %v14019_v57 }
 0x3fe   :  { %20732 = vst [vmem:[#allocation61_spill] sm:$0xff] %v14039_v43  ;;  %20733 = vst [vmem:[#allocation19_spill] sm:$0xff] %v14043_v16 }
 0x3ff   :  { %v3956_v18 = vcombine.low %v3948_v47, %v3955_v5  ;;  %v14048_v47 = vrot.slane %v4470_v2, %v11914_v40  ;;  %v5465_v5 = vcombine.low %v14003_v55, %v14028_v58 }
 0x401   :  { %10396 = vmatmul.mubr.msk.f32.gmra.mrb[46].mxu1 %vm3957_vm12, %v3956_v18  ;;  %v14054_v18 = vcombine.high %v14024_v61, %v14024_v61  ;;  %v5472_v8 = vrot.slane %v5465_v5, %v11914_v40 }
 0x405   :  { %v13980_v54 = vpop.f32.mrb[16].mxu1 }
 0x406   :  { %v10352_v19 = vpop.f32.mrb[17].mxu1 }
 0x407   :  { %v5482_v19 = vcombine.low %v14035_v17, %v14031_v32  ;;  %v4504_v17 = vcombine.high %v12912_v49, %v12912_v49 }
 0x409   :  { %v5496_v15 = vrot.slane %v5482_v19, %v11914_v40  ;;  %v5479_v19 = vrot.slane %v14024_v61, %v11914_v40  ;;  %v14119_v11 = vrot.slane %v4504_v17, %v11914_v40 }
 0x40f   :  { %v13982_v36 = vpop.f32.mrb[46].mxu0 }
 0x410   :  { %v10322_v22 = vpop.f32.mrb[47].mxu0 }
 0x411   :  { %v4487_v22 = vcombine.high %v12867_v27, %v12867_v27  ;;  %v14078_v27 = vcombine.high %v14048_v47, %v14048_v47 }
 0x413   :  { %v13984_v53 = vpop.f32.mrb[48].mxu0  ;;  %20736 = vst [vmem:[#allocation18_spill] sm:$0xff] %v14078_v27  ;;  %v14084_v4 = vrot.slane %v4487_v22, %v11914_v40 }
 0x414   :  { %v10325_v48 = vpop.f32.mrb[49].mxu0 }
 0x415   :  { %v14062_v48 = vrot.slane %v12821_v13, %v11914_v40  ;;  %v5463_v13 = vrot.slane %v5449_v7, %v11914_v40  ;;  %20737 = vst [vmem:[#allocation65_spill] sm:$0xff] %v14084_v4 }
 0x417   :  { %20734 = vst [vmem:[#allocation57_spill] sm:$0xff] %v14062_v48  ;;  %v14090_v2 = vcombine.high %v14062_v48, %v14062_v48 }
 0x419   :  { %v13986_v42 = vpop.f32.mrb[18].mxu1  ;;  %20738 = vst [vmem:[#allocation21_spill] sm:$0xff] %v14090_v2 }
 0x41a   :  { %v10355_v63 = vpop.f32.mrb[19].mxu1 }
 0x41b   :  { %v14066_v63 = vcombine.high %v14039_v43, %v14039_v43 }
 0x41d   :  { %20735 = vst [vmem:[#allocation66_spill] sm:$0xff] %v14066_v63  ;;  %v5515_v57 = vcombine.low %v14039_v43, %v14066_v63  ;;  %v5480_v63 = vcombine.low %v5472_v8, %v5479_v19  ;;  %v14125_v8 = vrot.slane %v12963_v31, %v11914_v40 }
 0x41f   :  { %v5529_v61 = vrot.slane %v5515_v57, %v11914_v40  ;;  %20741 = vst [vmem:[#allocation28_spill] sm:$0xff] %v14125_v8 }
 0x421   :  { %v13988_v62 = vpop.f32.mrb[20].mxu1 }
 0x422   :  { %v10358_v41 = vpop.f32.mrb[21].mxu1 }
 0x423   :  { %v5448_v41 = vcombine.low %v14015_v10, %v14043_v16 }
 0x425   :  { %v5456_v5 = vrot.slane %v5448_v41, %v11914_v40  ;;  %v14108_v41 = vcombine.high %v14084_v4, %v14084_v4 }
 0x427   :  { %v5464_v58 = vcombine.low %v5456_v5, %v5463_v13  ;;  %20739 = vst [vmem:[#allocation29_spill] sm:$0xff] %v14108_v41  ;;  %v4521_v13 = vcombine.high %v12963_v31, %v12963_v31  ;;  %v5531_v17 = vcombine.low %v14084_v4, %v14108_v41 }
 0x429   :  { %v6428_v57 = vsel %vm1745_vm4, %v5464_v58, 0.0 }
 0x437   :  { %v13990_v3 = vpop.f32.mrb[22].mxu1 }
 0x438   :  { %v10361_v12 = vpop.f32.mrb[23].mxu1 }
 0x439   :  { %v5481_v12 = vcombine.low %v14054_v18, %v14009_v9  ;;  %v5514_v9 = vcombine.low %v14048_v47, %v14078_v27  ;;  %v14116_v27 = vrot.slane %v12912_v49, %v11914_v40  ;;  %v6430_v49 = vsel %vm6429_vm13, %v5480_v63, 0.0 }
 0x43a   :  { %v14151_v63 = vrot.slane %v4521_v13, %v11914_v40 }
 0x43b   :  { %v5489_v22 = vrot.slane %v5481_v12, %v11914_v40  ;;  %v5512_v12 = vrot.slane %v14090_v2, %v11914_v40  ;;  %20740 = vst [vmem:[#allocation70_spill] sm:$0xff] %v14116_v27  ;;  %v14138_v31 = vcombine.high %v14116_v27, %v14116_v27  ;;  %v5545_v58 = vrot.slane %v14116_v27, %v11914_v40 }
 0x43c   :  { %20745 = vst [vmem:[#allocation73_spill] sm:$0xff] %v14151_v63 }
 0x43d   :  { %v5547_v16 = vcombine.low %v14138_v31, %v14119_v11 }
 0x447   :  { %v13992_v6 = vpop.f32.mrb[24].mxu1 }
 0x448   :  { %v10364_v30 = vpop.f32.mrb[25].mxu1 }
 0x449   :  { %v14074_v30 = vcombine.high %v14031_v32, %v14031_v32 }
 0x44b   :  { %v5498_v32 = vcombine.low %v14074_v30, %v14062_v48  ;;  %v4538_v48 = vcombine.high %v12983_v14, %v12983_v14 }
 0x44d   :  { %v5505_v43 = vrot.slane %v5498_v32, %v11914_v40  ;;  %v5522_v32 = vrot.slane %v5514_v9, %v11914_v40  ;;  %v14142_v9 = vrot.slane %v12983_v14, %v11914_v40  ;;  %v14163_v14 = vrot.slane %v13052_v56, %v11914_v40 }
 0x44f   :  { %v5513_v19 = vcombine.low %v5505_v43, %v5512_v12  ;;  %20743 = vst [vmem:[#allocation74_spill] sm:$0xff] %v14142_v9  ;;  %v6431_v43 = vadd.f32 %v6430_v49, %v6428_v57  ;;  %20748 = vst [vmem:[#allocation76_spill] sm:$0xff] %v14163_v14  ;;  %v14173_v57 = vcombine.high %v14142_v9, %v14142_v9 }
 0x451   :  { %v14011_v25 = vpop.f32.mrb[26].mxu1  ;;  %v6434_v2 = vsel %vm6429_vm13, %v5513_v19, 0.0  ;;  %20749 = vst [vmem:[#allocation23_spill] sm:$0xff] %v14173_v57  ;;  %v14190_v19 = vcombine.high %v14163_v14, %v14163_v14 }
 0x452   :  { %v10367_v50 = vpop.f32.mrb[27].mxu1 }
 0x453   :  { %20750 = vst [vmem:[#allocation75_spill] sm:$0xff] %v14190_v19 }
 0x45d   :  { %v14086_v50 = vpop.f32.mrb[28].mxu1 }
 0x45e   :  { %v10370_v7 = vpop.f32.mrb[29].mxu1 }
 0x45f   :  { %v5497_v7 = vcombine.low %v5489_v22, %v5496_v15  ;;  %v14129_v15 = vrot.slane %v4538_v48, %v11914_v40  ;;  %v5530_v22 = vcombine.low %v5522_v32, %v5529_v61  ;;  %v14148_v48 = vcombine.high %v14119_v11, %v14119_v11 }
 0x460   :  { %v14155_v61 = vcombine.high %v14125_v8, %v14125_v8  ;;  %v5538_v32 = vrot.slane %v5531_v17, %v11914_v40 }
 0x461   :  { %20742 = vst [vmem:[#allocation69_spill] sm:$0xff] %v14129_v15  ;;  %v6432_v5 = vsel %vm1745_vm4, %v5497_v7, 0.0  ;;  %20744 = vst [vmem:[#allocation31_spill] sm:$0xff] %v14148_v48  ;;  %v14159_v7 = vcombine.high %v14129_v15, %v14129_v15  ;;  %v5548_v13 = vcombine.low %v14148_v48, %v14125_v8  ;;  %v6436_v49 = vsel %vm1745_vm4, %v5530_v22, 0.0 }
 0x462   :  { %20746 = vst [vmem:[#allocation30_spill] sm:$0xff] %v14155_v61  ;;  %v6433_v41 = vadd.f32 %v6432_v5, %v6431_v43  ;;  %v5546_v4 = vcombine.low %v5538_v32, %v5545_v58  ;;  %v5564_v17 = vcombine.low %v14155_v61, %v14151_v63  ;;  %v14182_v8 = vcombine.high %v14151_v63, %v14151_v63 }
 0x463   :  { %20747 = vst [vmem:[#allocation20_spill] sm:$0xff] %v14159_v7  ;;  %v4555_v5 = vcombine.high %v13052_v56, %v13052_v56  ;;  %v5562_v58 = vrot.slane %v5548_v13, %v11914_v40  ;;  %v4572_v43 = vcombine.high %v13112_v1, %v13112_v1  ;;  %v14197_v32 = vrot.slane %v13112_v1, %v11914_v40 }
 0x464   :  { %v6435_v22 = vadd.f32 %v6434_v2, %v6433_v41  ;;  %v6438_v63 = vsel %vm6429_vm13, %v5546_v4, 0.0  ;;  %v5571_v61 = vrot.slane %v5564_v17, %v11914_v40  ;;  %v5578_v2 = vrot.slane %v14182_v8, %v11914_v40 }
 0x465   :  { %20751 = vst [vmem:[#allocation78_spill] sm:$0xff] %v14197_v32  ;;  %v14208_v13 = vrot.slane %v4555_v5, %v11914_v40  ;;  %v5597_v1 = vcombine.low %v14163_v14, %v14190_v19  ;;  %v4589_v4 = vcombine.high %v13145_v60, %v13145_v60  ;;  %v4606_v17 = vcombine.high %v13171_v0, %v13171_v0 }
 0x466   :  { %v6437_v56 = vadd.f32 %v6436_v49, %v6435_v22  ;;  %v14226_v5 = vrot.slane %v13171_v0, %v11914_v40 }
 0x467   :  { %20752 = vst [vmem:[#allocation33_spill] sm:$0xff] %v14208_v13  ;;  %v14241_v0 = vrot.slane %v4589_v4, %v11914_v40 }
 0x468   :  { %20755 = vst [vmem:[#allocation80_spill] sm:$0xff] %v14226_v5 }
 0x469   :  { %v14165_v12 = vpop.f32.mrb[30].mxu1  ;;  %20758 = vst [vmem:[#allocation25_spill] sm:$0xff] %v14241_v0 }
 0x46a   :  { %v10373_v27 = vpop.f32.mrb[31].mxu1 }
 0x46b   :  { %v5581_v27 = vcombine.low %v14129_v15, %v14159_v7  ;;  %v5580_v7 = vcombine.low %v14142_v9, %v14173_v57  ;;  %v5555_v15 = vrot.slane %v5547_v16, %v11914_v40  ;;  %v14213_v57 = vrot.slane %v4572_v43, %v11914_v40 }
 0x46c   :  { %v14217_v16 = vcombine.high %v14197_v32, %v14197_v32  ;;  %v14231_v43 = vcombine.high %v14208_v13, %v14208_v13 }
 0x46d   :  { %v5595_v41 = vrot.slane %v5581_v27, %v11914_v40  ;;  %v5563_v48 = vcombine.low %v5555_v15, %v5562_v58  ;;  %20753 = vst [vmem:[#allocation77_spill] sm:$0xff] %v14213_v57  ;;  %v5588_v49 = vrot.slane %v5580_v7, %v11914_v40  ;;  %v6439_v27 = vadd.f32 %v6438_v63, %v6437_v56 }
 0x46e   :  { %20754 = vst [vmem:[#allocation22_spill] sm:$0xff] %v14217_v16  ;;  %v5579_v15 = vcombine.low %v5571_v61, %v5578_v2  ;;  %v5604_v58 = vrot.slane %v5597_v1, %v11914_v40  ;;  %20756 = vst [vmem:[#allocation83_spill] sm:$0xff] %v14231_v43  ;;  %v5614_v7 = vcombine.low %v14217_v16, %v14213_v57 }
 0x46f   :  { %v5596_v22 = vcombine.low %v5588_v49, %v5595_v41  ;;  %v6440_v19 = vsel %vm1745_vm4, %v5563_v48, 0.0  ;;  %v14238_v63 = vrot.slane %v13145_v60, %v11914_v40  ;;  %v5611_v61 = vrot.slane %v14208_v13, %v11914_v40 }
 0x470   :  { %v5613_v56 = vcombine.low %v14231_v43, %v14197_v32  ;;  %v14248_v2 = vrot.slane %v4606_v17, %v11914_v40  ;;  %v4623_v48 = vcombine.high %v13236_v39, %v13236_v39  ;;  %v14254_v41 = vcombine.high %v14213_v57, %v14213_v57 }
 0x471   :  { %20757 = vst [vmem:[#allocation32_spill] sm:$0xff] %v14238_v63  ;;  %v14258_v60 = vcombine.high %v14226_v5, %v14226_v5  ;;  %v6441_v1 = vadd.f32 %v6440_v19, %v6439_v27  ;;  %v6442_v4 = vsel %vm6429_vm13, %v5579_v15, 0.0  ;;  %v6444_v49 = vsel %vm1745_vm4, %v5596_v22, 0.0 }
 0x472   :  { %20759 = vst [vmem:[#allocation79_spill] sm:$0xff] %v14248_v2  ;;  %20760 = vst [vmem:[#allocation89_spill] sm:$0xff] %v14254_v41  ;;  %v5612_v16 = vcombine.low %v5604_v58, %v5611_v61  ;;  %v5628_v17 = vrot.slane %v5614_v7, %v11914_v40  ;;  %v14265_v32 = vcombine.high %v14238_v63, %v14238_v63 }
 0x473   :  { %20761 = vst [vmem:[#allocation82_spill] sm:$0xff] %v14258_v60  ;;  %v14269_v57 = vcombine.high %v14241_v0, %v14241_v0  ;;  %v5630_v43 = vcombine.low %v14254_v41, %v14238_v63  ;;  %v5621_v19 = vrot.slane %v5613_v56, %v11914_v40  ;;  %v14278_v27 = vcombine.high %v14248_v2, %v14248_v2 }
 0x474   :  { %v14282_v15 = vrot.slane %v13236_v39, %v11914_v40  ;;  %v14285_v22 = vrot.slane %v4623_v48, %v11914_v40  ;;  %v5647_v7 = vcombine.low %v14226_v5, %v14258_v60  ;;  %v4640_v61 = vcombine.high %v13301_v59, %v13301_v59 }
 0x475   :  { %20762 = vst [vmem:[#allocation12_spill] sm:$0xff] %v14269_v57  ;;  %20763 = vst [vmem:[#allocation35_spill] sm:$0xff] %v14278_v27  ;;  %v14293_v56 = vrot.slane %v13301_v59, %v11914_v40  ;;  %v4657_v63 = vcombine.high %v13320_v44, %v13320_v44  ;;  %v6443_v41 = vadd.f32 %v6442_v4, %v6441_v1  ;;  %v6446_v39 = vsel %vm6429_vm13, %v5612_v16, 0.0 }
 0x476   :  { %20764 = vst [vmem:[#allocation55_spill] sm:$0xff] %v14285_v22  ;;  %v5629_v14 = vcombine.low %v5621_v19, %v5628_v17  ;;  %v5637_v48 = vrot.slane %v5630_v43, %v11914_v40  ;;  %v5646_v60 = vcombine.low %v14241_v0, %v14269_v57  ;;  %v5663_v59 = vcombine.low %v14248_v2, %v14278_v27 }
 0x477   :  { %20765 = vst [vmem:[#allocation105_spill] sm:$0xff] %v14293_v56  ;;  %v6445_v5 = vadd.f32 %v6444_v49, %v6443_v41  ;;  %v14307_v9 = vcombine.high %v14282_v15, %v14282_v15  ;;  %v14311_v16 = vcombine.high %v14285_v22, %v14285_v22  ;;  %v5661_v43 = vrot.slane %v5647_v7, %v11914_v40 }
 0x478   :  { %v14315_v1 = vrot.slane %v4640_v61, %v11914_v40  ;;  %v14319_v4 = vcombine.high %v14293_v56, %v14293_v56  ;;  %v14322_v41 = vrot.slane %v4657_v63, %v11914_v40  ;;  %v6448_v27 = vsel %vm1745_vm4, %v5629_v14, 0.0 }
 0x479   :  { %v14273_v13 = vpop.f32.mrb[32].mxu1  ;;  %20766 = vst [vmem:[#allocation24_spill] sm:$0xff] %v14311_v16  ;;  %v6447_v49 = vadd.f32 %v6446_v39, %v6445_v5  ;;  %v5680_v17 = vcombine.low %v14311_v16, %v14293_v56  ;;  %v5654_v7 = vrot.slane %v5646_v60, %v11914_v40  ;;  %v14332_v61 = vrot.slane %v13320_v44, %v11914_v40 }
 0x47a   :  { %v10376_v58 = vpop.f32.mrb[33].mxu1  ;;  %20767 = vst [vmem:[#allocation86_spill] sm:$0xff] %v14315_v1  ;;  %20768 = vst [vmem:[#allocation99_spill] sm:$0xff] %v14319_v4  ;;  %v5670_v0 = vrot.slane %v5663_v59, %v11914_v40  ;;  %v5677_v5 = vrot.slane %v14282_v15, %v11914_v40  ;;  %v5679_v63 = vcombine.low %v14307_v9, %v14285_v22 }
 0x47b   :  { %v5644_v58 = vrot.slane %v14265_v32, %v11914_v40  ;;  %20769 = vst [vmem:[#allocation150_spill] sm:$0xff] %v14322_v41  ;;  %v14341_v39 = vrot.slane %v13534_v51, %v11914_v40  ;;  %v5662_v14 = vcombine.low %v5654_v7, %v5661_v43  ;;  %v14345_v60 = vcombine.high %v14315_v1, %v14315_v1 }
 0x47c   :  { %v5696_v44 = vcombine.low %v14319_v4, %v14315_v1  ;;  %v4691_v59 = vcombine.high %v13659_v21, %v13659_v21  ;;  %v14360_v43 = vrot.slane %v13659_v21, %v11914_v40  ;;  %v6449_v7 = vadd.f32 %v6448_v27, %v6447_v49 }
 0x47d   :  { %v5645_v2 = vcombine.low %v5637_v48, %v5644_v58  ;;  %20770 = vst [vmem:[#allocation34_spill] sm:$0xff] %v14341_v39  ;;  %v5694_v48 = vrot.slane %v5680_v17, %v11914_v40  ;;  %v4674_v58 = vcombine.high %v13534_v51, %v13534_v51  ;;  %v14364_v1 = vcombine.high %v14332_v61, %v14332_v61 }
 0x47e   :  { %20772 = vst [vmem:[#allocation98_spill] sm:$0xff] %v14360_v43  ;;  %v5678_v56 = vcombine.low %v5670_v0, %v5677_v5  ;;  %v5687_v17 = vrot.slane %v5679_v63, %v11914_v40  ;;  %v14370_v51 = vcombine.high %v14341_v39, %v14341_v39  ;;  %v6452_v16 = vsel %vm1745_vm4, %v5662_v14, 0.0 }
 0x47f   :  { %20773 = vst [vmem:[#allocation102_spill] sm:$0xff] %v14364_v1  ;;  %v6450_v4 = vsel %vm6429_vm13, %v5645_v2, 0.0  ;;  %v5703_v22 = vrot.slane %v5696_v44, %v11914_v40  ;;  %v5710_v21 = vrot.slane %v14345_v60, %v11914_v40  ;;  %v14379_v2 = vrot.slane %v4674_v58, %v11914_v40 }
 0x480   :  { %20774 = vst [vmem:[#allocation93_spill] sm:$0xff] %v14370_v51  ;;  %v5695_v49 = vcombine.low %v5687_v17, %v5694_v48  ;;  %v14382_v0 = vrot.slane %v4691_v59, %v11914_v40  ;;  %v14386_v5 = vcombine.high %v14360_v43, %v14360_v43  ;;  %v6451_v63 = vadd.f32 %v6450_v4, %v6449_v7 }
 0x481   :  { %20775 = vst [vmem:[#allocation7_spill] sm:$0xff] %v14379_v2  ;;  %v5712_v14 = vcombine.low %v14332_v61, %v14364_v1  ;;  %v4708_v44 = vcombine.high %v13712_v52, %v13712_v52  ;;  %v5729_v48 = vcombine.low %v14341_v39, %v14370_v51  ;;  %v5711_v17 = vcombine.low %v5703_v22, %v5710_v21 }
 0x482   :  { %v14326_v19 = vpop.f32.mrb[34].mxu1  ;;  %20776 = vst [vmem:[#allocation81_spill] sm:$0xff] %v14382_v0  ;;  %20777 = vst [vmem:[#allocation3_spill] sm:$0xff] %v14386_v5  ;;  %v6453_v58 = vadd.f32 %v6452_v16, %v6451_v63  ;;  %v6456_v4 = vsel %vm1745_vm4, %v5695_v49, 0.0  ;;  %v14401_v7 = vcombine.high %v14379_v2, %v14379_v2  ;;  %v5746_v1 = vcombine.low %v14386_v5, %v14382_v0 }
 0x483   :  { %v10379_v57 = vpop.f32.mrb[35].mxu1  ;;  %v5720_v22 = vrot.slane %v5712_v14, %v11914_v40  ;;  %v14412_v21 = vrot.slane %v13712_v52, %v11914_v40  ;;  %v5736_v49 = vrot.slane %v5729_v48, %v11914_v40  ;;  %v4742_v5 = vcombine.high %v13818_v23, %v13818_v23 }
 0x484   :  { %v14351_v57 = vcombine.high %v14322_v41, %v14322_v41  ;;  %20778 = vst [vmem:[#allocation37_spill] sm:$0xff] %v14401_v7  ;;  %v5745_v63 = vcombine.low %v14401_v7, %v14360_v43  ;;  %v6458_v14 = vsel %vm6429_vm13, %v5711_v17, 0.0  ;;  %v5760_v48 = vrot.slane %v5746_v1, %v11914_v40 }
 0x485   :  { %20780 = vst [vmem:[#allocation5_spill] sm:$0xff] %v14412_v21  ;;  %v4776_v17 = vcombine.high %v13890_v45, %v13890_v45 }
 0x486   :  { %20771 = vst [vmem:[#allocation27_spill] sm:$0xff] %v14351_v57  ;;  %v5713_v27 = vcombine.low %v14322_v41, %v14351_v57  ;;  %v6454_v57 = vsel %vm6429_vm13, %v5678_v56, 0.0  ;;  %v4725_v41 = vcombine.high %v13773_v24, %v13773_v24  ;;  %v14407_v56 = vrot.slane %v13773_v24, %v11914_v40 }
 0x487   :  { %v6455_v16 = vadd.f32 %v6454_v57, %v6453_v58  ;;  %v14424_v57 = vcombine.high %v14382_v0, %v14382_v0  ;;  %v5753_v1 = vrot.slane %v5745_v63, %v11914_v40  ;;  %v14455_v0 = vrot.slane %v4742_v5, %v11914_v40 }
 0x488   :  { %v5727_v59 = vrot.slane %v5713_v27, %v11914_v40  ;;  %20779 = vst [vmem:[#allocation85_spill] sm:$0xff] %v14407_v56  ;;  %v14415_v27 = vrot.slane %v4708_v44, %v11914_v40  ;;  %v14427_v52 = vrot.slane %v4725_v41, %v11914_v40  ;;  %v5743_v44 = vrot.slane %v14379_v2, %v11914_v40 }
 0x489   :  { %v6457_v24 = vadd.f32 %v6456_v4, %v6455_v16  ;;  %20782 = vst [vmem:[#allocation26_spill] sm:$0xff] %v14424_v57  ;;  %v14435_v58 = vcombine.high %v14407_v56, %v14407_v56  ;;  %v5762_v41 = vcombine.low %v14424_v57, %v14412_v21  ;;  %20788 = vst [vmem:[#allocation106_spill] sm:$0xff] %v14455_v0 }
 0x48a   :  { %20781 = vst [vmem:[#allocation109_spill] sm:$0xff] %v14415_v27  ;;  %v5728_v51 = vcombine.low %v5720_v22, %v5727_v59  ;;  %20783 = vst [vmem:[#allocation101_spill] sm:$0xff] %v14427_v52  ;;  %v14439_v59 = vcombine.high %v14412_v21, %v14412_v21  ;;  %v14443_v4 = vcombine.high %v14415_v27, %v14415_v27 }
 0x48b   :  { %20784 = vst [vmem:[#allocation151_spill] sm:$0xff] %v14435_v58  ;;  %v5744_v16 = vcombine.low %v5736_v49, %v5743_v44  ;;  %v14452_v22 = vrot.slane %v13818_v23, %v11914_v40  ;;  %v14460_v7 = vcombine.high %v14427_v52, %v14427_v52  ;;  %v4759_v21 = vcombine.high %v13869_v37, %v13869_v37 }
 0x48c   :  { %20785 = vst [vmem:[#allocation90_spill] sm:$0xff] %v14439_v59  ;;  %20786 = vst [vmem:[#allocation36_spill] sm:$0xff] %v14443_v4  ;;  %v6460_v43 = vsel %vm1745_vm4, %v5728_v51, 0.0  ;;  %v14466_v49 = vrot.slane %v13869_v37, %v11914_v40  ;;  %v6459_v63 = vadd.f32 %v6458_v14, %v6457_v24  ;;  %v5761_v44 = vcombine.low %v5753_v1, %v5760_v48 }
 0x48d   :  { %20787 = vst [vmem:[#allocation84_spill] sm:$0xff] %v14452_v22  ;;  %20789 = vst [vmem:[#allocation59_spill] sm:$0xff] %v14460_v7  ;;  %v5779_v23 = vcombine.low %v14407_v56, %v14435_v58  ;;  %v5769_v5 = vrot.slane %v5762_v41, %v11914_v40  ;;  %v5776_v51 = vrot.slane %v14439_v59, %v11914_v40  ;;  %v6462_v37 = vsel %vm6429_vm13, %v5744_v16, 0.0 }
 0x48e   :  { %20790 = vst [vmem:[#allocation39_spill] sm:$0xff] %v14466_v49  ;;  %v5778_v57 = vcombine.low %v14415_v27, %v14443_v4  ;;  %v14476_v2 = vrot.slane %v4776_v17, %v11914_v40  ;;  %v6461_v39 = vadd.f32 %v6460_v43, %v6459_v63  ;;  %v14481_v24 = vcombine.high %v14452_v22, %v14452_v22 }
 0x48f   :  { %v14485_v14 = vcombine.high %v14455_v0, %v14455_v0  ;;  %v5795_v41 = vcombine.low %v14427_v52, %v14460_v7  ;;  %v14492_v1 = vrot.slane %v4759_v21, %v11914_v40  ;;  %v14496_v43 = vcombine.high %v14466_v49, %v14466_v49 }
 0x490   :  { %20791 = vst [vmem:[#allocation113_spill] sm:$0xff] %v14481_v24  ;;  %v14500_v17 = vrot.slane %v13890_v45, %v11914_v40  ;;  %v6464_v63 = vsel %vm1745_vm4, %v5761_v44, 0.0  ;;  %v5793_v58 = vrot.slane %v5779_v23, %v11914_v40  ;;  %v14508_v21 = vrot.slane %v13972_v46, %v11914_v40 }
 0x491   :  { %20792 = vst [vmem:[#allocation100_spill] sm:$0xff] %v14485_v14  ;;  %20793 = vst [vmem:[#allocation88_spill] sm:$0xff] %v14492_v1  ;;  %v5812_v56 = vcombine.low %v14485_v14, %v14466_v49  ;;  %v5777_v7 = vcombine.low %v5769_v5, %v5776_v51  ;;  %v5786_v52 = vrot.slane %v5778_v57, %v11914_v40 }
 0x492   :  { %20794 = vst [vmem:[#allocation63_spill] sm:$0xff] %v14496_v43  ;;  %v5809_v4 = vrot.slane %v14452_v22, %v11914_v40  ;;  %v14515_v45 = vcombine.high %v14476_v2, %v14476_v2  ;;  %v5811_v44 = vcombine.low %v14481_v24, %v14455_v0  ;;  %v4793_v23 = vcombine.high %v13972_v46, %v13972_v46 }
 0x493   :  { %v14525_v5 = vrot.slane %v13982_v36, %v11914_v40  ;;  %v5802_v57 = vrot.slane %v5795_v41, %v11914_v40  ;;  %v14530_v51 = vcombine.high %v14492_v1, %v14492_v1  ;;  %v5828_v49 = vcombine.low %v14496_v43, %v14492_v1 }
 0x494   :  { %20795 = vst [vmem:[#allocation2_spill] sm:$0xff] %v14515_v45  ;;  %v14536_v14 = vcombine.high %v14500_v17, %v14500_v17  ;;  %v5794_v46 = vcombine.low %v5786_v52, %v5793_v58  ;;  %v5826_v0 = vrot.slane %v5812_v56, %v11914_v40  ;;  %v4827_v41 = vcombine.high %v13984_v53, %v13984_v53 }
 0x495   :  { %20796 = vst [vmem:[#allocation104_spill] sm:$0xff] %v14525_v5  ;;  %v6463_v24 = vadd.f32 %v6462_v37, %v6461_v39  ;;  %v6466_v22 = vsel %vm6429_vm13, %v5777_v7, 0.0  ;;  %v5810_v27 = vcombine.low %v5802_v57, %v5809_v4  ;;  %v5845_v1 = vcombine.low %v14476_v2, %v14515_v45 }
 0x496   :  { %v5819_v43 = vrot.slane %v5811_v44, %v11914_v40  ;;  %v14550_v52 = vrot.slane %v4793_v23, %v11914_v40  ;;  %v14557_v58 = vcombine.high %v14525_v5, %v14525_v5  ;;  %v5835_v39 = vrot.slane %v5828_v49, %v11914_v40 }
 0x497   :  { %v14487_v48 = vpop.f32.mrb[36].mxu1  ;;  %v6465_v59 = vadd.f32 %v6464_v63, %v6463_v24  ;;  %v5842_v7 = vrot.slane %v14530_v51, %v11914_v40  ;;  %v5844_v4 = vcombine.low %v14500_v17, %v14536_v14  ;;  %v6468_v37 = vsel %vm1745_vm4, %v5794_v46, 0.0 }
 0x498   :  { %v10382_v16 = vpop.f32.mrb[37].mxu1  ;;  %20798 = vst [vmem:[#allocation38_spill] sm:$0xff] %v14550_v52  ;;  %20800 = vst [vmem:[#allocation54_spill] sm:$0xff] %v14557_v58  ;;  %v5827_v44 = vcombine.low %v5819_v43, %v5826_v0  ;;  %v14572_v24 = vrot.slane %v13493_v33, %v11914_v40  ;;  %v6470_v63 = vsel %vm6429_vm13, %v5810_v27, 0.0  ;;  %v5859_v57 = vrot.slane %v5845_v1, %v11914_v40 }
 0x499   :  { %v4810_v16 = vcombine.high %v13982_v36, %v13982_v36  ;;  %v14541_v36 = vcombine.high %v14508_v21, %v14508_v21  ;;  %v6467_v49 = vadd.f32 %v6466_v22, %v6465_v59  ;;  %v14578_v45 = vcombine.high %v14550_v52, %v14550_v52 }
 0x49a   :  { %v14588_v46 = vrot.slane %v13984_v53, %v11914_v40  ;;  %v4844_v27 = vcombine.high %v13493_v33, %v13493_v33  ;;  %v5843_v22 = vcombine.low %v5835_v39, %v5842_v7  ;;  %v5852_v1 = vrot.slane %v5844_v4, %v11914_v40 }
 0x49b   :  { %20797 = vst [vmem:[#allocation153_spill] sm:$0xff] %v14541_v36  ;;  %v14553_v56 = vrot.slane %v4810_v16, %v11914_v40  ;;  %v5861_v23 = vcombine.low %v14508_v21, %v14541_v36  ;;  %v14568_v16 = vrot.slane %v4827_v41, %v11914_v40  ;;  %20801 = vst [vmem:[#allocation110_spill] sm:$0xff] %v14578_v45  ;;  %v6472_v41 = vsel %vm1745_vm4, %v5827_v44, 0.0 }
 0x49c   :  { %20803 = vst [vmem:[#allocation117_spill] sm:$0xff] %v14588_v46  ;;  %v6469_v59 = vadd.f32 %v6468_v37, %v6467_v49  ;;  %v14603_v53 = vcombine.high %v14572_v24, %v14572_v24  ;;  %v5860_v37 = vcombine.low %v5852_v1, %v5859_v57  ;;  %v5875_v39 = vrot.slane %v14550_v52, %v11914_v40 }
 0x49d   :  { %20799 = vst [vmem:[#allocation87_spill] sm:$0xff] %v14553_v56  ;;  %v5878_v0 = vcombine.low %v14557_v58, %v14553_v56  ;;  %v14584_v43 = vcombine.high %v14553_v56, %v14553_v56  ;;  %v5868_v36 = vrot.slane %v5861_v23, %v11914_v40  ;;  %v5877_v58 = vcombine.low %v14578_v45, %v14525_v5 }
 0x49e   :  { %v14599_v56 = vcombine.high %v14568_v16, %v14568_v16  ;;  %20804 = vst [vmem:[#allocation92_spill] sm:$0xff] %v14603_v53  ;;  %v6471_v33 = vadd.f32 %v6470_v63, %v6469_v59  ;;  %v14610_v4 = vcombine.high %v14588_v46, %v14588_v46  ;;  %v14615_v23 = vrot.slane %v4844_v27, %v11914_v40 }
 0x49f   :  { %20802 = vst [vmem:[#allocation41_spill] sm:$0xff] %v14584_v43  ;;  %v5892_v7 = vrot.slane %v5878_v0, %v11914_v40  ;;  %v5894_v44 = vcombine.low %v14584_v43, %v14588_v46  ;;  %v4861_v49 = vcombine.high %v13603_v35, %v13603_v35  ;;  %v6474_v59 = vsel %vm6429_vm13, %v5843_v22, 0.0 }
 0x4a0   :  { %v6473_v63 = vadd.f32 %v6472_v41, %v6471_v33  ;;  %v5876_v1 = vcombine.low %v5868_v36, %v5875_v39  ;;  %v5885_v0 = vrot.slane %v5877_v58, %v11914_v40  ;;  %v5910_v5 = vcombine.low %v14568_v16, %v14599_v56 }
 0x4a1   :  { %v5911_v46 = vcombine.low %v14572_v24, %v14603_v53  ;;  %v6476_v27 = vsel %vm1745_vm4, %v5860_v37, 0.0  ;;  %v5901_v52 = vrot.slane %v5894_v44, %v11914_v40  ;;  %v5908_v41 = vrot.slane %v14610_v4, %v11914_v40 }
 0x4a2   :  { %v5893_v43 = vcombine.low %v5885_v0, %v5892_v7  ;;  %v14633_v36 = vcombine.high %v14615_v23, %v14615_v23  ;;  %v14637_v58 = vrot.slane %v13603_v35, %v11914_v40  ;;  %v14640_v22 = vrot.slane %v4861_v49, %v11914_v40 }
 0x4a3   :  { %v4895_v33 = vcombine.high %v13740_v38, %v13740_v38  ;;  %v6478_v37 = vsel %vm6429_vm13, %v5876_v1, 0.0  ;;  %v5918_v39 = vrot.slane %v5910_v5, %v11914_v40  ;;  %v5925_v7 = vrot.slane %v5911_v46, %v11914_v40 }
 0x4a4   :  { %20805 = vst [vmem:[#allocation147_spill] sm:$0xff] %v14637_v58  ;;  %20806 = vst [vmem:[#allocation103_spill] sm:$0xff] %v14640_v22  ;;  %v4878_v0 = vcombine.high %v13714_v29, %v13714_v29  ;;  %v14651_v35 = vrot.slane %v13714_v29, %v11914_v40  ;;  %v6480_v49 = vsel %vm1745_vm4, %v5893_v43, 0.0  ;;  %v14658_v5 = vcombine.high %v14637_v58, %v14637_v58 }
 0x4a5   :  { %v14662_v46 = vcombine.high %v14640_v22, %v14640_v22  ;;  %v14665_v1 = vrot.slane %v4895_v33, %v11914_v40  ;;  %v5926_v29 = vcombine.low %v5918_v39, %v5925_v7  ;;  %v5941_v43 = vrot.slane %v14637_v58, %v11914_v40 }
 0x4a6   :  { %20807 = vst [vmem:[#allocation152_spill] sm:$0xff] %v14651_v35  ;;  %20808 = vst [vmem:[#allocation108_spill] sm:$0xff] %v14658_v5  ;;  %v14683_v39 = vrot.slane %v13740_v38, %v11914_v40  ;;  %v5943_v7 = vcombine.low %v14658_v5, %v14640_v22 }
 0x4a7   :  { %v14619_v57 = vpop.f32.mrb[38].mxu1  ;;  %20809 = vst [vmem:[#allocation40_spill] sm:$0xff] %v14662_v46  ;;  %20810 = vst [vmem:[#allocation154_spill] sm:$0xff] %v14665_v1 }
 0x4a8   :  { %v10385_v45 = vpop.f32.mrb[39].mxu1  ;;  %v14706_v22 = vcombine.high %v14683_v39, %v14683_v39  ;;  %v5951_v5 = vrot.slane %v5943_v7, %v11914_v40 }
 0x4a9   :  { %v6475_v45 = vadd.f32 %v6474_v59, %v6473_v63  ;;  %v5909_v63 = vcombine.low %v5901_v52, %v5908_v41  ;;  %v5927_v59 = vcombine.low %v14615_v23, %v14633_v36  ;;  %v14672_v41 = vrot.slane %v4878_v0, %v11914_v40 }
 0x4aa   :  { %v14690_v0 = vcombine.high %v14665_v1, %v14665_v1  ;;  %20815 = vst [vmem:[#allocation146_spill] sm:$0xff] %v14706_v22 }
 0x4ab   :  { %v6477_v44 = vadd.f32 %v6476_v27, %v6475_v45  ;;  %20811 = vst [vmem:[#allocation114_spill] sm:$0xff] %v14672_v41  ;;  %v14676_v45 = vcombine.high %v14651_v35, %v14651_v35  ;;  %v6482_v33 = vsel %vm6429_vm13, %v5909_v63, 0.0  ;;  %v14699_v38 = vcombine.high %v14672_v41, %v14672_v41 }
 0x4ac   :  { %20813 = vst [vmem:[#allocation43_spill] sm:$0xff] %v14690_v0 }
 0x4ad   :  { %v6479_v53 = vadd.f32 %v6478_v37, %v6477_v44  ;;  %20812 = vst [vmem:[#allocation121_spill] sm:$0xff] %v14676_v45  ;;  %v5944_v37 = vcombine.low %v14662_v46, %v14651_v35  ;;  %v14695_v35 = vrot.slane %v13839_v34, %v11914_v40  ;;  %v5960_v46 = vcombine.low %v14676_v45, %v14672_v41 }
 0x4af   :  { %v6481_v52 = vadd.f32 %v6480_v49, %v6479_v53  ;;  %v5934_v53 = vrot.slane %v5927_v59, %v11914_v40  ;;  %v6484_v49 = vsel %vm1745_vm4, %v5926_v29, 0.0  ;;  %20814 = vst [vmem:[#allocation91_spill] sm:$0xff] %v14695_v35  ;;  %v5958_v59 = vrot.slane %v5944_v37, %v11914_v40 }
 0x4b0   :  { %v4929_v37 = vcombine.high %v13878_v28, %v13878_v28 }
 0x4b1   :  { %v14669_v27 = vpop.f32.mrb[40].mxu1  ;;  %v6483_v63 = vadd.f32 %v6482_v33, %v6481_v52  ;;  %v5977_v52 = vcombine.low %v14665_v1, %v14690_v0  ;;  %v14715_v33 = vcombine.high %v14695_v35, %v14695_v35  ;;  %v5959_v7 = vcombine.low %v5951_v5, %v5958_v59 }
 0x4b2   :  { %v10388_v44 = vpop.f32.mrb[41].mxu1  ;;  %v5974_v0 = vrot.slane %v14699_v38, %v11914_v40  ;;  %v14738_v5 = vrot.slane %v4929_v37, %v11914_v40 }
 0x4b3   :  { %v5942_v44 = vcombine.low %v5934_v53, %v5941_v43  ;;  %v6485_v29 = vadd.f32 %v6484_v49, %v6483_v63  ;;  %v4912_v43 = vcombine.high %v13839_v34, %v13839_v34  ;;  %20816 = vst [vmem:[#allocation42_spill] sm:$0xff] %v14715_v33  ;;  %v14721_v53 = vrot.slane %v13878_v28, %v11914_v40 }
 0x4b4   :  { %v5967_v63 = vrot.slane %v5960_v46, %v11914_v40  ;;  %v5976_v34 = vcombine.low %v14683_v39, %v14706_v22  ;;  %v5991_v41 = vrot.slane %v5977_v52, %v11914_v40  ;;  %v5993_v28 = vcombine.low %v14695_v35, %v14715_v33  ;;  %20818 = vst [vmem:[#allocation107_spill] sm:$0xff] %v14738_v5 }
 0x4b5   :  { %20817 = vst [vmem:[#allocation95_spill] sm:$0xff] %v14721_v53  ;;  %v6486_v49 = vsel %vm6429_vm13, %v5942_v44, 0.0  ;;  %v14733_v58 = vrot.slane %v4912_v43, %v11914_v40  ;;  %v14742_v46 = vcombine.high %v14721_v53, %v14721_v53  ;;  %v4946_v43 = vcombine.high %v13909_v20, %v13909_v20 }
 0x4b6   :  { %v6487_v1 = vadd.f32 %v6486_v49, %v6485_v29  ;;  %v5975_v59 = vcombine.low %v5967_v63, %v5974_v0  ;;  %v6488_v29 = vsel %vm1745_vm4, %v5959_v7, 0.0  ;;  %v5984_v52 = vrot.slane %v5976_v34, %v11914_v40 }
 0x4b7   :  { %20819 = vst [vmem:[#allocation118_spill] sm:$0xff] %v14742_v46  ;;  %v6000_v33 = vrot.slane %v5993_v28, %v11914_v40  ;;  %v14751_v37 = vcombine.high %v14733_v58, %v14733_v58  ;;  %v6010_v35 = vcombine.low %v14742_v46, %v14738_v5  ;;  %v14758_v7 = vrot.slane %v13909_v20, %v11914_v40 }
 0x4b8   :  { %v6489_v49 = vadd.f32 %v6488_v29, %v6487_v1  ;;  %v5992_v22 = vcombine.low %v5984_v52, %v5991_v41  ;;  %v6490_v0 = vsel %vm6429_vm13, %v5975_v59, 0.0  ;;  %v4963_v1 = vcombine.high %v13957_v26, %v13957_v26 }
 0x4b9   :  { %20820 = vst [vmem:[#allocation148_spill] sm:$0xff] %v14758_v7  ;;  %v14764_v41 = vrot.slane %v13957_v26, %v11914_v40  ;;  %v6007_v63 = vrot.slane %v14733_v58, %v11914_v40  ;;  %v6009_v34 = vcombine.low %v14751_v37, %v14721_v53  ;;  %v14775_v20 = vrot.slane %v4946_v43, %v11914_v40 }
 0x4ba   :  { %v6491_v28 = vadd.f32 %v6490_v0, %v6489_v49  ;;  %v6492_v59 = vsel %vm1745_vm4, %v5992_v22, 0.0  ;;  %v6024_v26 = vrot.slane %v6010_v35, %v11914_v40  ;;  %v14781_v52 = vcombine.high %v14758_v7, %v14758_v7 }
 0x4bb   :  { %20821 = vst [vmem:[#allocation6_spill] sm:$0xff] %v14764_v41  ;;  %20823 = vst [vmem:[#allocation125_spill] sm:$0xff] %v14775_v20  ;;  %v6008_v29 = vcombine.low %v6000_v33, %v6007_v63  ;;  %v14786_v49 = vrot.slane %v4963_v1, %v11914_v40  ;;  %v14790_v0 = vcombine.high %v14764_v41, %v14764_v41 }
 0x4bc   :  { %20824 = vst [vmem:[#allocation112_spill] sm:$0xff] %v14781_v52  ;;  %v6017_v43 = vrot.slane %v6009_v34, %v11914_v40  ;;  %v4980_v22 = vcombine.high %v13980_v54, %v13980_v54  ;;  %v6493_v35 = vadd.f32 %v6492_v59, %v6491_v28  ;;  %v14797_v33 = vcombine.high %v14775_v20, %v14775_v20 }
 0x4bd   :  { %v14730_v45 = vpop.f32.mrb[42].mxu1  ;;  %20825 = vst [vmem:[#allocation155_spill] sm:$0xff] %v14786_v49  ;;  %20826 = vst [vmem:[#allocation44_spill] sm:$0xff] %v14790_v0  ;;  %v6040_v53 = vrot.slane %v14781_v52, %v11914_v40  ;;  %v14807_v34 = vcombine.high %v14786_v49, %v14786_v49  ;;  %v6043_v28 = vcombine.low %v14764_v41, %v14790_v0 }
 0x4be   :  { %v10391_v44 = vpop.f32.mrb[43].mxu1  ;;  %20827 = vst [vmem:[#allocation122_spill] sm:$0xff] %v14797_v33  ;;  %v6025_v1 = vcombine.low %v6017_v43, %v6024_v26  ;;  %v14813_v59 = vrot.slane %v13980_v54, %v11914_v40  ;;  %v4997_v26 = vcombine.high %v13986_v42, %v13986_v42  ;;  %v14824_v43 = vrot.slane %v13986_v42, %v11914_v40 }
 0x4bf   :  { %v14772_v44 = vcombine.high %v14738_v5, %v14738_v5  ;;  %20828 = vst [vmem:[#allocation47_spill] sm:$0xff] %v14807_v34  ;;  %v5014_v0 = vcombine.high %v13988_v62, %v13988_v62  ;;  %v14863_v52 = vrot.slane %v13988_v62, %v11914_v40 }
 0x4c0   :  { %20829 = vst [vmem:[#allocation129_spill] sm:$0xff] %v14813_v59  ;;  %20831 = vst [vmem:[#allocation46_spill] sm:$0xff] %v14824_v43  ;;  %v6496_v54 = vsel %vm1745_vm4, %v6025_v1, 0.0  ;;  %v6073_v1 = vrot.slane %v14813_v59, %v11914_v40 }
 0x4c1   :  { %20822 = vst [vmem:[#allocation45_spill] sm:$0xff] %v14772_v44  ;;  %v6026_v46 = vcombine.low %v14772_v44, %v14758_v7  ;;  %v6494_v7 = vsel %vm6429_vm13, %v6008_v29, 0.0  ;;  %v14816_v29 = vrot.slane %v4980_v22, %v11914_v40  ;;  %v6057_v22 = vrot.slane %v6043_v28, %v11914_v40  ;;  %20837 = vst [vmem:[#allocation49_spill] sm:$0xff] %v14863_v52 }
 0x4c3   :  { %v6033_v5 = vrot.slane %v6026_v46, %v11914_v40  ;;  %20830 = vst [vmem:[#allocation111_spill] sm:$0xff] %v14816_v29  ;;  %v6042_v46 = vcombine.low %v14775_v20, %v14797_v33  ;;  %v14838_v33 = vcombine.high %v14816_v29, %v14816_v29 }
 0x4c5   :  { %v6041_v41 = vcombine.low %v6033_v5, %v6040_v53  ;;  %20833 = vst [vmem:[#allocation94_spill] sm:$0xff] %v14838_v33  ;;  %v6050_v20 = vrot.slane %v6042_v46, %v11914_v40  ;;  %v14844_v53 = vrot.slane %v4997_v26, %v11914_v40  ;;  %v14848_v5 = vcombine.high %v14824_v43, %v14824_v43 }
 0x4c6   :  { %v6076_v28 = vcombine.low %v14838_v33, %v14824_v43  ;;  %v14867_v43 = vrot.slane %v13990_v3, %v11914_v40 }
 0x4c7   :  { %20834 = vst [vmem:[#allocation4_spill] sm:$0xff] %v14844_v53  ;;  %20835 = vst [vmem:[#allocation126_spill] sm:$0xff] %v14848_v5 }
 0x4c8   :  { %20838 = vst [vmem:[#allocation149_spill] sm:$0xff] %v14867_v43 }
 0x4c9   :  { %v14799_v63 = vpop.f32.mrb[44].mxu1 }
 0x4ca   :  { %v10394_v44 = vpop.f32.mrb[45].mxu1 }
 0x4cb   :  { %v6495_v44 = vadd.f32 %v6494_v7, %v6493_v35  ;;  %v6059_v7 = vcombine.low %v14786_v49, %v14807_v34  ;;  %v14834_v35 = vcombine.high %v14813_v59, %v14813_v59  ;;  %v14853_v34 = vrot.slane %v5014_v0, %v11914_v40 }
 0x4cd   :  { %20832 = vst [vmem:[#allocation60_spill] sm:$0xff] %v14834_v35  ;;  %v6497_v42 = vadd.f32 %v6496_v54, %v6495_v44  ;;  %20836 = vst [vmem:[#allocation97_spill] sm:$0xff] %v14853_v34  ;;  %v6498_v44 = vsel %vm6429_vm13, %v6041_v41, 0.0  ;;  %v6058_v54 = vcombine.low %v6050_v20, %v6057_v22  ;;  %v6066_v46 = vrot.slane %v6059_v7, %v11914_v40 }
 0x4ce   :  { %v6075_v26 = vcombine.low %v14834_v35, %v14816_v29  ;;  %v14871_v41 = vcombine.high %v14844_v53, %v14844_v53  ;;  %v6090_v20 = vrot.slane %v6076_v28, %v11914_v40  ;;  %v6092_v22 = vcombine.low %v14848_v5, %v14844_v53 }
 0x4cf   :  { %v6499_v59 = vadd.f32 %v6498_v44, %v6497_v42  ;;  %v6074_v33 = vcombine.low %v6066_v46, %v6073_v1  ;;  %v14878_v7 = vcombine.high %v14853_v34, %v14853_v34  ;;  %v6500_v62 = vsel %vm1745_vm4, %v6058_v54, 0.0 }
 0x4d0   :  { %20839 = vst [vmem:[#allocation133_spill] sm:$0xff] %v14871_v41  ;;  %v5031_v42 = vcombine.high %v13990_v3, %v13990_v3  ;;  %v5048_v1 = vcombine.high %v13992_v6, %v13992_v6  ;;  %v14887_v44 = vrot.slane %v13992_v6, %v11914_v40  ;;  %v6083_v28 = vrot.slane %v6075_v26, %v11914_v40 }
 0x4d1   :  { %20840 = vst [vmem:[#allocation116_spill] sm:$0xff] %v14878_v7  ;;  %v6501_v46 = vadd.f32 %v6500_v62, %v6499_v59  ;;  %v14896_v54 = vcombine.high %v14867_v43, %v14867_v43  ;;  %v6502_v3 = vsel %vm6429_vm13, %v6074_v33, 0.0  ;;  %v5065_v53 = vcombine.high %v14011_v25, %v14011_v25 }
 0x4d2   :  { %20841 = vst [vmem:[#allocation156_spill] sm:$0xff] %v14887_v44  ;;  %v6091_v5 = vcombine.low %v6083_v28, %v6090_v20  ;;  %v6099_v6 = vrot.slane %v6092_v22, %v11914_v40  ;;  %v6106_v26 = vrot.slane %v14871_v41, %v11914_v40  ;;  %v6109_v59 = vcombine.low %v14853_v34, %v14878_v7 }
 0x4d3   :  { %20843 = vst [vmem:[#allocation130_spill] sm:$0xff] %v14896_v54  ;;  %v14907_v62 = vrot.slane %v5031_v42, %v11914_v40  ;;  %v14910_v29 = vrot.slane %v5048_v1, %v11914_v40  ;;  %v14914_v33 = vcombine.high %v14887_v44, %v14887_v44  ;;  %v14918_v20 = vrot.slane %v14086_v50, %v11914_v40 }
 0x4d4   :  { %v14857_v49 = vpop.f32.mrb[46].mxu1  ;;  %v6503_v22 = vadd.f32 %v6502_v3, %v6501_v46  ;;  %v6125_v7 = vcombine.low %v14867_v43, %v14896_v54  ;;  %v5082_v42 = vcombine.high %v14086_v50, %v14086_v50  ;;  %v14928_v1 = vrot.slane %v14011_v25, %v11914_v40 }
 0x4d5   :  { %v10397_v0 = vpop.f32.mrb[47].mxu1  ;;  %20844 = vst [vmem:[#allocation96_spill] sm:$0xff] %v14907_v62  ;;  %20845 = vst [vmem:[#allocation137_spill] sm:$0xff] %v14910_v29  ;;  %v14931_v34 = vrot.slane %v5065_v53, %v11914_v40  ;;  %v6107_v41 = vcombine.low %v6099_v6, %v6106_v26  ;;  %v6504_v35 = vsel %vm1745_vm4, %v6091_v5, 0.0  ;;  %v6123_v46 = vrot.slane %v6109_v59, %v11914_v40 }
 0x4d6   :  { %v14892_v0 = vcombine.high %v14863_v52, %v14863_v52  ;;  %20846 = vst [vmem:[#allocation56_spill] sm:$0xff] %v14914_v33  ;;  %20847 = vst [vmem:[#allocation51_spill] sm:$0xff] %v14918_v20  ;;  %v14937_v3 = vcombine.high %v14907_v62, %v14907_v62  ;;  %v6142_v54 = vcombine.low %v14914_v33, %v14910_v29 }
 0x4d7   :  { %20848 = vst [vmem:[#allocation115_spill] sm:$0xff] %v14928_v1  ;;  %v14943_v50 = vcombine.high %v14910_v29, %v14910_v29  ;;  %v14947_v25 = vcombine.high %v14918_v20, %v14918_v20  ;;  %v6505_v53 = vadd.f32 %v6504_v35, %v6503_v22  ;;  %v6132_v6 = vrot.slane %v6125_v7, %v11914_v40 }
 0x4d8   :  { %20842 = vst [vmem:[#allocation48_spill] sm:$0xff] %v14892_v0  ;;  %v6108_v28 = vcombine.low %v14863_v52, %v14892_v0  ;;  %20849 = vst [vmem:[#allocation9_spill] sm:$0xff] %v14937_v3  ;;  %v14952_v26 = vrot.slane %v5082_v42, %v11914_v40  ;;  %v6141_v59 = vcombine.low %v14937_v3, %v14887_v44 }
 0x4d9   :  { %20850 = vst [vmem:[#allocation120_spill] sm:$0xff] %v14943_v50  ;;  %20851 = vst [vmem:[#allocation157_spill] sm:$0xff] %v14947_v25  ;;  %v14958_v33 = vcombine.high %v14928_v1, %v14928_v1  ;;  %v14962_v29 = vcombine.high %v14931_v34, %v14931_v34  ;;  %v6158_v35 = vcombine.low %v14943_v50, %v14928_v1 }
 0x4da   :  { %v6116_v5 = vrot.slane %v6108_v28, %v11914_v40  ;;  %v6139_v7 = vrot.slane %v14907_v62, %v11914_v40  ;;  %v5099_v22 = vcombine.high %v14165_v12, %v14165_v12  ;;  %v6506_v28 = vsel %vm6429_vm13, %v6107_v41, 0.0 }
 0x4db   :  { %v6156_v44 = vrot.slane %v6142_v54, %v11914_v40  ;;  %v6175_v3 = vcombine.low %v14918_v20, %v14947_v25  ;;  %v6507_v43 = vadd.f32 %v6506_v28, %v6505_v53  ;;  %v14976_v52 = vcombine.high %v14952_v26, %v14952_v26 }
 0x4dc   :  { %v6124_v42 = vcombine.low %v6116_v5, %v6123_v46  ;;  %v6140_v0 = vcombine.low %v6132_v6, %v6139_v7  ;;  %v6149_v1 = vrot.slane %v6141_v59, %v11914_v40  ;;  %v6165_v50 = vrot.slane %v6158_v35, %v11914_v40 }
 0x4dd   :  { %v6172_v62 = vrot.slane %v14958_v33, %v11914_v40  ;;  %v6174_v41 = vcombine.low %v14931_v34, %v14962_v29  ;;  %v14986_v54 = vrot.slane %v14165_v12, %v11914_v40  ;;  %v14989_v46 = vrot.slane %v5099_v22, %v11914_v40 }
 0x4de   :  { %v5133_v53 = vcombine.high %v14326_v19, %v14326_v19  ;;  %v6508_v5 = vsel %vm1745_vm4, %v6124_v42, 0.0  ;;  %v6157_v6 = vcombine.low %v6149_v1, %v6156_v44  ;;  %v6189_v59 = vrot.slane %v6175_v3, %v11914_v40 }
 0x4df   :  { %20852 = vst [vmem:[#allocation50_spill] sm:$0xff] %v14986_v54  ;;  %20853 = vst [vmem:[#allocation134_spill] sm:$0xff] %v14989_v46  ;;  %v6510_v35 = vsel %vm6429_vm13, %v6140_v0, 0.0  ;;  %v6191_v7 = vcombine.low %v14952_v26, %v14976_v52  ;;  %v5116_v12 = vcombine.high %v14273_v13, %v14273_v13  ;;  %v15002_v22 = vrot.slane %v14273_v13, %v11914_v40 }
 0x4e0   :  { %v6509_v28 = vadd.f32 %v6508_v5, %v6507_v43  ;;  %v6173_v25 = vcombine.low %v6165_v50, %v6172_v62  ;;  %v6182_v20 = vrot.slane %v6174_v41, %v11914_v40  ;;  %v15007_v44 = vcombine.high %v14986_v54, %v14986_v54 }
 0x4e1   :  { %20854 = vst [vmem:[#allocation53_spill] sm:$0xff] %v15002_v22  ;;  %v6205_v0 = vrot.slane %v14986_v54, %v11914_v40  ;;  %v15013_v1 = vcombine.high %v14989_v46, %v14989_v46  ;;  %v15016_v3 = vrot.slane %v5133_v53, %v11914_v40  ;;  %v6512_v43 = vsel %vm1745_vm4, %v6157_v6, 0.0 }
 0x4e2   :  { %v6511_v13 = vadd.f32 %v6510_v35, %v6509_v28  ;;  %v6190_v62 = vcombine.low %v6182_v20, %v6189_v59  ;;  %v6198_v50 = vrot.slane %v6191_v7, %v11914_v40  ;;  %v15021_v42 = vrot.slane %v5116_v12, %v11914_v40 }
 0x4e3   :  { %20855 = vst [vmem:[#allocation141_spill] sm:$0xff] %v15013_v1  ;;  %20856 = vst [vmem:[#allocation119_spill] sm:$0xff] %v15016_v3  ;;  %v15025_v41 = vcombine.high %v15002_v22, %v15002_v22  ;;  %v6208_v5 = vcombine.low %v15013_v1, %v15002_v22  ;;  %v6514_v54 = vsel %vm6429_vm13, %v6173_v25, 0.0  ;;  %v15032_v53 = vrot.slane %v14326_v19, %v11914_v40 }
 0x4e4   :  { %20857 = vst [vmem:[#allocation67_spill] sm:$0xff] %v15021_v42  ;;  %v15036_v20 = vrot.slane %v14487_v48, %v11914_v40  ;;  %v6513_v6 = vadd.f32 %v6512_v43, %v6511_v13  ;;  %v6206_v59 = vcombine.low %v6198_v50, %v6205_v0  ;;  %v6207_v35 = vcombine.low %v15007_v44, %v14989_v46 }
 0x4e5   :  { %20858 = vst [vmem:[#allocation124_spill] sm:$0xff] %v15025_v41  ;;  %20859 = vst [vmem:[#allocation52_spill] sm:$0xff] %v15032_v53  ;;  %v15042_v7 = vcombine.high %v15016_v3, %v15016_v3  ;;  %v6516_v12 = vsel %vm1745_vm4, %v6190_v62, 0.0  ;;  %v5150_v25 = vcombine.high %v14487_v48, %v14487_v48  ;;  %v5167_v19 = vcombine.high %v14619_v57, %v14619_v57 }
 0x4e6   :  { %20860 = vst [vmem:[#allocation158_spill] sm:$0xff] %v15036_v20  ;;  %v15051_v28 = vrot.slane %v14619_v57, %v11914_v40  ;;  %v6515_v0 = vadd.f32 %v6514_v54, %v6513_v6  ;;  %v15055_v13 = vcombine.high %v15021_v42, %v15021_v42  ;;  %v6222_v43 = vrot.slane %v6208_v5, %v11914_v40 }
 0x4e7   :  { %20861 = vst [vmem:[#allocation138_spill] sm:$0xff] %v15042_v7  ;;  %v6224_v62 = vcombine.low %v15025_v41, %v15021_v42  ;;  %v15062_v48 = vcombine.high %v15032_v53, %v15032_v53  ;;  %v15066_v50 = vcombine.high %v15036_v20, %v15036_v20  ;;  %v5184_v57 = vcombine.high %v14669_v27, %v14669_v27 }
 0x4e8   :  { %20862 = vst [vmem:[#allocation123_spill] sm:$0xff] %v15051_v28  ;;  %v6215_v54 = vrot.slane %v6207_v35, %v11914_v40  ;;  %v6517_v6 = vadd.f32 %v6516_v12, %v6515_v0  ;;  %v6518_v22 = vsel %vm6429_vm13, %v6206_v59, 0.0  ;;  %v6241_v5 = vcombine.low %v15016_v3, %v15042_v7 }
 0x4e9   :  { %20863 = vst [vmem:[#allocation8_spill] sm:$0xff] %v15062_v48  ;;  %20864 = vst [vmem:[#allocation128_spill] sm:$0xff] %v15066_v50  ;;  %v15075_v42 = vrot.slane %v5150_v25, %v11914_v40  ;;  %v15078_v41 = vrot.slane %v5167_v19, %v11914_v40  ;;  %v15082_v1 = vcombine.high %v15051_v28, %v15051_v28 }
 0x4ea   :  { %v15086_v46 = vrot.slane %v14730_v45, %v11914_v40  ;;  %v6223_v35 = vcombine.low %v6215_v54, %v6222_v43  ;;  %v6231_v59 = vrot.slane %v6224_v62, %v11914_v40  ;;  %v6238_v12 = vrot.slane %v15055_v13, %v11914_v40 }
 0x4eb   :  { %20865 = vst [vmem:[#allocation159_spill] sm:$0xff] %v15075_v42  ;;  %20866 = vst [vmem:[#allocation127_spill] sm:$0xff] %v15078_v41  ;;  %v5201_v25 = vcombine.high %v14730_v45, %v14730_v45  ;;  %v6240_v19 = vcombine.low %v15032_v53, %v15062_v48  ;;  %v6257_v0 = vcombine.low %v15036_v20, %v15066_v50 }
 0x4ec   :  { %20867 = vst [vmem:[#allocation64_spill] sm:$0xff] %v15082_v1  ;;  %20868 = vst [vmem:[#allocation132_spill] sm:$0xff] %v15086_v46  ;;  %v15098_v7 = vrot.slane %v5184_v57, %v11914_v40  ;;  %v6519_v3 = vadd.f32 %v6518_v22, %v6517_v6  ;;  %v15102_v43 = vrot.slane %v14669_v27, %v11914_v40  ;;  %v6520_v27 = vsel %vm1745_vm4, %v6223_v35, 0.0 }
 0x4ed   :  { %v5218_v62 = vcombine.high %v14799_v63, %v14799_v63  ;;  %v6255_v54 = vrot.slane %v6241_v5, %v11914_v40  ;;  %v15109_v45 = vcombine.high %v15075_v42, %v15075_v42  ;;  %v6274_v50 = vcombine.low %v15082_v1, %v15078_v41 }
 0x4ee   :  { %20869 = vst [vmem:[#allocation161_spill] sm:$0xff] %v15098_v7  ;;  %20870 = vst [vmem:[#allocation131_spill] sm:$0xff] %v15102_v43  ;;  %v15115_v57 = vcombine.high %v15086_v46, %v15086_v46  ;;  %v6239_v22 = vcombine.low %v6231_v59, %v6238_v12  ;;  %v15120_v6 = vcombine.high %v15078_v41, %v15078_v41 }
 0x4ef   :  { %20871 = vst [vmem:[#allocation160_spill] sm:$0xff] %v15109_v45  ;;  %v15123_v5 = vrot.slane %v5201_v25, %v11914_v40  ;;  %v6248_v20 = vrot.slane %v6240_v19, %v11914_v40  ;;  %v6264_v48 = vrot.slane %v6257_v0, %v11914_v40  ;;  %v6273_v1 = vcombine.low %v15109_v45, %v15051_v28 }
 0x4f0   :  { %20872 = vst [vmem:[#allocation136_spill] sm:$0xff] %v15115_v57  ;;  %20873 = vst [vmem:[#allocation162_spill] sm:$0xff] %v15120_v6  ;;  %v15131_v53 = vcombine.high %v15098_v7, %v15098_v7  ;;  %v15135_v35 = vcombine.high %v15102_v43, %v15102_v43  ;;  %v6290_v59 = vcombine.low %v15120_v6, %v15102_v43 }
 0x4f1   :  { %20874 = vst [vmem:[#allocation135_spill] sm:$0xff] %v15123_v5  ;;  %v15141_v12 = vrot.slane %v14799_v63, %v11914_v40  ;;  %v15144_v25 = vrot.slane %v5218_v62, %v11914_v40  ;;  %v6256_v19 = vcombine.low %v6248_v20, %v6255_v54  ;;  %v6271_v0 = vrot.slane %v15075_v42, %v11914_v40 }
 0x4f2   :  { %20875 = vst [vmem:[#allocation11_spill] sm:$0xff] %v15131_v53  ;;  %20876 = vst [vmem:[#allocation140_spill] sm:$0xff] %v15135_v35  ;;  %v6288_v41 = vrot.slane %v6274_v50, %v11914_v40  ;;  %v6307_v28 = vcombine.low %v15086_v46, %v15115_v57  ;;  %v6521_v45 = vadd.f32 %v6520_v27, %v6519_v3  ;;  %v6522_v20 = vsel %vm6429_vm13, %v6239_v22, 0.0 }
 0x4f3   :  { %v15153_v43 = vcombine.high %v15123_v5, %v15123_v5  ;;  %v5235_v63 = vcombine.high %v14857_v49, %v14857_v49  ;;  %v15159_v62 = vrot.slane %v14857_v49, %v11914_v40  ;;  %v6272_v54 = vcombine.low %v6264_v48, %v6271_v0 }
 0x4f4   :  { %v6281_v50 = vrot.slane %v6273_v1, %v11914_v40  ;;  %v6306_v57 = vcombine.low %v15098_v7, %v15131_v53  ;;  %v6297_v3 = vrot.slane %v6290_v59, %v11914_v40  ;;  %v6304_v27 = vrot.slane %v15135_v35, %v11914_v40 }
 0x4f5   :  { %20877 = vst [vmem:[#allocation163_spill] sm:$0xff] %v15153_v43  ;;  %20878 = vst [vmem:[#allocation139_spill] sm:$0xff] %v15159_v62  ;;  %v15170_v46 = vcombine.high %v15141_v12, %v15141_v12  ;;  %v15174_v49 = vcombine.high %v15144_v25, %v15144_v25  ;;  %v6524_v48 = vsel %vm1745_vm4, %v6256_v19, 0.0  ;;  %v6321_v1 = vrot.slane %v6307_v28, %v11914_v40 }
 0x4f6   :  { %v6289_v22 = vcombine.low %v6281_v50, %v6288_v41  ;;  %v6323_v0 = vcombine.low %v15123_v5, %v15153_v43  ;;  %v15181_v59 = vrot.slane %v5235_v63, %v11914_v40  ;;  %v15185_v53 = vcombine.high %v15159_v62, %v15159_v62 }
 0x4f7   :  { %20879 = vst [vmem:[#allocation71_spill] sm:$0xff] %v15174_v49  ;;  %v6340_v7 = vcombine.low %v15174_v49, %v15159_v62  ;;  %v6523_v35 = vadd.f32 %v6522_v20, %v6521_v45  ;;  %v6314_v6 = vrot.slane %v6306_v57, %v11914_v40  ;;  %v6526_v41 = vsel %vm6429_vm13, %v6272_v54, 0.0 }
 0x4f8   :  { %20880 = vst [vmem:[#allocation143_spill] sm:$0xff] %v15181_v59  ;;  %v6305_v19 = vcombine.low %v6297_v3, %v6304_v27  ;;  %v6337_v28 = vrot.slane %v15141_v12, %v11914_v40  ;;  %v6339_v63 = vcombine.low %v15170_v46, %v15144_v25  ;;  %v6528_v43 = vsel %vm1745_vm4, %v6289_v22, 0.0 }
 0x4f9   :  { %v6525_v50 = vadd.f32 %v6524_v48, %v6523_v35  ;;  %v6322_v5 = vcombine.low %v6314_v6, %v6321_v1  ;;  %v6330_v42 = vrot.slane %v6323_v0, %v11914_v40  ;;  %v15199_v45 = vcombine.high %v15181_v59, %v15181_v59 }
 0x4fa   :  { %v6354_v57 = vrot.slane %v6340_v7, %v11914_v40  ;;  %v6356_v20 = vcombine.low %v15185_v53, %v15181_v59  ;;  %v6530_v3 = vsel %vm6429_vm13, %v6305_v19, 0.0  ;;  %v6347_v35 = vrot.slane %v6339_v63, %v11914_v40 }
 0x4fb   :  { %20881 = vst [vmem:[#allocation165_spill] sm:$0xff] %v15199_v45  ;;  %v6527_v54 = vadd.f32 %v6526_v41, %v6525_v50  ;;  %v6338_v27 = vcombine.low %v6330_v42, %v6337_v28  ;;  %v6532_v6 = vsel %vm1745_vm4, %v6322_v5, 0.0  ;;  %v6370_v0 = vrot.slane %v15199_v45, %v11914_v40 }
 0x4fc   :  { %v6355_v22 = vcombine.low %v6347_v35, %v6354_v57  ;;  %v6363_v1 = vrot.slane %v6356_v20, %v11914_v40 }
 0x4fd   :  { %v6529_v48 = vadd.f32 %v6528_v43, %v6527_v54  ;;  %v6534_v7 = vsel %vm6429_vm13, %v6338_v27, 0.0 }
 0x4fe   :  { %v6371_v59 = vcombine.low %v6363_v1, %v6370_v0  ;;  %v6536_v41 = vsel %vm1745_vm4, %v6355_v22, 0.0  ;;  %v20887_v1 = vld [vmem:[#allocation19_spill] sm:$0xff]  ;;  %v20889_v0 = vld [vmem:[#allocation72_spill] sm:$0xff] }
 0x4ff   :  { %v6531_v62 = vadd.f32 %v6530_v3, %v6529_v48 }
 0x500   :  { %v6538_v28 = vsel %vm6429_vm13, %v6371_v59, 0.0 }
 0x501   :  { %v6533_v49 = vadd.f32 %v6532_v6, %v6531_v62 }
 0x503   :  { %v6535_v19 = vadd.f32 %v6534_v7, %v6533_v49  ;;  %v20891_v7 = vld [vmem:[#allocation17_spill] sm:$0xff] }
 0x505   :  { %v6537_v42 = vadd.f32 %v6536_v41, %v6535_v19  ;;  %v20893_v41 = vld [vmem:[#allocation65_spill] sm:$0xff]  ;;  %v20895_v19 = vld [vmem:[#allocation14_spill] sm:$0xff] }
 0x507   :  { %v6539_v43 = vadd.f32 %v6538_v28, %v6537_v42  ;;  %v20897_v42 = vld [vmem:[#allocation15_spill] sm:$0xff] }
 0x509   :  { %v6540_v63 = vrot.slane %v6539_v43, 4 }
 0x50b   :  { %v6541_v5 = vadd.f32 %v6540_v63, %v6539_v43  ;;  %v20899_v43 = vld [vmem:[#allocation16_spill] sm:$0xff] }
 0x50d   :  { %v6542_v50 = vrot.slane %v6541_v5, 2 }
 0x50f   :  { %v6543_v57 = vadd.f32 %v6542_v50, %v6541_v5  ;;  %v20901_v5 = vld [vmem:[#allocation57_spill] sm:$0xff] }
 0x511   :  { %v6544_v20 = vrot.slane %v6543_v57, 1 }
 0x513   :  { %v6545_v54 = vadd.f32 %v6544_v20, %v6543_v57  ;;  %v20903_v57 = vld [vmem:[#allocation62_spill] sm:$0xff] }
 0x515   :  { %v6546_v35 = vmul.f32 0.0025510204, %v6545_v54  ;;  %v20905_v54 = vld [vmem:[#allocation58_spill] sm:$0xff] }
 0x517   :  { %v6548_v45 = vcombine.high %v6546_v35, %v6546_v35  ;;  %v15214_v3 = vrot.slane %v6546_v35, %v11914_v40 }
 0x519   :  { %v15217_v62 = vrot.slane %v6548_v45, %v11914_v40  ;;  %v15221_v49 = vcombine.high %v15214_v3, %v15214_v3  ;;  %v15229_v27 = vsub.f32 %v14015_v10, %v15214_v3  ;;  %v15233_v48 = vsub.f32 %v14003_v55, %v15214_v3  ;;  %v20917_v40 = vld [vmem:[#allocation70_spill] sm:$0xff] }
 0x51a   :  { %v15237_v45 = vsub.f32 %v14054_v18, %v15214_v3  ;;  %v15241_v6 = vsub.f32 %v14074_v30, %v15214_v3  ;;  %v15245_v22 = vsub.f32 %v14048_v47, %v15214_v3  ;;  %v15261_v30 = vsub.f32 %v20893_v41, %v15214_v3 }
 0x51b   :  { %v15225_v59 = vcombine.high %v15217_v62, %v15217_v62  ;;  %20882 = vst [vmem:[#allocation142_spill] sm:$0xff] %v15229_v27  ;;  %20883 = vst [vmem:[#allocation164_spill] sm:$0xff] %v15233_v48  ;;  %v15249_v10 = vsub.f32 %v20887_v1, %v15221_v49  ;;  %v15253_v55 = vsub.f32 %v20889_v0, %v15217_v62  ;;  %v20907_v1 = vld [vmem:[#allocation21_spill] sm:$0xff] }
 0x51c   :  { %20884 = vst [vmem:[#allocation145_spill] sm:$0xff] %v15237_v45  ;;  %20885 = vst [vmem:[#allocation166_spill] sm:$0xff] %v15241_v6  ;;  %v15257_v18 = vsub.f32 %v20891_v7, %v15221_v49  ;;  %v15265_v47 = vsub.f32 %v20895_v19, %v15217_v62  ;;  %v15269_v28 = vsub.f32 %v20897_v42, %v15221_v49  ;;  %v20909_v7 = vld [vmem:[#allocation18_spill] sm:$0xff]  ;;  %v20911_v19 = vld [vmem:[#allocation61_spill] sm:$0xff] }
 0x51d   :  { %20886 = vst [vmem:[#allocation144_spill] sm:$0xff] %v15245_v22  ;;  %20888 = vst [vmem:[#allocation10_spill] sm:$0xff] %v15249_v10  ;;  %v15273_v63 = vsub.f32 %v20899_v43, %v15217_v62  ;;  %v15277_v50 = vsub.f32 %v20901_v5, %v15221_v49  ;;  %v15281_v20 = vsub.f32 %v20903_v57, %v15225_v59  ;;  %v20913_v43 = vld [vmem:[#allocation66_spill] sm:$0xff]  ;;  %v20915_v57 = vld [vmem:[#allocation29_spill] sm:$0xff] }
 0x51e   :  { %20890 = vst [vmem:[#allocation19_spill] sm:$0xff] %v15253_v55  ;;  %20892 = vst [vmem:[#allocation72_spill] sm:$0xff] %v15257_v18  ;;  %v15285_v35 = vsub.f32 %v20905_v54, %v15225_v59  ;;  %v15289_v0 = vsub.f32 %v20907_v1, %v15217_v62  ;;  %v15293_v41 = vsub.f32 %v20909_v7, %v15221_v49 }
 0x51f   :  { %20894 = vst [vmem:[#allocation17_spill] sm:$0xff] %v15261_v30  ;;  %20896 = vst [vmem:[#allocation65_spill] sm:$0xff] %v15265_v47  ;;  %v15297_v42 = vsub.f32 %v20911_v19, %v15217_v62  ;;  %v15301_v5 = vsub.f32 %v20913_v43, %v15225_v59  ;;  %v15305_v54 = vsub.f32 %v20915_v57, %v15221_v49  ;;  %v20921_v30 = vld [vmem:[#allocation31_spill] sm:$0xff] }
 0x520   :  { %20898 = vst [vmem:[#allocation14_spill] sm:$0xff] %v15269_v28  ;;  %20900 = vst [vmem:[#allocation15_spill] sm:$0xff] %v15273_v63  ;;  %v15309_v1 = vsub.f32 %v20917_v40, %v15217_v62  ;;  %v15313_v7 = vsub.f32 %v14138_v31, %v15214_v3  ;;  %v15317_v19 = vsub.f32 %v14119_v11, %v15221_v49 }
 0x521   :  { %20902 = vst [vmem:[#allocation16_spill] sm:$0xff] %v15277_v50  ;;  %20904 = vst [vmem:[#allocation57_spill] sm:$0xff] %v15281_v20  ;;  %v15321_v43 = vsub.f32 %v20921_v30, %v15217_v62  ;;  %v15337_v11 = vsub.f32 %v14182_v8, %v15217_v62 }
 0x522   :  { %20906 = vst [vmem:[#allocation62_spill] sm:$0xff] %v15285_v35  ;;  %20908 = vst [vmem:[#allocation58_spill] sm:$0xff] %v15289_v0 }
 0x523   :  { %20910 = vst [vmem:[#allocation21_spill] sm:$0xff] %v15293_v41  ;;  %20912 = vst [vmem:[#allocation18_spill] sm:$0xff] %v15297_v42 }
 0x524   :  { %20914 = vst [vmem:[#allocation61_spill] sm:$0xff] %v15301_v5  ;;  %20916 = vst [vmem:[#allocation66_spill] sm:$0xff] %v15305_v54  ;;  %v20923_v5 = vld [vmem:[#allocation28_spill] sm:$0xff]  ;;  %v20925_v54 = vld [vmem:[#allocation30_spill] sm:$0xff] }
 0x525   :  { %20918 = vst [vmem:[#allocation29_spill] sm:$0xff] %v15309_v1  ;;  %20919 = vst [vmem:[#allocation70_spill] sm:$0xff] %v15313_v7  ;;  %v15325_v57 = vsub.f32 %v20923_v5, %v15225_v59  ;;  %v15329_v40 = vsub.f32 %v20925_v54, %v15214_v3  ;;  %v20927_v1 = vld [vmem:[#allocation73_spill] sm:$0xff] }
 0x526   :  { %20920 = vst [vmem:[#allocation167_spill] sm:$0xff] %v15317_v19  ;;  %20922 = vst [vmem:[#allocation31_spill] sm:$0xff] %v15321_v43  ;;  %v15333_v31 = vsub.f32 %v20927_v1, %v15221_v49  ;;  %v20930_v19 = vld [vmem:[#allocation74_spill] sm:$0xff]  ;;  %v20932_v43 = vld [vmem:[#allocation23_spill] sm:$0xff] }
 0x527   :  { %20924 = vst [vmem:[#allocation28_spill] sm:$0xff] %v15325_v57  ;;  %20926 = vst [vmem:[#allocation30_spill] sm:$0xff] %v15329_v40  ;;  %v15341_v30 = vsub.f32 %v20930_v19, %v15214_v3  ;;  %v15345_v5 = vsub.f32 %v20932_v43, %v15221_v49  ;;  %v20934_v57 = vld [vmem:[#allocation69_spill] sm:$0xff]  ;;  %v20936_v40 = vld [vmem:[#allocation20_spill] sm:$0xff] }
 0x528   :  { %20928 = vst [vmem:[#allocation73_spill] sm:$0xff] %v15333_v31  ;;  %20929 = vst [vmem:[#allocation168_spill] sm:$0xff] %v15337_v11  ;;  %v15349_v54 = vsub.f32 %v20934_v57, %v15217_v62  ;;  %v15353_v1 = vsub.f32 %v20936_v40, %v15225_v59  ;;  %v20938_v31 = vld [vmem:[#allocation76_spill] sm:$0xff]  ;;  %v20940_v11 = vld [vmem:[#allocation75_spill] sm:$0xff] }
 0x529   :  { %20931 = vst [vmem:[#allocation74_spill] sm:$0xff] %v15341_v30  ;;  %20933 = vst [vmem:[#allocation23_spill] sm:$0xff] %v15345_v5  ;;  %v15357_v8 = vsub.f32 %v20938_v31, %v15214_v3  ;;  %v15361_v19 = vsub.f32 %v20940_v11, %v15221_v49  ;;  %v20942_v30 = vld [vmem:[#allocation33_spill] sm:$0xff]  ;;  %v20944_v5 = vld [vmem:[#allocation83_spill] sm:$0xff] }
 0x52a   :  { %20935 = vst [vmem:[#allocation69_spill] sm:$0xff] %v15349_v54  ;;  %20937 = vst [vmem:[#allocation20_spill] sm:$0xff] %v15353_v1  ;;  %v15365_v43 = vsub.f32 %v20942_v30, %v15217_v62  ;;  %v15369_v57 = vsub.f32 %v20944_v5, %v15214_v3  ;;  %v20946_v54 = vld [vmem:[#allocation78_spill] sm:$0xff] }
 0x52b   :  { %20939 = vst [vmem:[#allocation76_spill] sm:$0xff] %v15357_v8  ;;  %20941 = vst [vmem:[#allocation75_spill] sm:$0xff] %v15361_v19  ;;  %v15373_v40 = vsub.f32 %v20946_v54, %v15221_v49  ;;  %v20948_v1 = vld [vmem:[#allocation22_spill] sm:$0xff]  ;;  %v20950_v8 = vld [vmem:[#allocation77_spill] sm:$0xff]  ;;  %v15393_v54 = vsub.f32 %v14265_v32, %v15217_v62 }
 0x52c   :  { %20943 = vst [vmem:[#allocation33_spill] sm:$0xff] %v15365_v43  ;;  %20945 = vst [vmem:[#allocation83_spill] sm:$0xff] %v15369_v57  ;;  %v15377_v31 = vsub.f32 %v20948_v1, %v15217_v62  ;;  %v15381_v11 = vsub.f32 %v20950_v8, %v15225_v59  ;;  %v20952_v19 = vld [vmem:[#allocation89_spill] sm:$0xff]  ;;  %v20954_v43 = vld [vmem:[#allocation32_spill] sm:$0xff] }
 0x52d   :  { %20947 = vst [vmem:[#allocation78_spill] sm:$0xff] %v15373_v40  ;;  %v15385_v30 = vsub.f32 %v20952_v19, %v15214_v3  ;;  %v15389_v5 = vsub.f32 %v20954_v43, %v15221_v49  ;;  %20956 = vst [vmem:[#allocation169_spill] sm:$0xff] %v15393_v54  ;;  %v20957_v40 = vld [vmem:[#allocation25_spill] sm:$0xff]  ;;  %v20967_v54 = vld [vmem:[#allocation35_spill] sm:$0xff] }
 0x52e   :  { %20949 = vst [vmem:[#allocation22_spill] sm:$0xff] %v15377_v31  ;;  %20951 = vst [vmem:[#allocation77_spill] sm:$0xff] %v15381_v11  ;;  %v15397_v1 = vsub.f32 %v20957_v40, %v15214_v3  ;;  %v20959_v31 = vld [vmem:[#allocation12_spill] sm:$0xff]  ;;  %v15417_v40 = vsub.f32 %v20967_v54, %v15221_v49 }
 0x52f   :  { %20953 = vst [vmem:[#allocation89_spill] sm:$0xff] %v15385_v30  ;;  %20955 = vst [vmem:[#allocation32_spill] sm:$0xff] %v15389_v5  ;;  %v15401_v8 = vsub.f32 %v20959_v31, %v15221_v49  ;;  %v20961_v11 = vld [vmem:[#allocation80_spill] sm:$0xff]  ;;  %v20963_v30 = vld [vmem:[#allocation82_spill] sm:$0xff]  ;;  %v15421_v31 = vsub.f32 %v14282_v15, %v15217_v62 }
 0x530   :  { %20958 = vst [vmem:[#allocation25_spill] sm:$0xff] %v15397_v1  ;;  %v15405_v19 = vsub.f32 %v20961_v11, %v15217_v62  ;;  %v15409_v43 = vsub.f32 %v20963_v30, %v15225_v59  ;;  %v20965_v5 = vld [vmem:[#allocation79_spill] sm:$0xff]  ;;  %20968 = vst [vmem:[#allocation35_spill] sm:$0xff] %v15417_v40  ;;  %v15425_v11 = vsub.f32 %v14307_v9, %v15214_v3 }
 0x531   :  { %20960 = vst [vmem:[#allocation12_spill] sm:$0xff] %v15401_v8  ;;  %v15413_v32 = vsub.f32 %v20965_v5, %v15214_v3  ;;  %20969 = vst [vmem:[#allocation170_spill] sm:$0xff] %v15421_v31  ;;  %v20977_v40 = vld [vmem:[#allocation99_spill] sm:$0xff]  ;;  %v20979_v31 = vld [vmem:[#allocation86_spill] sm:$0xff] }
 0x532   :  { %20962 = vst [vmem:[#allocation80_spill] sm:$0xff] %v15405_v19  ;;  %20964 = vst [vmem:[#allocation82_spill] sm:$0xff] %v15409_v43  ;;  %v20971_v19 = vld [vmem:[#allocation55_spill] sm:$0xff]  ;;  %v20973_v43 = vld [vmem:[#allocation24_spill] sm:$0xff]  ;;  %v15441_v15 = vsub.f32 %v20977_v40, %v15214_v3  ;;  %v15445_v9 = vsub.f32 %v20979_v31, %v15221_v49 }
 0x533   :  { %20966 = vst [vmem:[#allocation79_spill] sm:$0xff] %v15413_v32  ;;  %20970 = vst [vmem:[#allocation171_spill] sm:$0xff] %v15425_v11  ;;  %v15429_v30 = vsub.f32 %v20971_v19, %v15221_v49  ;;  %v15433_v5 = vsub.f32 %v20973_v43, %v15217_v62  ;;  %v20975_v32 = vld [vmem:[#allocation105_spill] sm:$0xff]  ;;  %v15449_v19 = vsub.f32 %v14345_v60, %v15217_v62 }
 0x534   :  { %v15437_v54 = vsub.f32 %v20975_v32, %v15225_v59  ;;  %20978 = vst [vmem:[#allocation99_spill] sm:$0xff] %v15441_v15  ;;  %20980 = vst [vmem:[#allocation86_spill] sm:$0xff] %v15445_v9  ;;  %v15453_v43 = vsub.f32 %v14332_v61, %v15214_v3  ;;  %v20987_v15 = vld [vmem:[#allocation27_spill] sm:$0xff]  ;;  %v20989_v9 = vld [vmem:[#allocation34_spill] sm:$0xff] }
 0x535   :  { %20972 = vst [vmem:[#allocation55_spill] sm:$0xff] %v15429_v30  ;;  %20974 = vst [vmem:[#allocation24_spill] sm:$0xff] %v15433_v5  ;;  %v20983_v5 = vld [vmem:[#allocation102_spill] sm:$0xff]  ;;  %v15465_v31 = vsub.f32 %v20987_v15, %v15225_v59  ;;  %v15469_v60 = vsub.f32 %v20989_v9, %v15214_v3 }
 0x536   :  { %20976 = vst [vmem:[#allocation105_spill] sm:$0xff] %v15437_v54  ;;  %20981 = vst [vmem:[#allocation172_spill] sm:$0xff] %v15449_v19  ;;  %v15457_v32 = vsub.f32 %v20983_v5, %v15221_v49  ;;  %v20985_v54 = vld [vmem:[#allocation150_spill] sm:$0xff]  ;;  %v20991_v19 = vld [vmem:[#allocation93_spill] sm:$0xff] }
 0x537   :  { %20982 = vst [vmem:[#allocation173_spill] sm:$0xff] %v15453_v43  ;;  %v15461_v40 = vsub.f32 %v20985_v54, %v15217_v62  ;;  %20988 = vst [vmem:[#allocation27_spill] sm:$0xff] %v15465_v31  ;;  %v15473_v61 = vsub.f32 %v20991_v19, %v15221_v49  ;;  %v20993_v43 = vld [vmem:[#allocation7_spill] sm:$0xff] }
 0x538   :  { %20984 = vst [vmem:[#allocation102_spill] sm:$0xff] %v15457_v32  ;;  %20990 = vst [vmem:[#allocation34_spill] sm:$0xff] %v15469_v60  ;;  %v15477_v5 = vsub.f32 %v20993_v43, %v15217_v62  ;;  %v20995_v32 = vld [vmem:[#allocation37_spill] sm:$0xff]  ;;  %v20999_v31 = vld [vmem:[#allocation3_spill] sm:$0xff] }
 0x539   :  { %20986 = vst [vmem:[#allocation150_spill] sm:$0xff] %v15461_v40  ;;  %20992 = vst [vmem:[#allocation93_spill] sm:$0xff] %v15473_v61  ;;  %v15481_v54 = vsub.f32 %v20995_v32, %v15214_v3  ;;  %v20997_v40 = vld [vmem:[#allocation98_spill] sm:$0xff]  ;;  %v15489_v9 = vsub.f32 %v20999_v31, %v15217_v62  ;;  %v21001_v60 = vld [vmem:[#allocation81_spill] sm:$0xff] }
 0x53a   :  { %20994 = vst [vmem:[#allocation7_spill] sm:$0xff] %v15477_v5  ;;  %v15485_v15 = vsub.f32 %v20997_v40, %v15221_v49  ;;  %v15493_v19 = vsub.f32 %v21001_v60, %v15225_v59  ;;  %v21003_v61 = vld [vmem:[#allocation26_spill] sm:$0xff]  ;;  %v21005_v5 = vld [vmem:[#allocation5_spill] sm:$0xff] }
 0x53b   :  { %20996 = vst [vmem:[#allocation37_spill] sm:$0xff] %v15481_v54  ;;  %21000 = vst [vmem:[#allocation3_spill] sm:$0xff] %v15489_v9  ;;  %v15497_v43 = vsub.f32 %v21003_v61, %v15214_v3  ;;  %v15501_v32 = vsub.f32 %v21005_v5, %v15221_v49  ;;  %v21007_v54 = vld [vmem:[#allocation90_spill] sm:$0xff]  ;;  %v21011_v9 = vld [vmem:[#allocation36_spill] sm:$0xff] }
 0x53c   :  { %20998 = vst [vmem:[#allocation98_spill] sm:$0xff] %v15485_v15  ;;  %21002 = vst [vmem:[#allocation81_spill] sm:$0xff] %v15493_v19  ;;  %v15505_v40 = vsub.f32 %v21007_v54, %v15217_v62  ;;  %v21009_v15 = vld [vmem:[#allocation109_spill] sm:$0xff]  ;;  %v15513_v60 = vsub.f32 %v21011_v9, %v15221_v49 }
 0x53d   :  { %21004 = vst [vmem:[#allocation26_spill] sm:$0xff] %v15497_v43  ;;  %21006 = vst [vmem:[#allocation5_spill] sm:$0xff] %v15501_v32  ;;  %v15509_v31 = vsub.f32 %v21009_v15, %v15214_v3  ;;  %v21013_v19 = vld [vmem:[#allocation85_spill] sm:$0xff]  ;;  %v21015_v43 = vld [vmem:[#allocation151_spill] sm:$0xff] }
 0x53e   :  { %21008 = vst [vmem:[#allocation90_spill] sm:$0xff] %v15505_v40  ;;  %21012 = vst [vmem:[#allocation36_spill] sm:$0xff] %v15513_v60  ;;  %v15517_v61 = vsub.f32 %v21013_v19, %v15217_v62  ;;  %v15521_v5 = vsub.f32 %v21015_v43, %v15225_v59  ;;  %v21017_v32 = vld [vmem:[#allocation101_spill] sm:$0xff]  ;;  %v21019_v40 = vld [vmem:[#allocation59_spill] sm:$0xff] }
 0x53f   :  { %21010 = vst [vmem:[#allocation109_spill] sm:$0xff] %v15509_v31  ;;  %v15525_v54 = vsub.f32 %v21017_v32, %v15214_v3  ;;  %v15529_v15 = vsub.f32 %v21019_v40, %v15221_v49  ;;  %v21021_v31 = vld [vmem:[#allocation84_spill] sm:$0xff]  ;;  %v21023_v60 = vld [vmem:[#allocation113_spill] sm:$0xff] }
 0x540   :  { %21014 = vst [vmem:[#allocation85_spill] sm:$0xff] %v15517_v61  ;;  %21016 = vst [vmem:[#allocation151_spill] sm:$0xff] %v15521_v5  ;;  %v15533_v9 = vsub.f32 %v21021_v31, %v15217_v62  ;;  %v15537_v19 = vsub.f32 %v21023_v60, %v15214_v3  ;;  %v21025_v61 = vld [vmem:[#allocation106_spill] sm:$0xff]  ;;  %v21027_v5 = vld [vmem:[#allocation100_spill] sm:$0xff] }
 0x541   :  { %21018 = vst [vmem:[#allocation101_spill] sm:$0xff] %v15525_v54  ;;  %21020 = vst [vmem:[#allocation59_spill] sm:$0xff] %v15529_v15  ;;  %v15541_v43 = vsub.f32 %v21025_v61, %v15221_v49  ;;  %v15545_v32 = vsub.f32 %v21027_v5, %v15217_v62  ;;  %v21029_v54 = vld [vmem:[#allocation39_spill] sm:$0xff]  ;;  %v15561_v61 = vsub.f32 %v14530_v51, %v15217_v62 }
 0x542   :  { %21022 = vst [vmem:[#allocation84_spill] sm:$0xff] %v15533_v9  ;;  %21024 = vst [vmem:[#allocation113_spill] sm:$0xff] %v15537_v19  ;;  %v15549_v40 = vsub.f32 %v21029_v54, %v15225_v59  ;;  %v21031_v15 = vld [vmem:[#allocation63_spill] sm:$0xff]  ;;  %v21033_v9 = vld [vmem:[#allocation88_spill] sm:$0xff]  ;;  %v15565_v5 = vsub.f32 %v14500_v17, %v15214_v3  ;;  %v15569_v54 = vsub.f32 %v14536_v14, %v15221_v49 }
 0x543   :  { %21026 = vst [vmem:[#allocation106_spill] sm:$0xff] %v15541_v43  ;;  %21028 = vst [vmem:[#allocation100_spill] sm:$0xff] %v15545_v32  ;;  %v15553_v31 = vsub.f32 %v21031_v15, %v15214_v3  ;;  %v15557_v60 = vsub.f32 %v21033_v9, %v15221_v49  ;;  %v15573_v15 = vsub.f32 %v14476_v2, %v15217_v62 }
 0x544   :  { %21030 = vst [vmem:[#allocation39_spill] sm:$0xff] %v15549_v40  ;;  %21035 = vst [vmem:[#allocation174_spill] sm:$0xff] %v15561_v61  ;;  %v15581_v51 = vsub.f32 %v14508_v21, %v15214_v3  ;;  %v21042_v61 = vld [vmem:[#allocation153_spill] sm:$0xff] }
 0x545   :  { %21032 = vst [vmem:[#allocation63_spill] sm:$0xff] %v15553_v31  ;;  %21034 = vst [vmem:[#allocation88_spill] sm:$0xff] %v15557_v60  ;;  %v21039_v31 = vld [vmem:[#allocation2_spill] sm:$0xff]  ;;  %v15585_v17 = vsub.f32 %v21042_v61, %v15221_v49 }
 0x546   :  { %21036 = vst [vmem:[#allocation175_spill] sm:$0xff] %v15565_v5  ;;  %21037 = vst [vmem:[#allocation176_spill] sm:$0xff] %v15569_v54  ;;  %v15577_v9 = vsub.f32 %v21039_v31, %v15225_v59  ;;  %v21044_v5 = vld [vmem:[#allocation38_spill] sm:$0xff] }
 0x547   :  { %21038 = vst [vmem:[#allocation177_spill] sm:$0xff] %v15573_v15  ;;  %21041 = vst [vmem:[#allocation178_spill] sm:$0xff] %v15581_v51  ;;  %v15589_v14 = vsub.f32 %v21044_v5, %v15217_v62  ;;  %v21046_v54 = vld [vmem:[#allocation110_spill] sm:$0xff]  ;;  %v21048_v15 = vld [vmem:[#allocation104_spill] sm:$0xff] }
 0x548   :  { %21040 = vst [vmem:[#allocation2_spill] sm:$0xff] %v15577_v9  ;;  %21043 = vst [vmem:[#allocation153_spill] sm:$0xff] %v15585_v17  ;;  %v15593_v2 = vsub.f32 %v21046_v54, %v15214_v3  ;;  %v15597_v31 = vsub.f32 %v21048_v15, %v15221_v49  ;;  %v21050_v9 = vld [vmem:[#allocation54_spill] sm:$0xff]  ;;  %v21052_v51 = vld [vmem:[#allocation87_spill] sm:$0xff]  ;;  %v15617_v15 = vsub.f32 %v14610_v4, %v15217_v62 }
 0x549   :  { %21045 = vst [vmem:[#allocation38_spill] sm:$0xff] %v15589_v14  ;;  %v15601_v21 = vsub.f32 %v21050_v9, %v15217_v62  ;;  %v15605_v61 = vsub.f32 %v21052_v51, %v15225_v59  ;;  %v21054_v17 = vld [vmem:[#allocation41_spill] sm:$0xff]  ;;  %v15621_v9 = vsub.f32 %v14568_v16, %v15214_v3  ;;  %v15625_v51 = vsub.f32 %v14599_v56, %v15221_v49 }
 0x54a   :  { %21047 = vst [vmem:[#allocation110_spill] sm:$0xff] %v15593_v2  ;;  %21049 = vst [vmem:[#allocation104_spill] sm:$0xff] %v15597_v31  ;;  %v15609_v5 = vsub.f32 %v21054_v17, %v15214_v3  ;;  %v21056_v14 = vld [vmem:[#allocation117_spill] sm:$0xff]  ;;  %v15629_v17 = vsub.f32 %v14572_v24, %v15217_v62  ;;  %v15637_v4 = vsub.f32 %v14615_v23, %v15214_v3 }
 0x54b   :  { %21051 = vst [vmem:[#allocation54_spill] sm:$0xff] %v15601_v21  ;;  %21053 = vst [vmem:[#allocation87_spill] sm:$0xff] %v15605_v61  ;;  %v15613_v54 = vsub.f32 %v21056_v14, %v15221_v49  ;;  %v15641_v16 = vsub.f32 %v14633_v36, %v15221_v49 }
 0x54c   :  { %21055 = vst [vmem:[#allocation41_spill] sm:$0xff] %v15609_v5  ;;  %21058 = vst [vmem:[#allocation179_spill] sm:$0xff] %v15617_v15  ;;  %v21062_v5 = vld [vmem:[#allocation92_spill] sm:$0xff] }
 0x54d   :  { %21057 = vst [vmem:[#allocation117_spill] sm:$0xff] %v15613_v54  ;;  %21059 = vst [vmem:[#allocation180_spill] sm:$0xff] %v15621_v9  ;;  %v15633_v14 = vsub.f32 %v21062_v5, %v15225_v59  ;;  %v21066_v9 = vld [vmem:[#allocation147_spill] sm:$0xff] }
 0x54e   :  { %21060 = vst [vmem:[#allocation181_spill] sm:$0xff] %v15625_v51  ;;  %21061 = vst [vmem:[#allocation182_spill] sm:$0xff] %v15629_v17  ;;  %v15645_v56 = vsub.f32 %v21066_v9, %v15217_v62  ;;  %v21068_v51 = vld [vmem:[#allocation108_spill] sm:$0xff]  ;;  %v21070_v17 = vld [vmem:[#allocation103_spill] sm:$0xff] }
 0x54f   :  { %21063 = vst [vmem:[#allocation92_spill] sm:$0xff] %v15633_v14  ;;  %21064 = vst [vmem:[#allocation183_spill] sm:$0xff] %v15637_v4  ;;  %v15649_v24 = vsub.f32 %v21068_v51, %v15214_v3  ;;  %v15653_v5 = vsub.f32 %v21070_v17, %v15221_v49  ;;  %v21072_v14 = vld [vmem:[#allocation40_spill] sm:$0xff]  ;;  %v15673_v17 = vsub.f32 %v14699_v38, %v15217_v62 }
 0x550   :  { %21065 = vst [vmem:[#allocation184_spill] sm:$0xff] %v15641_v16  ;;  %21067 = vst [vmem:[#allocation147_spill] sm:$0xff] %v15645_v56  ;;  %v15657_v23 = vsub.f32 %v21072_v14, %v15217_v62  ;;  %v21074_v4 = vld [vmem:[#allocation152_spill] sm:$0xff]  ;;  %v21076_v16 = vld [vmem:[#allocation121_spill] sm:$0xff]  ;;  %v15677_v14 = vsub.f32 %v14683_v39, %v15214_v3 }
 0x551   :  { %21069 = vst [vmem:[#allocation108_spill] sm:$0xff] %v15649_v24  ;;  %21071 = vst [vmem:[#allocation103_spill] sm:$0xff] %v15653_v5  ;;  %v15661_v36 = vsub.f32 %v21074_v4, %v15225_v59  ;;  %v15665_v9 = vsub.f32 %v21076_v16, %v15214_v3  ;;  %v21078_v56 = vld [vmem:[#allocation114_spill] sm:$0xff] }
 0x552   :  { %21073 = vst [vmem:[#allocation40_spill] sm:$0xff] %v15657_v23  ;;  %v15669_v51 = vsub.f32 %v21078_v56, %v15221_v49  ;;  %21080 = vst [vmem:[#allocation185_spill] sm:$0xff] %v15673_v17  ;;  %v21082_v23 = vld [vmem:[#allocation146_spill] sm:$0xff] }
 0x553   :  { %21075 = vst [vmem:[#allocation152_spill] sm:$0xff] %v15661_v36  ;;  %21077 = vst [vmem:[#allocation121_spill] sm:$0xff] %v15665_v9  ;;  %v15681_v4 = vsub.f32 %v21082_v23, %v15221_v49  ;;  %v21084_v36 = vld [vmem:[#allocation154_spill] sm:$0xff]  ;;  %v21086_v9 = vld [vmem:[#allocation43_spill] sm:$0xff]  ;;  %v15701_v23 = vsub.f32 %v14733_v58, %v15217_v62 }
 0x554   :  { %21079 = vst [vmem:[#allocation114_spill] sm:$0xff] %v15669_v51  ;;  %21081 = vst [vmem:[#allocation186_spill] sm:$0xff] %v15677_v14  ;;  %v15685_v16 = vsub.f32 %v21084_v36, %v15217_v62  ;;  %v15689_v56 = vsub.f32 %v21086_v9, %v15225_v59  ;;  %v21088_v51 = vld [vmem:[#allocation91_spill] sm:$0xff]  ;;  %v21090_v17 = vld [vmem:[#allocation42_spill] sm:$0xff]  ;;  %v15705_v36 = vsub.f32 %v14751_v37, %v15214_v3 }
 0x555   :  { %21083 = vst [vmem:[#allocation146_spill] sm:$0xff] %v15681_v4  ;;  %v15693_v38 = vsub.f32 %v21088_v51, %v15214_v3  ;;  %v15697_v39 = vsub.f32 %v21090_v17, %v15221_v49  ;;  %21092 = vst [vmem:[#allocation187_spill] sm:$0xff] %v15701_v23  ;;  %v21102_v23 = vld [vmem:[#allocation148_spill] sm:$0xff] }
 0x556   :  { %21085 = vst [vmem:[#allocation154_spill] sm:$0xff] %v15685_v16  ;;  %21087 = vst [vmem:[#allocation43_spill] sm:$0xff] %v15689_v56  ;;  %v21094_v16 = vld [vmem:[#allocation95_spill] sm:$0xff]  ;;  %v21096_v56 = vld [vmem:[#allocation118_spill] sm:$0xff]  ;;  %v15725_v37 = vsub.f32 %v21102_v23, %v15221_v49 }
 0x557   :  { %21089 = vst [vmem:[#allocation91_spill] sm:$0xff] %v15693_v38  ;;  %21091 = vst [vmem:[#allocation42_spill] sm:$0xff] %v15697_v39  ;;  %v15709_v9 = vsub.f32 %v21094_v16, %v15221_v49  ;;  %v15713_v51 = vsub.f32 %v21096_v56, %v15217_v62  ;;  %v21098_v38 = vld [vmem:[#allocation107_spill] sm:$0xff]  ;;  %v21100_v39 = vld [vmem:[#allocation45_spill] sm:$0xff] }
 0x558   :  { %21093 = vst [vmem:[#allocation188_spill] sm:$0xff] %v15705_v36  ;;  %v15717_v17 = vsub.f32 %v21098_v38, %v15225_v59  ;;  %v15721_v58 = vsub.f32 %v21100_v39, %v15214_v3  ;;  %21103 = vst [vmem:[#allocation148_spill] sm:$0xff] %v15725_v37  ;;  %v21104_v36 = vld [vmem:[#allocation112_spill] sm:$0xff]  ;;  %v21114_v37 = vld [vmem:[#allocation155_spill] sm:$0xff] }
 0x559   :  { %21095 = vst [vmem:[#allocation95_spill] sm:$0xff] %v15709_v9  ;;  %21097 = vst [vmem:[#allocation118_spill] sm:$0xff] %v15713_v51  ;;  %v15729_v16 = vsub.f32 %v21104_v36, %v15217_v62  ;;  %v21106_v9 = vld [vmem:[#allocation125_spill] sm:$0xff]  ;;  %v21108_v51 = vld [vmem:[#allocation122_spill] sm:$0xff]  ;;  %v15749_v36 = vsub.f32 %v21114_v37, %v15214_v3 }
 0x55a   :  { %21099 = vst [vmem:[#allocation107_spill] sm:$0xff] %v15717_v17  ;;  %21101 = vst [vmem:[#allocation45_spill] sm:$0xff] %v15721_v58  ;;  %v15733_v56 = vsub.f32 %v21106_v9, %v15214_v3  ;;  %v15737_v38 = vsub.f32 %v21108_v51, %v15221_v49  ;;  %v21110_v17 = vld [vmem:[#allocation6_spill] sm:$0xff]  ;;  %v21112_v58 = vld [vmem:[#allocation44_spill] sm:$0xff] }
 0x55b   :  { %21105 = vst [vmem:[#allocation112_spill] sm:$0xff] %v15729_v16  ;;  %v15741_v39 = vsub.f32 %v21110_v17, %v15217_v62  ;;  %v15745_v23 = vsub.f32 %v21112_v58, %v15225_v59  ;;  %21115 = vst [vmem:[#allocation155_spill] sm:$0xff] %v15749_v36  ;;  %v21116_v16 = vld [vmem:[#allocation47_spill] sm:$0xff]  ;;  %v21126_v36 = vld [vmem:[#allocation46_spill] sm:$0xff] }
 0x55c   :  { %21107 = vst [vmem:[#allocation125_spill] sm:$0xff] %v15733_v56  ;;  %21109 = vst [vmem:[#allocation122_spill] sm:$0xff] %v15737_v38  ;;  %v15753_v9 = vsub.f32 %v21116_v16, %v15221_v49  ;;  %v21118_v56 = vld [vmem:[#allocation129_spill] sm:$0xff]  ;;  %v21120_v38 = vld [vmem:[#allocation60_spill] sm:$0xff]  ;;  %v15773_v16 = vsub.f32 %v21126_v36, %v15225_v59 }
 0x55d   :  { %21111 = vst [vmem:[#allocation6_spill] sm:$0xff] %v15741_v39  ;;  %21113 = vst [vmem:[#allocation44_spill] sm:$0xff] %v15745_v23  ;;  %v15757_v51 = vsub.f32 %v21118_v56, %v15217_v62  ;;  %v15761_v17 = vsub.f32 %v21120_v38, %v15214_v3  ;;  %v21122_v39 = vld [vmem:[#allocation111_spill] sm:$0xff]  ;;  %v21124_v23 = vld [vmem:[#allocation94_spill] sm:$0xff] }
 0x55e   :  { %21117 = vst [vmem:[#allocation47_spill] sm:$0xff] %v15753_v9  ;;  %v15765_v58 = vsub.f32 %v21122_v39, %v15221_v49  ;;  %v15769_v37 = vsub.f32 %v21124_v23, %v15217_v62  ;;  %21127 = vst [vmem:[#allocation46_spill] sm:$0xff] %v15773_v16  ;;  %v21128_v9 = vld [vmem:[#allocation126_spill] sm:$0xff]  ;;  %v21138_v16 = vld [vmem:[#allocation97_spill] sm:$0xff] }
 0x55f   :  { %21119 = vst [vmem:[#allocation129_spill] sm:$0xff] %v15757_v51  ;;  %21121 = vst [vmem:[#allocation60_spill] sm:$0xff] %v15761_v17  ;;  %v15777_v56 = vsub.f32 %v21128_v9, %v15214_v3  ;;  %v21130_v51 = vld [vmem:[#allocation4_spill] sm:$0xff]  ;;  %v21132_v17 = vld [vmem:[#allocation133_spill] sm:$0xff]  ;;  %v15797_v9 = vsub.f32 %v21138_v16, %v15217_v62 }
 0x560   :  { %21123 = vst [vmem:[#allocation111_spill] sm:$0xff] %v15765_v58  ;;  %21125 = vst [vmem:[#allocation94_spill] sm:$0xff] %v15769_v37  ;;  %v15781_v38 = vsub.f32 %v21130_v51, %v15221_v49  ;;  %v15785_v39 = vsub.f32 %v21132_v17, %v15217_v62  ;;  %v21134_v58 = vld [vmem:[#allocation49_spill] sm:$0xff]  ;;  %v21136_v37 = vld [vmem:[#allocation48_spill] sm:$0xff] }
 0x561   :  { %21129 = vst [vmem:[#allocation126_spill] sm:$0xff] %v15777_v56  ;;  %v15789_v23 = vsub.f32 %v21134_v58, %v15214_v3  ;;  %v15793_v36 = vsub.f32 %v21136_v37, %v15221_v49  ;;  %21139 = vst [vmem:[#allocation97_spill] sm:$0xff] %v15797_v9  ;;  %v21140_v56 = vld [vmem:[#allocation116_spill] sm:$0xff] }
 0x562   :  { %21131 = vst [vmem:[#allocation4_spill] sm:$0xff] %v15781_v38  ;;  %21133 = vst [vmem:[#allocation133_spill] sm:$0xff] %v15785_v39  ;;  %v15801_v51 = vsub.f32 %v21140_v56, %v15225_v59  ;;  %v21142_v38 = vld [vmem:[#allocation149_spill] sm:$0xff]  ;;  %v21144_v39 = vld [vmem:[#allocation130_spill] sm:$0xff] }
 0x563   :  { %21135 = vst [vmem:[#allocation49_spill] sm:$0xff] %v15789_v23  ;;  %21137 = vst [vmem:[#allocation48_spill] sm:$0xff] %v15793_v36  ;;  %v15805_v17 = vsub.f32 %v21142_v38, %v15214_v3  ;;  %v15809_v58 = vsub.f32 %v21144_v39, %v15221_v49  ;;  %v21146_v23 = vld [vmem:[#allocation96_spill] sm:$0xff]  ;;  %v21148_v36 = vld [vmem:[#allocation9_spill] sm:$0xff] }
 0x564   :  { %21141 = vst [vmem:[#allocation116_spill] sm:$0xff] %v15801_v51  ;;  %v15813_v37 = vsub.f32 %v21146_v23, %v15217_v62  ;;  %v15817_v16 = vsub.f32 %v21148_v36, %v15214_v3  ;;  %v21150_v9 = vld [vmem:[#allocation156_spill] sm:$0xff] }
 0x565   :  { %21143 = vst [vmem:[#allocation149_spill] sm:$0xff] %v15805_v17  ;;  %21145 = vst [vmem:[#allocation130_spill] sm:$0xff] %v15809_v58  ;;  %v15821_v56 = vsub.f32 %v21150_v9, %v15221_v49  ;;  %v21152_v51 = vld [vmem:[#allocation56_spill] sm:$0xff]  ;;  %v21154_v17 = vld [vmem:[#allocation137_spill] sm:$0xff]  ;;  %v15841_v9 = vsub.f32 %v14958_v33, %v15217_v62  ;;  %v15861_v33 = vsub.f32 %v14952_v26, %v15214_v3 }
 0x566   :  { %21147 = vst [vmem:[#allocation96_spill] sm:$0xff] %v15813_v37  ;;  %21149 = vst [vmem:[#allocation9_spill] sm:$0xff] %v15817_v16  ;;  %v15825_v38 = vsub.f32 %v21152_v51, %v15217_v62  ;;  %v15829_v39 = vsub.f32 %v21154_v17, %v15225_v59  ;;  %v21156_v58 = vld [vmem:[#allocation120_spill] sm:$0xff]  ;;  %v21158_v37 = vld [vmem:[#allocation115_spill] sm:$0xff]  ;;  %v15845_v51 = vsub.f32 %v14931_v34, %v15214_v3 }
 0x567   :  { %21151 = vst [vmem:[#allocation156_spill] sm:$0xff] %v15821_v56  ;;  %v15833_v23 = vsub.f32 %v21156_v58, %v15214_v3  ;;  %v15837_v36 = vsub.f32 %v21158_v37, %v15221_v49  ;;  %21160 = vst [vmem:[#allocation189_spill] sm:$0xff] %v15841_v9  ;;  %v15849_v17 = vsub.f32 %v14962_v29, %v15221_v49  ;;  %v21251_v9 = vld [vmem:[#allocation33_spill] sm:$0xff] }
 0x568   :  { %21153 = vst [vmem:[#allocation56_spill] sm:$0xff] %v15825_v38  ;;  %21155 = vst [vmem:[#allocation137_spill] sm:$0xff] %v15829_v39  ;;  %v21163_v39 = vld [vmem:[#allocation51_spill] sm:$0xff]  ;;  %v15865_v34 = vsub.f32 %v14976_v52, %v15221_v49  ;;  %v21256_v38 = vld [vmem:[#allocation22_spill] sm:$0xff] }
 0x569   :  { %21157 = vst [vmem:[#allocation120_spill] sm:$0xff] %v15833_v23  ;;  %21159 = vst [vmem:[#allocation115_spill] sm:$0xff] %v15837_v36  ;;  %v15853_v58 = vsub.f32 %v21163_v39, %v15217_v62  ;;  %v21165_v23 = vld [vmem:[#allocation157_spill] sm:$0xff]  ;;  %v15873_v39 = vsub.f32 %v15007_v44, %v15214_v3  ;;  %v21254_v36 = vld [vmem:[#allocation78_spill] sm:$0xff] }
 0x56a   :  { %21161 = vst [vmem:[#allocation190_spill] sm:$0xff] %v15845_v51  ;;  %21162 = vst [vmem:[#allocation191_spill] sm:$0xff] %v15849_v17  ;;  %v15857_v37 = vsub.f32 %v21165_v23, %v15225_v59  ;;  %v21169_v51 = vld [vmem:[#allocation50_spill] sm:$0xff]  ;;  %v21250_v17 = vld [vmem:[#allocation75_spill] sm:$0xff] }
 0x56b   :  { %21164 = vst [vmem:[#allocation51_spill] sm:$0xff] %v15853_v58  ;;  %21167 = vst [vmem:[#allocation192_spill] sm:$0xff] %v15861_v33  ;;  %v15869_v29 = vsub.f32 %v21169_v51, %v15217_v62  ;;  %v21172_v58 = vld [vmem:[#allocation134_spill] sm:$0xff]  ;;  %v21176_v33 = vld [vmem:[#allocation53_spill] sm:$0xff] }
 0x56c   :  { %21166 = vst [vmem:[#allocation157_spill] sm:$0xff] %v15857_v37  ;;  %21168 = vst [vmem:[#allocation193_spill] sm:$0xff] %v15865_v34  ;;  %v15877_v23 = vsub.f32 %v21172_v58, %v15221_v49  ;;  %v21174_v37 = vld [vmem:[#allocation141_spill] sm:$0xff]  ;;  %v15885_v52 = vsub.f32 %v21176_v33, %v15225_v59  ;;  %v21178_v34 = vld [vmem:[#allocation124_spill] sm:$0xff]  ;;  %v15897_v58 = vsub.f32 %v15055_v13, %v15217_v62 }
 0x56d   :  { %21170 = vst [vmem:[#allocation50_spill] sm:$0xff] %v15869_v29  ;;  %21171 = vst [vmem:[#allocation194_spill] sm:$0xff] %v15873_v39  ;;  %v15881_v26 = vsub.f32 %v21174_v37, %v15217_v62  ;;  %v15889_v51 = vsub.f32 %v21178_v34, %v15214_v3  ;;  %v21180_v29 = vld [vmem:[#allocation67_spill] sm:$0xff]  ;;  %v21249_v39 = vld [vmem:[#allocation76_spill] sm:$0xff] }
 0x56e   :  { %21173 = vst [vmem:[#allocation134_spill] sm:$0xff] %v15877_v23  ;;  %21177 = vst [vmem:[#allocation53_spill] sm:$0xff] %v15885_v52  ;;  %v15893_v44 = vsub.f32 %v21180_v29, %v15221_v49  ;;  %v21183_v23 = vld [vmem:[#allocation52_spill] sm:$0xff]  ;;  %v21187_v52 = vld [vmem:[#allocation119_spill] sm:$0xff] }
 0x56f   :  { %21175 = vst [vmem:[#allocation141_spill] sm:$0xff] %v15881_v26  ;;  %21179 = vst [vmem:[#allocation124_spill] sm:$0xff] %v15889_v51  ;;  %v15901_v37 = vsub.f32 %v21183_v23, %v15214_v3  ;;  %v21185_v26 = vld [vmem:[#allocation8_spill] sm:$0xff]  ;;  %v15909_v34 = vsub.f32 %v21187_v52, %v15217_v62  ;;  %v21189_v51 = vld [vmem:[#allocation138_spill] sm:$0xff] }
 0x570   :  { %21181 = vst [vmem:[#allocation67_spill] sm:$0xff] %v15893_v44  ;;  %21182 = vst [vmem:[#allocation195_spill] sm:$0xff] %v15897_v58  ;;  %v15905_v33 = vsub.f32 %v21185_v26, %v15221_v49  ;;  %v15913_v29 = vsub.f32 %v21189_v51, %v15225_v59  ;;  %v21191_v44 = vld [vmem:[#allocation158_spill] sm:$0xff]  ;;  %v21193_v58 = vld [vmem:[#allocation128_spill] sm:$0xff] }
 0x571   :  { %21184 = vst [vmem:[#allocation52_spill] sm:$0xff] %v15901_v37  ;;  %21188 = vst [vmem:[#allocation119_spill] sm:$0xff] %v15909_v34  ;;  %v15917_v13 = vsub.f32 %v21191_v44, %v15214_v3  ;;  %v15921_v23 = vsub.f32 %v21193_v58, %v15221_v49  ;;  %v21195_v37 = vld [vmem:[#allocation159_spill] sm:$0xff]  ;;  %v21257_v56 = vld [vmem:[#allocation77_spill] sm:$0xff] }
 0x572   :  { %21186 = vst [vmem:[#allocation8_spill] sm:$0xff] %v15905_v33  ;;  %21190 = vst [vmem:[#allocation138_spill] sm:$0xff] %v15913_v29  ;;  %v15925_v26 = vsub.f32 %v21195_v37, %v15217_v62  ;;  %v21197_v33 = vld [vmem:[#allocation160_spill] sm:$0xff]  ;;  %v21199_v34 = vld [vmem:[#allocation123_spill] sm:$0xff] }
 0x573   :  { %21192 = vst [vmem:[#allocation158_spill] sm:$0xff] %v15917_v13  ;;  %21194 = vst [vmem:[#allocation128_spill] sm:$0xff] %v15921_v23  ;;  %v15929_v52 = vsub.f32 %v21197_v33, %v15214_v3  ;;  %v15933_v51 = vsub.f32 %v21199_v34, %v15221_v49  ;;  %v21201_v29 = vld [vmem:[#allocation64_spill] sm:$0xff]  ;;  %v21203_v13 = vld [vmem:[#allocation127_spill] sm:$0xff] }
 0x574   :  { %21196 = vst [vmem:[#allocation159_spill] sm:$0xff] %v15925_v26  ;;  %v15937_v44 = vsub.f32 %v21201_v29, %v15217_v62  ;;  %v15941_v58 = vsub.f32 %v21203_v13, %v15225_v59  ;;  %v21205_v23 = vld [vmem:[#allocation162_spill] sm:$0xff]  ;;  %v21207_v26 = vld [vmem:[#allocation131_spill] sm:$0xff]  ;;  %v21258_v16 = vld [vmem:[#allocation89_spill] sm:$0xff] }
 0x575   :  { %21198 = vst [vmem:[#allocation160_spill] sm:$0xff] %v15929_v52  ;;  %21200 = vst [vmem:[#allocation123_spill] sm:$0xff] %v15933_v51  ;;  %v15945_v37 = vsub.f32 %v21205_v23, %v15214_v3  ;;  %v15949_v33 = vsub.f32 %v21207_v26, %v15221_v49  ;;  %v21209_v52 = vld [vmem:[#allocation140_spill] sm:$0xff]  ;;  %v21211_v51 = vld [vmem:[#allocation161_spill] sm:$0xff] }
 0x576   :  { %21202 = vst [vmem:[#allocation64_spill] sm:$0xff] %v15937_v44  ;;  %21204 = vst [vmem:[#allocation127_spill] sm:$0xff] %v15941_v58  ;;  %v15953_v34 = vsub.f32 %v21209_v52, %v15217_v62  ;;  %v15957_v29 = vsub.f32 %v21211_v51, %v15214_v3  ;;  %v21213_v44 = vld [vmem:[#allocation11_spill] sm:$0xff]  ;;  %v21215_v58 = vld [vmem:[#allocation132_spill] sm:$0xff] }
 0x577   :  { %21206 = vst [vmem:[#allocation162_spill] sm:$0xff] %v15945_v37  ;;  %21208 = vst [vmem:[#allocation131_spill] sm:$0xff] %v15949_v33  ;;  %v15961_v13 = vsub.f32 %v21213_v44, %v15221_v49  ;;  %v15965_v23 = vsub.f32 %v21215_v58, %v15217_v62  ;;  %v21217_v37 = vld [vmem:[#allocation136_spill] sm:$0xff]  ;;  %v21219_v33 = vld [vmem:[#allocation135_spill] sm:$0xff]  ;;  %v15981_v44 = vsub.f32 %v15141_v12, %v15217_v62 }
 0x578   :  { %21210 = vst [vmem:[#allocation140_spill] sm:$0xff] %v15953_v34  ;;  %21212 = vst [vmem:[#allocation161_spill] sm:$0xff] %v15957_v29  ;;  %v15969_v26 = vsub.f32 %v21217_v37, %v15225_v59  ;;  %v15973_v52 = vsub.f32 %v21219_v33, %v15214_v3  ;;  %v21221_v34 = vld [vmem:[#allocation163_spill] sm:$0xff]  ;;  %v15985_v58 = vsub.f32 %v15170_v46, %v15214_v3  ;;  %v21248_v29 = vld [vmem:[#allocation20_spill] sm:$0xff] }
 0x579   :  { %21214 = vst [vmem:[#allocation11_spill] sm:$0xff] %v15961_v13  ;;  %21216 = vst [vmem:[#allocation132_spill] sm:$0xff] %v15965_v23  ;;  %v15977_v51 = vsub.f32 %v21221_v34, %v15221_v49  ;;  %v15989_v37 = vsub.f32 %v15144_v25, %v15221_v49  ;;  %v16001_v12 = vsub.f32 %v15185_v53, %v15214_v3  ;;  %v21246_v23 = vld [vmem:[#allocation23_spill] sm:$0xff]  ;;  %v21247_v13 = vld [vmem:[#allocation69_spill] sm:$0xff] }
 0x57a   :  { %21218 = vst [vmem:[#allocation136_spill] sm:$0xff] %v15969_v26  ;;  %21220 = vst [vmem:[#allocation135_spill] sm:$0xff] %v15973_v52  ;;  %v21226_v26 = vld [vmem:[#allocation71_spill] sm:$0xff]  ;;  %v16021_v53 = vmul.f32 %v15253_v55, %v15253_v55  ;;  %v16025_v3 = vmul.f32 %v15281_v20, %v15281_v20  ;;  %v16049_v20 = vmul.f32 %v15273_v63, %v15273_v63 }
 0x57b   :  { %21222 = vst [vmem:[#allocation163_spill] sm:$0xff] %v15977_v51  ;;  %21223 = vst [vmem:[#allocation196_spill] sm:$0xff] %v15981_v44  ;;  %v15993_v33 = vsub.f32 %v21226_v26, %v15217_v62  ;;  %v21228_v52 = vld [vmem:[#allocation139_spill] sm:$0xff]  ;;  %v16013_v26 = vmul.f32 %v15229_v27, %v15229_v27  ;;  %v16061_v55 = vmul.f32 %v15277_v50, %v15277_v50  ;;  %v21238_v27 = vld [vmem:[#allocation29_spill] sm:$0xff] }
 0x57c   :  { %21224 = vst [vmem:[#allocation197_spill] sm:$0xff] %v15985_v58  ;;  %21225 = vst [vmem:[#allocation198_spill] sm:$0xff] %v15989_v37  ;;  %v15997_v34 = vsub.f32 %v21228_v52, %v15225_v59  ;;  %v21231_v44 = vld [vmem:[#allocation143_spill] sm:$0xff]  ;;  %v21233_v58 = vld [vmem:[#allocation165_spill] sm:$0xff]  ;;  %v16017_v59 = vmul.f32 %v15249_v10, %v15249_v10  ;;  %v16037_v52 = vmul.f32 %v15265_v47, %v15265_v47 }
 0x57d   :  { %21227 = vst [vmem:[#allocation71_spill] sm:$0xff] %v15993_v33  ;;  %21230 = vst [vmem:[#allocation199_spill] sm:$0xff] %v16001_v12  ;;  %v16005_v46 = vsub.f32 %v21231_v44, %v15221_v49  ;;  %v16009_v25 = vsub.f32 %v21233_v58, %v15217_v62  ;;  %v16029_v62 = vmul.f32 %v15233_v48, %v15233_v48  ;;  %v21237_v48 = vld [vmem:[#allocation66_spill] sm:$0xff]  ;;  %v21240_v12 = vld [vmem:[#allocation31_spill] sm:$0xff] }
 0x57e   :  { %21229 = vst [vmem:[#allocation139_spill] sm:$0xff] %v15997_v34  ;;  %v16033_v49 = vmul.f32 %v15257_v18, %v15257_v18  ;;  %v16041_v44 = vmul.f32 %v15237_v45, %v15237_v45  ;;  %v16045_v58 = vmul.f32 %v15269_v28, %v15269_v28  ;;  %v16053_v18 = vmul.f32 %v15285_v35, %v15285_v35  ;;  %v21236_v45 = vld [vmem:[#allocation17_spill] sm:$0xff]  ;;  %v21242_v34 = vld [vmem:[#allocation30_spill] sm:$0xff]  ;;  %v21244_v37 = vld [vmem:[#allocation168_spill] sm:$0xff] }
 0x57f   :  { %21232 = vst [vmem:[#allocation143_spill] sm:$0xff] %v16005_v46  ;;  %21234 = vst [vmem:[#allocation165_spill] sm:$0xff] %v16009_v25  ;;  %v16057_v47 = vmul.f32 %v15241_v6, %v15241_v6  ;;  %v16065_v28 = vmul.f32 %v15289_v0, %v15289_v0  ;;  %v16069_v63 = vmul.f32 %v15245_v22, %v15245_v22  ;;  %v21235_v6 = vld [vmem:[#allocation61_spill] sm:$0xff]  ;;  %v21239_v25 = vld [vmem:[#allocation167_spill] sm:$0xff] }
 0x580   :  { %v16073_v35 = vmul.f32 %v15293_v41, %v15293_v41  ;;  %v16077_v10 = vmul.f32 %v15297_v42, %v15297_v42  ;;  %v16081_v50 = vmul.f32 %v21235_v6, %v21235_v6  ;;  %v16085_v0 = vmul.f32 %v21236_v45, %v21236_v45  ;;  %v21241_v46 = vld [vmem:[#allocation28_spill] sm:$0xff]  ;;  %v21243_v33 = vld [vmem:[#allocation73_spill] sm:$0xff]  ;;  %v21245_v51 = vld [vmem:[#allocation74_spill] sm:$0xff] }
 0x581   :  { %v16089_v22 = vmul.f32 %v21237_v48, %v21237_v48  ;;  %v16093_v41 = vmul.f32 %v21238_v27, %v21238_v27  ;;  %v16097_v42 = vmul.f32 %v15313_v7, %v15313_v7  ;;  %v16101_v6 = vmul.f32 %v21239_v25, %v21239_v25 }
 0x582   :  { %v16105_v45 = vmul.f32 %v21240_v12, %v21240_v12  ;;  %v16109_v48 = vmul.f32 %v21241_v46, %v21241_v46  ;;  %v16113_v27 = vmul.f32 %v21242_v34, %v21242_v34  ;;  %v16117_v7 = vmul.f32 %v21243_v33, %v21243_v33 }
 0x583   :  { %v16121_v25 = vmul.f32 %v21244_v37, %v21244_v37  ;;  %v16125_v12 = vmul.f32 %v21245_v51, %v21245_v51  ;;  %v16129_v46 = vmul.f32 %v21246_v23, %v21246_v23  ;;  %v16133_v34 = vmul.f32 %v21247_v13, %v21247_v13 }
 0x584   :  { %v16137_v33 = vmul.f32 %v21248_v29, %v21248_v29  ;;  %v16141_v37 = vmul.f32 %v21249_v39, %v21249_v39  ;;  %v16145_v51 = vmul.f32 %v21250_v17, %v21250_v17  ;;  %v16149_v23 = vmul.f32 %v21251_v9, %v21251_v9 }
 0x585   :  { %v16153_v13 = vmul.f32 %v15369_v57, %v15369_v57  ;;  %v16157_v29 = vmul.f32 %v21254_v36, %v21254_v36  ;;  %v16161_v39 = vmul.f32 %v21256_v38, %v21256_v38  ;;  %v16165_v17 = vmul.f32 %v21257_v56, %v21257_v56 }
 0x586   :  { %21252 = vst [vmem:[#allocation200_spill] sm:$0xff] %v16149_v23  ;;  %v16169_v9 = vmul.f32 %v21258_v16, %v21258_v16  ;;  %v21260_v23 = vld [vmem:[#allocation32_spill] sm:$0xff]  ;;  %v16181_v38 = vmul.f32 %v15397_v1, %v15397_v1  ;;  %v16185_v56 = vmul.f32 %v15401_v8, %v15401_v8 }
 0x587   :  { %21253 = vst [vmem:[#allocation201_spill] sm:$0xff] %v16153_v13  ;;  %21255 = vst [vmem:[#allocation202_spill] sm:$0xff] %v16157_v29  ;;  %v16173_v57 = vmul.f32 %v21260_v23, %v21260_v23  ;;  %v21262_v13 = vld [vmem:[#allocation169_spill] sm:$0xff]  ;;  %v21266_v29 = vld [vmem:[#allocation80_spill] sm:$0xff] }
 0x588   :  { %21259 = vst [vmem:[#allocation203_spill] sm:$0xff] %v16169_v9  ;;  %v16177_v36 = vmul.f32 %v21262_v13, %v21262_v13  ;;  %21264 = vst [vmem:[#allocation206_spill] sm:$0xff] %v16181_v38  ;;  %v16189_v16 = vmul.f32 %v21266_v29, %v21266_v29  ;;  %v21267_v9 = vld [vmem:[#allocation82_spill] sm:$0xff]  ;;  %v16209_v29 = vmul.f32 %v15425_v11, %v15425_v11 }
 0x589   :  { %21261 = vst [vmem:[#allocation204_spill] sm:$0xff] %v16173_v57  ;;  %21265 = vst [vmem:[#allocation207_spill] sm:$0xff] %v16185_v56  ;;  %v16193_v23 = vmul.f32 %v21267_v9, %v21267_v9  ;;  %v21268_v57 = vld [vmem:[#allocation79_spill] sm:$0xff]  ;;  %v21272_v38 = vld [vmem:[#allocation170_spill] sm:$0xff]  ;;  %v16213_v9 = vmul.f32 %v15429_v30, %v15429_v30 }
 0x58a   :  { %21263 = vst [vmem:[#allocation205_spill] sm:$0xff] %v16177_v36  ;;  %v16197_v13 = vmul.f32 %v21268_v57, %v21268_v57  ;;  %v21270_v36 = vld [vmem:[#allocation35_spill] sm:$0xff]  ;;  %v16205_v8 = vmul.f32 %v21272_v38, %v21272_v38  ;;  %21274 = vst [vmem:[#allocation211_spill] sm:$0xff] %v16209_v29  ;;  %v21276_v56 = vld [vmem:[#allocation24_spill] sm:$0xff] }
 0x58b   :  { %v16201_v1 = vmul.f32 %v21270_v36, %v21270_v36  ;;  %21275 = vst [vmem:[#allocation212_spill] sm:$0xff] %v16213_v9  ;;  %v16217_v57 = vmul.f32 %v21276_v56, %v21276_v56  ;;  %v21284_v29 = vld [vmem:[#allocation172_spill] sm:$0xff]  ;;  %v21286_v9 = vld [vmem:[#allocation173_spill] sm:$0xff] }
 0x58c   :  { %21269 = vst [vmem:[#allocation208_spill] sm:$0xff] %v16197_v13  ;;  %21273 = vst [vmem:[#allocation210_spill] sm:$0xff] %v16205_v8  ;;  %v21278_v13 = vld [vmem:[#allocation105_spill] sm:$0xff]  ;;  %v21282_v8 = vld [vmem:[#allocation86_spill] sm:$0xff]  ;;  %v16233_v30 = vmul.f32 %v21284_v29, %v21284_v29  ;;  %v16237_v56 = vmul.f32 %v21286_v9, %v21286_v9 }
 0x58d   :  { %21271 = vst [vmem:[#allocation209_spill] sm:$0xff] %v16201_v1  ;;  %21277 = vst [vmem:[#allocation213_spill] sm:$0xff] %v16217_v57  ;;  %v16221_v36 = vmul.f32 %v21278_v13, %v21278_v13  ;;  %v21280_v1 = vld [vmem:[#allocation99_spill] sm:$0xff]  ;;  %v16229_v11 = vmul.f32 %v21282_v8, %v21282_v8  ;;  %v21288_v57 = vld [vmem:[#allocation102_spill] sm:$0xff] }
 0x58e   :  { %v16225_v38 = vmul.f32 %v21280_v1, %v21280_v1  ;;  %21285 = vst [vmem:[#allocation217_spill] sm:$0xff] %v16233_v30  ;;  %21287 = vst [vmem:[#allocation218_spill] sm:$0xff] %v16237_v56  ;;  %v16241_v13 = vmul.f32 %v21288_v57, %v21288_v57  ;;  %v21296_v30 = vld [vmem:[#allocation93_spill] sm:$0xff]  ;;  %v21298_v56 = vld [vmem:[#allocation7_spill] sm:$0xff] }
 0x58f   :  { %21279 = vst [vmem:[#allocation214_spill] sm:$0xff] %v16221_v36  ;;  %21283 = vst [vmem:[#allocation216_spill] sm:$0xff] %v16229_v11  ;;  %v21290_v36 = vld [vmem:[#allocation150_spill] sm:$0xff]  ;;  %v16257_v9 = vmul.f32 %v21296_v30, %v21296_v30  ;;  %v16261_v57 = vmul.f32 %v21298_v56, %v21298_v56 }
 0x590   :  { %21281 = vst [vmem:[#allocation215_spill] sm:$0xff] %v16225_v38  ;;  %21289 = vst [vmem:[#allocation219_spill] sm:$0xff] %v16241_v13  ;;  %v16245_v1 = vmul.f32 %v21290_v36, %v21290_v36  ;;  %v21292_v38 = vld [vmem:[#allocation27_spill] sm:$0xff]  ;;  %v21294_v11 = vld [vmem:[#allocation34_spill] sm:$0xff] }
 0x591   :  { %v16249_v8 = vmul.f32 %v21292_v38, %v21292_v38  ;;  %v16253_v29 = vmul.f32 %v21294_v11, %v21294_v11  ;;  %21297 = vst [vmem:[#allocation223_spill] sm:$0xff] %v16257_v9  ;;  %21299 = vst [vmem:[#allocation224_spill] sm:$0xff] %v16261_v57  ;;  %v21300_v13 = vld [vmem:[#allocation37_spill] sm:$0xff]  ;;  %v21308_v9 = vld [vmem:[#allocation26_spill] sm:$0xff] }
 0x592   :  { %21291 = vst [vmem:[#allocation220_spill] sm:$0xff] %v16245_v1  ;;  %v16265_v36 = vmul.f32 %v21300_v13, %v21300_v13  ;;  %v21302_v1 = vld [vmem:[#allocation98_spill] sm:$0xff]  ;;  %v16281_v56 = vmul.f32 %v21308_v9, %v21308_v9  ;;  %v21310_v57 = vld [vmem:[#allocation5_spill] sm:$0xff] }
 0x593   :  { %21293 = vst [vmem:[#allocation221_spill] sm:$0xff] %v16249_v8  ;;  %21295 = vst [vmem:[#allocation222_spill] sm:$0xff] %v16253_v29  ;;  %v16269_v38 = vmul.f32 %v21302_v1, %v21302_v1  ;;  %v21304_v8 = vld [vmem:[#allocation3_spill] sm:$0xff]  ;;  %v21306_v29 = vld [vmem:[#allocation81_spill] sm:$0xff]  ;;  %v16285_v13 = vmul.f32 %v21310_v57, %v21310_v57 }
 0x594   :  { %21301 = vst [vmem:[#allocation225_spill] sm:$0xff] %v16265_v36  ;;  %v16273_v11 = vmul.f32 %v21304_v8, %v21304_v8  ;;  %v16277_v30 = vmul.f32 %v21306_v29, %v21306_v29  ;;  %21309 = vst [vmem:[#allocation229_spill] sm:$0xff] %v16281_v56  ;;  %v21312_v36 = vld [vmem:[#allocation90_spill] sm:$0xff]  ;;  %v21318_v56 = vld [vmem:[#allocation151_spill] sm:$0xff] }
 0x595   :  { %21303 = vst [vmem:[#allocation226_spill] sm:$0xff] %v16269_v38  ;;  %21311 = vst [vmem:[#allocation230_spill] sm:$0xff] %v16285_v13  ;;  %v16289_v1 = vmul.f32 %v21312_v36, %v21312_v36  ;;  %v21314_v38 = vld [vmem:[#allocation109_spill] sm:$0xff]  ;;  %v16305_v57 = vmul.f32 %v21318_v56, %v21318_v56  ;;  %v16325_v56 = vmul.f32 %v15541_v43, %v15541_v43 }
 0x596   :  { %21305 = vst [vmem:[#allocation227_spill] sm:$0xff] %v16273_v11  ;;  %21307 = vst [vmem:[#allocation228_spill] sm:$0xff] %v16277_v30  ;;  %v16293_v8 = vmul.f32 %v21314_v38, %v21314_v38  ;;  %v21316_v11 = vld [vmem:[#allocation36_spill] sm:$0xff]  ;;  %v21317_v30 = vld [vmem:[#allocation85_spill] sm:$0xff] }
 0x597   :  { %21313 = vst [vmem:[#allocation231_spill] sm:$0xff] %v16289_v1  ;;  %v16297_v29 = vmul.f32 %v21316_v11, %v21316_v11  ;;  %v16301_v9 = vmul.f32 %v21317_v30, %v21317_v30  ;;  %v21319_v13 = vld [vmem:[#allocation101_spill] sm:$0xff]  ;;  %v21321_v1 = vld [vmem:[#allocation59_spill] sm:$0xff]  ;;  %v16321_v30 = vmul.f32 %v15537_v19, %v15537_v19  ;;  %21325 = vst [vmem:[#allocation236_spill] sm:$0xff] %v16325_v56 }
 0x598   :  { %21315 = vst [vmem:[#allocation232_spill] sm:$0xff] %v16293_v8  ;;  %v16309_v36 = vmul.f32 %v21319_v13, %v21319_v13  ;;  %v16313_v38 = vmul.f32 %v21321_v1, %v21321_v1  ;;  %v21322_v8 = vld [vmem:[#allocation84_spill] sm:$0xff]  ;;  %v16329_v13 = vmul.f32 %v15545_v32, %v15545_v32  ;;  %v16333_v1 = vmul.f32 %v15549_v40, %v15549_v40 }
 0x599   :  { %v16317_v11 = vmul.f32 %v21322_v8, %v21322_v8  ;;  %21324 = vst [vmem:[#allocation235_spill] sm:$0xff] %v16321_v30  ;;  %v16341_v19 = vmul.f32 %v15557_v60, %v15557_v60  ;;  %v21332_v30 = vld [vmem:[#allocation175_spill] sm:$0xff]  ;;  %v21334_v56 = vld [vmem:[#allocation176_spill] sm:$0xff] }
 0x59a   :  { %21320 = vst [vmem:[#allocation233_spill] sm:$0xff] %v16309_v36  ;;  %21326 = vst [vmem:[#allocation237_spill] sm:$0xff] %v16329_v13  ;;  %v21327_v36 = vld [vmem:[#allocation63_spill] sm:$0xff]  ;;  %v16349_v32 = vmul.f32 %v21332_v30, %v21332_v30  ;;  %v16353_v40 = vmul.f32 %v21334_v56, %v21334_v56  ;;  %v21335_v13 = vld [vmem:[#allocation177_spill] sm:$0xff] }
 0x59b   :  { %21323 = vst [vmem:[#allocation234_spill] sm:$0xff] %v16317_v11  ;;  %v16337_v8 = vmul.f32 %v21327_v36, %v21327_v36  ;;  %21329 = vst [vmem:[#allocation239_spill] sm:$0xff] %v16341_v19  ;;  %v21330_v11 = vld [vmem:[#allocation174_spill] sm:$0xff]  ;;  %v16357_v36 = vmul.f32 %v21335_v13, %v21335_v13  ;;  %v16377_v13 = vmul.f32 %v15593_v2, %v15593_v2 }
 0x59c   :  { %v16345_v43 = vmul.f32 %v21330_v11, %v21330_v11  ;;  %21333 = vst [vmem:[#allocation241_spill] sm:$0xff] %v16349_v32  ;;  %v21337_v19 = vld [vmem:[#allocation178_spill] sm:$0xff]  ;;  %v16397_v2 = vmul.f32 %v15613_v54, %v15613_v54  ;;  %v21352_v54 = vld [vmem:[#allocation92_spill] sm:$0xff] }
 0x59d   :  { %21328 = vst [vmem:[#allocation238_spill] sm:$0xff] %v16337_v8  ;;  %v21336_v8 = vld [vmem:[#allocation2_spill] sm:$0xff]  ;;  %v16365_v11 = vmul.f32 %v21337_v19, %v21337_v19  ;;  %21342 = vst [vmem:[#allocation244_spill] sm:$0xff] %v16377_v13  ;;  %v16385_v19 = vmul.f32 %v15601_v21, %v15601_v21  ;;  %v21350_v13 = vld [vmem:[#allocation181_spill] sm:$0xff] }
 0x59e   :  { %21331 = vst [vmem:[#allocation240_spill] sm:$0xff] %v16345_v43  ;;  %v16361_v60 = vmul.f32 %v21336_v8, %v21336_v8  ;;  %v21339_v43 = vld [vmem:[#allocation153_spill] sm:$0xff]  ;;  %v21340_v32 = vld [vmem:[#allocation38_spill] sm:$0xff]  ;;  %v16381_v8 = vmul.f32 %v15597_v31, %v15597_v31  ;;  %21346 = vst [vmem:[#allocation247_spill] sm:$0xff] %v16397_v2  ;;  %v16401_v31 = vmul.f32 %v15617_v15, %v15617_v15 }
 0x59f   :  { %21338 = vst [vmem:[#allocation242_spill] sm:$0xff] %v16365_v11  ;;  %v16369_v30 = vmul.f32 %v21339_v43, %v21339_v43  ;;  %v16373_v56 = vmul.f32 %v21340_v32, %v21340_v32  ;;  %v16389_v43 = vmul.f32 %v15605_v61, %v15605_v61  ;;  %v21344_v11 = vld [vmem:[#allocation41_spill] sm:$0xff]  ;;  %v16409_v61 = vmul.f32 %v21350_v13, %v21350_v13  ;;  %v21353_v15 = vld [vmem:[#allocation183_spill] sm:$0xff]  ;;  %v21355_v13 = vld [vmem:[#allocation184_spill] sm:$0xff] }
 0x5a0   :  { %21343 = vst [vmem:[#allocation245_spill] sm:$0xff] %v16381_v8  ;;  %v16393_v32 = vmul.f32 %v21344_v11, %v21344_v11  ;;  %21347 = vst [vmem:[#allocation248_spill] sm:$0xff] %v16401_v31  ;;  %v7158_v11 = vcombine.low %v16021_v53, %v16025_v3  ;;  %v16419_v2 = vmul.f32 %v21352_v54, %v21352_v54  ;;  %v21356_v53 = vld [vmem:[#allocation147_spill] sm:$0xff] }
 0x5a1   :  { %21341 = vst [vmem:[#allocation243_spill] sm:$0xff] %v16373_v56  ;;  %v21348_v56 = vld [vmem:[#allocation180_spill] sm:$0xff]  ;;  %v16423_v31 = vmul.f32 %v21353_v15, %v21353_v15  ;;  %v16433_v3 = vmul.f32 %v21356_v53, %v21356_v53  ;;  %v7157_v54 = vcombine.low %v16013_v26, %v16017_v59  ;;  %v16443_v15 = vmul.f32 %v15653_v5, %v15653_v5  ;;  %v21363_v26 = vld [vmem:[#allocation114_spill] sm:$0xff]  ;;  %v21364_v5 = vld [vmem:[#allocation185_spill] sm:$0xff] }
 0x5a2   :  { %21345 = vst [vmem:[#allocation246_spill] sm:$0xff] %v16393_v32  ;;  %v16405_v21 = vmul.f32 %v21348_v56, %v21348_v56  ;;  %v21351_v32 = vld [vmem:[#allocation182_spill] sm:$0xff]  ;;  %v7174_v56 = vcombine.low %v16029_v62, %v16033_v49  ;;  %v21360_v62 = vld [vmem:[#allocation40_spill] sm:$0xff]  ;;  %v7191_v53 = vcombine.low %v16049_v20, %v16053_v18  ;;  %v16461_v59 = vmul.f32 %v21363_v26, %v21363_v26 }
 0x5a3   :  { %v16415_v8 = vmul.f32 %v21351_v32, %v21351_v32  ;;  %21354 = vst [vmem:[#allocation250_spill] sm:$0xff] %v16423_v31  ;;  %21357 = vst [vmem:[#allocation251_spill] sm:$0xff] %v16433_v3  ;;  %v16437_v32 = vmul.f32 %v15649_v24, %v15649_v24  ;;  %v16447_v49 = vmul.f32 %v21360_v62, %v21360_v62  ;;  %v21362_v24 = vld [vmem:[#allocation121_spill] sm:$0xff] }
 0x5a4   :  { %21349 = vst [vmem:[#allocation249_spill] sm:$0xff] %v16405_v21  ;;  %v16429_v21 = vmul.f32 %v21355_v13, %v21355_v13  ;;  %21359 = vst [vmem:[#allocation253_spill] sm:$0xff] %v16443_v15  ;;  %v21361_v13 = vld [vmem:[#allocation152_spill] sm:$0xff]  ;;  %v16457_v3 = vmul.f32 %v21362_v24, %v21362_v24  ;;  %v21366_v62 = vld [vmem:[#allocation13_spill] sm:$0xff]  ;;  %v7190_v20 = vcombine.low %v16041_v44, %v16045_v58 }
 0x5a5   :  { %21358 = vst [vmem:[#allocation252_spill] sm:$0xff] %v16437_v32  ;;  %v16451_v31 = vmul.f32 %v21361_v13, %v21361_v13  ;;  %v16465_v32 = vmul.f32 %v21364_v5, %v21364_v5  ;;  %v7172_v15 = vrot.slane %v7158_v11, %v21366_v62  ;;  %v16470_v13 = vmul.f32 %v15677_v14, %v15677_v14  ;;  %v21369_v5 = vld [vmem:[#allocation154_spill] sm:$0xff]  ;;  %v21370_v11 = vld [vmem:[#allocation43_spill] sm:$0xff] }
 0x5a6   :  { %v7181_v18 = vrot.slane %v7174_v56, %v21366_v62  ;;  %v7207_v24 = vcombine.low %v16057_v47, %v16061_v55  ;;  %v16479_v26 = vmul.f32 %v15681_v4, %v15681_v4  ;;  %v16487_v14 = vmul.f32 %v21370_v11, %v21370_v11 }
 0x5a7   :  { %21365 = vst [vmem:[#allocation254_spill] sm:$0xff] %v16465_v32  ;;  %21367 = vst [vmem:[#allocation255_spill] sm:$0xff] %v16470_v13  ;;  %v16483_v32 = vmul.f32 %v21369_v5, %v21369_v5  ;;  %v7165_v56 = vrot.slane %v7157_v54, %v21366_v62  ;;  %v21371_v13 = vld [vmem:[#allocation91_spill] sm:$0xff]  ;;  %v7188_v55 = vrot.slane %v16037_v52, %v21366_v62  ;;  %v21373_v5 = vld [vmem:[#allocation42_spill] sm:$0xff] }
 0x5a8   :  { %21368 = vst [vmem:[#allocation256_spill] sm:$0xff] %v16479_v26  ;;  %v16492_v44 = vmul.f32 %v21371_v13, %v21371_v13  ;;  %v7205_v47 = vrot.slane %v7191_v53, %v21366_v62  ;;  %v7224_v58 = vcombine.low %v16077_v10, %v16081_v50  ;;  %v16501_v4 = vmul.f32 %v21373_v5, %v21373_v5  ;;  %v21376_v50 = vld [vmem:[#allocation188_spill] sm:$0xff] }
 0x5a9   :  { %v7173_v11 = vcombine.low %v7165_v56, %v7172_v15  ;;  %v7223_v54 = vcombine.low %v16069_v63, %v16073_v35  ;;  %v7240_v13 = vcombine.low %v16085_v0, %v16089_v22  ;;  %v7189_v52 = vcombine.low %v7181_v18, %v7188_v55  ;;  %v21377_v15 = vld [vmem:[#allocation95_spill] sm:$0xff]  ;;  %v21378_v63 = vld [vmem:[#allocation118_spill] sm:$0xff] }
 0x5aa   :  { %21372 = vst [vmem:[#allocation257_spill] sm:$0xff] %v16492_v44  ;;  %v21374_v44 = vld [vmem:[#allocation187_spill] sm:$0xff]  ;;  %v7198_v53 = vrot.slane %v7190_v20, %v21366_v62  ;;  %v7214_v10 = vrot.slane %v7207_v24, %v21366_v62  ;;  %v16515_v5 = vmul.f32 %v21376_v50, %v21376_v50  ;;  %v16519_v56 = vmul.f32 %v21377_v15, %v21377_v15  ;;  %v21380_v50 = vld [vmem:[#allocation45_spill] sm:$0xff] }
 0x5ab   :  { %v16509_v26 = vmul.f32 %v21374_v44, %v21374_v44  ;;  %v16523_v22 = vmul.f32 %v21378_v63, %v21378_v63  ;;  %v21379_v35 = vld [vmem:[#allocation107_spill] sm:$0xff]  ;;  %v7221_v24 = vrot.slane %v16065_v28, %v21366_v62  ;;  %v7238_v20 = vrot.slane %v7224_v58, %v21366_v62 }
 0x5ac   :  { %v16527_v0 = vmul.f32 %v21379_v35, %v21379_v35  ;;  %v7206_v18 = vcombine.low %v7198_v53, %v7205_v47  ;;  %v7257_v55 = vcombine.low %v16105_v45, %v16109_v48  ;;  %v16536_v15 = vmul.f32 %v21380_v50, %v21380_v50  ;;  %v21381_v48 = vld [vmem:[#allocation148_spill] sm:$0xff] }
 0x5ad   :  { %21375 = vst [vmem:[#allocation258_spill] sm:$0xff] %v16509_v26  ;;  %v7231_v63 = vrot.slane %v7223_v54, %v21366_v62  ;;  %v7247_v44 = vrot.slane %v7240_v13, %v21366_v62  ;;  %v8137_v35 = vsel %vm1745_vm4, %v7173_v11, 0.0  ;;  %v7222_v26 = vcombine.low %v7214_v10, %v7221_v24  ;;  %v21382_v53 = vld [vmem:[#allocation112_spill] sm:$0xff] }
 0x5ae   :  { %v7256_v47 = vcombine.low %v16097_v42, %v16101_v6  ;;  %v7273_v28 = vcombine.low %v16113_v27, %v16117_v7  ;;  %v8138_v58 = vsel %vm6429_vm13, %v7189_v52, 0.0  ;;  %v16548_v45 = vmul.f32 %v21381_v48, %v21381_v48  ;;  %v21383_v7 = vld [vmem:[#allocation125_spill] sm:$0xff] }
 0x5af   :  { %v16552_v54 = vmul.f32 %v21382_v53, %v21382_v53  ;;  %v7254_v13 = vrot.slane %v16093_v41, %v21366_v62  ;;  %v8139_v11 = vadd.f32 %v8138_v58, %v8137_v35  ;;  %v7239_v10 = vcombine.low %v7231_v63, %v7238_v20  ;;  %v21385_v20 = vld [vmem:[#allocation6_spill] sm:$0xff] }
 0x5b0   :  { %v7271_v6 = vrot.slane %v7257_v55, %v21366_v62  ;;  %v7290_v27 = vcombine.low %v16133_v34, %v16137_v33  ;;  %v8140_v42 = vsel %vm1745_vm4, %v7206_v18, 0.0  ;;  %v16562_v52 = vmul.f32 %v21383_v7, %v21383_v7  ;;  %v21384_v34 = vld [vmem:[#allocation122_spill] sm:$0xff]  ;;  %v21409_v7 = vld [vmem:[#allocation211_spill] sm:$0xff] }
 0x5b1   :  { %v7255_v24 = vcombine.low %v7247_v44, %v7254_v13  ;;  %v7289_v53 = vcombine.low %v16125_v12, %v16129_v46  ;;  %v8141_v48 = vadd.f32 %v8140_v42, %v8139_v11  ;;  %v7264_v41 = vrot.slane %v7256_v47, %v21366_v62  ;;  %v21387_v13 = vld [vmem:[#allocation202_spill] sm:$0xff]  ;;  %v21388_v11 = vld [vmem:[#allocation201_spill] sm:$0xff] }
 0x5b2   :  { %v7280_v63 = vrot.slane %v7273_v28, %v21366_v62  ;;  %v7306_v35 = vcombine.low %v16141_v37, %v16145_v51  ;;  %v8142_v33 = vsel %vm6429_vm13, %v7222_v26, 0.0  ;;  %v16573_v18 = vmul.f32 %v21384_v34, %v21384_v34  ;;  %v21386_v26 = vld [vmem:[#allocation44_spill] sm:$0xff] }
 0x5b3   :  { %v16577_v44 = vmul.f32 %v21385_v20, %v21385_v20  ;;  %v7287_v12 = vrot.slane %v16121_v25, %v21366_v62  ;;  %v8143_v46 = vadd.f32 %v8142_v33, %v8141_v48  ;;  %v7272_v55 = vcombine.low %v7264_v41, %v7271_v6  ;;  %v21389_v6 = vld [vmem:[#allocation204_spill] sm:$0xff]  ;;  %v21392_v33 = vld [vmem:[#allocation47_spill] sm:$0xff] }
 0x5b4   :  { %v7304_v47 = vrot.slane %v7290_v27, %v21366_v62  ;;  %v7323_v51 = vcombine.low %v16161_v39, %v16165_v17  ;;  %v8144_v37 = vsel %vm1745_vm4, %v7239_v10, 0.0  ;;  %v16587_v28 = vmul.f32 %v21386_v26, %v21386_v26  ;;  %v21390_v27 = vld [vmem:[#allocation203_spill] sm:$0xff] }
 0x5b5   :  { %v7297_v58 = vrot.slane %v7289_v53, %v21366_v62  ;;  %v7322_v42 = vcombine.low %v21388_v11, %v21387_v13  ;;  %v8145_v20 = vadd.f32 %v8144_v37, %v8143_v46  ;;  %v7288_v25 = vcombine.low %v7280_v63, %v7287_v12  ;;  %v21391_v39 = vld [vmem:[#allocation155_spill] sm:$0xff]  ;;  %v21393_v53 = vld [vmem:[#allocation200_spill] sm:$0xff]  ;;  %v21394_v37 = vld [vmem:[#allocation129_spill] sm:$0xff] }
 0x5b6   :  { %v7313_v48 = vrot.slane %v7306_v35, %v21366_v62  ;;  %v7339_v41 = vcombine.low %v21390_v27, %v21389_v6  ;;  %v8146_v17 = vsel %vm6429_vm13, %v7255_v24, 0.0  ;;  %v16598_v10 = vmul.f32 %v21391_v39, %v21391_v39  ;;  %v21396_v27 = vld [vmem:[#allocation207_spill] sm:$0xff] }
 0x5b7   :  { %v16602_v26 = vmul.f32 %v21392_v33, %v21392_v33  ;;  %v7320_v13 = vrot.slane %v21393_v53, %v21366_v62  ;;  %v8147_v46 = vadd.f32 %v8146_v17, %v8145_v20  ;;  %v7305_v63 = vcombine.low %v7297_v58, %v7304_v47  ;;  %v21397_v33 = vld [vmem:[#allocation206_spill] sm:$0xff]  ;;  %v21398_v47 = vld [vmem:[#allocation209_spill] sm:$0xff]  ;;  %v21402_v17 = vld [vmem:[#allocation111_spill] sm:$0xff] }
 0x5b8   :  { %v7337_v35 = vrot.slane %v7323_v51, %v21366_v62  ;;  %v7356_v12 = vcombine.low %v16189_v16, %v16193_v23  ;;  %v8148_v24 = vsel %vm1745_vm4, %v7272_v55, 0.0  ;;  %v16612_v11 = vmul.f32 %v21394_v37, %v21394_v37  ;;  %v21399_v51 = vld [vmem:[#allocation208_spill] sm:$0xff] }
 0x5b9   :  { %v7330_v6 = vrot.slane %v7322_v42, %v21366_v62  ;;  %v7355_v39 = vcombine.low %v21397_v33, %v21396_v27  ;;  %v8149_v34 = vadd.f32 %v8148_v24, %v8147_v46  ;;  %v7321_v53 = vcombine.low %v7313_v48, %v7320_v13  ;;  %v21400_v23 = vld [vmem:[#allocation60_spill] sm:$0xff]  ;;  %v21404_v42 = vld [vmem:[#allocation205_spill] sm:$0xff]  ;;  %v21405_v13 = vld [vmem:[#allocation214_spill] sm:$0xff] }
 0x5ba   :  { %21395 = vst [vmem:[#allocation202_spill] sm:$0xff] %v16612_v11  ;;  %v7346_v20 = vrot.slane %v7339_v41, %v21366_v62  ;;  %v7372_v58 = vcombine.low %v21399_v51, %v21398_v47  ;;  %v8150_v16 = vsel %vm6429_vm13, %v7288_v25, 0.0  ;;  %v16623_v55 = vmul.f32 %v21400_v23, %v21400_v23  ;;  %v21406_v24 = vld [vmem:[#allocation213_spill] sm:$0xff]  ;;  %v21407_v47 = vld [vmem:[#allocation94_spill] sm:$0xff] }
 0x5bb   :  { %v16627_v37 = vmul.f32 %v21402_v17, %v21402_v17  ;;  %v7353_v33 = vrot.slane %v21404_v42, %v21366_v62  ;;  %v8151_v46 = vadd.f32 %v8150_v16, %v8149_v34  ;;  %v7338_v48 = vcombine.low %v7330_v6, %v7337_v35  ;;  %v21408_v17 = vld [vmem:[#allocation212_spill] sm:$0xff] }
 0x5bc   :  { %21401 = vst [vmem:[#allocation201_spill] sm:$0xff] %v16623_v55  ;;  %v7370_v41 = vrot.slane %v7356_v12, %v21366_v62  ;;  %v7389_v27 = vcombine.low %v21406_v24, %v21405_v13  ;;  %v8152_v25 = vsel %vm1745_vm4, %v7305_v63, 0.0  ;;  %v16637_v51 = vmul.f32 %v21407_v47, %v21407_v47  ;;  %v21410_v35 = vld [vmem:[#allocation216_spill] sm:$0xff]  ;;  %v21411_v12 = vld [vmem:[#allocation215_spill] sm:$0xff]  ;;  %v21412_v13 = vld [vmem:[#allocation46_spill] sm:$0xff] }
 0x5bd   :  { %21403 = vst [vmem:[#allocation204_spill] sm:$0xff] %v16627_v37  ;;  %v7363_v23 = vrot.slane %v7355_v39, %v21366_v62  ;;  %v7388_v50 = vcombine.low %v21409_v7, %v21408_v17  ;;  %v8153_v11 = vadd.f32 %v8152_v25, %v8151_v46  ;;  %v7354_v42 = vcombine.low %v7346_v20, %v7353_v33  ;;  %v21413_v24 = vld [vmem:[#allocation126_spill] sm:$0xff]  ;;  %v21416_v33 = vld [vmem:[#allocation221_spill] sm:$0xff]  ;;  %v21417_v46 = vld [vmem:[#allocation220_spill] sm:$0xff] }
 0x5be   :  { %v7379_v34 = vrot.slane %v7372_v58, %v21366_v62  ;;  %v7405_v6 = vcombine.low %v21411_v12, %v21410_v35  ;;  %v8154_v16 = vsel %vm6429_vm13, %v7321_v53, 0.0  ;;  %v16648_v63 = vmul.f32 %v21412_v13, %v21412_v13  ;;  %v21415_v39 = vld [vmem:[#allocation210_spill] sm:$0xff]  ;;  %v21418_v35 = vld [vmem:[#allocation4_spill] sm:$0xff] }
 0x5bf   :  { %v16652_v47 = vmul.f32 %v21413_v24, %v21413_v24  ;;  %v7386_v7 = vrot.slane %v21415_v39, %v21366_v62  ;;  %v8155_v17 = vadd.f32 %v8154_v16, %v8153_v11  ;;  %v7371_v20 = vcombine.low %v7363_v23, %v7370_v41  ;;  %v21420_v24 = vld [vmem:[#allocation219_spill] sm:$0xff]  ;;  %v21423_v41 = vld [vmem:[#allocation222_spill] sm:$0xff] }
 0x5c0   :  { %v7403_v58 = vrot.slane %v7389_v27, %v21366_v62  ;;  %v7422_v25 = vcombine.low %v21417_v46, %v21416_v33  ;;  %v8156_v53 = vsel %vm1745_vm4, %v7338_v48, 0.0  ;;  %v16662_v12 = vmul.f32 %v21418_v35, %v21418_v35  ;;  %v21422_v23 = vld [vmem:[#allocation223_spill] sm:$0xff]  ;;  %v21424_v33 = vld [vmem:[#allocation133_spill] sm:$0xff] }
 0x5c1   :  { %21414 = vst [vmem:[#allocation203_spill] sm:$0xff] %v16652_v47  ;;  %v7396_v13 = vrot.slane %v7388_v50, %v21366_v62  ;;  %v21421_v47 = vld [vmem:[#allocation218_spill] sm:$0xff]  ;;  %v8157_v37 = vadd.f32 %v8156_v53, %v8155_v17  ;;  %v7387_v39 = vcombine.low %v7379_v34, %v7386_v7  ;;  %v7412_v11 = vrot.slane %v7405_v6, %v21366_v62  ;;  %v21426_v46 = vld [vmem:[#allocation49_spill] sm:$0xff]  ;;  %v21429_v7 = vld [vmem:[#allocation228_spill] sm:$0xff] }
 0x5c2   :  { %21419 = vst [vmem:[#allocation200_spill] sm:$0xff] %v16662_v12  ;;  %v7421_v55 = vcombine.low %v21421_v47, %v21420_v24  ;;  %v7438_v27 = vcombine.low %v21423_v41, %v21422_v23  ;;  %v8158_v16 = vsel %vm6429_vm13, %v7354_v42, 0.0  ;;  %v16673_v48 = vmul.f32 %v21424_v33, %v21424_v33  ;;  %v21428_v50 = vld [vmem:[#allocation217_spill] sm:$0xff]  ;;  %v21430_v17 = vld [vmem:[#allocation227_spill] sm:$0xff]  ;;  %v21431_v23 = vld [vmem:[#allocation48_spill] sm:$0xff] }
 0x5c3   :  { %v16677_v35 = vmul.f32 %v21426_v46, %v21426_v46  ;;  %v7419_v47 = vrot.slane %v21428_v50, %v21366_v62  ;;  %v8159_v24 = vadd.f32 %v8158_v16, %v8157_v37  ;;  %v7404_v34 = vcombine.low %v7396_v13, %v7403_v58  ;;  %v21432_v46 = vld [vmem:[#allocation226_spill] sm:$0xff]  ;;  %v21435_v58 = vld [vmem:[#allocation229_spill] sm:$0xff] }
 0x5c4   :  { %21425 = vst [vmem:[#allocation207_spill] sm:$0xff] %v16673_v48  ;;  %v7436_v6 = vrot.slane %v7422_v25, %v21366_v62  ;;  %v7455_v53 = vcombine.low %v21430_v17, %v21429_v7  ;;  %v8160_v42 = vsel %vm1745_vm4, %v7371_v20, 0.0  ;;  %v16687_v41 = vmul.f32 %v21431_v23, %v21431_v23  ;;  %v21433_v48 = vld [vmem:[#allocation225_spill] sm:$0xff]  ;;  %v21434_v13 = vld [vmem:[#allocation230_spill] sm:$0xff]  ;;  %v21437_v17 = vld [vmem:[#allocation116_spill] sm:$0xff] }
 0x5c5   :  { %21427 = vst [vmem:[#allocation206_spill] sm:$0xff] %v16677_v35  ;;  %v7429_v33 = vrot.slane %v7421_v55, %v21366_v62  ;;  %v7454_v35 = vcombine.low %v21433_v48, %v21432_v46  ;;  %v8161_v12 = vadd.f32 %v8160_v42, %v8159_v24  ;;  %v7420_v50 = vcombine.low %v7412_v11, %v7419_v47  ;;  %v21436_v7 = vld [vmem:[#allocation97_spill] sm:$0xff]  ;;  %v21438_v55 = vld [vmem:[#allocation224_spill] sm:$0xff] }
 0x5c6   :  { %v7445_v37 = vrot.slane %v7438_v27, %v21366_v62  ;;  %v7471_v25 = vcombine.low %v21435_v58, %v21434_v13  ;;  %v8162_v16 = vsel %vm6429_vm13, %v7387_v39, 0.0  ;;  %v16698_v20 = vmul.f32 %v21436_v7, %v21436_v7  ;;  %v21439_v24 = vld [vmem:[#allocation149_spill] sm:$0xff]  ;;  %v21440_v58 = vld [vmem:[#allocation232_spill] sm:$0xff] }
 0x5c7   :  { %v16702_v23 = vmul.f32 %v21437_v17, %v21437_v17  ;;  %v7452_v48 = vrot.slane %v21438_v55, %v21366_v62  ;;  %v8163_v46 = vadd.f32 %v8162_v16, %v8161_v12  ;;  %v7437_v11 = vcombine.low %v7429_v33, %v7436_v6  ;;  %v21441_v33 = vld [vmem:[#allocation233_spill] sm:$0xff] }
 0x5c8   :  { %v7469_v27 = vrot.slane %v7455_v53, %v21366_v62  ;;  %v7488_v47 = vcombine.low %v16301_v9, %v16305_v57  ;;  %v8164_v39 = vsel %vm1745_vm4, %v7404_v34, 0.0  ;;  %v16712_v42 = vmul.f32 %v21439_v24, %v21439_v24  ;;  %v21442_v9 = vld [vmem:[#allocation130_spill] sm:$0xff]  ;;  %v21443_v53 = vld [vmem:[#allocation96_spill] sm:$0xff] }
 0x5c9   :  { %v7462_v13 = vrot.slane %v7454_v35, %v21366_v62  ;;  %v7487_v17 = vcombine.low %v21440_v58, %v16297_v29  ;;  %v8165_v7 = vadd.f32 %v8164_v39, %v8163_v46  ;;  %v7453_v55 = vcombine.low %v7445_v37, %v7452_v48  ;;  %v21445_v35 = vld [vmem:[#allocation231_spill] sm:$0xff]  ;;  %v21446_v48 = vld [vmem:[#allocation237_spill] sm:$0xff] }
 0x5ca   :  { %v7478_v12 = vrot.slane %v7471_v25, %v21366_v62  ;;  %v7504_v6 = vcombine.low %v21441_v33, %v16313_v38  ;;  %v8166_v57 = vsel %vm6429_vm13, %v7420_v50, 0.0  ;;  %v16723_v34 = vmul.f32 %v21442_v9, %v21442_v9  ;;  %v21447_v39 = vld [vmem:[#allocation9_spill] sm:$0xff]  ;;  %v21449_v9 = vld [vmem:[#allocation235_spill] sm:$0xff] }
 0x5cb   :  { %v16727_v16 = vmul.f32 %v21443_v53, %v21443_v53  ;;  %v7485_v29 = vrot.slane %v21445_v35, %v21366_v62  ;;  %v8167_v46 = vadd.f32 %v8166_v57, %v8165_v7  ;;  %v7470_v37 = vcombine.low %v7462_v13, %v7469_v27  ;;  %v21448_v53 = vld [vmem:[#allocation236_spill] sm:$0xff]  ;;  %v21450_v27 = vld [vmem:[#allocation239_spill] sm:$0xff] }
 0x5cc   :  { %v7502_v25 = vrot.slane %v7488_v47, %v21366_v62  ;;  %v7521_v38 = vcombine.low %v21446_v48, %v16333_v1  ;;  %v8168_v50 = vsel %vm1745_vm4, %v7437_v11, 0.0  ;;  %v16737_v58 = vmul.f32 %v21447_v39, %v21447_v39  ;;  %v21451_v47 = vld [vmem:[#allocation238_spill] sm:$0xff]  ;;  %v21452_v57 = vld [vmem:[#allocation156_spill] sm:$0xff] }
 0x5cd   :  { %21444 = vst [vmem:[#allocation209_spill] sm:$0xff] %v16727_v16  ;;  %v7495_v33 = vrot.slane %v7487_v17, %v21366_v62  ;;  %v7520_v24 = vcombine.low %v21449_v9, %v21448_v53  ;;  %v8169_v16 = vadd.f32 %v8168_v50, %v8167_v46  ;;  %v7486_v35 = vcombine.low %v7478_v12, %v7485_v29  ;;  %v21453_v48 = vld [vmem:[#allocation56_spill] sm:$0xff]  ;;  %v21454_v17 = vld [vmem:[#allocation234_spill] sm:$0xff]  ;;  %v21455_v46 = vld [vmem:[#allocation137_spill] sm:$0xff] }
 0x5ce   :  { %v7511_v7 = vrot.slane %v7504_v6, %v21366_v62  ;;  %v7537_v13 = vcombine.low %v21451_v47, %v21450_v27  ;;  %v8170_v1 = vsel %vm6429_vm13, %v7453_v55, 0.0  ;;  %v16748_v11 = vmul.f32 %v21452_v57, %v21452_v57  ;;  %v21456_v47 = vld [vmem:[#allocation241_spill] sm:$0xff] }
 0x5cf   :  { %v16752_v39 = vmul.f32 %v21453_v48, %v21453_v48  ;;  %v7518_v9 = vrot.slane %v21454_v17, %v21366_v62  ;;  %v8171_v53 = vadd.f32 %v8170_v1, %v8169_v16  ;;  %v7503_v12 = vcombine.low %v7495_v33, %v7502_v25  ;;  %v21457_v25 = vld [vmem:[#allocation242_spill] sm:$0xff]  ;;  %v21459_v33 = vld [vmem:[#allocation115_spill] sm:$0xff] }
 0x5d0   :  { %v7535_v6 = vrot.slane %v7521_v38, %v21366_v62  ;;  %v7554_v29 = vcombine.low %v16357_v36, %v16361_v60  ;;  %v8172_v55 = vsel %vm1745_vm4, %v7470_v37, 0.0  ;;  %v16762_v50 = vmul.f32 %v21455_v46, %v21455_v46  ;;  %v21458_v36 = vld [vmem:[#allocation120_spill] sm:$0xff] }
 0x5d1   :  { %v7528_v27 = vrot.slane %v7520_v24, %v21366_v62  ;;  %v7553_v48 = vcombine.low %v21456_v47, %v16353_v40  ;;  %v8173_v57 = vadd.f32 %v8172_v55, %v8171_v53  ;;  %v7519_v17 = vcombine.low %v7511_v7, %v7518_v9  ;;  %v21460_v24 = vld [vmem:[#allocation240_spill] sm:$0xff]  ;;  %v21461_v9 = vld [vmem:[#allocation189_spill] sm:$0xff] }
 0x5d2   :  { %v7544_v16 = vrot.slane %v7537_v13, %v21366_v62  ;;  %v7570_v38 = vcombine.low %v21457_v25, %v16369_v30  ;;  %v8174_v60 = vsel %vm6429_vm13, %v7486_v35, 0.0  ;;  %v16773_v37 = vmul.f32 %v21458_v36, %v21458_v36  ;;  %v21462_v25 = vld [vmem:[#allocation245_spill] sm:$0xff] }
 0x5d3   :  { %v16777_v1 = vmul.f32 %v21459_v33, %v21459_v33  ;;  %v7551_v40 = vrot.slane %v21460_v24, %v21366_v62  ;;  %v8175_v53 = vadd.f32 %v8174_v60, %v8173_v57  ;;  %v7536_v7 = vcombine.low %v7528_v27, %v7535_v6  ;;  %v21463_v33 = vld [vmem:[#allocation244_spill] sm:$0xff]  ;;  %v21464_v6 = vld [vmem:[#allocation247_spill] sm:$0xff] }
 0x5d4   :  { %v7568_v13 = vrot.slane %v7554_v29, %v21366_v62  ;;  %v7587_v30 = vcombine.low %v16385_v19, %v16389_v43  ;;  %v8176_v35 = vsel %vm1745_vm4, %v7503_v12, 0.0  ;;  %v16787_v55 = vmul.f32 %v21461_v9, %v21461_v9  ;;  %v21465_v29 = vld [vmem:[#allocation246_spill] sm:$0xff]  ;;  %v21467_v60 = vld [vmem:[#allocation191_spill] sm:$0xff] }
 0x5d5   :  { %v7561_v47 = vrot.slane %v7553_v48, %v21366_v62  ;;  %v7586_v36 = vcombine.low %v21463_v33, %v21462_v25  ;;  %v8177_v46 = vadd.f32 %v8176_v35, %v8175_v53  ;;  %v7552_v24 = vcombine.low %v7544_v16, %v7551_v40  ;;  %v21466_v43 = vld [vmem:[#allocation190_spill] sm:$0xff]  ;;  %v21468_v48 = vld [vmem:[#allocation243_spill] sm:$0xff] }
 0x5d6   :  { %v7577_v57 = vrot.slane %v7570_v38, %v21366_v62  ;;  %v7603_v27 = vcombine.low %v21465_v29, %v21464_v6  ;;  %v8178_v19 = vsel %vm6429_vm13, %v7519_v17, 0.0  ;;  %v16798_v12 = vmul.f32 %v21466_v43, %v21466_v43  ;;  %v21469_v35 = vld [vmem:[#allocation51_spill] sm:$0xff]  ;;  %v21470_v29 = vld [vmem:[#allocation249_spill] sm:$0xff] }
 0x5d7   :  { %v16802_v9 = vmul.f32 %v21467_v60, %v21467_v60  ;;  %v7584_v33 = vrot.slane %v21468_v48, %v21366_v62  ;;  %v8179_v53 = vadd.f32 %v8178_v19, %v8177_v46  ;;  %v7569_v16 = vcombine.low %v7561_v47, %v7568_v13  ;;  %v21471_v13 = vld [vmem:[#allocation250_spill] sm:$0xff]  ;;  %v21473_v47 = vld [vmem:[#allocation192_spill] sm:$0xff] }
 0x5d8   :  { %v7601_v38 = vrot.slane %v7587_v30, %v21366_v62  ;;  %v7620_v40 = vcombine.low %v16415_v8, %v16419_v2  ;;  %v8180_v17 = vsel %vm1745_vm4, %v7536_v7, 0.0  ;;  %v16812_v25 = vmul.f32 %v21469_v35, %v21469_v35  ;;  %v21472_v2 = vld [vmem:[#allocation157_spill] sm:$0xff] }
 0x5d9   :  { %v7594_v6 = vrot.slane %v7586_v36, %v21366_v62  ;;  %v7619_v60 = vcombine.low %v21470_v29, %v16409_v61  ;;  %v8181_v43 = vadd.f32 %v8180_v17, %v8179_v53  ;;  %v7585_v48 = vcombine.low %v7577_v57, %v7584_v33  ;;  %v21474_v36 = vld [vmem:[#allocation248_spill] sm:$0xff]  ;;  %v21475_v33 = vld [vmem:[#allocation193_spill] sm:$0xff] }
 0x5da   :  { %v7610_v46 = vrot.slane %v7603_v27, %v21366_v62  ;;  %v7636_v30 = vcombine.low %v21471_v13, %v16429_v21  ;;  %v8182_v8 = vsel %vm6429_vm13, %v7552_v24, 0.0  ;;  %v16823_v7 = vmul.f32 %v21472_v2, %v21472_v2  ;;  %v21476_v13 = vld [vmem:[#allocation253_spill] sm:$0xff] }
 0x5db   :  { %v16827_v19 = vmul.f32 %v21473_v47, %v21473_v47  ;;  %v7617_v61 = vrot.slane %v21474_v36, %v21366_v62  ;;  %v8183_v53 = vadd.f32 %v8182_v8, %v8181_v43  ;;  %v7602_v57 = vcombine.low %v7594_v6, %v7601_v38  ;;  %v21477_v47 = vld [vmem:[#allocation252_spill] sm:$0xff] }
 0x5dc   :  { %v7634_v27 = vrot.slane %v7620_v40, %v21366_v62  ;;  %v7653_v21 = vcombine.low %v16447_v49, %v16451_v31  ;;  %v8184_v24 = vsel %vm1745_vm4, %v7569_v16, 0.0  ;;  %v16837_v17 = vmul.f32 %v21475_v33, %v21475_v33  ;;  %v21478_v49 = vld [vmem:[#allocation50_spill] sm:$0xff] }
 0x5dd   :  { %v7627_v29 = vrot.slane %v7619_v60, %v21366_v62  ;;  %v7652_v2 = vcombine.low %v21477_v47, %v21476_v13  ;;  %v8185_v35 = vadd.f32 %v8184_v24, %v8183_v53  ;;  %v7618_v36 = vcombine.low %v7610_v46, %v7617_v61  ;;  %v21479_v40 = vld [vmem:[#allocation194_spill] sm:$0xff]  ;;  %v21480_v60 = vld [vmem:[#allocation251_spill] sm:$0xff]  ;;  %v21482_v24 = vld [vmem:[#allocation256_spill] sm:$0xff] }
 0x5de   :  { %v7643_v43 = vrot.slane %v7636_v30, %v21366_v62  ;;  %v7669_v38 = vcombine.low %v16457_v3, %v16461_v59  ;;  %v8186_v31 = vsel %vm6429_vm13, %v7585_v48, 0.0  ;;  %v16848_v16 = vmul.f32 %v21478_v49, %v21478_v49  ;;  %v21481_v48 = vld [vmem:[#allocation134_spill] sm:$0xff]  ;;  %v21483_v13 = vld [vmem:[#allocation255_spill] sm:$0xff] }
 0x5df   :  { %v16852_v6 = vmul.f32 %v21479_v40, %v21479_v40  ;;  %v7650_v8 = vrot.slane %v21480_v60, %v21366_v62  ;;  %v8187_v47 = vadd.f32 %v8186_v31, %v8185_v35  ;;  %v7635_v46 = vcombine.low %v7627_v29, %v7634_v27  ;;  %v21484_v27 = vld [vmem:[#allocation257_spill] sm:$0xff] }
 0x5e0   :  { %v7667_v30 = vrot.slane %v7653_v21, %v21366_v62  ;;  %v7686_v3 = vcombine.low %v16483_v32, %v16487_v14  ;;  %v8188_v59 = vsel %vm1745_vm4, %v7602_v57, 0.0  ;;  %v16862_v61 = vmul.f32 %v21481_v48, %v21481_v48  ;;  %v21485_v14 = vld [vmem:[#allocation141_spill] sm:$0xff] }
 0x5e1   :  { %v7660_v53 = vrot.slane %v7652_v2, %v21366_v62  ;;  %v7685_v40 = vcombine.low %v21483_v13, %v21482_v24  ;;  %v8189_v49 = vadd.f32 %v8188_v59, %v8187_v47  ;;  %v7651_v60 = vcombine.low %v7643_v43, %v7650_v8  ;;  %v21486_v29 = vld [vmem:[#allocation53_spill] sm:$0xff]  ;;  %v21487_v2 = vld [vmem:[#allocation254_spill] sm:$0xff]  ;;  %v21488_v8 = vld [vmem:[#allocation124_spill] sm:$0xff] }
 0x5e2   :  { %v7676_v35 = vrot.slane %v7669_v38, %v21366_v62  ;;  %v7702_v21 = vcombine.low %v21484_v27, %v16501_v4  ;;  %v8190_v32 = vsel %vm6429_vm13, %v7618_v36, 0.0  ;;  %v16873_v57 = vmul.f32 %v21485_v14, %v21485_v14 }
 0x5e3   :  { %v16877_v31 = vmul.f32 %v21486_v29, %v21486_v29  ;;  %v7683_v24 = vrot.slane %v21487_v2, %v21366_v62  ;;  %v8191_v47 = vadd.f32 %v8190_v32, %v8189_v49  ;;  %v7668_v43 = vcombine.low %v7660_v53, %v7667_v30 }
 0x5e4   :  { %v7700_v38 = vrot.slane %v7686_v3, %v21366_v62  ;;  %v7719_v4 = vcombine.low %v16523_v22, %v16527_v0  ;;  %v8192_v36 = vsel %vm1745_vm4, %v7635_v46, 0.0  ;;  %v16887_v59 = vmul.f32 %v21488_v8, %v21488_v8  ;;  %v21489_v0 = vld [vmem:[#allocation67_spill] sm:$0xff] }
 0x5e5   :  { %v7693_v13 = vrot.slane %v7685_v40, %v21366_v62  ;;  %v7718_v27 = vcombine.low %v16515_v5, %v16519_v56  ;;  %v8193_v29 = vadd.f32 %v8192_v36, %v8191_v47  ;;  %v7684_v2 = vcombine.low %v7676_v35, %v7683_v24  ;;  %v21490_v3 = vld [vmem:[#allocation195_spill] sm:$0xff]  ;;  %v21491_v40 = vld [vmem:[#allocation258_spill] sm:$0xff] }
 0x5e6   :  { %v7709_v49 = vrot.slane %v7702_v21, %v21366_v62  ;;  %v7735_v30 = vcombine.low %v16536_v15, %v16548_v45  ;;  %v8194_v22 = vsel %vm6429_vm13, %v7651_v60, 0.0  ;;  %v16898_v46 = vmul.f32 %v21489_v0, %v21489_v0  ;;  %v21492_v60 = vld [vmem:[#allocation52_spill] sm:$0xff] }
 0x5e7   :  { %v16902_v53 = vmul.f32 %v21490_v3, %v21490_v3  ;;  %v7716_v5 = vrot.slane %v21491_v40, %v21366_v62  ;;  %v8195_v56 = vadd.f32 %v8194_v22, %v8193_v29  ;;  %v7701_v35 = vcombine.low %v7693_v13, %v7700_v38 }
 0x5e8   :  { %v7733_v21 = vrot.slane %v7719_v4, %v21366_v62  ;;  %v7752_v15 = vcombine.low %v16577_v44, %v16587_v28  ;;  %v8196_v45 = vsel %vm1745_vm4, %v7668_v43, 0.0  ;;  %v16912_v32 = vmul.f32 %v21492_v60, %v21492_v60  ;;  %v21493_v28 = vld [vmem:[#allocation8_spill] sm:$0xff]  ;;  %v21494_v4 = vld [vmem:[#allocation119_spill] sm:$0xff] }
 0x5e9   :  { %v7726_v24 = vrot.slane %v7718_v27, %v21366_v62  ;;  %v7751_v47 = vcombine.low %v16562_v52, %v16573_v18  ;;  %v8197_v36 = vadd.f32 %v8196_v45, %v8195_v56  ;;  %v7717_v40 = vcombine.low %v7709_v49, %v7716_v5  ;;  %v21496_v5 = vld [vmem:[#allocation204_spill] sm:$0xff]  ;;  %v21497_v56 = vld [vmem:[#allocation201_spill] sm:$0xff] }
 0x5ea   :  { %v7742_v29 = vrot.slane %v7735_v30, %v21366_v62  ;;  %v7768_v38 = vcombine.low %v16598_v10, %v16602_v26  ;;  %v8198_v44 = vsel %vm6429_vm13, %v7684_v2, 0.0  ;;  %v16923_v43 = vmul.f32 %v21493_v28, %v21493_v28  ;;  %v21495_v2 = vld [vmem:[#allocation138_spill] sm:$0xff] }
 0x5eb   :  { %v16927_v13 = vmul.f32 %v21494_v4, %v21494_v4  ;;  %v7749_v52 = vrot.slane %v16552_v54, %v21366_v62  ;;  %v8199_v18 = vadd.f32 %v8198_v44, %v8197_v36  ;;  %v7734_v27 = vcombine.low %v7726_v24, %v7733_v21  ;;  %v21498_v24 = vld [vmem:[#allocation200_spill] sm:$0xff] }
 0x5ec   :  { %v7766_v49 = vrot.slane %v7752_v15, %v21366_v62  ;;  %v7785_v26 = vcombine.low %v16637_v51, %v16648_v63  ;;  %v8200_v10 = vsel %vm1745_vm4, %v7701_v35, 0.0  ;;  %v16937_v30 = vmul.f32 %v21495_v2, %v21495_v2  ;;  %v21499_v15 = vld [vmem:[#allocation203_spill] sm:$0xff]  ;;  %v21500_v63 = vld [vmem:[#allocation158_spill] sm:$0xff]  ;;  %v21501_v44 = vld [vmem:[#allocation128_spill] sm:$0xff] }
 0x5ed   :  { %v7759_v22 = vrot.slane %v7751_v47, %v21366_v62  ;;  %v7784_v45 = vcombine.low %v21497_v56, %v21496_v5  ;;  %v8201_v4 = vadd.f32 %v8200_v10, %v8199_v18  ;;  %v7750_v54 = vcombine.low %v7742_v29, %v7749_v52  ;;  %v21502_v47 = vld [vmem:[#allocation202_spill] sm:$0xff]  ;;  %v21503_v10 = vld [vmem:[#allocation159_spill] sm:$0xff] }
 0x5ee   :  { %v7775_v21 = vrot.slane %v7768_v38, %v21366_v62  ;;  %v7801_v36 = vcombine.low %v21499_v15, %v21498_v24  ;;  %v8202_v51 = vsel %vm6429_vm13, %v7717_v40, 0.0  ;;  %v16948_v35 = vmul.f32 %v21500_v63, %v21500_v63  ;;  %v21504_v15 = vld [vmem:[#allocation206_spill] sm:$0xff] }
 0x5ef   :  { %v16952_v2 = vmul.f32 %v21501_v44, %v21501_v44  ;;  %v7782_v5 = vrot.slane %v21502_v47, %v21366_v62  ;;  %v8203_v18 = vadd.f32 %v8202_v51, %v8201_v4  ;;  %v7767_v29 = vcombine.low %v7759_v22, %v7766_v49 }
 0x5f0   :  { %v7799_v38 = vrot.slane %v7785_v26, %v21366_v62  ;;  %v7818_v52 = vcombine.low %v16698_v20, %v16702_v23  ;;  %v8204_v40 = vsel %vm1745_vm4, %v7734_v27, 0.0  ;;  %v16962_v56 = vmul.f32 %v21503_v10, %v21503_v10  ;;  %v21505_v20 = vld [vmem:[#allocation160_spill] sm:$0xff]  ;;  %v21506_v26 = vld [vmem:[#allocation123_spill] sm:$0xff] }
 0x5f1   :  { %v7792_v24 = vrot.slane %v7784_v45, %v21366_v62  ;;  %v7817_v44 = vcombine.low %v21504_v15, %v16687_v41  ;;  %v8205_v63 = vadd.f32 %v8204_v40, %v8203_v18  ;;  %v7783_v47 = vcombine.low %v7775_v21, %v7782_v5  ;;  %v21507_v45 = vld [vmem:[#allocation207_spill] sm:$0xff] }
 0x5f2   :  { %v7808_v4 = vrot.slane %v7801_v36, %v21366_v62  ;;  %v7834_v49 = vcombine.low %v16712_v42, %v16723_v34  ;;  %v8206_v23 = vsel %vm6429_vm13, %v7750_v54, 0.0  ;;  %v16973_v27 = vmul.f32 %v21505_v20, %v21505_v20  ;;  %v21508_v54 = vld [vmem:[#allocation64_spill] sm:$0xff] }
 0x5f3   :  { %v16977_v22 = vmul.f32 %v21506_v26, %v21506_v26  ;;  %v7815_v41 = vrot.slane %v21507_v45, %v21366_v62  ;;  %v8207_v51 = vadd.f32 %v8206_v23, %v8205_v63  ;;  %v7800_v21 = vcombine.low %v7792_v24, %v7799_v38 }
 0x5f4   :  { %v7832_v36 = vrot.slane %v7818_v52, %v21366_v62  ;;  %v7851_v42 = vcombine.low %v16752_v39, %v16762_v50  ;;  %v8208_v34 = vsel %vm1745_vm4, %v7767_v29, 0.0  ;;  %v16987_v5 = vmul.f32 %v21508_v54, %v21508_v54  ;;  %v21509_v50 = vld [vmem:[#allocation127_spill] sm:$0xff]  ;;  %v21510_v52 = vld [vmem:[#allocation162_spill] sm:$0xff] }
 0x5f5   :  { %v7825_v18 = vrot.slane %v7817_v44, %v21366_v62  ;;  %v7850_v40 = vcombine.low %v16737_v58, %v16748_v11  ;;  %v8209_v15 = vadd.f32 %v8208_v34, %v8207_v51  ;;  %v7816_v45 = vcombine.low %v7808_v4, %v7815_v41  ;;  %v21511_v44 = vld [vmem:[#allocation209_spill] sm:$0xff] }
 0x5f6   :  { %v7841_v63 = vrot.slane %v7834_v49, %v21366_v62  ;;  %v7867_v38 = vcombine.low %v16773_v37, %v16777_v1  ;;  %v8210_v39 = vsel %vm6429_vm13, %v7783_v47, 0.0  ;;  %v16998_v29 = vmul.f32 %v21509_v50, %v21509_v50  ;;  %v21512_v47 = vld [vmem:[#allocation131_spill] sm:$0xff] }
 0x5f7   :  { %v17002_v24 = vmul.f32 %v21510_v52, %v21510_v52  ;;  %v7848_v58 = vrot.slane %v21511_v44, %v21366_v62  ;;  %v8211_v11 = vadd.f32 %v8210_v39, %v8209_v15  ;;  %v7833_v4 = vcombine.low %v7825_v18, %v7832_v36  ;;  %v21514_v18 = vld [vmem:[#allocation161_spill] sm:$0xff] }
 0x5f8   :  { %v7865_v49 = vrot.slane %v7851_v42, %v21366_v62  ;;  %v7884_v37 = vcombine.low %v16812_v25, %v16823_v7  ;;  %v8212_v1 = vsel %vm1745_vm4, %v7800_v21, 0.0  ;;  %v17012_v23 = vmul.f32 %v21512_v47, %v21512_v47  ;;  %v21513_v7 = vld [vmem:[#allocation140_spill] sm:$0xff] }
 0x5f9   :  { %v7858_v41 = vrot.slane %v7850_v40, %v21366_v62  ;;  %v7883_v51 = vcombine.low %v16798_v12, %v16802_v9  ;;  %v8213_v34 = vadd.f32 %v8212_v1, %v8211_v11  ;;  %v7849_v44 = vcombine.low %v7841_v63, %v7848_v58  ;;  %v21517_v1 = vld [vmem:[#allocation136_spill] sm:$0xff] }
 0x5fa   :  { %v7874_v36 = vrot.slane %v7867_v38, %v21366_v62  ;;  %v7900_v42 = vcombine.low %v16827_v19, %v16837_v17  ;;  %v8214_v25 = vsel %vm6429_vm13, %v7816_v45, 0.0  ;;  %v17023_v21 = vmul.f32 %v21513_v7, %v21513_v7  ;;  %v21515_v45 = vld [vmem:[#allocation11_spill] sm:$0xff] }
 0x5fb   :  { %v17027_v15 = vmul.f32 %v21514_v18, %v21514_v18  ;;  %v7881_v9 = vrot.slane %v16787_v55, %v21366_v62  ;;  %v8215_v12 = vadd.f32 %v8214_v25, %v8213_v34  ;;  %v7866_v40 = vcombine.low %v7858_v41, %v7865_v49 }
 0x5fc   :  { %v7898_v63 = vrot.slane %v7884_v37, %v21366_v62  ;;  %v7917_v19 = vcombine.low %v16873_v57, %v16877_v31  ;;  %v8216_v17 = vsel %vm1745_vm4, %v7833_v4, 0.0  ;;  %v17037_v38 = vmul.f32 %v21515_v45, %v21515_v45  ;;  %v21516_v31 = vld [vmem:[#allocation132_spill] sm:$0xff] }
 0x5fd   :  { %v7891_v39 = vrot.slane %v7883_v51, %v21366_v62  ;;  %v7916_v58 = vcombine.low %v16852_v6, %v16862_v61  ;;  %v8217_v11 = vadd.f32 %v8216_v17, %v8215_v12  ;;  %v7882_v55 = vcombine.low %v7874_v36, %v7881_v9 }
 0x5fe   :  { %v7907_v49 = vrot.slane %v7900_v42, %v21366_v62  ;;  %v7933_v37 = vcombine.low %v16887_v59, %v16898_v46  ;;  %v8218_v57 = vsel %vm6429_vm13, %v7849_v44, 0.0  ;;  %v6949_v4 = vmul.f32 %v21516_v31, %v21516_v31  ;;  %v21518_v46 = vld [vmem:[#allocation135_spill] sm:$0xff] }
 0x5ff   :  { %v6950_v41 = vmul.f32 %v21517_v1, %v21517_v1  ;;  %v7914_v51 = vrot.slane %v16848_v16, %v21366_v62  ;;  %v8219_v34 = vadd.f32 %v8218_v57, %v8217_v11  ;;  %v7899_v6 = vcombine.low %v7891_v39, %v7898_v63 }
 0x600   :  { %v7931_v61 = vrot.slane %v7917_v19, %v21366_v62  ;;  %v7950_v36 = vcombine.low %v16927_v13, %v16937_v30  ;;  %v8220_v59 = vsel %vm1745_vm4, %v7866_v40, 0.0  ;;  %v6951_v44 = vmul.f32 %v21518_v46, %v21518_v46  ;;  %v21519_v13 = vld [vmem:[#allocation163_spill] sm:$0xff]  ;;  %v21520_v40 = vld [vmem:[#allocation196_spill] sm:$0xff] }
 0x601   :  { %v7924_v42 = vrot.slane %v7916_v58, %v21366_v62  ;;  %v7949_v25 = vcombine.low %v16912_v32, %v16923_v43  ;;  %v8221_v9 = vadd.f32 %v8220_v59, %v8219_v34  ;;  %v7915_v12 = vcombine.low %v7907_v49, %v7914_v51 }
 0x602   :  { %v7940_v16 = vrot.slane %v7933_v37, %v21366_v62  ;;  %v7966_v63 = vcombine.low %v16948_v35, %v16952_v2  ;;  %v8222_v19 = vsel %vm6429_vm13, %v7882_v55, 0.0  ;;  %v6952_v30 = vmul.f32 %v21519_v13, %v21519_v13  ;;  %v21521_v35 = vld [vmem:[#allocation198_spill] sm:$0xff] }
 0x603   :  { %v6953_v17 = vmul.f32 %v21520_v40, %v21520_v40  ;;  %v7947_v39 = vrot.slane %v16902_v53, %v21366_v62  ;;  %v8223_v58 = vadd.f32 %v8222_v19, %v8221_v9  ;;  %v7932_v32 = vcombine.low %v7924_v42, %v7931_v61 }
 0x604   :  { %v7964_v43 = vrot.slane %v7950_v36, %v21366_v62  ;;  %v7983_v11 = vcombine.low %v16987_v5, %v16998_v29  ;;  %v8224_v2 = vsel %vm1745_vm4, %v7899_v6, 0.0  ;;  %v6955_v55 = vmul.f32 %v21521_v35, %v21521_v35  ;;  %v21522_v5 = vld [vmem:[#allocation71_spill] sm:$0xff] }
 0x605   :  { %v7957_v49 = vrot.slane %v7949_v25, %v21366_v62  ;;  %v7982_v37 = vcombine.low %v16973_v27, %v16977_v22  ;;  %v8225_v57 = vadd.f32 %v8224_v2, %v8223_v58  ;;  %v7948_v51 = vcombine.low %v7940_v16, %v7947_v39  ;;  %v21523_v6 = vld [vmem:[#allocation139_spill] sm:$0xff] }
 0x606   :  { %v7973_v53 = vrot.slane %v7966_v63, %v21366_v62  ;;  %v7999_v34 = vcombine.low %v17002_v24, %v17012_v23  ;;  %v8226_v61 = vsel %vm6429_vm13, %v7915_v12, 0.0  ;;  %v6956_v29 = vmul.f32 %v21522_v5, %v21522_v5  ;;  %v21524_v16 = vld [vmem:[#allocation143_spill] sm:$0xff] }
 0x607   :  { %v6957_v36 = vmul.f32 %v21523_v6, %v21523_v6  ;;  %v7980_v59 = vrot.slane %v16962_v56, %v21366_v62  ;;  %v8227_v42 = vadd.f32 %v8226_v61, %v8225_v57  ;;  %v7965_v27 = vcombine.low %v7957_v49, %v7964_v43  ;;  %v21525_v43 = vld [vmem:[#allocation197_spill] sm:$0xff] }
 0x608   :  { %v7997_v22 = vrot.slane %v7983_v11, %v21366_v62  ;;  %v8016_v25 = vcombine.low %v6949_v4, %v6950_v41  ;;  %v8228_v9 = vsel %vm1745_vm4, %v7932_v32, 0.0  ;;  %v6959_v24 = vmul.f32 %v21524_v16, %v21524_v16  ;;  %v21526_v41 = vld [vmem:[#allocation199_spill] sm:$0xff] }
 0x609   :  { %v7990_v23 = vrot.slane %v7982_v37, %v21366_v62  ;;  %v8015_v12 = vcombine.low %v17027_v15, %v17037_v38  ;;  %v8229_v63 = vadd.f32 %v8228_v9, %v8227_v42  ;;  %v7981_v19 = vcombine.low %v7973_v53, %v7980_v59  ;;  %v21527_v59 = vld [vmem:[#allocation165_spill] sm:$0xff] }
 0x60a   :  { %v8006_v39 = vrot.slane %v7999_v34, %v21366_v62  ;;  %v8032_v56 = vcombine.low %v6951_v44, %v6952_v30  ;;  %v8230_v58 = vsel %vm6429_vm13, %v7948_v51, 0.0  ;;  %v6954_v4 = vmul.f32 %v21525_v43, %v21525_v43 }
 0x60b   :  { %v6958_v32 = vmul.f32 %v21526_v41, %v21526_v41  ;;  %v8013_v11 = vrot.slane %v17023_v21, %v21366_v62  ;;  %v8231_v2 = vadd.f32 %v8230_v58, %v8229_v63  ;;  %v7998_v49 = vcombine.low %v7990_v23, %v7997_v22 }
 0x60c   :  { %v8030_v15 = vrot.slane %v8016_v25, %v21366_v62  ;;  %v8049_v38 = vcombine.low %v6956_v29, %v6957_v36  ;;  %v8232_v37 = vsel %vm1745_vm4, %v7965_v27, 0.0  ;;  %v8023_v44 = vrot.slane %v8015_v12, %v21366_v62 }
 0x60d   :  { %v8048_v30 = vcombine.low %v6954_v4, %v6955_v55  ;;  %v8233_v57 = vadd.f32 %v8232_v37, %v8231_v2  ;;  %v8014_v51 = vcombine.low %v8006_v39, %v8013_v11  ;;  %v8039_v53 = vrot.slane %v8032_v56, %v21366_v62 }
 0x60e   :  { %v8065_v34 = vcombine.low %v6958_v32, %v6959_v24  ;;  %v8234_v61 = vsel %vm6429_vm13, %v7981_v19, 0.0  ;;  %v6960_v21 = vmul.f32 %v21527_v59, %v21527_v59  ;;  %v8031_v22 = vcombine.low %v8023_v44, %v8030_v15 }
 0x60f   :  { %v8235_v42 = vadd.f32 %v8234_v61, %v8233_v57  ;;  %v8046_v25 = vrot.slane %v6953_v17, %v21366_v62  ;;  %v8063_v29 = vrot.slane %v8049_v38, %v21366_v62  ;;  %v8236_v36 = vsel %vm1745_vm4, %v7998_v49, 0.0  ;;  %v8255_v61 = vld [vmem:[%s19651_s2] sm:$0x1] }
 0x610   :  { %v8056_v9 = vrot.slane %v8048_v30, %v21366_v62  ;;  %v8072_v23 = vrot.slane %v8065_v34, %v21366_v62  ;;  %v8238_v24 = vsel %vm6429_vm13, %v8014_v51, 0.0  ;;  %v8079_v19 = vrot.slane %v6960_v21, %v21366_v62  ;;  %v10186_v34 = vld [vmem:[%s19650_s3] ss:$0 sm:$0xff]  ;;  %v21528_v21 = vld [vmem:[#allocation68_spill] sm:$0xff] }
 0x611   :  { %v8237_v27 = vadd.f32 %v8236_v36, %v8235_v42  ;;  %v8047_v55 = vcombine.low %v8039_v53, %v8046_v25  ;;  %v8240_v39 = vsel %vm1745_vm4, %v8031_v22, 0.0  ;;  %v8262_v42 = vsub.s32 0, %v21528_v21  ;;  %v21539_v21 = vld [vmem:[#allocation65_spill] sm:$0xff] }
 0x612   :  { %v8064_v63 = vcombine.low %v8056_v9, %v8063_v29  ;;  %v8080_v17 = vcombine.low %v8072_v23, %v8079_v19  ;;  %v8487_v22 = vcombine.high %v10186_v34, %v10186_v34  ;;  %v17131_v36 = vrot.slane %v10186_v34, %v21366_v62  ;;  %v21529_v19 = vld [vmem:[#allocation142_spill] sm:$0xff]  ;;  %v21538_v34 = vld [vmem:[#allocation72_spill] sm:$0xff] }
 0x613   :  { %v8239_v12 = vadd.f32 %v8238_v24, %v8237_v27  ;;  %v8242_v58 = vsel %vm6429_vm13, %v8047_v55, 0.0 }
 0x614   :  { %v8244_v32 = vsel %vm1745_vm4, %v8064_v63, 0.0  ;;  %v8246_v2 = vsel %vm6429_vm13, %v8080_v17, 0.0  ;;  %v17134_v55 = vrot.slane %v8487_v22, %v21366_v62  ;;  %v17141_v24 = vcombine.high %v17131_v36, %v17131_v36  ;;  %v21530_v17 = vld [vmem:[#allocation164_spill] sm:$0xff]  ;;  %v21540_v22 = vld [vmem:[#allocation14_spill] sm:$0xff] }
 0x615   :  { %v8241_v56 = vadd.f32 %v8240_v39, %v8239_v12 }
 0x617   :  { %v8243_v4 = vadd.f32 %v8242_v58, %v8241_v56  ;;  %v17156_v56 = vcombine.high %v17134_v55, %v17134_v55 }
 0x619   :  { %v8245_v11 = vadd.f32 %v8244_v32, %v8243_v4  ;;  %v21531_v4 = vld [vmem:[#allocation145_spill] sm:$0xff] }
 0x61b   :  { %v8247_v49 = vadd.f32 %v8246_v2, %v8245_v11  ;;  %v21532_v11 = vld [vmem:[#allocation166_spill] sm:$0xff] }
 0x61d   :  { %v8248_v15 = vrot.slane %v8247_v49, 4 }
 0x61f   :  { %v8249_v38 = vadd.f32 %v8248_v15, %v8247_v49  ;;  %v21533_v49 = vld [vmem:[#allocation144_spill] sm:$0xff] }
 0x621   :  { %v8250_v37 = vrot.slane %v8249_v38, 2 }
 0x623   :  { %v8251_v44 = vadd.f32 %v8250_v37, %v8249_v38  ;;  %v21534_v37 = vld [vmem:[#allocation10_spill] sm:$0xff] }
 0x625   :  { %v8252_v30 = vrot.slane %v8251_v44, 1 }
 0x627   :  { %v8253_v57 = vadd.f32 %v8252_v30, %v8251_v44  ;;  %v21535_v30 = vld [vmem:[#allocation19_spill] sm:$0xff] }
 0x629   :  { %v8254_v51 = vmul.f32 0.0025510204, %v8253_v57 }
 0x62b   :  { %v8256_v53 = vadd.f32 1e-05, %v8254_v51  ;;  %v21536_v51 = vld [vmem:[#allocation17_spill] sm:$0xff] }
 0x62d   :  { %10422 = vrsqrt.f32 %v8256_v53 }
 0x637   :  { %v10423_v25 = vpop.eup %10422 }
 0x638   :  { %v8258_v29 = vmul.f32 %v10423_v25, %v8255_v61 }
 0x63a   :  { %v8263_v27 = vrot.slane %v8258_v29, %v8262_v42  ;;  %v21541_v29 = vld [vmem:[#allocation15_spill] sm:$0xff] }
 0x63c   :  { %v8264_v9 = vcombine.high %v8263_v27, %v8263_v27  ;;  %v17137_v23 = vrot.slane %v8263_v27, %v21366_v62 }
 0x63e   :  { %v17144_v12 = vrot.slane %v8264_v9, %v21366_v62  ;;  %v17148_v63 = vcombine.high %v17137_v23, %v17137_v23  ;;  %v17152_v39 = vmul.f32 %v17137_v23, %v21529_v19  ;;  %v17160_v58 = vmul.f32 %v17137_v23, %v21530_v17  ;;  %v21542_v9 = vld [vmem:[#allocation57_spill] sm:$0xff]  ;;  %v21543_v17 = vld [vmem:[#allocation62_spill] sm:$0xff] }
 0x63f   :  { %v17164_v32 = vmul.f32 %v17137_v23, %v21531_v4  ;;  %v17168_v2 = vmul.f32 %v17137_v23, %v21532_v11  ;;  %v17172_v15 = vmul.f32 %v17137_v23, %v21533_v49  ;;  %v17188_v53 = vmul.f32 %v17137_v23, %v21536_v51  ;;  %v21544_v11 = vld [vmem:[#allocation16_spill] sm:$0xff]  ;;  %v21546_v51 = vld [vmem:[#allocation21_spill] sm:$0xff] }
 0x640   :  { %v17176_v38 = vcombine.high %v17144_v12, %v17144_v12  ;;  %v17180_v44 = vmul.f32 %v17148_v63, %v21534_v37  ;;  %v17184_v57 = vmul.f32 %v17144_v12, %v21535_v30  ;;  %v17192_v61 = vmul.f32 %v17148_v63, %v21538_v34  ;;  %v21545_v37 = vld [vmem:[#allocation58_spill] sm:$0xff]  ;;  %v21554_v62 = vld [vmem:[#allocation29_spill] sm:$0xff] }
 0x641   :  { %21537 = vst [vmem:[#allocation208_spill] sm:$0xff] %v17188_v53  ;;  %v17196_v42 = vmul.f32 %v17144_v12, %v21539_v21  ;;  %v17200_v25 = vmul.f32 %v17148_v63, %v21540_v22  ;;  %v17204_v27 = vmul.f32 %v17144_v12, %v21541_v29  ;;  %v17216_v49 = vmul.f32 %v17148_v63, %v21544_v11  ;;  %v21548_v21 = vld [vmem:[#allocation18_spill] sm:$0xff]  ;;  %v21550_v29 = vld [vmem:[#allocation61_spill] sm:$0xff] }
 0x642   :  { %v17208_v19 = vmul.f32 %v17176_v38, %v21542_v9  ;;  %v17212_v4 = vmul.f32 %v17176_v38, %v21543_v17  ;;  %v17220_v30 = vmul.f32 %v17144_v12, %v21545_v37  ;;  %v17224_v34 = vmul.f32 %v17148_v63, %v21546_v51  ;;  %v21552_v17 = vld [vmem:[#allocation66_spill] sm:$0xff] }
 0x643   :  { %v17228_v22 = vmul.f32 %v17144_v12, %v21548_v21  ;;  %v17232_v9 = vmul.f32 %v17176_v38, %v21550_v29  ;;  %v17236_v11 = vmul.f32 %v17148_v63, %v21552_v17  ;;  %v17240_v37 = vmul.f32 %v17144_v12, %v21554_v62  ;;  %v21556_v53 = vld [vmem:[#allocation70_spill] sm:$0xff] }
 0x644   :  { %21547 = vst [vmem:[#allocation205_spill] sm:$0xff] %v17224_v34  ;;  %v17244_v51 = vmul.f32 %v17137_v23, %v21556_v53  ;;  %v21558_v34 = vld [vmem:[#allocation167_spill] sm:$0xff] }
 0x645   :  { %21549 = vst [vmem:[#allocation214_spill] sm:$0xff] %v17228_v22  ;;  %21551 = vst [vmem:[#allocation213_spill] sm:$0xff] %v17232_v9  ;;  %v17248_v21 = vmul.f32 %v17148_v63, %v21558_v34  ;;  %v21560_v22 = vld [vmem:[#allocation31_spill] sm:$0xff]  ;;  %v21562_v9 = vld [vmem:[#allocation28_spill] sm:$0xff] }
 0x646   :  { %21553 = vst [vmem:[#allocation212_spill] sm:$0xff] %v17236_v11  ;;  %21555 = vst [vmem:[#allocation211_spill] sm:$0xff] %v17240_v37  ;;  %v17252_v29 = vmul.f32 %v17144_v12, %v21560_v22  ;;  %v17256_v17 = vmul.f32 %v17176_v38, %v21562_v9  ;;  %v21564_v11 = vld [vmem:[#allocation30_spill] sm:$0xff]  ;;  %v21566_v37 = vld [vmem:[#allocation73_spill] sm:$0xff] }
 0x647   :  { %21557 = vst [vmem:[#allocation216_spill] sm:$0xff] %v17244_v51  ;;  %21559 = vst [vmem:[#allocation215_spill] sm:$0xff] %v17248_v21  ;;  %v17260_v62 = vmul.f32 %v17137_v23, %v21564_v11  ;;  %v17264_v53 = vmul.f32 %v17148_v63, %v21566_v37  ;;  %v21568_v51 = vld [vmem:[#allocation168_spill] sm:$0xff]  ;;  %v21570_v21 = vld [vmem:[#allocation74_spill] sm:$0xff] }
 0x648   :  { %21561 = vst [vmem:[#allocation210_spill] sm:$0xff] %v17252_v29  ;;  %21563 = vst [vmem:[#allocation221_spill] sm:$0xff] %v17256_v17  ;;  %v17268_v34 = vmul.f32 %v17144_v12, %v21568_v51  ;;  %v17272_v22 = vmul.f32 %v17137_v23, %v21570_v21  ;;  %v21572_v29 = vld [vmem:[#allocation23_spill] sm:$0xff]  ;;  %v21574_v17 = vld [vmem:[#allocation69_spill] sm:$0xff] }
 0x649   :  { %21565 = vst [vmem:[#allocation220_spill] sm:$0xff] %v17260_v62  ;;  %21567 = vst [vmem:[#allocation219_spill] sm:$0xff] %v17264_v53  ;;  %v17276_v9 = vmul.f32 %v17148_v63, %v21572_v29  ;;  %v17280_v11 = vmul.f32 %v17144_v12, %v21574_v17  ;;  %v21576_v62 = vld [vmem:[#allocation20_spill] sm:$0xff] }
 0x64a   :  { %21569 = vst [vmem:[#allocation218_spill] sm:$0xff] %v17268_v34  ;;  %21571 = vst [vmem:[#allocation223_spill] sm:$0xff] %v17272_v22  ;;  %v17284_v37 = vmul.f32 %v17176_v38, %v21576_v62  ;;  %v21578_v53 = vld [vmem:[#allocation76_spill] sm:$0xff]  ;;  %v21580_v34 = vld [vmem:[#allocation75_spill] sm:$0xff] }
 0x64b   :  { %21573 = vst [vmem:[#allocation222_spill] sm:$0xff] %v17276_v9  ;;  %21575 = vst [vmem:[#allocation217_spill] sm:$0xff] %v17280_v11  ;;  %v17288_v51 = vmul.f32 %v17137_v23, %v21578_v53  ;;  %v17292_v21 = vmul.f32 %v17148_v63, %v21580_v34  ;;  %v21582_v22 = vld [vmem:[#allocation33_spill] sm:$0xff]  ;;  %v21584_v9 = vld [vmem:[#allocation83_spill] sm:$0xff] }
 0x64c   :  { %21577 = vst [vmem:[#allocation228_spill] sm:$0xff] %v17284_v37  ;;  %v17296_v29 = vmul.f32 %v17144_v12, %v21582_v22  ;;  %v17300_v17 = vmul.f32 %v17137_v23, %v21584_v9  ;;  %v21586_v11 = vld [vmem:[#allocation78_spill] sm:$0xff] }
 0x64d   :  { %21579 = vst [vmem:[#allocation227_spill] sm:$0xff] %v17288_v51  ;;  %21581 = vst [vmem:[#allocation226_spill] sm:$0xff] %v17292_v21  ;;  %v17304_v62 = vmul.f32 %v17148_v63, %v21586_v11  ;;  %v21588_v37 = vld [vmem:[#allocation22_spill] sm:$0xff]  ;;  %v21590_v51 = vld [vmem:[#allocation77_spill] sm:$0xff] }
 0x64e   :  { %21583 = vst [vmem:[#allocation225_spill] sm:$0xff] %v17296_v29  ;;  %21585 = vst [vmem:[#allocation230_spill] sm:$0xff] %v17300_v17  ;;  %v17308_v53 = vmul.f32 %v17144_v12, %v21588_v37  ;;  %v17312_v34 = vmul.f32 %v17176_v38, %v21590_v51  ;;  %v21592_v21 = vld [vmem:[#allocation89_spill] sm:$0xff]  ;;  %v21594_v29 = vld [vmem:[#allocation32_spill] sm:$0xff] }
 0x64f   :  { %21587 = vst [vmem:[#allocation229_spill] sm:$0xff] %v17304_v62  ;;  %v17316_v22 = vmul.f32 %v17137_v23, %v21592_v21  ;;  %v17320_v9 = vmul.f32 %v17148_v63, %v21594_v29  ;;  %v21596_v17 = vld [vmem:[#allocation169_spill] sm:$0xff] }
 0x650   :  { %21589 = vst [vmem:[#allocation224_spill] sm:$0xff] %v17308_v53  ;;  %21591 = vst [vmem:[#allocation232_spill] sm:$0xff] %v17312_v34  ;;  %v17324_v11 = vmul.f32 %v17144_v12, %v21596_v17  ;;  %v21598_v62 = vld [vmem:[#allocation25_spill] sm:$0xff]  ;;  %v21600_v53 = vld [vmem:[#allocation12_spill] sm:$0xff] }
 0x651   :  { %21593 = vst [vmem:[#allocation233_spill] sm:$0xff] %v17316_v22  ;;  %21595 = vst [vmem:[#allocation231_spill] sm:$0xff] %v17320_v9  ;;  %v17328_v37 = vmul.f32 %v17137_v23, %v21598_v62  ;;  %v17332_v51 = vmul.f32 %v17148_v63, %v21600_v53  ;;  %v21602_v34 = vld [vmem:[#allocation80_spill] sm:$0xff]  ;;  %v21604_v22 = vld [vmem:[#allocation82_spill] sm:$0xff] }
 0x652   :  { %21597 = vst [vmem:[#allocation237_spill] sm:$0xff] %v17324_v11  ;;  %v17336_v21 = vmul.f32 %v17144_v12, %v21602_v34  ;;  %v17340_v29 = vmul.f32 %v17176_v38, %v21604_v22  ;;  %v21606_v9 = vld [vmem:[#allocation79_spill] sm:$0xff] }
 0x653   :  { %21599 = vst [vmem:[#allocation236_spill] sm:$0xff] %v17328_v37  ;;  %21601 = vst [vmem:[#allocation235_spill] sm:$0xff] %v17332_v51  ;;  %v17344_v17 = vmul.f32 %v17137_v23, %v21606_v9  ;;  %v21608_v11 = vld [vmem:[#allocation35_spill] sm:$0xff]  ;;  %v21610_v37 = vld [vmem:[#allocation170_spill] sm:$0xff] }
 0x654   :  { %21603 = vst [vmem:[#allocation239_spill] sm:$0xff] %v17336_v21  ;;  %21605 = vst [vmem:[#allocation238_spill] sm:$0xff] %v17340_v29  ;;  %v17348_v62 = vmul.f32 %v17148_v63, %v21608_v11  ;;  %v17352_v53 = vmul.f32 %v17144_v12, %v21610_v37  ;;  %v21612_v51 = vld [vmem:[#allocation171_spill] sm:$0xff]  ;;  %v21616_v29 = vld [vmem:[#allocation24_spill] sm:$0xff] }
 0x655   :  { %21607 = vst [vmem:[#allocation234_spill] sm:$0xff] %v17344_v17  ;;  %v17356_v34 = vmul.f32 %v17137_v23, %v21612_v51  ;;  %v21614_v21 = vld [vmem:[#allocation55_spill] sm:$0xff]  ;;  %v17364_v9 = vmul.f32 %v17144_v12, %v21616_v29  ;;  %v21618_v17 = vld [vmem:[#allocation105_spill] sm:$0xff] }
 0x656   :  { %21609 = vst [vmem:[#allocation241_spill] sm:$0xff] %v17348_v62  ;;  %21611 = vst [vmem:[#allocation242_spill] sm:$0xff] %v17352_v53  ;;  %v17360_v22 = vmul.f32 %v17148_v63, %v21614_v21  ;;  %v17368_v11 = vmul.f32 %v17176_v38, %v21618_v17  ;;  %v21620_v62 = vld [vmem:[#allocation99_spill] sm:$0xff]  ;;  %v21622_v53 = vld [vmem:[#allocation86_spill] sm:$0xff] }
 0x657   :  { %21613 = vst [vmem:[#allocation240_spill] sm:$0xff] %v17356_v34  ;;  %21617 = vst [vmem:[#allocation244_spill] sm:$0xff] %v17364_v9  ;;  %v17372_v37 = vmul.f32 %v17137_v23, %v21620_v62  ;;  %v17376_v51 = vmul.f32 %v17148_v63, %v21622_v53  ;;  %v21624_v34 = vld [vmem:[#allocation172_spill] sm:$0xff]  ;;  %v21628_v9 = vld [vmem:[#allocation102_spill] sm:$0xff] }
 0x658   :  { %21615 = vst [vmem:[#allocation245_spill] sm:$0xff] %v17360_v22  ;;  %21619 = vst [vmem:[#allocation247_spill] sm:$0xff] %v17368_v11  ;;  %v17380_v21 = vmul.f32 %v17144_v12, %v21624_v34  ;;  %v21626_v22 = vld [vmem:[#allocation173_spill] sm:$0xff]  ;;  %v17388_v17 = vmul.f32 %v17148_v63, %v21628_v9  ;;  %v21630_v11 = vld [vmem:[#allocation150_spill] sm:$0xff] }
 0x659   :  { %21621 = vst [vmem:[#allocation246_spill] sm:$0xff] %v17372_v37  ;;  %21623 = vst [vmem:[#allocation243_spill] sm:$0xff] %v17376_v51  ;;  %v17384_v29 = vmul.f32 %v17137_v23, %v21626_v22  ;;  %v17392_v62 = vmul.f32 %v17144_v12, %v21630_v11  ;;  %v21632_v37 = vld [vmem:[#allocation27_spill] sm:$0xff]  ;;  %v21634_v51 = vld [vmem:[#allocation34_spill] sm:$0xff] }
 0x65a   :  { %21625 = vst [vmem:[#allocation249_spill] sm:$0xff] %v17380_v21  ;;  %21629 = vst [vmem:[#allocation248_spill] sm:$0xff] %v17388_v17  ;;  %v17396_v53 = vmul.f32 %v17176_v38, %v21632_v37  ;;  %v17400_v34 = vmul.f32 %v17137_v23, %v21634_v51  ;;  %v21636_v21 = vld [vmem:[#allocation93_spill] sm:$0xff] }
 0x65b   :  { %21627 = vst [vmem:[#allocation250_spill] sm:$0xff] %v17384_v29  ;;  %21631 = vst [vmem:[#allocation193_spill] sm:$0xff] %v17392_v62  ;;  %v17404_v22 = vmul.f32 %v17148_v63, %v21636_v21  ;;  %v21638_v29 = vld [vmem:[#allocation7_spill] sm:$0xff]  ;;  %v21640_v17 = vld [vmem:[#allocation37_spill] sm:$0xff] }
 0x65c   :  { %21633 = vst [vmem:[#allocation253_spill] sm:$0xff] %v17396_v53  ;;  %21635 = vst [vmem:[#allocation252_spill] sm:$0xff] %v17400_v34  ;;  %v17408_v9 = vmul.f32 %v17144_v12, %v21638_v29  ;;  %v17412_v11 = vmul.f32 %v17137_v23, %v21640_v17  ;;  %v21642_v62 = vld [vmem:[#allocation98_spill] sm:$0xff]  ;;  %v21644_v53 = vld [vmem:[#allocation3_spill] sm:$0xff] }
 0x65d   :  { %21637 = vst [vmem:[#allocation251_spill] sm:$0xff] %v17404_v22  ;;  %v17416_v37 = vmul.f32 %v17148_v63, %v21642_v62  ;;  %v17420_v51 = vmul.f32 %v17144_v12, %v21644_v53  ;;  %v21646_v34 = vld [vmem:[#allocation81_spill] sm:$0xff]  ;;  %v21648_v22 = vld [vmem:[#allocation26_spill] sm:$0xff] }
 0x65e   :  { %21639 = vst [vmem:[#allocation134_spill] sm:$0xff] %v17408_v9  ;;  %21641 = vst [vmem:[#allocation256_spill] sm:$0xff] %v17412_v11  ;;  %v17424_v21 = vmul.f32 %v17176_v38, %v21646_v34  ;;  %v17428_v29 = vmul.f32 %v17137_v23, %v21648_v22  ;;  %v21650_v9 = vld [vmem:[#allocation5_spill] sm:$0xff]  ;;  %v21652_v11 = vld [vmem:[#allocation90_spill] sm:$0xff] }
 0x65f   :  { %21643 = vst [vmem:[#allocation255_spill] sm:$0xff] %v17416_v37  ;;  %21645 = vst [vmem:[#allocation257_spill] sm:$0xff] %v17420_v51  ;;  %v17432_v17 = vmul.f32 %v17148_v63, %v21650_v9  ;;  %v17436_v62 = vmul.f32 %v17144_v12, %v21652_v11  ;;  %v21654_v37 = vld [vmem:[#allocation109_spill] sm:$0xff]  ;;  %v21656_v51 = vld [vmem:[#allocation36_spill] sm:$0xff] }
 0x660   :  { %21647 = vst [vmem:[#allocation141_spill] sm:$0xff] %v17424_v21  ;;  %21649 = vst [vmem:[#allocation254_spill] sm:$0xff] %v17428_v29  ;;  %v17440_v53 = vmul.f32 %v17137_v23, %v21654_v37  ;;  %v17444_v34 = vmul.f32 %v17148_v63, %v21656_v51  ;;  %v21658_v21 = vld [vmem:[#allocation85_spill] sm:$0xff]  ;;  %v21660_v29 = vld [vmem:[#allocation151_spill] sm:$0xff] }
 0x661   :  { %21651 = vst [vmem:[#allocation124_spill] sm:$0xff] %v17432_v17  ;;  %21653 = vst [vmem:[#allocation67_spill] sm:$0xff] %v17436_v62  ;;  %v17448_v22 = vmul.f32 %v17144_v12, %v21658_v21  ;;  %v17452_v9 = vmul.f32 %v17176_v38, %v21660_v29  ;;  %v21662_v17 = vld [vmem:[#allocation101_spill] sm:$0xff]  ;;  %v21664_v62 = vld [vmem:[#allocation59_spill] sm:$0xff] }
 0x662   :  { %21655 = vst [vmem:[#allocation195_spill] sm:$0xff] %v17440_v53  ;;  %21657 = vst [vmem:[#allocation258_spill] sm:$0xff] %v17444_v34  ;;  %v17456_v11 = vmul.f32 %v17137_v23, %v21662_v17  ;;  %v17460_v37 = vmul.f32 %v17148_v63, %v21664_v62  ;;  %v21666_v53 = vld [vmem:[#allocation84_spill] sm:$0xff]  ;;  %v21668_v34 = vld [vmem:[#allocation113_spill] sm:$0xff] }
 0x663   :  { %21659 = vst [vmem:[#allocation52_spill] sm:$0xff] %v17448_v22  ;;  %21661 = vst [vmem:[#allocation8_spill] sm:$0xff] %v17452_v9  ;;  %v17464_v51 = vmul.f32 %v17144_v12, %v21666_v53  ;;  %v17468_v21 = vmul.f32 %v17137_v23, %v21668_v34  ;;  %v21670_v22 = vld [vmem:[#allocation106_spill] sm:$0xff]  ;;  %v21672_v9 = vld [vmem:[#allocation100_spill] sm:$0xff] }
 0x664   :  { %21663 = vst [vmem:[#allocation204_spill] sm:$0xff] %v17456_v11  ;;  %21665 = vst [vmem:[#allocation201_spill] sm:$0xff] %v17460_v37  ;;  %v17472_v29 = vmul.f32 %v17148_v63, %v21670_v22  ;;  %v17476_v17 = vmul.f32 %v17144_v12, %v21672_v9  ;;  %v21674_v11 = vld [vmem:[#allocation39_spill] sm:$0xff] }
 0x665   :  { %21667 = vst [vmem:[#allocation200_spill] sm:$0xff] %v17464_v51  ;;  %21669 = vst [vmem:[#allocation203_spill] sm:$0xff] %v17468_v21  ;;  %v17480_v62 = vmul.f32 %v17176_v38, %v21674_v11  ;;  %v21676_v37 = vld [vmem:[#allocation63_spill] sm:$0xff]  ;;  %v21678_v51 = vld [vmem:[#allocation88_spill] sm:$0xff] }
 0x666   :  { %21671 = vst [vmem:[#allocation202_spill] sm:$0xff] %v17472_v29  ;;  %21673 = vst [vmem:[#allocation159_spill] sm:$0xff] %v17476_v17  ;;  %v17484_v53 = vmul.f32 %v17137_v23, %v21676_v37  ;;  %v17488_v34 = vmul.f32 %v17148_v63, %v21678_v51  ;;  %v21680_v21 = vld [vmem:[#allocation174_spill] sm:$0xff]  ;;  %v21682_v29 = vld [vmem:[#allocation175_spill] sm:$0xff] }
 0x667   :  { %21675 = vst [vmem:[#allocation206_spill] sm:$0xff] %v17480_v62  ;;  %v17492_v22 = vmul.f32 %v17144_v12, %v21680_v21  ;;  %v17496_v9 = vmul.f32 %v17137_v23, %v21682_v29  ;;  %v21684_v17 = vld [vmem:[#allocation176_spill] sm:$0xff]  ;;  %v21686_v62 = vld [vmem:[#allocation177_spill] sm:$0xff] }
 0x668   :  { %21677 = vst [vmem:[#allocation160_spill] sm:$0xff] %v17484_v53  ;;  %21679 = vst [vmem:[#allocation123_spill] sm:$0xff] %v17488_v34  ;;  %v17500_v11 = vmul.f32 %v17148_v63, %v21684_v17  ;;  %v17504_v37 = vmul.f32 %v17144_v12, %v21686_v62  ;;  %v21688_v53 = vld [vmem:[#allocation2_spill] sm:$0xff] }
 0x669   :  { %21681 = vst [vmem:[#allocation207_spill] sm:$0xff] %v17492_v22  ;;  %21683 = vst [vmem:[#allocation64_spill] sm:$0xff] %v17496_v9  ;;  %v17508_v51 = vmul.f32 %v17176_v38, %v21688_v53  ;;  %v21690_v34 = vld [vmem:[#allocation178_spill] sm:$0xff]  ;;  %v21692_v22 = vld [vmem:[#allocation153_spill] sm:$0xff] }
 0x66a   :  { %21685 = vst [vmem:[#allocation127_spill] sm:$0xff] %v17500_v11  ;;  %21687 = vst [vmem:[#allocation162_spill] sm:$0xff] %v17504_v37  ;;  %v17512_v21 = vmul.f32 %v17137_v23, %v21690_v34  ;;  %v17516_v29 = vmul.f32 %v17148_v63, %v21692_v22  ;;  %v21694_v9 = vld [vmem:[#allocation38_spill] sm:$0xff]  ;;  %v21698_v37 = vld [vmem:[#allocation104_spill] sm:$0xff] }
 0x66b   :  { %21689 = vst [vmem:[#allocation209_spill] sm:$0xff] %v17508_v51  ;;  %v17520_v17 = vmul.f32 %v17144_v12, %v21694_v9  ;;  %v21696_v11 = vld [vmem:[#allocation110_spill] sm:$0xff]  ;;  %v17528_v53 = vmul.f32 %v17148_v63, %v21698_v37 }
 0x66c   :  { %21691 = vst [vmem:[#allocation131_spill] sm:$0xff] %v17512_v21  ;;  %21693 = vst [vmem:[#allocation140_spill] sm:$0xff] %v17516_v29  ;;  %v17524_v62 = vmul.f32 %v17137_v23, %v21696_v11  ;;  %v21700_v51 = vld [vmem:[#allocation54_spill] sm:$0xff]  ;;  %v21702_v21 = vld [vmem:[#allocation87_spill] sm:$0xff] }
 0x66d   :  { %21695 = vst [vmem:[#allocation161_spill] sm:$0xff] %v17520_v17  ;;  %21699 = vst [vmem:[#allocation132_spill] sm:$0xff] %v17528_v53  ;;  %v17532_v34 = vmul.f32 %v17144_v12, %v21700_v51  ;;  %v17536_v22 = vmul.f32 %v17176_v38, %v21702_v21  ;;  %v21704_v29 = vld [vmem:[#allocation41_spill] sm:$0xff]  ;;  %v21710_v53 = vld [vmem:[#allocation180_spill] sm:$0xff] }
 0x66e   :  { %21697 = vst [vmem:[#allocation11_spill] sm:$0xff] %v17524_v62  ;;  %v17540_v9 = vmul.f32 %v17137_v23, %v21704_v29  ;;  %v21706_v17 = vld [vmem:[#allocation117_spill] sm:$0xff]  ;;  %v21708_v62 = vld [vmem:[#allocation179_spill] sm:$0xff]  ;;  %v17552_v51 = vmul.f32 %v17137_v23, %v21710_v53 }
 0x66f   :  { %21701 = vst [vmem:[#allocation136_spill] sm:$0xff] %v17532_v34  ;;  %21703 = vst [vmem:[#allocation135_spill] sm:$0xff] %v17536_v22  ;;  %v17544_v11 = vmul.f32 %v17148_v63, %v21706_v17  ;;  %v17548_v37 = vmul.f32 %v17144_v12, %v21708_v62  ;;  %v21712_v34 = vld [vmem:[#allocation181_spill] sm:$0xff]  ;;  %v21714_v22 = vld [vmem:[#allocation182_spill] sm:$0xff] }
 0x670   :  { %21705 = vst [vmem:[#allocation163_spill] sm:$0xff] %v17540_v9  ;;  %21711 = vst [vmem:[#allocation71_spill] sm:$0xff] %v17552_v51  ;;  %v17556_v21 = vmul.f32 %v17148_v63, %v21712_v34  ;;  %v17560_v29 = vmul.f32 %v17144_v12, %v21714_v22  ;;  %v21716_v9 = vld [vmem:[#allocation92_spill] sm:$0xff]  ;;  %v21722_v51 = vld [vmem:[#allocation147_spill] sm:$0xff] }
 0x671   :  { %21707 = vst [vmem:[#allocation196_spill] sm:$0xff] %v17544_v11  ;;  %21709 = vst [vmem:[#allocation198_spill] sm:$0xff] %v17548_v37  ;;  %v17564_v17 = vmul.f32 %v17176_v38, %v21716_v9  ;;  %v21718_v11 = vld [vmem:[#allocation183_spill] sm:$0xff]  ;;  %v21720_v37 = vld [vmem:[#allocation184_spill] sm:$0xff]  ;;  %v17576_v34 = vmul.f32 %v17144_v12, %v21722_v51 }
 0x672   :  { %21713 = vst [vmem:[#allocation139_spill] sm:$0xff] %v17556_v21  ;;  %21715 = vst [vmem:[#allocation143_spill] sm:$0xff] %v17560_v29  ;;  %v17568_v62 = vmul.f32 %v17137_v23, %v21718_v11  ;;  %v17572_v53 = vmul.f32 %v17148_v63, %v21720_v37  ;;  %v21724_v21 = vld [vmem:[#allocation108_spill] sm:$0xff]  ;;  %v21726_v29 = vld [vmem:[#allocation103_spill] sm:$0xff] }
 0x673   :  { %21717 = vst [vmem:[#allocation197_spill] sm:$0xff] %v17564_v17  ;;  %21723 = vst [vmem:[#allocation68_spill] sm:$0xff] %v17576_v34  ;;  %v17580_v22 = vmul.f32 %v17137_v23, %v21724_v21  ;;  %v17584_v9 = vmul.f32 %v17148_v63, %v21726_v29  ;;  %v21728_v17 = vld [vmem:[#allocation40_spill] sm:$0xff]  ;;  %v21734_v34 = vld [vmem:[#allocation114_spill] sm:$0xff] }
 0x674   :  { %21719 = vst [vmem:[#allocation199_spill] sm:$0xff] %v17568_v62  ;;  %21721 = vst [vmem:[#allocation165_spill] sm:$0xff] %v17572_v53  ;;  %v17588_v11 = vmul.f32 %v17144_v12, %v21728_v17  ;;  %v21730_v62 = vld [vmem:[#allocation152_spill] sm:$0xff]  ;;  %v21732_v53 = vld [vmem:[#allocation121_spill] sm:$0xff]  ;;  %v17600_v21 = vmul.f32 %v17148_v63, %v21734_v34 }
 0x675   :  { %21725 = vst [vmem:[#allocation142_spill] sm:$0xff] %v17580_v22  ;;  %21727 = vst [vmem:[#allocation164_spill] sm:$0xff] %v17584_v9  ;;  %v17592_v37 = vmul.f32 %v17176_v38, %v21730_v62  ;;  %v17596_v51 = vmul.f32 %v17137_v23, %v21732_v53  ;;  %v21736_v22 = vld [vmem:[#allocation185_spill] sm:$0xff]  ;;  %v21738_v9 = vld [vmem:[#allocation186_spill] sm:$0xff] }
 0x676   :  { %21729 = vst [vmem:[#allocation145_spill] sm:$0xff] %v17588_v11  ;;  %21735 = vst [vmem:[#allocation10_spill] sm:$0xff] %v17600_v21  ;;  %v17604_v29 = vmul.f32 %v17144_v12, %v21736_v22  ;;  %v17608_v17 = vmul.f32 %v17137_v23, %v21738_v9  ;;  %v21740_v11 = vld [vmem:[#allocation146_spill] sm:$0xff]  ;;  %v21746_v21 = vld [vmem:[#allocation91_spill] sm:$0xff] }
 0x677   :  { %21731 = vst [vmem:[#allocation166_spill] sm:$0xff] %v17592_v37  ;;  %21733 = vst [vmem:[#allocation144_spill] sm:$0xff] %v17596_v51  ;;  %v17612_v62 = vmul.f32 %v17148_v63, %v21740_v11  ;;  %v21742_v37 = vld [vmem:[#allocation154_spill] sm:$0xff]  ;;  %v21744_v51 = vld [vmem:[#allocation43_spill] sm:$0xff]  ;;  %v17624_v22 = vmul.f32 %v17137_v23, %v21746_v21 }
 0x678   :  { %21737 = vst [vmem:[#allocation19_spill] sm:$0xff] %v17604_v29  ;;  %21739 = vst [vmem:[#allocation17_spill] sm:$0xff] %v17608_v17  ;;  %v17616_v53 = vmul.f32 %v17144_v12, %v21742_v37  ;;  %v17620_v34 = vmul.f32 %v17176_v38, %v21744_v51  ;;  %v21748_v29 = vld [vmem:[#allocation42_spill] sm:$0xff]  ;;  %v21750_v17 = vld [vmem:[#allocation187_spill] sm:$0xff] }
 0x679   :  { %21741 = vst [vmem:[#allocation72_spill] sm:$0xff] %v17612_v62  ;;  %21747 = vst [vmem:[#allocation15_spill] sm:$0xff] %v17624_v22  ;;  %v17628_v9 = vmul.f32 %v17148_v63, %v21748_v29  ;;  %v17632_v11 = vmul.f32 %v17144_v12, %v21750_v17  ;;  %v21752_v62 = vld [vmem:[#allocation188_spill] sm:$0xff]  ;;  %v21758_v22 = vld [vmem:[#allocation107_spill] sm:$0xff] }
 0x67a   :  { %21743 = vst [vmem:[#allocation65_spill] sm:$0xff] %v17616_v53  ;;  %21745 = vst [vmem:[#allocation14_spill] sm:$0xff] %v17620_v34  ;;  %v17636_v37 = vmul.f32 %v17137_v23, %v21752_v62  ;;  %v21754_v53 = vld [vmem:[#allocation95_spill] sm:$0xff]  ;;  %v21756_v34 = vld [vmem:[#allocation118_spill] sm:$0xff]  ;;  %v17648_v29 = vmul.f32 %v17176_v38, %v21758_v22 }
 0x67b   :  { %21749 = vst [vmem:[#allocation57_spill] sm:$0xff] %v17628_v9  ;;  %21751 = vst [vmem:[#allocation62_spill] sm:$0xff] %v17632_v11  ;;  %v17640_v51 = vmul.f32 %v17148_v63, %v21754_v53  ;;  %v17644_v21 = vmul.f32 %v17144_v12, %v21756_v34  ;;  %v21760_v9 = vld [vmem:[#allocation45_spill] sm:$0xff]  ;;  %v21762_v11 = vld [vmem:[#allocation148_spill] sm:$0xff] }
 0x67c   :  { %21753 = vst [vmem:[#allocation16_spill] sm:$0xff] %v17636_v37  ;;  %21759 = vst [vmem:[#allocation18_spill] sm:$0xff] %v17648_v29  ;;  %v17652_v17 = vmul.f32 %v17137_v23, %v21760_v9  ;;  %v17656_v62 = vmul.f32 %v17148_v63, %v21762_v11  ;;  %v21764_v37 = vld [vmem:[#allocation112_spill] sm:$0xff]  ;;  %v21770_v29 = vld [vmem:[#allocation6_spill] sm:$0xff] }
 0x67d   :  { %21755 = vst [vmem:[#allocation58_spill] sm:$0xff] %v17640_v51  ;;  %21757 = vst [vmem:[#allocation21_spill] sm:$0xff] %v17644_v21  ;;  %v17660_v53 = vmul.f32 %v17144_v12, %v21764_v37  ;;  %v21766_v51 = vld [vmem:[#allocation125_spill] sm:$0xff]  ;;  %v21768_v21 = vld [vmem:[#allocation122_spill] sm:$0xff]  ;;  %v17672_v9 = vmul.f32 %v17144_v12, %v21770_v29 }
 0x67e   :  { %21761 = vst [vmem:[#allocation61_spill] sm:$0xff] %v17652_v17  ;;  %21763 = vst [vmem:[#allocation66_spill] sm:$0xff] %v17656_v62  ;;  %v17664_v34 = vmul.f32 %v17137_v23, %v21766_v51  ;;  %v17668_v22 = vmul.f32 %v17148_v63, %v21768_v21  ;;  %v21772_v17 = vld [vmem:[#allocation44_spill] sm:$0xff]  ;;  %v21774_v62 = vld [vmem:[#allocation155_spill] sm:$0xff] }
 0x67f   :  { %21765 = vst [vmem:[#allocation29_spill] sm:$0xff] %v17660_v53  ;;  %21771 = vst [vmem:[#allocation31_spill] sm:$0xff] %v17672_v9  ;;  %v17676_v11 = vmul.f32 %v17176_v38, %v21772_v17  ;;  %v17680_v37 = vmul.f32 %v17137_v23, %v21774_v62  ;;  %v21776_v53 = vld [vmem:[#allocation47_spill] sm:$0xff] }
 0x680   :  { %21767 = vst [vmem:[#allocation70_spill] sm:$0xff] %v17664_v34  ;;  %21769 = vst [vmem:[#allocation167_spill] sm:$0xff] %v17668_v22  ;;  %v17684_v51 = vmul.f32 %v17148_v63, %v21776_v53  ;;  %v21778_v34 = vld [vmem:[#allocation129_spill] sm:$0xff]  ;;  %v21780_v22 = vld [vmem:[#allocation60_spill] sm:$0xff] }
 0x681   :  { %21773 = vst [vmem:[#allocation28_spill] sm:$0xff] %v17676_v11  ;;  %21775 = vst [vmem:[#allocation30_spill] sm:$0xff] %v17680_v37  ;;  %v17688_v21 = vmul.f32 %v17144_v12, %v21778_v34  ;;  %v17692_v29 = vmul.f32 %v17137_v23, %v21780_v22  ;;  %v21782_v9 = vld [vmem:[#allocation111_spill] sm:$0xff]  ;;  %v21784_v11 = vld [vmem:[#allocation94_spill] sm:$0xff] }
 0x682   :  { %21777 = vst [vmem:[#allocation73_spill] sm:$0xff] %v17684_v51  ;;  %v17696_v17 = vmul.f32 %v17148_v63, %v21782_v9  ;;  %v17700_v62 = vmul.f32 %v17144_v12, %v21784_v11  ;;  %v21786_v37 = vld [vmem:[#allocation46_spill] sm:$0xff] }
 0x683   :  { %21779 = vst [vmem:[#allocation168_spill] sm:$0xff] %v17688_v21  ;;  %21781 = vst [vmem:[#allocation74_spill] sm:$0xff] %v17692_v29  ;;  %v17704_v53 = vmul.f32 %v17176_v38, %v21786_v37  ;;  %v21788_v51 = vld [vmem:[#allocation126_spill] sm:$0xff]  ;;  %v21790_v21 = vld [vmem:[#allocation4_spill] sm:$0xff] }
 0x684   :  { %21783 = vst [vmem:[#allocation23_spill] sm:$0xff] %v17696_v17  ;;  %21785 = vst [vmem:[#allocation69_spill] sm:$0xff] %v17700_v62  ;;  %v17708_v34 = vmul.f32 %v17137_v23, %v21788_v51  ;;  %v17712_v22 = vmul.f32 %v17148_v63, %v21790_v21  ;;  %v21792_v29 = vld [vmem:[#allocation133_spill] sm:$0xff]  ;;  %v21796_v62 = vld [vmem:[#allocation48_spill] sm:$0xff] }
 0x685   :  { %21787 = vst [vmem:[#allocation20_spill] sm:$0xff] %v17704_v53  ;;  %v17716_v9 = vmul.f32 %v17144_v12, %v21792_v29  ;;  %v21794_v17 = vld [vmem:[#allocation49_spill] sm:$0xff]  ;;  %v17724_v37 = vmul.f32 %v17148_v63, %v21796_v62 }
 0x686   :  { %21789 = vst [vmem:[#allocation76_spill] sm:$0xff] %v17708_v34  ;;  %21791 = vst [vmem:[#allocation75_spill] sm:$0xff] %v17712_v22  ;;  %v17720_v11 = vmul.f32 %v17137_v23, %v21794_v17  ;;  %v21798_v53 = vld [vmem:[#allocation97_spill] sm:$0xff]  ;;  %v21800_v34 = vld [vmem:[#allocation116_spill] sm:$0xff] }
 0x687   :  { %21793 = vst [vmem:[#allocation33_spill] sm:$0xff] %v17716_v9  ;;  %21797 = vst [vmem:[#allocation78_spill] sm:$0xff] %v17724_v37  ;;  %v17728_v51 = vmul.f32 %v17144_v12, %v21798_v53  ;;  %v17732_v21 = vmul.f32 %v17176_v38, %v21800_v34  ;;  %v21802_v22 = vld [vmem:[#allocation149_spill] sm:$0xff]  ;;  %v21804_v9 = vld [vmem:[#allocation130_spill] sm:$0xff] }
 0x688   :  { %21795 = vst [vmem:[#allocation83_spill] sm:$0xff] %v17720_v11  ;;  %v17736_v29 = vmul.f32 %v17137_v23, %v21802_v22  ;;  %v17740_v17 = vmul.f32 %v17148_v63, %v21804_v9  ;;  %v21806_v11 = vld [vmem:[#allocation96_spill] sm:$0xff]  ;;  %v21808_v37 = vld [vmem:[#allocation9_spill] sm:$0xff] }
 0x689   :  { %21799 = vst [vmem:[#allocation22_spill] sm:$0xff] %v17728_v51  ;;  %21801 = vst [vmem:[#allocation77_spill] sm:$0xff] %v17732_v21  ;;  %v17744_v62 = vmul.f32 %v17144_v12, %v21806_v11  ;;  %v17748_v53 = vmul.f32 %v17137_v23, %v21808_v37  ;;  %v21810_v51 = vld [vmem:[#allocation156_spill] sm:$0xff] }
 0x68a   :  { %21803 = vst [vmem:[#allocation89_spill] sm:$0xff] %v17736_v29  ;;  %21805 = vst [vmem:[#allocation32_spill] sm:$0xff] %v17740_v17  ;;  %v17752_v34 = vmul.f32 %v17148_v63, %v21810_v51  ;;  %v21812_v21 = vld [vmem:[#allocation56_spill] sm:$0xff]  ;;  %v21814_v29 = vld [vmem:[#allocation137_spill] sm:$0xff] }
 0x68b   :  { %21807 = vst [vmem:[#allocation169_spill] sm:$0xff] %v17744_v62  ;;  %21809 = vst [vmem:[#allocation25_spill] sm:$0xff] %v17748_v53  ;;  %v17756_v22 = vmul.f32 %v17144_v12, %v21812_v21  ;;  %v17760_v9 = vmul.f32 %v17176_v38, %v21814_v29  ;;  %v21816_v17 = vld [vmem:[#allocation120_spill] sm:$0xff]  ;;  %v21818_v62 = vld [vmem:[#allocation115_spill] sm:$0xff] }
 0x68c   :  { %21811 = vst [vmem:[#allocation12_spill] sm:$0xff] %v17752_v34  ;;  %v17764_v11 = vmul.f32 %v17137_v23, %v21816_v17  ;;  %v17768_v37 = vmul.f32 %v17148_v63, %v21818_v62  ;;  %v21820_v53 = vld [vmem:[#allocation189_spill] sm:$0xff]  ;;  %v21821_v34 = vld [vmem:[#allocation190_spill] sm:$0xff] }
 0x68d   :  { %21813 = vst [vmem:[#allocation80_spill] sm:$0xff] %v17756_v22  ;;  %21815 = vst [vmem:[#allocation82_spill] sm:$0xff] %v17760_v9  ;;  %v17772_v51 = vmul.f32 %v17144_v12, %v21820_v53  ;;  %v17776_v21 = vmul.f32 %v17137_v23, %v21821_v34  ;;  %v21823_v22 = vld [vmem:[#allocation191_spill] sm:$0xff]  ;;  %v17796_v34 = vmul.f32 %v17148_v63, %v21475_v33 }
 0x68e   :  { %21817 = vst [vmem:[#allocation79_spill] sm:$0xff] %v17764_v11  ;;  %21819 = vst [vmem:[#allocation35_spill] sm:$0xff] %v17768_v37  ;;  %v17780_v29 = vmul.f32 %v17148_v63, %v21823_v22  ;;  %v21825_v9 = vld [vmem:[#allocation51_spill] sm:$0xff]  ;;  %v21826_v11 = vld [vmem:[#allocation157_spill] sm:$0xff] }
 0x68f   :  { %21822 = vst [vmem:[#allocation170_spill] sm:$0xff] %v17776_v21  ;;  %v17784_v17 = vmul.f32 %v17144_v12, %v21825_v9  ;;  %v17788_v62 = vmul.f32 %v17176_v38, %v21826_v11  ;;  %v21827_v37 = vld [vmem:[#allocation192_spill] sm:$0xff]  ;;  %v21829_v21 = vld [vmem:[#allocation50_spill] sm:$0xff]  ;;  %v17808_v11 = vmul.f32 %v17148_v63, %v21481_v48  ;;  %v17828_v48 = vmul.f32 %v17144_v12, %v21490_v3 }
 0x690   :  { %21824 = vst [vmem:[#allocation171_spill] sm:$0xff] %v17780_v29  ;;  %v17792_v53 = vmul.f32 %v17137_v23, %v21827_v37  ;;  %v17800_v22 = vmul.f32 %v17144_v12, %v21829_v21  ;;  %v21830_v29 = vld [vmem:[#allocation194_spill] sm:$0xff]  ;;  %v17812_v37 = vmul.f32 %v17144_v12, %v21485_v14  ;;  %v17820_v21 = vmul.f32 %v17137_v23, %v21488_v8 }
 0x691   :  { %v17804_v9 = vmul.f32 %v17137_v23, %v21830_v29  ;;  %v17824_v29 = vmul.f32 %v17148_v63, %v21489_v0  ;;  %21835 = vst [vmem:[#allocation86_spill] sm:$0xff] %v17828_v48  ;;  %v17832_v14 = vmul.f32 %v17137_v23, %v21492_v60  ;;  %v21839_v48 = vld [vmem:[#allocation128_spill] sm:$0xff] }
 0x692   :  { %21828 = vst [vmem:[#allocation55_spill] sm:$0xff] %v17792_v53  ;;  %v21831_v53 = vld [vmem:[#allocation53_spill] sm:$0xff]  ;;  %21833 = vst [vmem:[#allocation105_spill] sm:$0xff] %v17820_v21  ;;  %v21837_v21 = vld [vmem:[#allocation138_spill] sm:$0xff]  ;;  %v17852_v60 = vmul.f32 %v17148_v63, %v21839_v48  ;;  %v17872_v48 = vmul.f32 %v17176_v38, %v21509_v50  ;;  %v17892_v50 = vmul.f32 %v17148_v63, %v21515_v45 }
 0x693   :  { %v17816_v33 = vmul.f32 %v17176_v38, %v21831_v53  ;;  %21834 = vst [vmem:[#allocation99_spill] sm:$0xff] %v17824_v29  ;;  %v17836_v53 = vmul.f32 %v17148_v63, %v21493_v28  ;;  %v17844_v0 = vmul.f32 %v17176_v38, %v21837_v21  ;;  %v21838_v29 = vld [vmem:[#allocation158_spill] sm:$0xff]  ;;  %v17856_v28 = vmul.f32 %v17144_v12, %v21503_v10 }
 0x694   :  { %v17848_v3 = vmul.f32 %v17137_v23, %v21838_v29  ;;  %v17864_v21 = vmul.f32 %v17148_v63, %v21506_v26  ;;  %v17868_v29 = vmul.f32 %v17144_v12, %v21508_v54  ;;  %v17876_v10 = vmul.f32 %v17137_v23, %v21510_v52 }
 0x695   :  { %21832 = vst [vmem:[#allocation24_spill] sm:$0xff] %v17816_v33  ;;  %v21836_v33 = vld [vmem:[#allocation119_spill] sm:$0xff]  ;;  %v17884_v26 = vmul.f32 %v17144_v12, %v21513_v7  ;;  %v17888_v54 = vmul.f32 %v17137_v23, %v21514_v18  ;;  %v17896_v52 = vmul.f32 %v17144_v12, %v21516_v31  ;;  %v17904_v7 = vmul.f32 %v17137_v23, %v21518_v46 }
 0x696   :  { %v17840_v8 = vmul.f32 %v17144_v12, %v21836_v33  ;;  %v17860_v33 = vmul.f32 %v17137_v23, %v21505_v20  ;;  %v17880_v20 = vmul.f32 %v17148_v63, %v21512_v47  ;;  %v17900_v47 = vmul.f32 %v17176_v38, %v21517_v1 }
 0x697   :  { %v17908_v18 = vmul.f32 %v17148_v63, %v21519_v13  ;;  %v17912_v45 = vmul.f32 %v17144_v12, %v21520_v40  ;;  %v17916_v31 = vmul.f32 %v17137_v23, %v21525_v43  ;;  %v17920_v1 = vmul.f32 %v17148_v63, %v21521_v35 }
 0x698   :  { %v17924_v46 = vmul.f32 %v17144_v12, %v21522_v5  ;;  %v17928_v13 = vmul.f32 %v17176_v38, %v21523_v6  ;;  %v17932_v40 = vmul.f32 %v17137_v23, %v21526_v41  ;;  %v17936_v43 = vmul.f32 %v17148_v63, %v21524_v16 }
 0x699   :  { %v17940_v35 = vmul.f32 %v17144_v12, %v21527_v59  ;;  %v17944_v5 = vadd.f32 %v17131_v36, %v17152_v39  ;;  %v17948_v6 = vadd.f32 %v17141_v24, %v17180_v44  ;;  %v17952_v41 = vadd.f32 %v17134_v55, %v17184_v57 }
 0x69a   :  { %v17956_v16 = vadd.f32 %v17156_v56, %v17208_v19  ;;  %v17960_v59 = vadd.f32 %v17131_v36, %v17160_v58  ;;  %v17964_v23 = vadd.f32 %v17141_v24, %v17192_v61  ;;  %v17968_v12 = vadd.f32 %v17134_v55, %v17196_v42  ;;  %v21851_v42 = vld [vmem:[#allocation205_spill] sm:$0xff] }
 0x69b   :  { %v17972_v63 = vadd.f32 %v17131_v36, %v17164_v32  ;;  %v17976_v39 = vadd.f32 %v17141_v24, %v17200_v25  ;;  %v17980_v58 = vadd.f32 %v17134_v55, %v17204_v27  ;;  %v17984_v38 = vadd.f32 %v17156_v56, %v17212_v4  ;;  %v21853_v27 = vld [vmem:[#allocation214_spill] sm:$0xff]  ;;  %v21855_v19 = vld [vmem:[#allocation213_spill] sm:$0xff] }
 0x69c   :  { %21840 = vst [vmem:[#allocation172_spill] sm:$0xff] %v17960_v59  ;;  %21841 = vst [vmem:[#allocation173_spill] sm:$0xff] %v17964_v23  ;;  %v17988_v44 = vadd.f32 %v17131_v36, %v17168_v2  ;;  %v17992_v32 = vadd.f32 %v17141_v24, %v17216_v49  ;;  %v17996_v57 = vadd.f32 %v17134_v55, %v17220_v30  ;;  %v21857_v49 = vld [vmem:[#allocation208_spill] sm:$0xff] }
 0x69d   :  { %21842 = vst [vmem:[#allocation102_spill] sm:$0xff] %v17968_v12  ;;  %21843 = vst [vmem:[#allocation150_spill] sm:$0xff] %v17972_v63  ;;  %v18000_v61 = vadd.f32 %v17131_v36, %v17172_v15  ;;  %v18004_v25 = vadd.f32 %v17141_v24, %v21851_v42  ;;  %v18008_v2 = vadd.f32 %v17134_v55, %v21853_v27 }
 0x69e   :  { %21844 = vst [vmem:[#allocation27_spill] sm:$0xff] %v17976_v39  ;;  %21845 = vst [vmem:[#allocation34_spill] sm:$0xff] %v17980_v58  ;;  %v18012_v4 = vadd.f32 %v17156_v56, %v21855_v19  ;;  %v18016_v30 = vadd.f32 %v17131_v36, %v21857_v49 }
 0x69f   :  { %21846 = vst [vmem:[#allocation93_spill] sm:$0xff] %v17984_v38  ;;  %21847 = vst [vmem:[#allocation7_spill] sm:$0xff] %v17988_v44 }
 0x6a0   :  { %21848 = vst [vmem:[#allocation37_spill] sm:$0xff] %v17992_v32  ;;  %21849 = vst [vmem:[#allocation98_spill] sm:$0xff] %v17996_v57  ;;  %v21859_v57 = vld [vmem:[#allocation212_spill] sm:$0xff] }
 0x6a1   :  { %21850 = vst [vmem:[#allocation3_spill] sm:$0xff] %v18000_v61  ;;  %21852 = vst [vmem:[#allocation81_spill] sm:$0xff] %v18004_v25  ;;  %v18020_v15 = vadd.f32 %v17141_v24, %v21859_v57  ;;  %v21861_v61 = vld [vmem:[#allocation211_spill] sm:$0xff]  ;;  %v21863_v25 = vld [vmem:[#allocation216_spill] sm:$0xff] }
 0x6a2   :  { %21854 = vst [vmem:[#allocation26_spill] sm:$0xff] %v18008_v2  ;;  %21856 = vst [vmem:[#allocation5_spill] sm:$0xff] %v18012_v4  ;;  %v18024_v42 = vadd.f32 %v17134_v55, %v21861_v61  ;;  %v18028_v27 = vadd.f32 %v17131_v36, %v21863_v25  ;;  %v21865_v2 = vld [vmem:[#allocation215_spill] sm:$0xff]  ;;  %v21867_v4 = vld [vmem:[#allocation210_spill] sm:$0xff] }
 0x6a3   :  { %21858 = vst [vmem:[#allocation90_spill] sm:$0xff] %v18016_v30  ;;  %21860 = vst [vmem:[#allocation109_spill] sm:$0xff] %v18020_v15  ;;  %v18032_v19 = vadd.f32 %v17141_v24, %v21865_v2  ;;  %v18036_v49 = vadd.f32 %v17134_v55, %v21867_v4  ;;  %v21869_v30 = vld [vmem:[#allocation221_spill] sm:$0xff]  ;;  %v21871_v15 = vld [vmem:[#allocation220_spill] sm:$0xff] }
 0x6a4   :  { %21862 = vst [vmem:[#allocation36_spill] sm:$0xff] %v18024_v42  ;;  %21864 = vst [vmem:[#allocation85_spill] sm:$0xff] %v18028_v27  ;;  %v18040_v57 = vadd.f32 %v17156_v56, %v21869_v30  ;;  %v18044_v61 = vadd.f32 %v17131_v36, %v21871_v15  ;;  %v21873_v42 = vld [vmem:[#allocation219_spill] sm:$0xff]  ;;  %v21875_v27 = vld [vmem:[#allocation218_spill] sm:$0xff] }
 0x6a5   :  { %21866 = vst [vmem:[#allocation151_spill] sm:$0xff] %v18032_v19  ;;  %21868 = vst [vmem:[#allocation101_spill] sm:$0xff] %v18036_v49  ;;  %v18048_v25 = vadd.f32 %v17141_v24, %v21873_v42  ;;  %v18052_v2 = vadd.f32 %v17134_v55, %v21875_v27  ;;  %v21877_v19 = vld [vmem:[#allocation223_spill] sm:$0xff]  ;;  %v21879_v49 = vld [vmem:[#allocation222_spill] sm:$0xff] }
 0x6a6   :  { %21870 = vst [vmem:[#allocation59_spill] sm:$0xff] %v18040_v57  ;;  %21872 = vst [vmem:[#allocation84_spill] sm:$0xff] %v18044_v61  ;;  %v18056_v4 = vadd.f32 %v17131_v36, %v21877_v19  ;;  %v18060_v30 = vadd.f32 %v17141_v24, %v21879_v49  ;;  %v21881_v57 = vld [vmem:[#allocation217_spill] sm:$0xff]  ;;  %v21883_v61 = vld [vmem:[#allocation228_spill] sm:$0xff] }
 0x6a7   :  { %21874 = vst [vmem:[#allocation113_spill] sm:$0xff] %v18048_v25  ;;  %21876 = vst [vmem:[#allocation106_spill] sm:$0xff] %v18052_v2  ;;  %v18064_v15 = vadd.f32 %v17134_v55, %v21881_v57  ;;  %v18068_v42 = vadd.f32 %v17156_v56, %v21883_v61  ;;  %v21885_v25 = vld [vmem:[#allocation227_spill] sm:$0xff]  ;;  %v21887_v2 = vld [vmem:[#allocation226_spill] sm:$0xff] }
 0x6a8   :  { %21878 = vst [vmem:[#allocation100_spill] sm:$0xff] %v18056_v4  ;;  %21880 = vst [vmem:[#allocation39_spill] sm:$0xff] %v18060_v30  ;;  %v18072_v27 = vadd.f32 %v17131_v36, %v21885_v25  ;;  %v18076_v19 = vadd.f32 %v17141_v24, %v21887_v2  ;;  %v21889_v4 = vld [vmem:[#allocation225_spill] sm:$0xff]  ;;  %v21891_v30 = vld [vmem:[#allocation230_spill] sm:$0xff] }
 0x6a9   :  { %21882 = vst [vmem:[#allocation63_spill] sm:$0xff] %v18064_v15  ;;  %21884 = vst [vmem:[#allocation88_spill] sm:$0xff] %v18068_v42  ;;  %v18080_v49 = vadd.f32 %v17134_v55, %v21889_v4  ;;  %v18084_v57 = vadd.f32 %v17131_v36, %v21891_v30  ;;  %v21893_v15 = vld [vmem:[#allocation229_spill] sm:$0xff]  ;;  %v21895_v42 = vld [vmem:[#allocation224_spill] sm:$0xff] }
 0x6aa   :  { %21886 = vst [vmem:[#allocation174_spill] sm:$0xff] %v18072_v27  ;;  %21888 = vst [vmem:[#allocation175_spill] sm:$0xff] %v18076_v19  ;;  %v18088_v61 = vadd.f32 %v17141_v24, %v21893_v15  ;;  %v18092_v25 = vadd.f32 %v17134_v55, %v21895_v42  ;;  %v21897_v27 = vld [vmem:[#allocation232_spill] sm:$0xff]  ;;  %v21899_v19 = vld [vmem:[#allocation233_spill] sm:$0xff] }
 0x6ab   :  { %21890 = vst [vmem:[#allocation176_spill] sm:$0xff] %v18080_v49  ;;  %21892 = vst [vmem:[#allocation177_spill] sm:$0xff] %v18084_v57  ;;  %v18096_v2 = vadd.f32 %v17156_v56, %v21897_v27  ;;  %v18100_v4 = vadd.f32 %v17131_v36, %v21899_v19  ;;  %v21901_v49 = vld [vmem:[#allocation231_spill] sm:$0xff]  ;;  %v21903_v57 = vld [vmem:[#allocation237_spill] sm:$0xff] }
 0x6ac   :  { %21894 = vst [vmem:[#allocation2_spill] sm:$0xff] %v18088_v61  ;;  %21896 = vst [vmem:[#allocation178_spill] sm:$0xff] %v18092_v25  ;;  %v18104_v30 = vadd.f32 %v17141_v24, %v21901_v49  ;;  %v18108_v15 = vadd.f32 %v17134_v55, %v21903_v57  ;;  %v21905_v61 = vld [vmem:[#allocation236_spill] sm:$0xff]  ;;  %v21907_v25 = vld [vmem:[#allocation235_spill] sm:$0xff] }
 0x6ad   :  { %21898 = vst [vmem:[#allocation153_spill] sm:$0xff] %v18096_v2  ;;  %21900 = vst [vmem:[#allocation38_spill] sm:$0xff] %v18100_v4  ;;  %v18112_v42 = vadd.f32 %v17131_v36, %v21905_v61  ;;  %v18116_v27 = vadd.f32 %v17141_v24, %v21907_v25  ;;  %v21909_v2 = vld [vmem:[#allocation239_spill] sm:$0xff]  ;;  %v21911_v4 = vld [vmem:[#allocation238_spill] sm:$0xff] }
 0x6ae   :  { %21902 = vst [vmem:[#allocation110_spill] sm:$0xff] %v18104_v30  ;;  %21904 = vst [vmem:[#allocation104_spill] sm:$0xff] %v18108_v15  ;;  %v18120_v19 = vadd.f32 %v17134_v55, %v21909_v2  ;;  %v18124_v49 = vadd.f32 %v17156_v56, %v21911_v4  ;;  %v21913_v30 = vld [vmem:[#allocation234_spill] sm:$0xff]  ;;  %v21915_v15 = vld [vmem:[#allocation241_spill] sm:$0xff] }
 0x6af   :  { %21906 = vst [vmem:[#allocation54_spill] sm:$0xff] %v18112_v42  ;;  %21908 = vst [vmem:[#allocation87_spill] sm:$0xff] %v18116_v27  ;;  %v18128_v57 = vadd.f32 %v17131_v36, %v21913_v30  ;;  %v18132_v61 = vadd.f32 %v17141_v24, %v21915_v15  ;;  %v21917_v42 = vld [vmem:[#allocation242_spill] sm:$0xff]  ;;  %v21919_v27 = vld [vmem:[#allocation240_spill] sm:$0xff] }
 0x6b0   :  { %21910 = vst [vmem:[#allocation41_spill] sm:$0xff] %v18120_v19  ;;  %21912 = vst [vmem:[#allocation117_spill] sm:$0xff] %v18124_v49  ;;  %v18136_v25 = vadd.f32 %v17134_v55, %v21917_v42  ;;  %v18140_v2 = vadd.f32 %v17131_v36, %v21919_v27  ;;  %v21921_v19 = vld [vmem:[#allocation245_spill] sm:$0xff]  ;;  %v21923_v49 = vld [vmem:[#allocation244_spill] sm:$0xff] }
 0x6b1   :  { %21914 = vst [vmem:[#allocation179_spill] sm:$0xff] %v18128_v57  ;;  %21916 = vst [vmem:[#allocation180_spill] sm:$0xff] %v18132_v61  ;;  %v18144_v4 = vadd.f32 %v17141_v24, %v21921_v19  ;;  %v18148_v30 = vadd.f32 %v17134_v55, %v21923_v49  ;;  %v21925_v57 = vld [vmem:[#allocation247_spill] sm:$0xff]  ;;  %v21927_v61 = vld [vmem:[#allocation246_spill] sm:$0xff] }
 0x6b2   :  { %21918 = vst [vmem:[#allocation181_spill] sm:$0xff] %v18136_v25  ;;  %21920 = vst [vmem:[#allocation182_spill] sm:$0xff] %v18140_v2  ;;  %v18152_v15 = vadd.f32 %v17156_v56, %v21925_v57  ;;  %v18156_v42 = vadd.f32 %v17131_v36, %v21927_v61  ;;  %v21929_v25 = vld [vmem:[#allocation243_spill] sm:$0xff]  ;;  %v21931_v2 = vld [vmem:[#allocation249_spill] sm:$0xff] }
 0x6b3   :  { %21922 = vst [vmem:[#allocation92_spill] sm:$0xff] %v18144_v4  ;;  %21924 = vst [vmem:[#allocation183_spill] sm:$0xff] %v18148_v30  ;;  %v18160_v27 = vadd.f32 %v17141_v24, %v21929_v25  ;;  %v18164_v19 = vadd.f32 %v17134_v55, %v21931_v2  ;;  %v21933_v4 = vld [vmem:[#allocation250_spill] sm:$0xff]  ;;  %v21935_v30 = vld [vmem:[#allocation248_spill] sm:$0xff] }
 0x6b4   :  { %21926 = vst [vmem:[#allocation184_spill] sm:$0xff] %v18152_v15  ;;  %21928 = vst [vmem:[#allocation147_spill] sm:$0xff] %v18156_v42  ;;  %v18168_v49 = vadd.f32 %v17131_v36, %v21933_v4  ;;  %v18172_v57 = vadd.f32 %v17141_v24, %v21935_v30  ;;  %v21937_v15 = vld [vmem:[#allocation193_spill] sm:$0xff] }
 0x6b5   :  { %21930 = vst [vmem:[#allocation108_spill] sm:$0xff] %v18160_v27  ;;  %21932 = vst [vmem:[#allocation103_spill] sm:$0xff] %v18164_v19  ;;  %v18176_v61 = vadd.f32 %v17134_v55, %v21937_v15  ;;  %v21939_v42 = vld [vmem:[#allocation253_spill] sm:$0xff]  ;;  %v21941_v27 = vld [vmem:[#allocation252_spill] sm:$0xff] }
 0x6b6   :  { %21934 = vst [vmem:[#allocation40_spill] sm:$0xff] %v18168_v49  ;;  %21936 = vst [vmem:[#allocation152_spill] sm:$0xff] %v18172_v57  ;;  %v18180_v25 = vadd.f32 %v17156_v56, %v21939_v42  ;;  %v18184_v2 = vadd.f32 %v17131_v36, %v21941_v27  ;;  %v21943_v19 = vld [vmem:[#allocation251_spill] sm:$0xff]  ;;  %v21945_v49 = vld [vmem:[#allocation134_spill] sm:$0xff] }
 0x6b7   :  { %21938 = vst [vmem:[#allocation121_spill] sm:$0xff] %v18176_v61  ;;  %v18188_v4 = vadd.f32 %v17141_v24, %v21943_v19  ;;  %v18192_v30 = vadd.f32 %v17134_v55, %v21945_v49  ;;  %v21947_v57 = vld [vmem:[#allocation256_spill] sm:$0xff]  ;;  %v21949_v61 = vld [vmem:[#allocation255_spill] sm:$0xff] }
 0x6b8   :  { %21940 = vst [vmem:[#allocation114_spill] sm:$0xff] %v18180_v25  ;;  %21942 = vst [vmem:[#allocation185_spill] sm:$0xff] %v18184_v2  ;;  %v18196_v15 = vadd.f32 %v17131_v36, %v21947_v57  ;;  %v18200_v42 = vadd.f32 %v17141_v24, %v21949_v61  ;;  %v21951_v25 = vld [vmem:[#allocation257_spill] sm:$0xff] }
 0x6b9   :  { %21944 = vst [vmem:[#allocation186_spill] sm:$0xff] %v18188_v4  ;;  %21946 = vst [vmem:[#allocation146_spill] sm:$0xff] %v18192_v30  ;;  %v18204_v27 = vadd.f32 %v17134_v55, %v21951_v25  ;;  %v21953_v2 = vld [vmem:[#allocation141_spill] sm:$0xff]  ;;  %v21955_v4 = vld [vmem:[#allocation254_spill] sm:$0xff] }
 0x6ba   :  { %21948 = vst [vmem:[#allocation154_spill] sm:$0xff] %v18196_v15  ;;  %21950 = vst [vmem:[#allocation43_spill] sm:$0xff] %v18200_v42  ;;  %v18208_v19 = vadd.f32 %v17156_v56, %v21953_v2  ;;  %v18212_v49 = vadd.f32 %v17131_v36, %v21955_v4  ;;  %v21957_v30 = vld [vmem:[#allocation124_spill] sm:$0xff]  ;;  %v21959_v15 = vld [vmem:[#allocation67_spill] sm:$0xff] }
 0x6bb   :  { %21952 = vst [vmem:[#allocation91_spill] sm:$0xff] %v18204_v27  ;;  %v18216_v57 = vadd.f32 %v17141_v24, %v21957_v30  ;;  %v18220_v61 = vadd.f32 %v17134_v55, %v21959_v15  ;;  %v21961_v42 = vld [vmem:[#allocation195_spill] sm:$0xff]  ;;  %v21963_v27 = vld [vmem:[#allocation258_spill] sm:$0xff] }
 0x6bc   :  { %21954 = vst [vmem:[#allocation42_spill] sm:$0xff] %v18208_v19  ;;  %21956 = vst [vmem:[#allocation187_spill] sm:$0xff] %v18212_v49  ;;  %v18224_v25 = vadd.f32 %v17131_v36, %v21961_v42  ;;  %v18228_v2 = vadd.f32 %v17141_v24, %v21963_v27  ;;  %v21965_v19 = vld [vmem:[#allocation52_spill] sm:$0xff] }
 0x6bd   :  { %21958 = vst [vmem:[#allocation188_spill] sm:$0xff] %v18216_v57  ;;  %21960 = vst [vmem:[#allocation95_spill] sm:$0xff] %v18220_v61  ;;  %v18232_v4 = vadd.f32 %v17134_v55, %v21965_v19  ;;  %v21967_v49 = vld [vmem:[#allocation8_spill] sm:$0xff]  ;;  %v21971_v61 = vld [vmem:[#allocation201_spill] sm:$0xff] }
 0x6be   :  { %21962 = vst [vmem:[#allocation118_spill] sm:$0xff] %v18224_v25  ;;  %21964 = vst [vmem:[#allocation107_spill] sm:$0xff] %v18228_v2  ;;  %v18236_v30 = vadd.f32 %v17156_v56, %v21967_v49  ;;  %v21969_v57 = vld [vmem:[#allocation204_spill] sm:$0xff]  ;;  %v18244_v42 = vadd.f32 %v17141_v24, %v21971_v61  ;;  %v21975_v2 = vld [vmem:[#allocation203_spill] sm:$0xff] }
 0x6bf   :  { %21966 = vst [vmem:[#allocation45_spill] sm:$0xff] %v18232_v4  ;;  %v18240_v15 = vadd.f32 %v17131_v36, %v21969_v57  ;;  %v21973_v25 = vld [vmem:[#allocation200_spill] sm:$0xff]  ;;  %v18252_v19 = vadd.f32 %v17131_v36, %v21975_v2  ;;  %v21977_v4 = vld [vmem:[#allocation202_spill] sm:$0xff] }
 0x6c0   :  { %21968 = vst [vmem:[#allocation148_spill] sm:$0xff] %v18236_v30  ;;  %21972 = vst [vmem:[#allocation125_spill] sm:$0xff] %v18244_v42  ;;  %v18248_v27 = vadd.f32 %v17134_v55, %v21973_v25  ;;  %v18256_v49 = vadd.f32 %v17141_v24, %v21977_v4  ;;  %v21979_v30 = vld [vmem:[#allocation159_spill] sm:$0xff]  ;;  %v21983_v42 = vld [vmem:[#allocation160_spill] sm:$0xff] }
 0x6c1   :  { %21970 = vst [vmem:[#allocation112_spill] sm:$0xff] %v18240_v15  ;;  %21976 = vst [vmem:[#allocation6_spill] sm:$0xff] %v18252_v19  ;;  %v18260_v57 = vadd.f32 %v17134_v55, %v21979_v30  ;;  %v21981_v15 = vld [vmem:[#allocation206_spill] sm:$0xff]  ;;  %v18268_v25 = vadd.f32 %v17131_v36, %v21983_v42  ;;  %v21987_v19 = vld [vmem:[#allocation207_spill] sm:$0xff] }
 0x6c2   :  { %21974 = vst [vmem:[#allocation122_spill] sm:$0xff] %v18248_v27  ;;  %21978 = vst [vmem:[#allocation44_spill] sm:$0xff] %v18256_v49  ;;  %v18264_v61 = vadd.f32 %v17156_v56, %v21981_v15  ;;  %v21985_v27 = vld [vmem:[#allocation123_spill] sm:$0xff]  ;;  %v18276_v4 = vadd.f32 %v17134_v55, %v21987_v19  ;;  %v21989_v49 = vld [vmem:[#allocation64_spill] sm:$0xff] }
 0x6c3   :  { %21980 = vst [vmem:[#allocation155_spill] sm:$0xff] %v18260_v57  ;;  %21984 = vst [vmem:[#allocation129_spill] sm:$0xff] %v18268_v25  ;;  %v18272_v2 = vadd.f32 %v17141_v24, %v21985_v27  ;;  %v18280_v30 = vadd.f32 %v17131_v36, %v21989_v49  ;;  %v21991_v57 = vld [vmem:[#allocation127_spill] sm:$0xff]  ;;  %v21995_v25 = vld [vmem:[#allocation209_spill] sm:$0xff] }
 0x6c4   :  { %21982 = vst [vmem:[#allocation47_spill] sm:$0xff] %v18264_v61  ;;  %21988 = vst [vmem:[#allocation111_spill] sm:$0xff] %v18276_v4  ;;  %v18284_v15 = vadd.f32 %v17141_v24, %v21991_v57  ;;  %v21993_v61 = vld [vmem:[#allocation162_spill] sm:$0xff]  ;;  %v18292_v27 = vadd.f32 %v17156_v56, %v21995_v25  ;;  %v21999_v4 = vld [vmem:[#allocation140_spill] sm:$0xff] }
 0x6c5   :  { %21986 = vst [vmem:[#allocation60_spill] sm:$0xff] %v18272_v2  ;;  %21990 = vst [vmem:[#allocation94_spill] sm:$0xff] %v18280_v30  ;;  %v18288_v42 = vadd.f32 %v17134_v55, %v21993_v61  ;;  %v21997_v2 = vld [vmem:[#allocation131_spill] sm:$0xff]  ;;  %v18300_v49 = vadd.f32 %v17141_v24, %v21999_v4  ;;  %v22001_v30 = vld [vmem:[#allocation161_spill] sm:$0xff] }
 0x6c6   :  { %21992 = vst [vmem:[#allocation46_spill] sm:$0xff] %v18284_v15  ;;  %21996 = vst [vmem:[#allocation4_spill] sm:$0xff] %v18292_v27  ;;  %v18296_v19 = vadd.f32 %v17131_v36, %v21997_v2  ;;  %v18304_v57 = vadd.f32 %v17134_v55, %v22001_v30  ;;  %v22003_v15 = vld [vmem:[#allocation11_spill] sm:$0xff]  ;;  %v22007_v27 = vld [vmem:[#allocation136_spill] sm:$0xff] }
 0x6c7   :  { %21994 = vst [vmem:[#allocation126_spill] sm:$0xff] %v18288_v42  ;;  %22000 = vst [vmem:[#allocation49_spill] sm:$0xff] %v18300_v49  ;;  %v18308_v61 = vadd.f32 %v17131_v36, %v22003_v15  ;;  %v22005_v42 = vld [vmem:[#allocation132_spill] sm:$0xff]  ;;  %v18316_v2 = vadd.f32 %v17134_v55, %v22007_v27  ;;  %v22011_v49 = vld [vmem:[#allocation163_spill] sm:$0xff] }
 0x6c8   :  { %21998 = vst [vmem:[#allocation133_spill] sm:$0xff] %v18296_v19  ;;  %22002 = vst [vmem:[#allocation48_spill] sm:$0xff] %v18304_v57  ;;  %v18312_v25 = vadd.f32 %v17141_v24, %v22005_v42  ;;  %v22009_v19 = vld [vmem:[#allocation135_spill] sm:$0xff]  ;;  %v18324_v30 = vadd.f32 %v17131_v36, %v22011_v49  ;;  %v22013_v57 = vld [vmem:[#allocation196_spill] sm:$0xff] }
 0x6c9   :  { %22004 = vst [vmem:[#allocation97_spill] sm:$0xff] %v18308_v61  ;;  %22008 = vst [vmem:[#allocation149_spill] sm:$0xff] %v18316_v2  ;;  %v18320_v4 = vadd.f32 %v17156_v56, %v22009_v19  ;;  %v18328_v15 = vadd.f32 %v17141_v24, %v22013_v57  ;;  %v22015_v61 = vld [vmem:[#allocation198_spill] sm:$0xff]  ;;  %v22019_v2 = vld [vmem:[#allocation139_spill] sm:$0xff] }
 0x6ca   :  { %22006 = vst [vmem:[#allocation116_spill] sm:$0xff] %v18312_v25  ;;  %22012 = vst [vmem:[#allocation96_spill] sm:$0xff] %v18324_v30  ;;  %v18332_v42 = vadd.f32 %v17134_v55, %v22015_v61  ;;  %v22017_v25 = vld [vmem:[#allocation71_spill] sm:$0xff]  ;;  %v18340_v19 = vadd.f32 %v17141_v24, %v22019_v2  ;;  %v22023_v30 = vld [vmem:[#allocation197_spill] sm:$0xff] }
 0x6cb   :  { %22010 = vst [vmem:[#allocation130_spill] sm:$0xff] %v18320_v4  ;;  %22014 = vst [vmem:[#allocation9_spill] sm:$0xff] %v18328_v15  ;;  %v18336_v27 = vadd.f32 %v17131_v36, %v22017_v25  ;;  %v22021_v4 = vld [vmem:[#allocation143_spill] sm:$0xff]  ;;  %v18348_v57 = vadd.f32 %v17156_v56, %v22023_v30 }
 0x6cc   :  { %22016 = vst [vmem:[#allocation156_spill] sm:$0xff] %v18332_v42  ;;  %22020 = vst [vmem:[#allocation137_spill] sm:$0xff] %v18340_v19  ;;  %v18344_v49 = vadd.f32 %v17134_v55, %v22021_v4  ;;  %v22025_v15 = vld [vmem:[#allocation199_spill] sm:$0xff]  ;;  %v22027_v42 = vld [vmem:[#allocation165_spill] sm:$0xff] }
 0x6cd   :  { %22018 = vst [vmem:[#allocation56_spill] sm:$0xff] %v18336_v27  ;;  %22024 = vst [vmem:[#allocation115_spill] sm:$0xff] %v18348_v57  ;;  %v18352_v61 = vadd.f32 %v17131_v36, %v22025_v15  ;;  %v18356_v25 = vadd.f32 %v17141_v24, %v22027_v42  ;;  %v22029_v27 = vld [vmem:[#allocation68_spill] sm:$0xff]  ;;  %v22031_v19 = vld [vmem:[#allocation142_spill] sm:$0xff] }
 0x6ce   :  { %22022 = vst [vmem:[#allocation120_spill] sm:$0xff] %v18344_v49  ;;  %v18360_v2 = vadd.f32 %v17134_v55, %v22029_v27  ;;  %v18364_v4 = vadd.f32 %v17131_v36, %v22031_v19  ;;  %v22033_v49 = vld [vmem:[#allocation164_spill] sm:$0xff]  ;;  %v22035_v57 = vld [vmem:[#allocation145_spill] sm:$0xff] }
 0x6cf   :  { %22026 = vst [vmem:[#allocation189_spill] sm:$0xff] %v18352_v61  ;;  %22028 = vst [vmem:[#allocation190_spill] sm:$0xff] %v18356_v25  ;;  %v18368_v30 = vadd.f32 %v17141_v24, %v22033_v49  ;;  %v18372_v15 = vadd.f32 %v17134_v55, %v22035_v57  ;;  %v22037_v61 = vld [vmem:[#allocation166_spill] sm:$0xff]  ;;  %v22039_v25 = vld [vmem:[#allocation144_spill] sm:$0xff] }
 0x6d0   :  { %22030 = vst [vmem:[#allocation191_spill] sm:$0xff] %v18360_v2  ;;  %22032 = vst [vmem:[#allocation51_spill] sm:$0xff] %v18364_v4  ;;  %v18376_v42 = vadd.f32 %v17156_v56, %v22037_v61  ;;  %v18380_v27 = vadd.f32 %v17131_v36, %v22039_v25  ;;  %v22041_v2 = vld [vmem:[#allocation10_spill] sm:$0xff]  ;;  %v22043_v4 = vld [vmem:[#allocation19_spill] sm:$0xff] }
 0x6d1   :  { %22034 = vst [vmem:[#allocation157_spill] sm:$0xff] %v18368_v30  ;;  %22036 = vst [vmem:[#allocation192_spill] sm:$0xff] %v18372_v15  ;;  %v18384_v19 = vadd.f32 %v17141_v24, %v22041_v2  ;;  %v18388_v49 = vadd.f32 %v17134_v55, %v22043_v4  ;;  %v22045_v30 = vld [vmem:[#allocation17_spill] sm:$0xff]  ;;  %v22047_v15 = vld [vmem:[#allocation72_spill] sm:$0xff] }
 0x6d2   :  { %22038 = vst [vmem:[#allocation50_spill] sm:$0xff] %v18376_v42  ;;  %22040 = vst [vmem:[#allocation194_spill] sm:$0xff] %v18380_v27  ;;  %v18392_v57 = vadd.f32 %v17131_v36, %v22045_v30  ;;  %v18396_v61 = vadd.f32 %v17141_v24, %v22047_v15  ;;  %v22049_v42 = vld [vmem:[#allocation65_spill] sm:$0xff]  ;;  %v22051_v27 = vld [vmem:[#allocation14_spill] sm:$0xff] }
 0x6d3   :  { %22042 = vst [vmem:[#allocation53_spill] sm:$0xff] %v18384_v19  ;;  %22044 = vst [vmem:[#allocation119_spill] sm:$0xff] %v18388_v49  ;;  %v18400_v25 = vadd.f32 %v17134_v55, %v22049_v42  ;;  %v18404_v2 = vadd.f32 %v17156_v56, %v22051_v27  ;;  %v22053_v19 = vld [vmem:[#allocation15_spill] sm:$0xff]  ;;  %v22055_v49 = vld [vmem:[#allocation57_spill] sm:$0xff] }
 0x6d4   :  { %22046 = vst [vmem:[#allocation138_spill] sm:$0xff] %v18392_v57  ;;  %22048 = vst [vmem:[#allocation158_spill] sm:$0xff] %v18396_v61  ;;  %v18408_v4 = vadd.f32 %v17131_v36, %v22053_v19  ;;  %v18412_v30 = vadd.f32 %v17141_v24, %v22055_v49  ;;  %v22057_v57 = vld [vmem:[#allocation62_spill] sm:$0xff]  ;;  %v22059_v61 = vld [vmem:[#allocation16_spill] sm:$0xff] }
 0x6d5   :  { %22050 = vst [vmem:[#allocation128_spill] sm:$0xff] %v18400_v25  ;;  %22052 = vst [vmem:[#allocation205_spill] sm:$0xff] %v18404_v2  ;;  %v18416_v15 = vadd.f32 %v17134_v55, %v22057_v57  ;;  %v18420_v42 = vadd.f32 %v17131_v36, %v22059_v61  ;;  %v22061_v25 = vld [vmem:[#allocation58_spill] sm:$0xff]  ;;  %v22063_v2 = vld [vmem:[#allocation21_spill] sm:$0xff] }
 0x6d6   :  { %22054 = vst [vmem:[#allocation214_spill] sm:$0xff] %v18408_v4  ;;  %22056 = vst [vmem:[#allocation213_spill] sm:$0xff] %v18412_v30  ;;  %v18424_v27 = vadd.f32 %v17141_v24, %v22061_v25  ;;  %v18428_v19 = vadd.f32 %v17134_v55, %v22063_v2  ;;  %v22065_v4 = vld [vmem:[#allocation18_spill] sm:$0xff]  ;;  %v22067_v30 = vld [vmem:[#allocation61_spill] sm:$0xff] }
 0x6d7   :  { %22058 = vst [vmem:[#allocation208_spill] sm:$0xff] %v18416_v15  ;;  %22060 = vst [vmem:[#allocation212_spill] sm:$0xff] %v18420_v42  ;;  %v18432_v49 = vadd.f32 %v17156_v56, %v22065_v4  ;;  %v18436_v57 = vadd.f32 %v17131_v36, %v22067_v30  ;;  %v22069_v15 = vld [vmem:[#allocation66_spill] sm:$0xff]  ;;  %v22071_v42 = vld [vmem:[#allocation29_spill] sm:$0xff] }
 0x6d8   :  { %22062 = vst [vmem:[#allocation211_spill] sm:$0xff] %v18424_v27  ;;  %22064 = vst [vmem:[#allocation216_spill] sm:$0xff] %v18428_v19  ;;  %v18440_v61 = vadd.f32 %v17141_v24, %v22069_v15  ;;  %v18444_v25 = vadd.f32 %v17134_v55, %v22071_v42  ;;  %v22073_v27 = vld [vmem:[#allocation70_spill] sm:$0xff]  ;;  %v22075_v19 = vld [vmem:[#allocation167_spill] sm:$0xff] }
 0x6d9   :  { %22066 = vst [vmem:[#allocation215_spill] sm:$0xff] %v18432_v49  ;;  %22068 = vst [vmem:[#allocation210_spill] sm:$0xff] %v18436_v57  ;;  %v18448_v2 = vadd.f32 %v17131_v36, %v22073_v27  ;;  %v18452_v4 = vadd.f32 %v17141_v24, %v22075_v19  ;;  %v22077_v49 = vld [vmem:[#allocation31_spill] sm:$0xff]  ;;  %v22079_v57 = vld [vmem:[#allocation28_spill] sm:$0xff] }
 0x6da   :  { %22070 = vst [vmem:[#allocation221_spill] sm:$0xff] %v18440_v61  ;;  %22072 = vst [vmem:[#allocation220_spill] sm:$0xff] %v18444_v25  ;;  %v18456_v30 = vadd.f32 %v17134_v55, %v22077_v49  ;;  %v18460_v15 = vadd.f32 %v17156_v56, %v22079_v57  ;;  %v22081_v61 = vld [vmem:[#allocation30_spill] sm:$0xff]  ;;  %v22083_v25 = vld [vmem:[#allocation73_spill] sm:$0xff] }
 0x6db   :  { %22074 = vst [vmem:[#allocation219_spill] sm:$0xff] %v18448_v2  ;;  %22076 = vst [vmem:[#allocation218_spill] sm:$0xff] %v18452_v4  ;;  %v18464_v42 = vadd.f32 %v17131_v36, %v22081_v61  ;;  %v18468_v27 = vadd.f32 %v17141_v24, %v22083_v25  ;;  %v22085_v2 = vld [vmem:[#allocation168_spill] sm:$0xff]  ;;  %v22087_v4 = vld [vmem:[#allocation74_spill] sm:$0xff] }
 0x6dc   :  { %22078 = vst [vmem:[#allocation223_spill] sm:$0xff] %v18456_v30  ;;  %22080 = vst [vmem:[#allocation222_spill] sm:$0xff] %v18460_v15  ;;  %v18472_v19 = vadd.f32 %v17134_v55, %v22085_v2  ;;  %v18476_v49 = vadd.f32 %v17131_v36, %v22087_v4  ;;  %v22089_v30 = vld [vmem:[#allocation23_spill] sm:$0xff]  ;;  %v22091_v15 = vld [vmem:[#allocation69_spill] sm:$0xff] }
 0x6dd   :  { %22082 = vst [vmem:[#allocation217_spill] sm:$0xff] %v18464_v42  ;;  %22084 = vst [vmem:[#allocation228_spill] sm:$0xff] %v18468_v27  ;;  %v18480_v57 = vadd.f32 %v17141_v24, %v22089_v30  ;;  %v18484_v61 = vadd.f32 %v17134_v55, %v22091_v15  ;;  %v22093_v42 = vld [vmem:[#allocation20_spill] sm:$0xff] }
 0x6de   :  { %22086 = vst [vmem:[#allocation227_spill] sm:$0xff] %v18472_v19  ;;  %22088 = vst [vmem:[#allocation226_spill] sm:$0xff] %v18476_v49  ;;  %v18488_v25 = vadd.f32 %v17156_v56, %v22093_v42  ;;  %v22095_v27 = vld [vmem:[#allocation76_spill] sm:$0xff]  ;;  %v22097_v19 = vld [vmem:[#allocation75_spill] sm:$0xff] }
 0x6df   :  { %22090 = vst [vmem:[#allocation225_spill] sm:$0xff] %v18480_v57  ;;  %22092 = vst [vmem:[#allocation230_spill] sm:$0xff] %v18484_v61  ;;  %v18492_v2 = vadd.f32 %v17131_v36, %v22095_v27  ;;  %v18496_v4 = vadd.f32 %v17141_v24, %v22097_v19  ;;  %v22099_v49 = vld [vmem:[#allocation33_spill] sm:$0xff]  ;;  %v22101_v57 = vld [vmem:[#allocation83_spill] sm:$0xff] }
 0x6e0   :  { %22094 = vst [vmem:[#allocation229_spill] sm:$0xff] %v18488_v25  ;;  %v18500_v30 = vadd.f32 %v17134_v55, %v22099_v49  ;;  %v18504_v15 = vadd.f32 %v17131_v36, %v22101_v57  ;;  %v22103_v61 = vld [vmem:[#allocation78_spill] sm:$0xff] }
 0x6e1   :  { %22096 = vst [vmem:[#allocation224_spill] sm:$0xff] %v18492_v2  ;;  %22098 = vst [vmem:[#allocation232_spill] sm:$0xff] %v18496_v4  ;;  %v18508_v42 = vadd.f32 %v17141_v24, %v22103_v61  ;;  %v22105_v25 = vld [vmem:[#allocation22_spill] sm:$0xff]  ;;  %v22107_v2 = vld [vmem:[#allocation77_spill] sm:$0xff] }
 0x6e2   :  { %22100 = vst [vmem:[#allocation233_spill] sm:$0xff] %v18500_v30  ;;  %22102 = vst [vmem:[#allocation231_spill] sm:$0xff] %v18504_v15  ;;  %v18512_v27 = vadd.f32 %v17134_v55, %v22105_v25  ;;  %v18516_v19 = vadd.f32 %v17156_v56, %v22107_v2  ;;  %v22109_v4 = vld [vmem:[#allocation89_spill] sm:$0xff]  ;;  %v22111_v30 = vld [vmem:[#allocation32_spill] sm:$0xff] }
 0x6e3   :  { %22104 = vst [vmem:[#allocation237_spill] sm:$0xff] %v18508_v42  ;;  %v18520_v49 = vadd.f32 %v17131_v36, %v22109_v4  ;;  %v18524_v57 = vadd.f32 %v17141_v24, %v22111_v30  ;;  %v22113_v15 = vld [vmem:[#allocation169_spill] sm:$0xff] }
 0x6e4   :  { %22106 = vst [vmem:[#allocation236_spill] sm:$0xff] %v18512_v27  ;;  %22108 = vst [vmem:[#allocation235_spill] sm:$0xff] %v18516_v19  ;;  %v18528_v61 = vadd.f32 %v17134_v55, %v22113_v15  ;;  %v22115_v42 = vld [vmem:[#allocation25_spill] sm:$0xff]  ;;  %v22117_v27 = vld [vmem:[#allocation12_spill] sm:$0xff] }
 0x6e5   :  { %22110 = vst [vmem:[#allocation239_spill] sm:$0xff] %v18520_v49  ;;  %22112 = vst [vmem:[#allocation238_spill] sm:$0xff] %v18524_v57  ;;  %v18532_v25 = vadd.f32 %v17131_v36, %v22115_v42  ;;  %v18536_v2 = vadd.f32 %v17141_v24, %v22117_v27  ;;  %v22119_v19 = vld [vmem:[#allocation80_spill] sm:$0xff]  ;;  %v22121_v49 = vld [vmem:[#allocation82_spill] sm:$0xff]  ;;  %v18556_v27 = vadd.f32 %v17134_v55, %v17772_v51 }
 0x6e6   :  { %22114 = vst [vmem:[#allocation234_spill] sm:$0xff] %v18528_v61  ;;  %v18540_v4 = vadd.f32 %v17134_v55, %v22119_v19  ;;  %v18544_v30 = vadd.f32 %v17156_v56, %v22121_v49  ;;  %v22123_v57 = vld [vmem:[#allocation79_spill] sm:$0xff] }
 0x6e7   :  { %22116 = vst [vmem:[#allocation241_spill] sm:$0xff] %v18532_v25  ;;  %22118 = vst [vmem:[#allocation242_spill] sm:$0xff] %v18536_v2  ;;  %v18548_v15 = vadd.f32 %v17131_v36, %v22123_v57  ;;  %v22124_v61 = vld [vmem:[#allocation35_spill] sm:$0xff]  ;;  %v22126_v2 = vld [vmem:[#allocation170_spill] sm:$0xff]  ;;  %v18568_v57 = vadd.f32 %v17134_v55, %v17784_v17  ;;  %v18588_v17 = vadd.f32 %v17131_v36, %v17804_v9 }
 0x6e8   :  { %22120 = vst [vmem:[#allocation240_spill] sm:$0xff] %v18540_v4  ;;  %22122 = vst [vmem:[#allocation245_spill] sm:$0xff] %v18544_v30  ;;  %v18552_v42 = vadd.f32 %v17141_v24, %v22124_v61  ;;  %v18560_v19 = vadd.f32 %v17131_v36, %v22126_v2  ;;  %v22127_v4 = vld [vmem:[#allocation171_spill] sm:$0xff]  ;;  %v18572_v61 = vadd.f32 %v17156_v56, %v17788_v62  ;;  %v22278_v59 = vld [vmem:[#allocation229_spill] sm:$0xff] }
 0x6e9   :  { %v18564_v49 = vadd.f32 %v17141_v24, %v22127_v4  ;;  %v18580_v2 = vadd.f32 %v17141_v24, %v17796_v34  ;;  %v18584_v4 = vadd.f32 %v17134_v55, %v17800_v22  ;;  %22132 = vst [vmem:[#allocation249_spill] sm:$0xff] %v18588_v17  ;;  %v18592_v62 = vadd.f32 %v17141_v24, %v17808_v11  ;;  %v22136_v17 = vld [vmem:[#allocation86_spill] sm:$0xff]  ;;  %v22281_v63 = vld [vmem:[#allocation233_spill] sm:$0xff] }
 0x6ea   :  { %22125 = vst [vmem:[#allocation244_spill] sm:$0xff] %v18552_v42  ;;  %v22128_v42 = vld [vmem:[#allocation55_spill] sm:$0xff]  ;;  %v18612_v11 = vadd.f32 %v17134_v55, %v22136_v17  ;;  %v18632_v17 = vadd.f32 %v17131_v36, %v17848_v3  ;;  %v18652_v3 = vadd.f32 %v17134_v55, %v17868_v29  ;;  %v18672_v29 = vadd.f32 %v17131_v36, %v17888_v54  ;;  %v22283_v58 = vld [vmem:[#allocation237_spill] sm:$0xff] }
 0x6eb   :  { %v18576_v51 = vadd.f32 %v17131_v36, %v22128_v42  ;;  %22130 = vst [vmem:[#allocation246_spill] sm:$0xff] %v18580_v2  ;;  %22131 = vst [vmem:[#allocation243_spill] sm:$0xff] %v18584_v4  ;;  %v18596_v42 = vadd.f32 %v17134_v55, %v17812_v37  ;;  %v22134_v2 = vld [vmem:[#allocation105_spill] sm:$0xff]  ;;  %v22135_v4 = vld [vmem:[#allocation99_spill] sm:$0xff]  ;;  %v18616_v37 = vadd.f32 %v17131_v36, %v17832_v14 }
 0x6ec   :  { %v18604_v22 = vadd.f32 %v17131_v36, %v22134_v2  ;;  %v18608_v9 = vadd.f32 %v17141_v24, %v22135_v4  ;;  %v18624_v2 = vadd.f32 %v17134_v55, %v17840_v8  ;;  %v18628_v4 = vadd.f32 %v17156_v56, %v17844_v0  ;;  %22137 = vst [vmem:[#allocation250_spill] sm:$0xff] %v18652_v3  ;;  %v22284_v38 = vld [vmem:[#allocation236_spill] sm:$0xff]  ;;  %v22285_v44 = vld [vmem:[#allocation235_spill] sm:$0xff] }
 0x6ed   :  { %22129 = vst [vmem:[#allocation247_spill] sm:$0xff] %v18576_v51  ;;  %v22133_v51 = vld [vmem:[#allocation24_spill] sm:$0xff]  ;;  %v18636_v14 = vadd.f32 %v17141_v24, %v17852_v60  ;;  %v18644_v8 = vadd.f32 %v17131_v36, %v17860_v33  ;;  %v18648_v0 = vadd.f32 %v17141_v24, %v17864_v21  ;;  %v18656_v60 = vadd.f32 %v17156_v56, %v17872_v48  ;;  %v22286_v32 = vld [vmem:[#allocation239_spill] sm:$0xff] }
 0x6ee   :  { %v18600_v34 = vadd.f32 %v17156_v56, %v22133_v51  ;;  %v18620_v51 = vadd.f32 %v17141_v24, %v17836_v53  ;;  %v18640_v53 = vadd.f32 %v17134_v55, %v17856_v28  ;;  %v18660_v28 = vadd.f32 %v17131_v36, %v17876_v10  ;;  %22141 = vst [vmem:[#allocation252_spill] sm:$0xff] %v18672_v29 }
 0x6ef   :  { %v18664_v33 = vadd.f32 %v17141_v24, %v17880_v20  ;;  %v18668_v21 = vadd.f32 %v17134_v55, %v17884_v26  ;;  %v18676_v48 = vadd.f32 %v17141_v24, %v17892_v50  ;;  %v18680_v10 = vadd.f32 %v17134_v55, %v17896_v52 }
 0x6f0   :  { %22138 = vst [vmem:[#allocation248_spill] sm:$0xff] %v18660_v28  ;;  %v18684_v20 = vadd.f32 %v17156_v56, %v17900_v47  ;;  %v18688_v26 = vadd.f32 %v17131_v36, %v17904_v7  ;;  %v18692_v54 = vadd.f32 %v17141_v24, %v17908_v18  ;;  %v18696_v50 = vadd.f32 %v17134_v55, %v17912_v45  ;;  %v22295_v30 = vld [vmem:[#allocation249_spill] sm:$0xff] }
 0x6f1   :  { %22139 = vst [vmem:[#allocation193_spill] sm:$0xff] %v18664_v33  ;;  %22140 = vst [vmem:[#allocation253_spill] sm:$0xff] %v18668_v21  ;;  %v18700_v52 = vadd.f32 %v17131_v36, %v17916_v31  ;;  %v18704_v47 = vadd.f32 %v17141_v24, %v17920_v1  ;;  %v18708_v7 = vadd.f32 %v17134_v55, %v17924_v46  ;;  %v22287_v46 = vld [vmem:[#allocation238_spill] sm:$0xff]  ;;  %v22291_v39 = vld [vmem:[#allocation244_spill] sm:$0xff] }
 0x6f2   :  { %22142 = vst [vmem:[#allocation251_spill] sm:$0xff] %v18676_v48  ;;  %22143 = vst [vmem:[#allocation134_spill] sm:$0xff] %v18680_v10  ;;  %v18712_v18 = vadd.f32 %v17156_v56, %v17928_v13  ;;  %v18716_v45 = vadd.f32 %v17131_v36, %v17932_v40  ;;  %v18720_v31 = vadd.f32 %v17141_v24, %v17936_v43  ;;  %v22293_v23 = vld [vmem:[#allocation246_spill] sm:$0xff]  ;;  %v22294_v12 = vld [vmem:[#allocation243_spill] sm:$0xff]  ;;  %v22298_v36 = vmax.f32 %v17948_v6, 0.0 }
 0x6f3   :  { %22144 = vst [vmem:[#allocation256_spill] sm:$0xff] %v18684_v20  ;;  %22145 = vst [vmem:[#allocation255_spill] sm:$0xff] %v18688_v26  ;;  %v18724_v1 = vadd.f32 %v17134_v55, %v17940_v35  ;;  %v22299_v40 = vmax.f32 %v17944_v5, 0.0  ;;  %v22300_v24 = vmax.f32 %v17956_v16, 0.0  ;;  %v22301_v43 = vmax.f32 %v17952_v41, 0.0  ;;  %v22309_v13 = vld [vmem:[#allocation27_spill] sm:$0xff] }
 0x6f4   :  { %22146 = vst [vmem:[#allocation257_spill] sm:$0xff] %v18692_v54  ;;  %22147 = vst [vmem:[#allocation141_spill] sm:$0xff] %v18696_v50  ;;  %v22292_v25 = vld [vmem:[#allocation247_spill] sm:$0xff]  ;;  %v22302_v50 = vld [vmem:[#allocation173_spill] sm:$0xff] }
 0x6f5   :  { %22148 = vst [vmem:[#allocation254_spill] sm:$0xff] %v18700_v52  ;;  %22149 = vst [vmem:[#allocation124_spill] sm:$0xff] %v18704_v47  ;;  %v9096_v26 = vcombine.low %v22299_v40, %v22298_v36  ;;  %v9097_v55 = vcombine.low %v22301_v43, %v22300_v24  ;;  %v22303_v35 = vmax.f32 %v22302_v50, 0.0  ;;  %v22304_v52 = vld [vmem:[#allocation172_spill] sm:$0xff]  ;;  %v22311_v6 = vld [vmem:[#allocation150_spill] sm:$0xff] }
 0x6f6   :  { %22150 = vst [vmem:[#allocation67_spill] sm:$0xff] %v18708_v7  ;;  %22151 = vst [vmem:[#allocation195_spill] sm:$0xff] %v18712_v18  ;;  %v22305_v47 = vmax.f32 %v22304_v52, 0.0  ;;  %v22306_v7 = vld [vmem:[#allocation13_spill] sm:$0xff]  ;;  %v22307_v18 = vld [vmem:[#allocation102_spill] sm:$0xff]  ;;  %v22312_v28 = vmax.f32 %v22311_v6, 0.0 }
 0x6f7   :  { %22152 = vst [vmem:[#allocation258_spill] sm:$0xff] %v18716_v45  ;;  %22153 = vst [vmem:[#allocation52_spill] sm:$0xff] %v18720_v31  ;;  %v22308_v56 = vmax.f32 %v22307_v18, 0.0  ;;  %v22310_v31 = vmax.f32 %v22309_v13, 0.0  ;;  %v9104_v36 = vrot.slane %v9096_v26, %v22306_v7  ;;  %v22313_v16 = vld [vmem:[#allocation93_spill] sm:$0xff]  ;;  %v22315_v41 = vld [vmem:[#allocation34_spill] sm:$0xff]  ;;  %v9111_v13 = vrot.slane %v9097_v55, %v22306_v7 }
 0x6f8   :  { %22154 = vst [vmem:[#allocation8_spill] sm:$0xff] %v18724_v1  ;;  %v22288_v1 = vld [vmem:[#allocation234_spill] sm:$0xff]  ;;  %v9113_v33 = vcombine.low %v22305_v47, %v22303_v35  ;;  %v22314_v40 = vmax.f32 %v22313_v16, 0.0  ;;  %v22316_v24 = vmax.f32 %v22315_v41, 0.0  ;;  %v22317_v50 = vld [vmem:[#allocation37_spill] sm:$0xff]  ;;  %v22319_v52 = vld [vmem:[#allocation7_spill] sm:$0xff] }
 0x6f9   :  { %v9127_v45 = vrot.slane %v22308_v56, %v22306_v7  ;;  %v9129_v5 = vcombine.low %v22312_v28, %v22310_v31  ;;  %v22318_v54 = vmax.f32 %v22317_v50, 0.0  ;;  %v22320_v47 = vmax.f32 %v22319_v52, 0.0  ;;  %v22321_v18 = vld [vmem:[#allocation98_spill] sm:$0xff]  ;;  %v22323_v31 = vld [vmem:[#allocation81_spill] sm:$0xff]  ;;  %v22325_v16 = vld [vmem:[#allocation3_spill] sm:$0xff] }
 0x6fa   :  { %v9130_v43 = vcombine.low %v22316_v24, %v22314_v40  ;;  %v22322_v56 = vmax.f32 %v22321_v18, 0.0  ;;  %v9120_v28 = vrot.slane %v9113_v33, %v22306_v7  ;;  %v22324_v6 = vmax.f32 %v22323_v31, 0.0  ;;  %v22331_v10 = vld [vmem:[#allocation109_spill] sm:$0xff]  ;;  %v22333_v20 = vld [vmem:[#allocation90_spill] sm:$0xff] }
 0x6fb   :  { %v9146_v35 = vcombine.low %v22320_v47, %v22318_v54  ;;  %v9137_v26 = vrot.slane %v9129_v5, %v22306_v7  ;;  %v22326_v41 = vmax.f32 %v22325_v16, 0.0  ;;  %v22327_v54 = vld [vmem:[#allocation5_spill] sm:$0xff]  ;;  %v22329_v47 = vld [vmem:[#allocation26_spill] sm:$0xff]  ;;  %v22332_v55 = vmax.f32 %v22331_v10, 0.0 }
 0x6fc   :  { %v9160_v21 = vrot.slane %v22322_v56, %v22306_v7  ;;  %v9144_v24 = vrot.slane %v9130_v43, %v22306_v7  ;;  %v22328_v52 = vmax.f32 %v22327_v54, 0.0  ;;  %v22330_v18 = vmax.f32 %v22329_v47, 0.0  ;;  %v22339_v10 = vld [vmem:[#allocation85_spill] sm:$0xff] }
 0x6fd   :  { %v9162_v40 = vcombine.low %v22326_v41, %v22324_v6  ;;  %v9153_v50 = vrot.slane %v9146_v35, %v22306_v7  ;;  %v22334_v33 = vmax.f32 %v22333_v20, 0.0  ;;  %v9112_v5 = vcombine.low %v9104_v36, %v9111_v13  ;;  %v22335_v6 = vld [vmem:[#allocation36_spill] sm:$0xff] }
 0x6fe   :  { %v9163_v56 = vcombine.low %v22330_v18, %v22328_v52  ;;  %v9128_v48 = vcombine.low %v9120_v28, %v9127_v45  ;;  %v22336_v16 = vmax.f32 %v22335_v6, 0.0  ;;  %v9145_v41 = vcombine.low %v9137_v26, %v9144_v24  ;;  %v22337_v52 = vld [vmem:[#allocation151_spill] sm:$0xff]  ;;  %v22343_v45 = vld [vmem:[#allocation101_spill] sm:$0xff]  ;;  %v22347_v6 = vld [vmem:[#allocation84_spill] sm:$0xff] }
 0x6ff   :  { %v9179_v29 = vcombine.low %v22334_v33, %v22332_v55  ;;  %v9170_v31 = vrot.slane %v9162_v40, %v22306_v7  ;;  %v9161_v35 = vcombine.low %v9153_v50, %v9160_v21  ;;  %v22338_v18 = vmax.f32 %v22337_v52, 0.0  ;;  %v22341_v55 = vld [vmem:[#allocation59_spill] sm:$0xff]  ;;  %v22345_v40 = vld [vmem:[#allocation113_spill] sm:$0xff]  ;;  %v22349_v21 = vld [vmem:[#allocation106_spill] sm:$0xff]  ;;  %10076 = vst.msk [vmem:[%s19652_s4] sm:$0xff] %vm1745_vm4, %v9112_v5 }
 0x700   :  { %v9193_v43 = vrot.slane %v22336_v16, %v22306_v7  ;;  %v9177_v54 = vrot.slane %v9163_v56, %v22306_v7  ;;  %v22340_v3 = vmax.f32 %v22339_v10, 0.0  ;;  %v22342_v36 = vmax.f32 %v22341_v55, 0.0  ;;  %10077 = vst.msk [vmem:[%s19652_s4 + $0x8] sm:$0x3f] %vm6429_vm13, %v9128_v48  ;;  %v22351_v56 = vld [vmem:[#allocation39_spill] sm:$0xff] }
 0x701   :  { %v9186_v47 = vrot.slane %v9179_v29, %v22306_v7  ;;  %v22344_v13 = vmax.f32 %v22343_v45, 0.0  ;;  %v22346_v33 = vmax.f32 %v22345_v40, 0.0  ;;  %v22348_v16 = vmax.f32 %v22347_v6, 0.0  ;;  %10078 = vst.msk [vmem:[%s19652_s4 + $0x10] sm:$0xff] %vm1745_vm4, %v9145_v41 }
 0x702   :  { %v9195_v20 = vcombine.low %v22340_v3, %v22338_v18  ;;  %v22350_v24 = vmax.f32 %v22349_v21, 0.0  ;;  %v9178_v3 = vcombine.low %v9170_v31, %v9177_v54  ;;  %v22352_v52 = vmax.f32 %v22351_v56, 0.0  ;;  %v22353_v18 = vld [vmem:[#allocation100_spill] sm:$0xff]  ;;  %10079 = vst.msk [vmem:[%s19652_s4 + $0x18] sm:$0x3f] %vm6429_vm13, %v9161_v35  ;;  %v22365_v35 = vld [vmem:[#allocation2_spill] sm:$0xff] }
 0x703   :  { %v9196_v28 = vcombine.low %v22344_v13, %v22342_v36  ;;  %v9212_v26 = vcombine.low %v22348_v16, %v22346_v33  ;;  %v9194_v29 = vcombine.low %v9186_v47, %v9193_v43  ;;  %v22354_v10 = vmax.f32 %v22353_v18, 0.0  ;;  %v22355_v36 = vld [vmem:[#allocation88_spill] sm:$0xff]  ;;  %v22357_v13 = vld [vmem:[#allocation63_spill] sm:$0xff]  ;;  %v22361_v47 = vld [vmem:[#allocation174_spill] sm:$0xff] }
 0x704   :  { %v9226_v50 = vrot.slane %v22350_v24, %v22306_v7  ;;  %v22356_v45 = vmax.f32 %v22355_v36, 0.0  ;;  %v22358_v40 = vmax.f32 %v22357_v13, 0.0  ;;  %v9203_v48 = vrot.slane %v9195_v20, %v22306_v7  ;;  %v22359_v43 = vld [vmem:[#allocation175_spill] sm:$0xff]  ;;  %v22363_v24 = vld [vmem:[#allocation176_spill] sm:$0xff]  ;;  %v22367_v20 = vld [vmem:[#allocation177_spill] sm:$0xff]  ;;  %10080 = vst.msk [vmem:[%s19652_s4 + $0x20] sm:$0xff] %vm1745_vm4, %v9178_v3 }
 0x705   :  { %v9228_v55 = vcombine.low %v22354_v10, %v22352_v52  ;;  %v9210_v5 = vrot.slane %v9196_v28, %v22306_v7  ;;  %v9219_v31 = vrot.slane %v9212_v26, %v22306_v7  ;;  %v22360_v54 = vmax.f32 %v22359_v43, 0.0  ;;  %10081 = vst.msk [vmem:[%s19652_s4 + $0x28] sm:$0x3f] %vm6429_vm13, %v9194_v29  ;;  %v22375_v3 = vld [vmem:[#allocation38_spill] sm:$0xff] }
 0x706   :  { %v9229_v33 = vcombine.low %v22358_v40, %v22356_v45  ;;  %v22362_v6 = vmax.f32 %v22361_v47, 0.0  ;;  %v22364_v56 = vmax.f32 %v22363_v24, 0.0  ;;  %v22366_v18 = vmax.f32 %v22365_v35, 0.0  ;;  %v22369_v45 = vld [vmem:[#allocation153_spill] sm:$0xff]  ;;  %v22371_v40 = vld [vmem:[#allocation178_spill] sm:$0xff] }
 0x707   :  { %v9236_v21 = vrot.slane %v9228_v55, %v22306_v7  ;;  %v22368_v10 = vmax.f32 %v22367_v20, 0.0  ;;  %v9211_v26 = vcombine.low %v9203_v48, %v9210_v5  ;;  %v9227_v55 = vcombine.low %v9219_v31, %v9226_v50  ;;  %v22379_v31 = vld [vmem:[#allocation87_spill] sm:$0xff]  ;;  %v22381_v20 = vld [vmem:[#allocation54_spill] sm:$0xff] }
 0x708   :  { %v9245_v16 = vcombine.low %v22362_v6, %v22360_v54  ;;  %v9243_v41 = vrot.slane %v9229_v33, %v22306_v7  ;;  %v9259_v52 = vrot.slane %v22364_v56, %v22306_v7  ;;  %v22370_v13 = vmax.f32 %v22369_v45, 0.0  ;;  %v22373_v6 = vld [vmem:[#allocation110_spill] sm:$0xff] }
 0x709   :  { %v9261_v28 = vcombine.low %v22368_v10, %v22366_v18  ;;  %v22372_v33 = vmax.f32 %v22371_v40, 0.0  ;;  %v22374_v24 = vmax.f32 %v22373_v6, 0.0  ;;  %v22376_v56 = vmax.f32 %v22375_v3, 0.0  ;;  %v22377_v18 = vld [vmem:[#allocation104_spill] sm:$0xff]  ;;  %10082 = vst.msk [vmem:[%s19652_s4 + $0x30] sm:$0xff] %vm1745_vm4, %v9211_v26  ;;  %v22391_v3 = vld [vmem:[#allocation181_spill] sm:$0xff] }
 0x70a   :  { %v9252_v36 = vrot.slane %v9245_v16, %v22306_v7  ;;  %v9244_v54 = vcombine.low %v9236_v21, %v9243_v41  ;;  %v22378_v29 = vmax.f32 %v22377_v18, 0.0  ;;  %v22380_v16 = vmax.f32 %v22379_v31, 0.0  ;;  %v22383_v21 = vld [vmem:[#allocation117_spill] sm:$0xff]  ;;  %10083 = vst.msk [vmem:[%s19652_s4 + $0x38] sm:$0x3f] %vm6429_vm13, %v9227_v55 }
 0x70b   :  { %v9262_v43 = vcombine.low %v22372_v33, %v22370_v13  ;;  %v9269_v47 = vrot.slane %v9261_v28, %v22306_v7  ;;  %v9278_v35 = vcombine.low %v22376_v56, %v22374_v24  ;;  %v22382_v10 = vmax.f32 %v22381_v20, 0.0  ;;  %v22385_v28 = vld [vmem:[#allocation41_spill] sm:$0xff] }
 0x70c   :  { %v9292_v48 = vrot.slane %v22378_v29, %v22306_v7  ;;  %v9260_v50 = vcombine.low %v9252_v36, %v9259_v52  ;;  %v22384_v41 = vmax.f32 %v22383_v21, 0.0  ;;  %v22386_v13 = vmax.f32 %v22385_v28, 0.0  ;;  %v22387_v36 = vld [vmem:[#allocation180_spill] sm:$0xff]  ;;  %10084 = vst.msk [vmem:[%s19652_s4 + $0x40] sm:$0xff] %vm1745_vm4, %v9244_v54  ;;  %v22399_v28 = vld [vmem:[#allocation183_spill] sm:$0xff] }
 0x70d   :  { %v9276_v5 = vrot.slane %v9262_v43, %v22306_v7  ;;  %v9294_v45 = vcombine.low %v22382_v10, %v22380_v16  ;;  %v9285_v52 = vrot.slane %v9278_v35, %v22306_v7  ;;  %v22388_v33 = vmax.f32 %v22387_v36, 0.0  ;;  %v22389_v43 = vld [vmem:[#allocation179_spill] sm:$0xff]  ;;  %v22393_v29 = vld [vmem:[#allocation92_spill] sm:$0xff]  ;;  %v22395_v16 = vld [vmem:[#allocation182_spill] sm:$0xff] }
 0x70e   :  { %v9295_v40 = vcombine.low %v22386_v13, %v22384_v41  ;;  %v22390_v6 = vmax.f32 %v22389_v43, 0.0  ;;  %v22392_v56 = vmax.f32 %v22391_v3, 0.0  ;;  %v22394_v31 = vmax.f32 %v22393_v29, 0.0  ;;  %v22397_v21 = vld [vmem:[#allocation184_spill] sm:$0xff]  ;;  %10085 = vst.msk [vmem:[%s19652_s4 + $0x48] sm:$0x3f] %vm6429_vm13, %v9260_v50 }
 0x70f   :  { %v22396_v26 = vmax.f32 %v22395_v16, 0.0  ;;  %v9277_v55 = vcombine.low %v9269_v47, %v9276_v5  ;;  %v9302_v35 = vrot.slane %v9294_v45, %v22306_v7  ;;  %v22398_v41 = vmax.f32 %v22397_v21, 0.0  ;;  %v22401_v47 = vld [vmem:[#allocation108_spill] sm:$0xff]  ;;  %v22403_v45 = vld [vmem:[#allocation147_spill] sm:$0xff] }
 0x710   :  { %v9311_v24 = vcombine.low %v22390_v6, %v22388_v33  ;;  %v9325_v18 = vrot.slane %v22392_v56, %v22306_v7  ;;  %v9309_v10 = vrot.slane %v9295_v40, %v22306_v7  ;;  %v22400_v13 = vmax.f32 %v22399_v28, 0.0  ;;  %v22405_v29 = vld [vmem:[#allocation103_spill] sm:$0xff]  ;;  %v22409_v50 = vld [vmem:[#allocation40_spill] sm:$0xff] }
 0x711   :  { %v9327_v20 = vcombine.low %v22396_v26, %v22394_v31  ;;  %v9293_v33 = vcombine.low %v9285_v52, %v9292_v48  ;;  %v22402_v5 = vmax.f32 %v22401_v47, 0.0  ;;  %v22404_v6 = vmax.f32 %v22403_v45, 0.0  ;;  %v22407_v26 = vld [vmem:[#allocation152_spill] sm:$0xff]  ;;  %10086 = vst.msk [vmem:[%s19652_s4 + $0x50] sm:$0xff] %vm1745_vm4, %v9277_v55  ;;  %v22419_v55 = vld [vmem:[#allocation146_spill] sm:$0xff] }
 0x712   :  { %v9328_v36 = vcombine.low %v22400_v13, %v22398_v41  ;;  %v9318_v43 = vrot.slane %v9311_v24, %v22306_v7  ;;  %v9310_v3 = vcombine.low %v9302_v35, %v9309_v10  ;;  %v22406_v31 = vmax.f32 %v22405_v29, 0.0  ;;  %v22411_v35 = vld [vmem:[#allocation114_spill] sm:$0xff]  ;;  %v22413_v41 = vld [vmem:[#allocation121_spill] sm:$0xff] }
 0x713   :  { %v9335_v54 = vrot.slane %v9327_v20, %v22306_v7  ;;  %v9344_v40 = vcombine.low %v22404_v6, %v22402_v5  ;;  %v22408_v21 = vmax.f32 %v22407_v26, 0.0  ;;  %v22410_v48 = vmax.f32 %v22409_v50, 0.0  ;;  %v22417_v5 = vld [vmem:[#allocation185_spill] sm:$0xff]  ;;  %10087 = vst.msk [vmem:[%s19652_s4 + $0x58] sm:$0x3f] %vm6429_vm13, %v9293_v33 }
 0x714   :  { %v9342_v56 = vrot.slane %v9328_v36, %v22306_v7  ;;  %v9358_v16 = vrot.slane %v22406_v31, %v22306_v7  ;;  %v9326_v24 = vcombine.low %v9318_v43, %v9325_v18  ;;  %v22412_v10 = vmax.f32 %v22411_v35, 0.0  ;;  %v22415_v36 = vld [vmem:[#allocation186_spill] sm:$0xff]  ;;  %v22421_v31 = vld [vmem:[#allocation43_spill] sm:$0xff]  ;;  %10088 = vst.msk [vmem:[%s19652_s4 + $0x60] sm:$0xff] %vm1745_vm4, %v9310_v3 }
 0x715   :  { %v9360_v52 = vcombine.low %v22410_v48, %v22408_v21  ;;  %v9351_v20 = vrot.slane %v9344_v40, %v22306_v7  ;;  %v22414_v28 = vmax.f32 %v22413_v41, 0.0  ;;  %v22416_v47 = vmax.f32 %v22415_v36, 0.0  ;;  %v22423_v21 = vld [vmem:[#allocation154_spill] sm:$0xff]  ;;  %v22431_v3 = vld [vmem:[#allocation187_spill] sm:$0xff] }
 0x716   :  { %v22418_v45 = vmax.f32 %v22417_v5, 0.0  ;;  %v9343_v29 = vcombine.low %v9335_v54, %v9342_v56  ;;  %v22420_v43 = vmax.f32 %v22419_v55, 0.0  ;;  %v22422_v26 = vmax.f32 %v22421_v31, 0.0  ;;  %v22425_v56 = vld [vmem:[#allocation42_spill] sm:$0xff]  ;;  %10089 = vst.msk [vmem:[%s19652_s4 + $0x68] sm:$0x3f] %vm6429_vm13, %v9326_v24 }
 0x717   :  { %v9361_v13 = vcombine.low %v22414_v28, %v22412_v10  ;;  %v9368_v18 = vrot.slane %v9360_v52, %v22306_v7  ;;  %v22424_v50 = vmax.f32 %v22423_v21, 0.0  ;;  %v9359_v35 = vcombine.low %v9351_v20, %v9358_v16  ;;  %v22427_v10 = vld [vmem:[#allocation91_spill] sm:$0xff]  ;;  %v22437_v31 = vld [vmem:[#allocation118_spill] sm:$0xff] }
 0x718   :  { %v9377_v6 = vcombine.low %v22418_v45, %v22416_v47  ;;  %v9391_v40 = vrot.slane %v22420_v43, %v22306_v7  ;;  %v22426_v52 = vmax.f32 %v22425_v56, 0.0  ;;  %v22428_v41 = vmax.f32 %v22427_v10, 0.0  ;;  %v22429_v47 = vld [vmem:[#allocation188_spill] sm:$0xff]  ;;  %v22435_v55 = vld [vmem:[#allocation107_spill] sm:$0xff]  ;;  %10090 = vst.msk [vmem:[%s19652_s4 + $0x70] sm:$0xff] %vm1745_vm4, %v9343_v29  ;;  %v22441_v10 = vld [vmem:[#allocation45_spill] sm:$0xff] }
 0x719   :  { %v9393_v48 = vcombine.low %v22424_v50, %v22422_v26  ;;  %v9375_v33 = vrot.slane %v9361_v13, %v22306_v7  ;;  %v22430_v5 = vmax.f32 %v22429_v47, 0.0  ;;  %v22432_v16 = vmax.f32 %v22431_v3, 0.0  ;;  %v22433_v13 = vld [vmem:[#allocation95_spill] sm:$0xff]  ;;  %v22439_v56 = vld [vmem:[#allocation148_spill] sm:$0xff]  ;;  %10091 = vst.msk [vmem:[%s19652_s4 + $0x78] sm:$0x3f] %vm6429_vm13, %v9359_v35 }
 0x71a   :  { %v9384_v54 = vrot.slane %v9377_v6, %v22306_v7  ;;  %v9394_v28 = vcombine.low %v22428_v41, %v22426_v52  ;;  %v22434_v45 = vmax.f32 %v22433_v13, 0.0  ;;  %v22436_v43 = vmax.f32 %v22435_v55, 0.0 }
 0x71b   :  { %v9401_v36 = vrot.slane %v9393_v48, %v22306_v7  ;;  %v9410_v20 = vcombine.low %v22432_v16, %v22430_v5  ;;  %v22438_v26 = vmax.f32 %v22437_v31, 0.0  ;;  %v9376_v24 = vcombine.low %v9368_v18, %v9375_v33  ;;  %v22443_v16 = vld [vmem:[#allocation125_spill] sm:$0xff]  ;;  %v22445_v18 = vld [vmem:[#allocation112_spill] sm:$0xff] }
 0x71c   :  { %v9424_v6 = vrot.slane %v22434_v45, %v22306_v7  ;;  %v9392_v50 = vcombine.low %v9384_v54, %v9391_v40  ;;  %v9408_v48 = vrot.slane %v9394_v28, %v22306_v7  ;;  %v22440_v52 = vmax.f32 %v22439_v56, 0.0  ;;  %v22447_v54 = vld [vmem:[#allocation122_spill] sm:$0xff] }
 0x71d   :  { %v9426_v21 = vcombine.low %v22438_v26, %v22436_v43  ;;  %v22442_v41 = vmax.f32 %v22441_v10, 0.0  ;;  %v9417_v5 = vrot.slane %v9410_v20, %v22306_v7  ;;  %v22444_v29 = vmax.f32 %v22443_v16, 0.0  ;;  %v22449_v43 = vld [vmem:[#allocation44_spill] sm:$0xff]  ;;  %v22451_v26 = vld [vmem:[#allocation6_spill] sm:$0xff]  ;;  %v22453_v20 = vld [vmem:[#allocation47_spill] sm:$0xff]  ;;  %10092 = vst.msk [vmem:[%s19652_s4 + $0x80] sm:$0xff] %vm1745_vm4, %v9376_v24 }
 0x71e   :  { %v22446_v40 = vmax.f32 %v22445_v18, 0.0  ;;  %v22448_v28 = vmax.f32 %v22447_v54, 0.0  ;;  %v9409_v45 = vcombine.low %v9401_v36, %v9408_v48  ;;  %v22450_v31 = vmax.f32 %v22449_v43, 0.0  ;;  %10093 = vst.msk [vmem:[%s19652_s4 + $0x88] sm:$0x3f] %vm6429_vm13, %v9392_v50  ;;  %v22461_v54 = vld [vmem:[#allocation111_spill] sm:$0xff] }
 0x71f   :  { %v9427_v47 = vcombine.low %v22442_v41, %v22440_v52  ;;  %v9434_v3 = vrot.slane %v9426_v21, %v22306_v7  ;;  %v22452_v35 = vmax.f32 %v22451_v26, 0.0  ;;  %v22454_v52 = vmax.f32 %v22453_v20, 0.0  ;;  %v22455_v21 = vld [vmem:[#allocation155_spill] sm:$0xff]  ;;  %v22465_v50 = vld [vmem:[#allocation94_spill] sm:$0xff] }
 0x720   :  { %v9443_v33 = vcombine.low %v22446_v40, %v22444_v29  ;;  %v9457_v13 = vrot.slane %v22448_v28, %v22306_v7  ;;  %v22456_v10 = vmax.f32 %v22455_v21, 0.0  ;;  %v9425_v36 = vcombine.low %v9417_v5, %v9424_v6  ;;  %v22459_v29 = vld [vmem:[#allocation129_spill] sm:$0xff]  ;;  %10094 = vst.msk [vmem:[%s19652_s4 + $0x90] sm:$0xff] %vm1745_vm4, %v9409_v45  ;;  %v22467_v21 = vld [vmem:[#allocation4_spill] sm:$0xff] }
 0x721   :  { %v9441_v55 = vrot.slane %v9427_v47, %v22306_v7  ;;  %v9459_v56 = vcombine.low %v22452_v35, %v22450_v31  ;;  %v22457_v47 = vld [vmem:[#allocation60_spill] sm:$0xff]  ;;  %v22460_v18 = vmax.f32 %v22459_v29, 0.0  ;;  %v22462_v28 = vmax.f32 %v22461_v54, 0.0  ;;  %v22463_v35 = vld [vmem:[#allocation46_spill] sm:$0xff] }
 0x722   :  { %v9460_v41 = vcombine.low %v22456_v10, %v22454_v52  ;;  %v9450_v48 = vrot.slane %v9443_v33, %v22306_v7  ;;  %v22458_v16 = vmax.f32 %v22457_v47, 0.0  ;;  %v22464_v20 = vmax.f32 %v22463_v35, 0.0  ;;  %v22471_v47 = vld [vmem:[#allocation49_spill] sm:$0xff]  ;;  %10095 = vst.msk [vmem:[%s19652_s4 + $0x98] sm:$0x3f] %vm6429_vm13, %v9425_v36  ;;  %v22475_v45 = vld [vmem:[#allocation48_spill] sm:$0xff] }
 0x723   :  { %v9490_v43 = vrot.slane %v22462_v28, %v22306_v7  ;;  %v9442_v31 = vcombine.low %v9434_v3, %v9441_v55  ;;  %v9467_v24 = vrot.slane %v9459_v56, %v22306_v7  ;;  %v22466_v6 = vmax.f32 %v22465_v50, 0.0  ;;  %v22469_v3 = vld [vmem:[#allocation126_spill] sm:$0xff]  ;;  %v22477_v28 = vld [vmem:[#allocation116_spill] sm:$0xff] }
 0x724   :  { %v9476_v40 = vcombine.low %v22460_v18, %v22458_v16  ;;  %v9474_v26 = vrot.slane %v9460_v41, %v22306_v7  ;;  %v9458_v33 = vcombine.low %v9450_v48, %v9457_v13  ;;  %v22468_v10 = vmax.f32 %v22467_v21, 0.0  ;;  %v22473_v16 = vld [vmem:[#allocation133_spill] sm:$0xff] }
 0x725   :  { %v9492_v5 = vcombine.low %v22466_v6, %v22464_v20  ;;  %v22470_v55 = vmax.f32 %v22469_v3, 0.0  ;;  %v22472_v41 = vmax.f32 %v22471_v47, 0.0  ;;  %v22474_v29 = vmax.f32 %v22473_v16, 0.0  ;;  %v22479_v20 = vld [vmem:[#allocation97_spill] sm:$0xff]  ;;  %10096 = vst.msk [vmem:[%s19652_s4 + $0xa0] sm:$0xff] %vm1745_vm4, %v9442_v31  ;;  %v22487_v31 = vld [vmem:[#allocation96_spill] sm:$0xff] }
 0x726   :  { %v9483_v52 = vrot.slane %v9476_v40, %v22306_v7  ;;  %v9475_v54 = vcombine.low %v9467_v24, %v9474_v26  ;;  %v22476_v48 = vmax.f32 %v22475_v45, 0.0  ;;  %v22478_v35 = vmax.f32 %v22477_v28, 0.0  ;;  %v22481_v26 = vld [vmem:[#allocation130_spill] sm:$0xff]  ;;  %10097 = vst.msk [vmem:[%s19652_s4 + $0xa8] sm:$0x3f] %vm6429_vm13, %v9458_v33  ;;  %v22491_v45 = vld [vmem:[#allocation137_spill] sm:$0xff] }
 0x727   :  { %v9493_v56 = vcombine.low %v22470_v55, %v22468_v10  ;;  %v9509_v18 = vcombine.low %v22474_v29, %v22472_v41  ;;  %v9500_v13 = vrot.slane %v9492_v5, %v22306_v7  ;;  %v22480_v50 = vmax.f32 %v22479_v20, 0.0  ;;  %v22483_v10 = vld [vmem:[#allocation149_spill] sm:$0xff]  ;;  %v22493_v28 = vld [vmem:[#allocation56_spill] sm:$0xff] }
 0x728   :  { %v9523_v40 = vrot.slane %v22476_v48, %v22306_v7  ;;  %v9491_v21 = vcombine.low %v9483_v52, %v9490_v43  ;;  %v22482_v5 = vmax.f32 %v22481_v26, 0.0  ;;  %v22484_v3 = vmax.f32 %v22483_v10, 0.0  ;;  %v22485_v41 = vld [vmem:[#allocation9_spill] sm:$0xff]  ;;  %10098 = vst.msk [vmem:[%s19652_s4 + $0xb0] sm:$0xff] %vm1745_vm4, %v9475_v54  ;;  %v22495_v26 = vld [vmem:[#allocation115_spill] sm:$0xff]  ;;  %v22497_v10 = vld [vmem:[#allocation120_spill] sm:$0xff] }
 0x729   :  { %v9525_v6 = vcombine.low %v22480_v50, %v22478_v35  ;;  %v9507_v36 = vrot.slane %v9493_v56, %v22306_v7  ;;  %v9516_v24 = vrot.slane %v9509_v18, %v22306_v7  ;;  %v22486_v16 = vmax.f32 %v22485_v41, 0.0  ;;  %v22489_v56 = vld [vmem:[#allocation156_spill] sm:$0xff] }
 0x72a   :  { %v9526_v55 = vcombine.low %v22484_v3, %v22482_v5  ;;  %v22488_v43 = vmax.f32 %v22487_v31, 0.0  ;;  %v22490_v29 = vmax.f32 %v22489_v56, 0.0  ;;  %v22492_v48 = vmax.f32 %v22491_v45, 0.0  ;;  %10099 = vst.msk [vmem:[%s19652_s4 + $0xb8] sm:$0x3f] %vm6429_vm13, %v9491_v21 }
 0x72b   :  { %v9533_v47 = vrot.slane %v9525_v6, %v22306_v7  ;;  %v22494_v35 = vmax.f32 %v22493_v28, 0.0  ;;  %v9508_v33 = vcombine.low %v9500_v13, %v9507_v36  ;;  %v9524_v50 = vcombine.low %v9516_v24, %v9523_v40  ;;  %v22501_v13 = vld [vmem:[#allocation189_spill] sm:$0xff]  ;;  %v22503_v24 = vld [vmem:[#allocation191_spill] sm:$0xff] }
 0x72c   :  { %v9542_v52 = vcombine.low %v22488_v43, %v22486_v16  ;;  %v9556_v18 = vrot.slane %v22490_v29, %v22306_v7  ;;  %v9540_v6 = vrot.slane %v9526_v55, %v22306_v7  ;;  %v22496_v5 = vmax.f32 %v22495_v26, 0.0  ;;  %v22499_v43 = vld [vmem:[#allocation190_spill] sm:$0xff] }
 0x72d   :  { %v9558_v20 = vcombine.low %v22494_v35, %v22492_v48  ;;  %v22498_v3 = vmax.f32 %v22497_v10, 0.0  ;;  %v22500_v54 = vmax.f32 %v22499_v43, 0.0  ;;  %v22502_v40 = vmax.f32 %v22501_v13, 0.0  ;;  %v22505_v48 = vld [vmem:[#allocation157_spill] sm:$0xff]  ;;  %v22507_v35 = vld [vmem:[#allocation51_spill] sm:$0xff]  ;;  %10100 = vst.msk [vmem:[%s19652_s4 + $0xc0] sm:$0xff] %vm1745_vm4, %v9508_v33 }
 0x72e   :  { %v9549_v16 = vrot.slane %v9542_v52, %v22306_v7  ;;  %v22504_v55 = vmax.f32 %v22503_v24, 0.0  ;;  %v9541_v29 = vcombine.low %v9533_v47, %v9540_v6  ;;  %v22506_v28 = vmax.f32 %v22505_v48, 0.0  ;;  %v22509_v52 = vld [vmem:[#allocation50_spill] sm:$0xff]  ;;  %10101 = vst.msk [vmem:[%s19652_s4 + $0xc8] sm:$0x3f] %vm6429_vm13, %v9524_v50  ;;  %v22517_v24 = vld [vmem:[#allocation119_spill] sm:$0xff] }
 0x72f   :  { %v9559_v41 = vcombine.low %v22498_v3, %v22496_v5  ;;  %v9566_v31 = vrot.slane %v9558_v20, %v22306_v7  ;;  %v9575_v36 = vcombine.low %v22502_v40, %v22500_v54  ;;  %v22508_v21 = vmax.f32 %v22507_v35, 0.0  ;;  %v22511_v20 = vld [vmem:[#allocation192_spill] sm:$0xff]  ;;  %v22515_v54 = vld [vmem:[#allocation194_spill] sm:$0xff] }
 0x730   :  { %v9589_v56 = vrot.slane %v22504_v55, %v22306_v7  ;;  %v22510_v5 = vmax.f32 %v22509_v52, 0.0  ;;  %v22512_v10 = vmax.f32 %v22511_v20, 0.0  ;;  %v9557_v47 = vcombine.low %v9549_v16, %v9556_v18  ;;  %v22521_v50 = vld [vmem:[#allocation138_spill] sm:$0xff]  ;;  %10102 = vst.msk [vmem:[%s19652_s4 + $0xd0] sm:$0xff] %vm1745_vm4, %v9541_v29  ;;  %v22523_v20 = vld [vmem:[#allocation205_spill] sm:$0xff]  ;;  %v22531_v29 = vld [vmem:[#allocation208_spill] sm:$0xff] }
 0x731   :  { %v9573_v45 = vrot.slane %v9559_v41, %v22306_v7  ;;  %v9591_v26 = vcombine.low %v22508_v21, %v22506_v28  ;;  %v9582_v6 = vrot.slane %v9575_v36, %v22306_v7  ;;  %v22513_v41 = vld [vmem:[#allocation53_spill] sm:$0xff]  ;;  %v22516_v13 = vmax.f32 %v22515_v54, 0.0  ;;  %v22519_v21 = vld [vmem:[#allocation158_spill] sm:$0xff] }
 0x732   :  { %v9592_v3 = vcombine.low %v22512_v10, %v22510_v5  ;;  %v22514_v43 = vmax.f32 %v22513_v41, 0.0  ;;  %v22518_v55 = vmax.f32 %v22517_v24, 0.0  ;;  %v22520_v52 = vmax.f32 %v22519_v21, 0.0  ;;  %v22527_v41 = vld [vmem:[#allocation213_spill] sm:$0xff]  ;;  %10103 = vst.msk [vmem:[%s19652_s4 + $0xd8] sm:$0x3f] %vm6429_vm13, %v9557_v47 }
 0x733   :  { %v9574_v28 = vcombine.low %v9566_v31, %v9573_v45  ;;  %v9599_v33 = vrot.slane %v9591_v26, %v22306_v7  ;;  %v22522_v18 = vmax.f32 %v22521_v50, 0.0  ;;  %v9590_v36 = vcombine.low %v9582_v6, %v9589_v56  ;;  %v22525_v31 = vld [vmem:[#allocation128_spill] sm:$0xff] }
 0x734   :  { %v9608_v40 = vcombine.low %v22516_v13, %v22514_v43  ;;  %v9622_v48 = vrot.slane %v22518_v55, %v22306_v7  ;;  %v9606_v35 = vrot.slane %v9592_v3, %v22306_v7  ;;  %v22524_v10 = vmax.f32 %v22523_v20, 0.0  ;;  %v22529_v43 = vld [vmem:[#allocation214_spill] sm:$0xff]  ;;  %v22533_v55 = vld [vmem:[#allocation211_spill] sm:$0xff] }
 0x735   :  { %v9624_v16 = vcombine.low %v22522_v18, %v22520_v52  ;;  %v22526_v45 = vmax.f32 %v22525_v31, 0.0  ;;  %v22528_v3 = vmax.f32 %v22527_v41, 0.0  ;;  %v22530_v54 = vmax.f32 %v22529_v43, 0.0  ;;  %v22535_v52 = vld [vmem:[#allocation212_spill] sm:$0xff]  ;;  %10104 = vst.msk [vmem:[%s19652_s4 + $0xe0] sm:$0xff] %vm1745_vm4, %v9574_v28  ;;  %v22543_v28 = vld [vmem:[#allocation210_spill] sm:$0xff] }
 0x736   :  { %v9615_v5 = vrot.slane %v9608_v40, %v22306_v7  ;;  %v9607_v24 = vcombine.low %v9599_v33, %v9606_v35  ;;  %v22532_v6 = vmax.f32 %v22531_v29, 0.0  ;;  %v22534_v21 = vmax.f32 %v22533_v55, 0.0  ;;  %v22537_v35 = vld [vmem:[#allocation215_spill] sm:$0xff]  ;;  %10105 = vst.msk [vmem:[%s19652_s4 + $0xe8] sm:$0x3f] %vm6429_vm13, %v9590_v36  ;;  %v22547_v29 = vld [vmem:[#allocation218_spill] sm:$0xff] }
 0x737   :  { %v9625_v26 = vcombine.low %v22526_v45, %v22524_v10  ;;  %v9641_v13 = vcombine.low %v22530_v54, %v22528_v3  ;;  %v9632_v56 = vrot.slane %v9624_v16, %v22306_v7  ;;  %v22536_v50 = vmax.f32 %v22535_v52, 0.0  ;;  %v22539_v10 = vld [vmem:[#allocation216_spill] sm:$0xff]  ;;  %v22541_v3 = vld [vmem:[#allocation221_spill] sm:$0xff]  ;;  %v22549_v55 = vld [vmem:[#allocation219_spill] sm:$0xff] }
 0x738   :  { %v9655_v40 = vrot.slane %v22532_v6, %v22306_v7  ;;  %v9623_v20 = vcombine.low %v9615_v5, %v9622_v48  ;;  %v22538_v16 = vmax.f32 %v22537_v35, 0.0  ;;  %v22540_v31 = vmax.f32 %v22539_v10, 0.0  ;;  %10106 = vst.msk [vmem:[%s19652_s4 + $0xf0] sm:$0xff] %vm1745_vm4, %v9607_v24  ;;  %v22551_v35 = vld [vmem:[#allocation222_spill] sm:$0xff]  ;;  %v22553_v10 = vld [vmem:[#allocation223_spill] sm:$0xff] }
 0x739   :  { %v9657_v18 = vcombine.low %v22536_v50, %v22534_v21  ;;  %v9639_v47 = vrot.slane %v9625_v26, %v22306_v7  ;;  %v9648_v33 = vrot.slane %v9641_v13, %v22306_v7  ;;  %v22542_v43 = vmax.f32 %v22541_v3, 0.0  ;;  %v22545_v26 = vld [vmem:[#allocation220_spill] sm:$0xff] }
 0x73a   :  { %v9658_v45 = vcombine.low %v22540_v31, %v22538_v16  ;;  %v22544_v48 = vmax.f32 %v22543_v28, 0.0  ;;  %v22546_v54 = vmax.f32 %v22545_v26, 0.0  ;;  %v22548_v6 = vmax.f32 %v22547_v29, 0.0  ;;  %10107 = vst.msk [vmem:[%s19652_s4 + $0xf8] sm:$0x3f] %vm6429_vm13, %v9623_v20 }
 0x73b   :  { %v9665_v41 = vrot.slane %v9657_v18, %v22306_v7  ;;  %v22550_v21 = vmax.f32 %v22549_v55, 0.0  ;;  %v9640_v36 = vcombine.low %v9632_v56, %v9639_v47  ;;  %v9656_v50 = vcombine.low %v9648_v33, %v9655_v40  ;;  %v22557_v56 = vld [vmem:[#allocation217_spill] sm:$0xff]  ;;  %v22559_v33 = vld [vmem:[#allocation227_spill] sm:$0xff] }
 0x73c   :  { %v9674_v5 = vcombine.low %v22544_v48, %v22542_v43  ;;  %v9688_v13 = vrot.slane %v22546_v54, %v22306_v7  ;;  %v9672_v18 = vrot.slane %v9658_v45, %v22306_v7  ;;  %v22552_v16 = vmax.f32 %v22551_v35, 0.0  ;;  %v22555_v48 = vld [vmem:[#allocation228_spill] sm:$0xff] }
 0x73d   :  { %v9690_v52 = vcombine.low %v22550_v21, %v22548_v6  ;;  %v22554_v31 = vmax.f32 %v22553_v10, 0.0  ;;  %v22556_v24 = vmax.f32 %v22555_v48, 0.0  ;;  %v22558_v40 = vmax.f32 %v22557_v56, 0.0  ;;  %v22561_v6 = vld [vmem:[#allocation225_spill] sm:$0xff]  ;;  %v22563_v21 = vld [vmem:[#allocation226_spill] sm:$0xff]  ;;  %10108 = vst.msk [vmem:[%s19652_s4 + $0x100] sm:$0xff] %vm1745_vm4, %v9640_v36 }
 0x73e   :  { %v9681_v43 = vrot.slane %v9674_v5, %v22306_v7  ;;  %v22560_v45 = vmax.f32 %v22559_v33, 0.0  ;;  %v9673_v54 = vcombine.low %v9665_v41, %v9672_v18  ;;  %v22562_v55 = vmax.f32 %v22561_v6, 0.0  ;;  %10109 = vst.msk [vmem:[%s19652_s4 + $0x108] sm:$0x3f] %vm6429_vm13, %v9656_v50  ;;  %v22570_v48 = vld [vmem:[#allocation224_spill] sm:$0xff]  ;;  %v22574_v50 = vld [vmem:[#allocation231_spill] sm:$0xff] }
 0x73f   :  { %v9691_v3 = vcombine.low %v22554_v31, %v22552_v16  ;;  %v9698_v28 = vrot.slane %v9690_v52, %v22306_v7  ;;  %v9707_v47 = vcombine.low %v22558_v40, %v22556_v24  ;;  %v22564_v20 = vmax.f32 %v22563_v21, 0.0  ;;  %v22566_v52 = vld [vmem:[#allocation230_spill] sm:$0xff]  ;;  %v22568_v31 = vld [vmem:[#allocation232_spill] sm:$0xff] }
 0x740   :  { %v9721_v26 = vrot.slane %v22560_v45, %v22306_v7  ;;  %v22565_v5 = vmax.f32 %v22278_v59, 0.0  ;;  %v22567_v16 = vmax.f32 %v22566_v52, 0.0  ;;  %v9689_v41 = vcombine.low %v9681_v43, %v9688_v13  ;;  %10110 = vst.msk [vmem:[%s19652_s4 + $0x110] sm:$0xff] %vm1745_vm4, %v9673_v54  ;;  %v22583_v52 = vld [vmem:[#allocation241_spill] sm:$0xff] }
 0x741   :  { %v9705_v29 = vrot.slane %v9691_v3, %v22306_v7  ;;  %v9723_v35 = vcombine.low %v22564_v20, %v22562_v55  ;;  %v9714_v18 = vrot.slane %v9707_v47, %v22306_v7  ;;  %v22569_v3 = vmax.f32 %v22568_v31, 0.0 }
 0x742   :  { %v9724_v10 = vcombine.low %v22567_v16, %v22565_v5  ;;  %v22571_v59 = vmax.f32 %v22570_v48, 0.0  ;;  %v22572_v56 = vmax.f32 %v22281_v63, 0.0  ;;  %v22573_v6 = vmax.f32 %v22283_v58, 0.0  ;;  %10111 = vst.msk [vmem:[%s19652_s4 + $0x118] sm:$0x3f] %vm6429_vm13, %v9689_v41  ;;  %v22581_v5 = vld [vmem:[#allocation242_spill] sm:$0xff] }
 0x743   :  { %v9706_v33 = vcombine.low %v9698_v28, %v9705_v29  ;;  %v9731_v36 = vrot.slane %v9723_v35, %v22306_v7  ;;  %v22575_v13 = vmax.f32 %v22574_v50, 0.0  ;;  %v9722_v47 = vcombine.low %v9714_v18, %v9721_v26  ;;  %v22585_v18 = vld [vmem:[#allocation245_spill] sm:$0xff] }
 0x744   :  { %v9740_v24 = vcombine.low %v22571_v59, %v22569_v3  ;;  %v9754_v40 = vrot.slane %v22572_v56, %v22306_v7  ;;  %v9738_v45 = vrot.slane %v9724_v10, %v22306_v7  ;;  %v22576_v63 = vmax.f32 %v22285_v44, 0.0  ;;  %v22587_v3 = vld [vmem:[#allocation240_spill] sm:$0xff] }
 0x745   :  { %v9756_v43 = vcombine.low %v22575_v13, %v22573_v6  ;;  %v22577_v28 = vmax.f32 %v22284_v38, 0.0  ;;  %v22578_v21 = vmax.f32 %v22287_v46, 0.0  ;;  %v22579_v58 = vmax.f32 %v22286_v32, 0.0  ;;  %10112 = vst.msk [vmem:[%s19652_s4 + $0x120] sm:$0xff] %vm1745_vm4, %v9706_v33 }
 0x746   :  { %v9747_v55 = vrot.slane %v9740_v24, %v22306_v7  ;;  %v9739_v35 = vcombine.low %v9731_v36, %v9738_v45  ;;  %v22580_v54 = vmax.f32 %v22288_v1, 0.0  ;;  %v22582_v38 = vmax.f32 %v22581_v5, 0.0  ;;  %10113 = vst.msk [vmem:[%s19652_s4 + $0x128] sm:$0x3f] %vm6429_vm13, %v9722_v47 }
 0x747   :  { %v9757_v29 = vcombine.low %v22577_v28, %v22576_v63  ;;  %v9773_v20 = vcombine.low %v22579_v58, %v22578_v21  ;;  %v9764_v26 = vrot.slane %v9756_v43, %v22306_v7  ;;  %v22584_v16 = vmax.f32 %v22583_v52, 0.0 }
 0x748   :  { %v9787_v44 = vrot.slane %v22580_v54, %v22306_v7  ;;  %v9755_v32 = vcombine.low %v9747_v55, %v9754_v40  ;;  %v22586_v31 = vmax.f32 %v22585_v18, 0.0  ;;  %v22588_v1 = vmax.f32 %v22587_v3, 0.0  ;;  %10114 = vst.msk [vmem:[%s19652_s4 + $0x130] sm:$0xff] %vm1745_vm4, %v9739_v35 }
 0x749   :  { %v9789_v46 = vcombine.low %v22584_v16, %v22582_v38  ;;  %v9771_v10 = vrot.slane %v9757_v29, %v22306_v7  ;;  %v9780_v41 = vrot.slane %v9773_v20, %v22306_v7  ;;  %v22589_v24 = vmax.f32 %v22291_v39, 0.0 }
 0x74a   :  { %v9790_v48 = vcombine.low %v22588_v1, %v22586_v31  ;;  %v22590_v56 = vmax.f32 %v18548_v15, 0.0  ;;  %v22591_v33 = vmax.f32 %v18556_v27, 0.0  ;;  %v22592_v45 = vmax.f32 %v18564_v49, 0.0  ;;  %10115 = vst.msk [vmem:[%s19652_s4 + $0x138] sm:$0x3f] %vm6429_vm13, %v9755_v32 }
 0x74b   :  { %v9797_v59 = vrot.slane %v9789_v46, %v22306_v7  ;;  %v22593_v6 = vmax.f32 %v18560_v19, 0.0  ;;  %v9772_v13 = vcombine.low %v9764_v26, %v9771_v10  ;;  %v9788_v43 = vcombine.low %v9780_v41, %v9787_v44 }
 0x74c   :  { %v9806_v40 = vcombine.low %v22590_v56, %v22589_v24  ;;  %v9820_v36 = vrot.slane %v22591_v33, %v22306_v7  ;;  %v9804_v39 = vrot.slane %v9790_v48, %v22306_v7  ;;  %v22594_v15 = vmax.f32 %v18572_v61, 0.0 }
 0x74d   :  { %v9822_v50 = vcombine.low %v22593_v6, %v22592_v45  ;;  %v22595_v47 = vmax.f32 %v18568_v57, 0.0  ;;  %v22596_v55 = vmax.f32 %v22293_v23, 0.0  ;;  %v22597_v63 = vmax.f32 %v22292_v25, 0.0  ;;  %10116 = vst.msk [vmem:[%s19652_s4 + $0x140] sm:$0xff] %vm1745_vm4, %v9772_v13  ;;  %v22619_v45 = vld [vmem:[#allocation193_spill] sm:$0xff] }
 0x74e   :  { %v9813_v19 = vrot.slane %v9806_v40, %v22306_v7  ;;  %v22598_v61 = vmax.f32 %v22294_v12, 0.0  ;;  %v9805_v57 = vcombine.low %v9797_v59, %v9804_v39  ;;  %v22599_v58 = vmax.f32 %v18592_v62, 0.0  ;;  %10117 = vst.msk [vmem:[%s19652_s4 + $0x148] sm:$0x3f] %vm6429_vm13, %v9788_v43  ;;  %v22616_v40 = vld [vmem:[#allocation250_spill] sm:$0xff]  ;;  %v22623_v39 = vld [vmem:[#allocation251_spill] sm:$0xff] }
 0x74f   :  { %v9823_v27 = vcombine.low %v22595_v47, %v22594_v15  ;;  %v9830_v49 = vrot.slane %v9822_v50, %v22306_v7  ;;  %v9839_v28 = vcombine.low %v22597_v63, %v22596_v55  ;;  %v22600_v20 = vmax.f32 %v22295_v30, 0.0  ;;  %v22621_v50 = vld [vmem:[#allocation248_spill] sm:$0xff] }
 0x750   :  { %v9853_v29 = vrot.slane %v22598_v61, %v22306_v7  ;;  %v22601_v26 = vmax.f32 %v18600_v34, 0.0  ;;  %v22602_v54 = vmax.f32 %v18596_v42, 0.0  ;;  %v9821_v12 = vcombine.low %v9813_v19, %v9820_v36  ;;  %10118 = vst.msk [vmem:[%s19652_s4 + $0x150] sm:$0xff] %vm1745_vm4, %v9805_v57  ;;  %v22627_v63 = vld [vmem:[#allocation256_spill] sm:$0xff]  ;;  %v22629_v61 = vld [vmem:[#allocation134_spill] sm:$0xff] }
 0x751   :  { %v9837_v21 = vrot.slane %v9823_v27, %v22306_v7  ;;  %v9855_v35 = vcombine.low %v22600_v20, %v22599_v58  ;;  %v9846_v25 = vrot.slane %v9839_v28, %v22306_v7  ;;  %v22603_v30 = vmax.f32 %v18608_v9, 0.0  ;;  %v22631_v58 = vld [vmem:[#allocation253_spill] sm:$0xff] }
 0x752   :  { %v9856_v23 = vcombine.low %v22602_v54, %v22601_v26  ;;  %v22604_v62 = vmax.f32 %v18604_v22, 0.0  ;;  %v22605_v42 = vmax.f32 %v18612_v11, 0.0  ;;  %v22606_v16 = vmax.f32 %v18620_v51, 0.0  ;;  %10119 = vst.msk [vmem:[%s19652_s4 + $0x158] sm:$0x3f] %vm6429_vm13, %v9821_v12  ;;  %v22633_v54 = vld [vmem:[#allocation257_spill] sm:$0xff] }
 0x753   :  { %v9838_v5 = vcombine.low %v9830_v49, %v9837_v21  ;;  %v9863_v38 = vrot.slane %v9855_v35, %v22306_v7  ;;  %v22607_v46 = vmax.f32 %v18616_v37, 0.0  ;;  %v9854_v22 = vcombine.low %v9846_v25, %v9853_v29  ;;  %v22635_v12 = vld [vmem:[#allocation255_spill] sm:$0xff] }
 0x754   :  { %v9872_v34 = vcombine.low %v22604_v62, %v22603_v30  ;;  %v9886_v44 = vrot.slane %v22605_v42, %v22306_v7  ;;  %v9870_v52 = vrot.slane %v9856_v23, %v22306_v7  ;;  %v22608_v11 = vmax.f32 %v18628_v4, 0.0  ;;  %v22637_v42 = vld [vmem:[#allocation124_spill] sm:$0xff] }
 0x755   :  { %v9888_v32 = vcombine.low %v22607_v46, %v22606_v16  ;;  %v22609_v10 = vmax.f32 %v18624_v2, 0.0  ;;  %v22610_v18 = vmax.f32 %v18636_v14, 0.0  ;;  %v22611_v51 = vmax.f32 %v18632_v17, 0.0  ;;  %10120 = vst.msk [vmem:[%s19652_s4 + $0x160] sm:$0xff] %vm1745_vm4, %v9838_v5  ;;  %v22639_v5 = vld [vmem:[#allocation254_spill] sm:$0xff]  ;;  %v22641_v16 = vld [vmem:[#allocation195_spill] sm:$0xff] }
 0x756   :  { %v9879_v9 = vrot.slane %v9872_v34, %v22306_v7  ;;  %v9871_v37 = vcombine.low %v9863_v38, %v9870_v52  ;;  %v22612_v1 = vmax.f32 %v18640_v53, 0.0  ;;  %v22613_v2 = vmax.f32 %v18648_v0, 0.0  ;;  %10121 = vst.msk [vmem:[%s19652_s4 + $0x168] sm:$0x3f] %vm6429_vm13, %v9854_v22 }
 0x757   :  { %v9889_v41 = vcombine.low %v22609_v10, %v22608_v11  ;;  %v9905_v31 = vcombine.low %v22611_v51, %v22610_v18  ;;  %v9896_v3 = vrot.slane %v9888_v32, %v22306_v7  ;;  %v22614_v48 = vmax.f32 %v18644_v8, 0.0  ;;  %v22618_v8 = vld [vmem:[#allocation8_spill] sm:$0xff]  ;;  %v22643_v32 = vld [vmem:[#allocation67_spill] sm:$0xff] }
 0x758   :  { %v9919_v4 = vrot.slane %v22612_v1, %v22306_v7  ;;  %v9887_v17 = vcombine.low %v9879_v9, %v9886_v44  ;;  %v22615_v56 = vmax.f32 %v18656_v60, 0.0  ;;  %v22617_v53 = vmax.f32 %v22616_v40, 0.0  ;;  %v22625_v60 = vld [vmem:[#allocation252_spill] sm:$0xff]  ;;  %10122 = vst.msk [vmem:[%s19652_s4 + $0x170] sm:$0xff] %vm1745_vm4, %v9871_v37 }
 0x759   :  { %v9921_v14 = vcombine.low %v22614_v48, %v22613_v2  ;;  %v9903_v59 = vrot.slane %v9889_v41, %v22306_v7  ;;  %v9912_v24 = vrot.slane %v9905_v31, %v22306_v7  ;;  %v8899_v0 = vmax.f32 %v22618_v8, 0.0  ;;  %v22645_v41 = vld [vmem:[#allocation141_spill] sm:$0xff]  ;;  %v22647_v31 = vld [vmem:[#allocation52_spill] sm:$0xff] }
 0x75a   :  { %v9922_v33 = vcombine.low %v22617_v53, %v22615_v56  ;;  %v22620_v6 = vmax.f32 %v22619_v45, 0.0  ;;  %v22622_v13 = vmax.f32 %v22621_v50, 0.0  ;;  %v22624_v15 = vmax.f32 %v22623_v39, 0.0  ;;  %10123 = vst.msk [vmem:[%s19652_s4 + $0x178] sm:$0x3f] %vm6429_vm13, %v9887_v17 }
 0x75b   :  { %v9929_v36 = vrot.slane %v9921_v14, %v22306_v7  ;;  %v22626_v47 = vmax.f32 %v22625_v60, 0.0  ;;  %v9904_v19 = vcombine.low %v9896_v3, %v9903_v59  ;;  %v9920_v49 = vcombine.low %v9912_v24, %v9919_v4  ;;  %v22649_v3 = vld [vmem:[#allocation258_spill] sm:$0xff] }
 0x75c   :  { %v9938_v43 = vcombine.low %v22622_v13, %v22620_v6  ;;  %v9936_v55 = vrot.slane %v9922_v33, %v22306_v7  ;;  %v22628_v28 = vmax.f32 %v22627_v63, 0.0  ;;  %v22630_v29 = vmax.f32 %v22629_v61, 0.0 }
 0x75d   :  { %v9954_v27 = vcombine.low %v22626_v47, %v22624_v15  ;;  %v22632_v20 = vmax.f32 %v22631_v58, 0.0  ;;  %v22634_v23 = vmax.f32 %v22633_v54, 0.0  ;;  %v22636_v25 = vmax.f32 %v22635_v12, 0.0  ;;  %10124 = vst.msk [vmem:[%s19652_s4 + $0x180] sm:$0xff] %vm1745_vm4, %v9904_v19 }
 0x75e   :  { %v9955_v57 = vcombine.low %v22630_v29, %v22628_v28  ;;  %v9945_v21 = vrot.slane %v9938_v43, %v22306_v7  ;;  %v9937_v62 = vcombine.low %v9929_v36, %v9936_v55  ;;  %v22638_v44 = vmax.f32 %v22637_v42, 0.0  ;;  %10125 = vst.msk [vmem:[%s19652_s4 + $0x188] sm:$0x3f] %vm6429_vm13, %v9920_v49 }
 0x75f   :  { %v9952_v35 = vrot.slane %v22632_v20, %v22306_v7  ;;  %v9962_v26 = vrot.slane %v9954_v27, %v22306_v7  ;;  %v9971_v30 = vcombine.low %v22636_v25, %v22634_v23  ;;  %v22640_v38 = vmax.f32 %v22639_v5, 0.0 }
 0x760   :  { %v9969_v34 = vrot.slane %v9955_v57, %v22306_v7  ;;  %v22642_v46 = vmax.f32 %v22641_v16, 0.0  ;;  %v22644_v22 = vmax.f32 %v22643_v32, 0.0  ;;  %v22646_v18 = vmax.f32 %v22645_v41, 0.0  ;;  %10126 = vst.msk [vmem:[%s19652_s4 + $0x190] sm:$0xff] %vm1745_vm4, %v9937_v62 }
 0x761   :  { %v9987_v52 = vcombine.low %v22640_v38, %v22638_v44  ;;  %v9953_v11 = vcombine.low %v9945_v21, %v9952_v35  ;;  %v9978_v10 = vrot.slane %v9971_v30, %v22306_v7  ;;  %v22648_v37 = vmax.f32 %v22647_v31, 0.0 }
 0x762   :  { %v9988_v9 = vcombine.low %v22644_v22, %v22642_v46  ;;  %v9985_v51 = vrot.slane %v22646_v18, %v22306_v7  ;;  %v22650_v1 = vmax.f32 %v22649_v3, 0.0  ;;  %v9970_v2 = vcombine.low %v9962_v26, %v9969_v34 }
 0x763   :  { %v9995_v48 = vrot.slane %v9987_v52, %v22306_v7  ;;  %v10018_v24 = vrot.slane %v8899_v0, %v22306_v7  ;;  %10127 = vst.msk [vmem:[%s19652_s4 + $0x198] sm:$0x3f] %vm6429_vm13, %v9953_v11 }
 0x764   :  { %v10004_v4 = vcombine.low %v22650_v1, %v22648_v37  ;;  %v10002_v14 = vrot.slane %v9988_v9, %v22306_v7  ;;  %v9986_v17 = vcombine.low %v9978_v10, %v9985_v51  ;;  %10128 = vst.msk [vmem:[%s19652_s4 + $0x1a0] sm:$0xff] %vm1745_vm4, %v9970_v2 }
 0x766   :  { %v10011_v59 = vrot.slane %v10004_v4, %v22306_v7  ;;  %v10003_v56 = vcombine.low %v9995_v48, %v10002_v14  ;;  %10129 = vst.msk [vmem:[%s19652_s4 + $0x1a8] sm:$0x3f] %vm6429_vm13, %v9986_v17 }
 0x768   :  { %v10019_v40 = vcombine.low %v10011_v59, %v10018_v24  ;;  %10130 = vst.msk [vmem:[%s19652_s4 + $0x1b0] sm:$0xff] %vm1745_vm4, %v10003_v56 }
 0x76a   :  { %10131 = vst.msk [vmem:[%s19652_s4 + $0x1b8] sm:$0x3f] %vm6429_vm13, %v10019_v40 }

</bundles_post_ra>
